<compile_context>
chip_gen: v5e
topology: v5e:2x2
jax: 0.10.0
libtpu: 0.0.40
codegen_flags: <defaults>
</compile_context>

<pallas_src>
import functools

import numpy as np
import jax
import jax.numpy as jnp
from jax.experimental import pallas as pl
from jax.experimental.pallas import tpu as pltpu


# ----------------------------------------------------------------------------
# Pallas kernel: one grid step == TB windows (M = TB*N token rows)
# ----------------------------------------------------------------------------
def _window_attn_kernel(x_ref, wqkv_ref, bq_ref, wproj_ref, bproj_ref, bias_ref,
                        o_ref, acc_ref, *, num_heads, head_dim):
    """Shapes seen by the kernel:
         x_ref     : (M, C)        activations (compute dtype: f32 or bf16)
         wqkv_ref  : (H, C, 3*hd)  per-head fused [q|k|v] weights (q pre-scaled)
         bq_ref    : (H, 1, hd)    q bias (pre-scaled), f32   (k/v biases folded away)
         wproj_ref : (H, hd, C)    per-head slice of the output projection
         bproj_ref : (1, C)        proj bias + sum_h v_bias[h] @ wproj[h], f32
         bias_ref  : (H, M, M)     block-diagonal additive bias: rel-pos (+shift mask)
                                   on the NxN diagonal blocks, -1e9 elsewhere, bf16
         o_ref     : (M, C)
         acc_ref   : (M, C) f32 VMEM scratch accumulator
    """
    x = x_ref[...]
    hd = head_dim
    cdt = x.dtype

    for h in range(num_heads):          # static unroll; leading-index weight views are free
        # fused qkv projection for this head: one MXU push with 3*hd output lanes
        qkv = jnp.dot(x, wqkv_ref[h], preferred_element_type=jnp.float32)   # (M, 3hd) f32
        q = (qkv[:, 0 * hd:1 * hd] + bq_ref[h]).astype(cdt)   # q bias kept (softmax-relevant)
        k = qkv[:, 1 * hd:2 * hd].astype(cdt)                 # k bias dropped (softmax-invariant)
        v = qkv[:, 2 * hd:3 * hd].astype(cdt)                 # v bias folded into proj bias

        # full-block lane-dense scores; window isolation comes from the block-diag bias
        s = jax.lax.dot_general(q, k, (((1,), (1,)), ((), ())),
                                preferred_element_type=jnp.float32)          # (M, M) f32
        s = s + bias_ref[h].astype(jnp.float32)

        # numerically-stable softmax in f32; divide -> EUP approx reciprocal
        s = s - jnp.max(s, axis=-1, keepdims=True)
        p = jnp.exp(s)
        p = p * pl.reciprocal(jnp.sum(p, axis=-1, keepdims=True), approx=True)

        y = jnp.dot(p.astype(cdt), v, preferred_element_type=jnp.float32)   # (M, hd) f32

        # per-head (M, hd) @ (hd, C) summed over heads == head-concat + full (C, C) proj
        contrib = jnp.dot(y.astype(cdt), wproj_ref[h],
                          preferred_element_type=jnp.float32)
        if h == 0:
            acc_ref[...] = contrib
        else:
            acc_ref[...] += contrib

    o_ref[...] = (acc_ref[...] + bproj_ref[...]).astype(o_ref.dtype)
    # TODO(synk): dropout (drop=0.0 in the module) is a no-op here; for p>0 one would use
    #             pltpu.prng_seed + pltpu.stateful_bernoulli on `p` and the output.


# ----------------------------------------------------------------------------
# Parameter prep (one-time transform; folds q scale and v bias, drops k bias)
# ----------------------------------------------------------------------------
def prepare_params(w_qkv, b_qkv, w_proj, b_proj, rel_pos_bias, num_heads, scale,
                   compute_dtype=jnp.float32, bias_dtype=jnp.bfloat16):
    C = w_qkv.shape[0]
    H = num_heads
    hd = C // H
    # per-head fused [q|k|v] weights with q pre-scaled: (H, C, 3*hd)
    w = jnp.transpose(w_qkv.reshape(C, 3, H, hd), (2, 0, 1, 3))       # (H, C, 3, hd)
    qkv_scale = jnp.array([scale, 1.0, 1.0], jnp.float32).reshape(1, 1, 3, 1)
    w = (w * qkv_scale).reshape(H, C, 3 * hd).astype(compute_dtype)
    b3 = b_qkv.reshape(3, H, hd)
    b_q = (b3[0] * scale).reshape(H, 1, hd).astype(jnp.float32)       # only q bias survives
    # k bias: softmax-invariant -> dropped.  v bias: folds into the projection bias.
    b_v_full = b3[2].reshape(C)                                       # head-concat order
    wp = w_proj.reshape(H, hd, C).astype(compute_dtype)               # (H, hd, C)
    bp = (b_proj + b_v_full @ w_proj).reshape(1, C).astype(jnp.float32)
    return dict(w_qkv=w, b_q=b_q, w_proj=wp, b_proj=bp,
                rpb=rel_pos_bias.astype(jnp.float32),
                num_heads=H, compute_dtype=compute_dtype, bias_dtype=bias_dtype)


# ----------------------------------------------------------------------------
# Blocking choice: TB windows per step; TB*N ~ target_rows, grid length >= min_grid
# ----------------------------------------------------------------------------
def _pick_windows_per_block(num_windows, tokens, mask_windows=None,
                            target_rows=512, min_grid=4):
    step = mask_windows if mask_windows else 1        # mask periodicity constraint
    max_tb = max(step, target_rows // max(tokens, 1))
    for g in sorted({max(min_grid, 1), 2, 1}, reverse=True):
        best = None
        tb = step
        while tb <= min(num_windows, max_tb):
            if num_windows % tb == 0 and num_windows // tb >= g:
                best = tb
            tb += step
        if best is not None:
            return best
    return step


# ----------------------------------------------------------------------------
# Block-diagonal additive bias (rel-pos + optional shift mask; -1e9 off-diagonal)
# ----------------------------------------------------------------------------
def _build_block_bias(rpb, mask, tb, tokens, neg=-1e9, dtype=jnp.bfloat16):
    H = rpb.shape[0]
    N = tokens
    if mask is not None:
        nW = mask.shape[0]
        win_bias = rpb[:, None] + jnp.tile(mask.astype(jnp.float32),
                                           (tb // nW, 1, 1))[None]    # (H, tb, N, N)
    else:
        win_bias = jnp.broadcast_to(rpb[:, None], (H, tb, N, N))
    same = (jnp.arange(tb)[:, None] == jnp.arange(tb)[None, :])       # (tb, tb)
    same = same[None, :, None, :, None]                               # (1,tb,1,tb,1)
    full = jnp.where(same, win_bias[:, :, :, None, :], jnp.float32(neg))
    return full.reshape(H, tb * N, tb * N).astype(dtype)              # (H, M, M)


def _nbytes(shape, dtype):
    n = 1
    for s in shape:
        n *= int(s)
    return n * np.dtype(dtype).itemsize


# ----------------------------------------------------------------------------
# Wrapper
# ----------------------------------------------------------------------------
def window_attention_mc(x, params, mask=None, *, target_rows=512, min_grid=4):
    """x: (B_, N, C).  mask: (nW, N, N) additive (0 / -inf) or None.  Returns (B_, N, C)."""
    B_, N, C = x.shape
    H = params["num_heads"]
    hd = C // H
    cdt = params["compute_dtype"]
    bdt = params["bias_dtype"]

    nW = None
    if mask is not None:
        nW = mask.shape[0]
        assert B_ % nW == 0, "B_ must be a multiple of the number of masks (nW)"

    tb = _pick_windows_per_block(B_, N, nW, target_rows, min_grid)
    assert B_ % tb == 0
    rows = tb * N
    grid = (B_ // tb,)

    # Resident block-diagonal bias (same for every grid step since tb % nW == 0 and
    # blocks start at multiples of nW): fetched once, stored bf16, upcast in-kernel.
    bias = _build_block_bias(params["rpb"], mask, tb, N, dtype=bdt)

    x2 = x.reshape(B_ * N, C).astype(cdt)

    kernel = functools.partial(_window_attn_kernel, num_heads=H, head_dim=hd)

    # VMEM budget from the actual footprint (residents counted twice in case Mosaic
    # double-buffers constant-index inputs), floored at 32 MiB, capped at 48 MiB (v7x).
    resident = (_nbytes((H, C, 3 * hd), cdt) + _nbytes((H, 1, hd), jnp.float32)
                + _nbytes((H, hd, C), cdt) + _nbytes((1, C), jnp.float32)
                + _nbytes((H, rows, rows), bdt))
    streamed = 2 * (_nbytes((rows, C), cdt) + _nbytes((rows, C), x.dtype))
    scratch = _nbytes((rows, C), jnp.float32)
    need = 2 * resident + streamed + scratch
    vmem_limit = int(min(max(need + (8 << 20), 32 << 20), 48 << 20))

    out2 = pl.pallas_call(
        kernel,
        out_shape=jax.ShapeDtypeStruct((B_ * N, C), x.dtype),
        grid_spec=pltpu.PrefetchScalarGridSpec(
            num_scalar_prefetch=0,
            grid=grid,
            in_specs=[
                pl.BlockSpec((rows, C), lambda g: (g, 0)),             # x (per block)
                pl.BlockSpec((H, C, 3 * hd), lambda g: (0, 0, 0)),     # qkv weights (resident)
                pl.BlockSpec((H, 1, hd), lambda g: (0, 0, 0)),         # q bias      (resident)
                pl.BlockSpec((H, hd, C), lambda g: (0, 0, 0)),         # proj weight (resident)
                pl.BlockSpec((1, C), lambda g: (0, 0)),                # proj bias   (resident)
                pl.BlockSpec((H, rows, rows), lambda g: (0, 0, 0)),    # block-diag bias (resident)
            ],
            out_specs=pl.BlockSpec((rows, C), lambda g: (g, 0)),
            scratch_shapes=[pltpu.VMEM((rows, C), jnp.float32)],       # proj accumulator
        ),
        compiler_params=pltpu.CompilerParams(
            dimension_semantics=("parallel",),     # window-block axis shards across TCs
            vmem_limit_bytes=vmem_limit,
        ),
    )(x2, params["w_qkv"], params["b_q"], params["w_proj"], params["b_proj"], bias)

    return out2.reshape(B_, N, C)


# ----------------------------------------------------------------------------
# Relative position index / bias (glue, matches the PyTorch buffer exactly)
# ----------------------------------------------------------------------------
def make_relative_position_index(window_size):
    Wh, Ww, Wt = window_size
    coords = np.stack(np.meshgrid(np.arange(Wh), np.arange(Ww), np.arange(Wt),
                                  indexing="ij"))                       # (3, Wh, Ww, Wt)
    coords_flatten = coords.reshape(3, -1)                              # (3, N)
    rel = coords_flatten[:, :, None] - coords_flatten[:, None, :]       # (3, N, N)
    rel = rel.transpose(1, 2, 0).astype(np.int64)                       # (N, N, 3)
    rel[:, :, 0] += Wh - 1
    rel[:, :, 1] += Ww - 1
    rel[:, :, 2] += Wt - 1
    rel[:, :, 0] *= (2 * Ww - 1) * (2 * Wt - 1)
    rel[:, :, 1] *= (2 * Wt - 1)
    return rel.sum(-1)                                                  # (N, N)


def make_relative_position_bias(table, index):
    N = index.shape[0]
    rpb = jnp.asarray(table)[jnp.asarray(index).reshape(-1)]            # (N*N, H)
    rpb = rpb.reshape(N, N, -1)
    return jnp.transpose(rpb, (2, 0, 1)).astype(jnp.float32)            # (H, N, N)


# ----------------------------------------------------------------------------
# Pure-JAX reference (silent correctness check)
# ----------------------------------------------------------------------------
def reference_forward(x, w_qkv, b_qkv, w_proj, b_proj, rpb, num_heads, scale, mask=None):
    B_, N, C = x.shape
    hd = C // num_heads
    qkv = x @ w_qkv + b_qkv                                   # (B_, N, 3C)
    qkv = qkv.reshape(B_, N, 3, num_heads, hd).transpose(2, 0, 3, 1, 4)
    q, k, v = qkv[0] * scale, qkv[1], qkv[2]                  # (B_, H, N, hd)
    attn = jnp.einsum("bhnd,bhmd->bhnm", q, k) + rpb[None]
    if mask is not None:
        nW = mask.shape[0]
        attn = attn.reshape(B_ // nW, nW, num_heads, N, N) + mask[None, :, None]
        attn = attn.reshape(B_, num_heads, N, N)
    attn = jax.nn.softmax(attn, axis=-1)
    y = jnp.einsum("bhnm,bhmd->bhnd", attn, v)
    y = y.transpose(0, 2, 1, 3).reshape(B_, N, C)
    return y @ w_proj + b_proj


# ----------------------------------------------------------------------------
# Main
# ----------------------------------------------------------------------------
if __name__ == "__main__":
    dim = 32
    num_heads = 4
    window_size = (2, 2, 2)
    N = window_size[0] * window_size[1] * window_size[2]      # 8 tokens per window
    nW = 8                                                    # windows per image
    batch = 16
    B_ = nW * batch                                           # 128 windows total
    head_dim = dim // num_heads
    scale = head_dim ** (-0.5)

    key = jax.random.PRNGKey(0)
    k1, k2, k3, k4, k5, k6, k7 = jax.random.split(key, 7)

    n_rel = ((2 * window_size[0] - 1) * (2 * window_size[1] - 1)
             * (2 * window_size[2] - 1))
    rel_pos_table = jax.random.normal(k1, (n_rel, num_heads), jnp.float32) * 0.02
    w_qkv = jax.random.normal(k2, (dim, 3 * dim), jnp.float32) * 0.05
    b_qkv = jax.random.normal(k3, (3 * dim,), jnp.float32) * 0.01
    w_proj = jax.random.normal(k4, (dim, dim), jnp.float32) * 0.05
    b_proj = jax.random.normal(k5, (dim,), jnp.float32) * 0.01
    x = jax.random.normal(k6, (B_, N, dim), jnp.float32)

    # Swin-style additive shift mask: 0 where attention is allowed, -100 where blocked.
    mask = jnp.where(jax.random.bernoulli(k7, 0.3, (nW, N, N)), -100.0, 0.0)
    mask = mask.astype(jnp.float32)

    rpi = make_relative_position_index(window_size)                     # (N, N)
    rpb = make_relative_position_bias(rel_pos_table, rpi)               # (H, N, N)

    # ---- f32 path, no mask ----
    params32 = prepare_params(w_qkv, b_qkv, w_proj, b_proj, rpb, num_heads, scale,
                              compute_dtype=jnp.float32)
    out = jax.block_until_ready(window_attention_mc(x, params32, mask=None))
    ref = reference_forward(x, w_qkv, b_qkv, w_proj, b_proj, rpb, num_heads, scale)
    assert out.shape == (B_, N, dim)
    np.testing.assert_allclose(np.asarray(out), np.asarray(ref), rtol=2e-2, atol=5e-3)

    # ---- f32 path, shifted-window mask ----
    out_m = jax.block_until_ready(window_attention_mc(x, params32, mask=mask))
    ref_m = reference_forward(x, w_qkv, b_qkv, w_proj, b_proj, rpb, num_heads, scale,
                              mask=mask)
    np.testing.assert_allclose(np.asarray(out_m), np.asarray(ref_m), rtol=2e-2, atol=5e-3)

    # ---- bf16 MXU operands (f32 accumulation / f32 softmax), with mask ----
    params16 = prepare_params(w_qkv, b_qkv, w_proj, b_proj, rpb, num_heads, scale,
                              compute_dtype=jnp.bfloat16)
    out_bf = jax.block_until_ready(window_attention_mc(x, params16, mask=mask))
    np.testing.assert_allclose(np.asarray(out_bf), np.asarray(ref_m), rtol=1e-1, atol=1e-1)

    print("KERNEL_OK")
</pallas_src>

<mosaic_0001>
module attributes {stable_mosaic.version = 11 : i64} {
  func.func @_window_attn_kernel(%arg0: i32, %arg1: memref<256x32xf32, #tpu.memory_space<vmem>>, %arg2: memref<4x32x24xf32, #tpu.memory_space<vmem>>, %arg3: memref<4x1x8xf32, #tpu.memory_space<vmem>>, %arg4: memref<4x8x32xf32, #tpu.memory_space<vmem>>, %arg5: memref<1x32xf32, #tpu.memory_space<vmem>>, %arg6: memref<4x256x256xbf16, #tpu.memory_space<vmem>>, %arg7: memref<256x32xf32, #tpu.memory_space<vmem>>, %arg8: memref<256x32xf32, #tpu.memory_space<vmem>>) attributes {dimension_semantics = [#tpu.dimension_semantics<parallel>], iteration_bounds = array<i64: 4>, scalar_prefetch = 0 : i64, scratch_operands = 1 : i64, tpu.core_type = #tpu.core_type<tc>, window_params = [{transform_indices = @transform_0, window_bounds = array<i64: 256, 32>}, {pipeline_mode = #tpu.pipeline_mode<synchronous>, transform_indices = @transform_1, window_bounds = array<i64: 4, 32, 24>}, {pipeline_mode = #tpu.pipeline_mode<synchronous>, transform_indices = @transform_2, window_bounds = array<i64: 4, 1, 8>}, {pipeline_mode = #tpu.pipeline_mode<synchronous>, transform_indices = @transform_3, window_bounds = array<i64: 4, 8, 32>}, {pipeline_mode = #tpu.pipeline_mode<synchronous>, transform_indices = @transform_4, window_bounds = array<i64: 1, 32>}, {pipeline_mode = #tpu.pipeline_mode<synchronous>, transform_indices = @transform_5, window_bounds = array<i64: 4, 256, 256>}, {transform_indices = @transform_6, window_bounds = array<i64: 256, 32>}]} {
    %c0 = arith.constant 0 : index
    %c0_0 = arith.constant 0 : index
    %0 = vector.load %arg1[%c0, %c0_0] : memref<256x32xf32, #tpu.memory_space<vmem>>, vector<256x32xf32>
    %c0_1 = arith.constant 0 : index
    %c0_2 = arith.constant 0 : index
    %c0_3 = arith.constant 0 : index
    %1 = vector.load %arg2[%c0_1, %c0_2, %c0_3] : memref<4x32x24xf32, #tpu.memory_space<vmem>>, vector<1x32x24xf32>
    %2 = vector.shape_cast %1 : vector<1x32x24xf32> to vector<32x24xf32>
    %cst = arith.constant dense<0.000000e+00> : vector<256x24xf32>
    %3 = tpu.matmul %0, %2, %cst {dimension_numbers = #tpu.dot_dimension_numbers<[1], [0], [0], [1], [0, 0, 1, 1], [], []>} : vector<256x32xf32>, vector<32x24xf32>, vector<256x24xf32> -> vector<256x24xf32>
    %4 = vector.extract_strided_slice %3 {offsets = [0, 0], sizes = [256, 8], strides = [1, 1]} : vector<256x24xf32> to vector<256x8xf32>
    %c0_4 = arith.constant 0 : index
    %c0_5 = arith.constant 0 : index
    %c0_6 = arith.constant 0 : index
    %5 = vector.load %arg3[%c0_4, %c0_5, %c0_6] : memref<4x1x8xf32, #tpu.memory_space<vmem>>, vector<1x1x8xf32>
    %6 = vector.shape_cast %5 : vector<1x1x8xf32> to vector<1x8xf32>
    %7 = vector.broadcast %6 : vector<1x8xf32> to vector<256x8xf32>
    %8 = arith.addf %4, %7 : vector<256x8xf32>
    %9 = vector.extract_strided_slice %3 {offsets = [0, 8], sizes = [256, 8], strides = [1, 1]} : vector<256x24xf32> to vector<256x8xf32>
    %10 = vector.extract_strided_slice %3 {offsets = [0, 16], sizes = [256, 8], strides = [1, 1]} : vector<256x24xf32> to vector<256x8xf32>
    %cst_7 = arith.constant dense<0.000000e+00> : vector<256x256xf32>
    %11 = tpu.matmul %8, %9, %cst_7 {dimension_numbers = #tpu.dot_dimension_numbers<[1], [1], [0], [0], [0, 0, 1, 0], [], []>} : vector<256x8xf32>, vector<256x8xf32>, vector<256x256xf32> -> vector<256x256xf32>
    %c0_8 = arith.constant 0 : index
    %c0_9 = arith.constant 0 : index
    %c0_10 = arith.constant 0 : index
    %12 = vector.load %arg6[%c0_8, %c0_9, %c0_10] : memref<4x256x256xbf16, #tpu.memory_space<vmem>>, vector<1x256x256xbf16>
    %13 = vector.shape_cast %12 : vector<1x256x256xbf16> to vector<256x256xbf16>
    %14 = arith.extf %13 : vector<256x256xbf16> to vector<256x256xf32>
    %15 = arith.addf %11, %14 : vector<256x256xf32>
    %cst_11 = arith.constant dense<0xFF800000> : vector<256xf32>
    %16 = vector.multi_reduction <maximumf>, %15, %cst_11 [1] : vector<256x256xf32> to vector<256xf32>
    %17 = vector.shape_cast %16 : vector<256xf32> to vector<256x1xf32>
    %18 = vector.broadcast %17 : vector<256x1xf32> to vector<256x256xf32>
    %19 = arith.subf %15, %18 : vector<256x256xf32>
    %20 = math.exp %19 : vector<256x256xf32>
    %cst_12 = arith.constant dense<0.000000e+00> : vector<256xf32>
    %21 = vector.multi_reduction <add>, %20, %cst_12 [1] : vector<256x256xf32> to vector<256xf32>
    %22 = vector.shape_cast %21 : vector<256xf32> to vector<256x1xf32>
    %23 = tpu.reciprocal %22 {approx = true} : vector<256x1xf32> -> vector<256x1xf32>
    %24 = vector.broadcast %23 : vector<256x1xf32> to vector<256x256xf32>
    %25 = arith.mulf %20, %24 : vector<256x256xf32>
    %cst_13 = arith.constant dense<0.000000e+00> : vector<256x8xf32>
    %26 = tpu.matmul %25, %10, %cst_13 {dimension_numbers = #tpu.dot_dimension_numbers<[1], [0], [0], [1], [0, 0, 1, 1], [], []>} : vector<256x256xf32>, vector<256x8xf32>, vector<256x8xf32> -> vector<256x8xf32>
    %c0_14 = arith.constant 0 : index
    %c0_15 = arith.constant 0 : index
    %c0_16 = arith.constant 0 : index
    %27 = vector.load %arg4[%c0_14, %c0_15, %c0_16] : memref<4x8x32xf32, #tpu.memory_space<vmem>>, vector<1x8x32xf32>
    %28 = vector.shape_cast %27 : vector<1x8x32xf32> to vector<8x32xf32>
    %cst_17 = arith.constant dense<0.000000e+00> : vector<256x32xf32>
    %29 = tpu.matmul %26, %28, %cst_17 {dimension_numbers = #tpu.dot_dimension_numbers<[1], [0], [0], [1], [0, 0, 1, 1], [], []>} : vector<256x8xf32>, vector<8x32xf32>, vector<256x32xf32> -> vector<256x32xf32>
    %c0_18 = arith.constant 0 : index
    %c0_19 = arith.constant 0 : index
    %30 = vector.load %arg8[%c0_18, %c0_19] : memref<256x32xf32, #tpu.memory_space<vmem>>, vector<256x32xf32>
    tpu.vector_store %arg8[%c0_18, %c0_19], %29 {strides = array<i32>} : memref<256x32xf32, #tpu.memory_space<vmem>>, vector<256x32xf32>,
    %c1 = arith.constant 1 : index
    %c0_20 = arith.constant 0 : index
    %c0_21 = arith.constant 0 : index
    %31 = vector.load %arg2[%c1, %c0_20, %c0_21] : memref<4x32x24xf32, #tpu.memory_space<vmem>>, vector<1x32x24xf32>
    %32 = vector.shape_cast %31 : vector<1x32x24xf32> to vector<32x24xf32>
    %cst_22 = arith.constant dense<0.000000e+00> : vector<256x24xf32>
    %33 = tpu.matmul %0, %32, %cst_22 {dimension_numbers = #tpu.dot_dimension_numbers<[1], [0], [0], [1], [0, 0, 1, 1], [], []>} : vector<256x32xf32>, vector<32x24xf32>, vector<256x24xf32> -> vector<256x24xf32>
    %34 = vector.extract_strided_slice %33 {offsets = [0, 0], sizes = [256, 8], strides = [1, 1]} : vector<256x24xf32> to vector<256x8xf32>
    %c1_23 = arith.constant 1 : index
    %c0_24 = arith.constant 0 : index
    %c0_25 = arith.constant 0 : index
    %35 = vector.load %arg3[%c1_23, %c0_24, %c0_25] : memref<4x1x8xf32, #tpu.memory_space<vmem>>, vector<1x1x8xf32>
    %36 = vector.shape_cast %35 : vector<1x1x8xf32> to vector<1x8xf32>
    %37 = vector.broadcast %36 : vector<1x8xf32> to vector<256x8xf32>
    %38 = arith.addf %34, %37 : vector<256x8xf32>
    %39 = vector.extract_strided_slice %33 {offsets = [0, 8], sizes = [256, 8], strides = [1, 1]} : vector<256x24xf32> to vector<256x8xf32>
    %40 = vector.extract_strided_slice %33 {offsets = [0, 16], sizes = [256, 8], strides = [1, 1]} : vector<256x24xf32> to vector<256x8xf32>
    %cst_26 = arith.constant dense<0.000000e+00> : vector<256x256xf32>
    %41 = tpu.matmul %38, %39, %cst_26 {dimension_numbers = #tpu.dot_dimension_numbers<[1], [1], [0], [0], [0, 0, 1, 0], [], []>} : vector<256x8xf32>, vector<256x8xf32>, vector<256x256xf32> -> vector<256x256xf32>
    %c1_27 = arith.constant 1 : index
    %c0_28 = arith.constant 0 : index
    %c0_29 = arith.constant 0 : index
    %42 = vector.load %arg6[%c1_27, %c0_28, %c0_29] : memref<4x256x256xbf16, #tpu.memory_space<vmem>>, vector<1x256x256xbf16>
    %43 = vector.shape_cast %42 : vector<1x256x256xbf16> to vector<256x256xbf16>
    %44 = arith.extf %43 : vector<256x256xbf16> to vector<256x256xf32>
    %45 = arith.addf %41, %44 : vector<256x256xf32>
    %cst_30 = arith.constant dense<0xFF800000> : vector<256xf32>
    %46 = vector.multi_reduction <maximumf>, %45, %cst_30 [1] : vector<256x256xf32> to vector<256xf32>
    %47 = vector.shape_cast %46 : vector<256xf32> to vector<256x1xf32>
    %48 = vector.broadcast %47 : vector<256x1xf32> to vector<256x256xf32>
    %49 = arith.subf %45, %48 : vector<256x256xf32>
    %50 = math.exp %49 : vector<256x256xf32>
    %cst_31 = arith.constant dense<0.000000e+00> : vector<256xf32>
    %51 = vector.multi_reduction <add>, %50, %cst_31 [1] : vector<256x256xf32> to vector<256xf32>
    %52 = vector.shape_cast %51 : vector<256xf32> to vector<256x1xf32>
    %53 = tpu.reciprocal %52 {approx = true} : vector<256x1xf32> -> vector<256x1xf32>
    %54 = vector.broadcast %53 : vector<256x1xf32> to vector<256x256xf32>
    %55 = arith.mulf %50, %54 : vector<256x256xf32>
    %cst_32 = arith.constant dense<0.000000e+00> : vector<256x8xf32>
    %56 = tpu.matmul %55, %40, %cst_32 {dimension_numbers = #tpu.dot_dimension_numbers<[1], [0], [0], [1], [0, 0, 1, 1], [], []>} : vector<256x256xf32>, vector<256x8xf32>, vector<256x8xf32> -> vector<256x8xf32>
    %c1_33 = arith.constant 1 : index
    %c0_34 = arith.constant 0 : index
    %c0_35 = arith.constant 0 : index
    %57 = vector.load %arg4[%c1_33, %c0_34, %c0_35] : memref<4x8x32xf32, #tpu.memory_space<vmem>>, vector<1x8x32xf32>
    %58 = vector.shape_cast %57 : vector<1x8x32xf32> to vector<8x32xf32>
    %cst_36 = arith.constant dense<0.000000e+00> : vector<256x32xf32>
    %59 = tpu.matmul %56, %58, %cst_36 {dimension_numbers = #tpu.dot_dimension_numbers<[1], [0], [0], [1], [0, 0, 1, 1], [], []>} : vector<256x8xf32>, vector<8x32xf32>, vector<256x32xf32> -> vector<256x32xf32>
    %c0_37 = arith.constant 0 : index
    %c0_38 = arith.constant 0 : index
    %60 = vector.load %arg8[%c0_37, %c0_38] : memref<256x32xf32, #tpu.memory_space<vmem>>, vector<256x32xf32>
    %61 = arith.addf %60, %59 : vector<256x32xf32>
    %c0_39 = arith.constant 0 : index
    %c0_40 = arith.constant 0 : index
    %62 = vector.load %arg8[%c0_39, %c0_40] : memref<256x32xf32, #tpu.memory_space<vmem>>, vector<256x32xf32>
    tpu.vector_store %arg8[%c0_39, %c0_40], %61 {strides = array<i32>} : memref<256x32xf32, #tpu.memory_space<vmem>>, vector<256x32xf32>,
    %c2 = arith.constant 2 : index
    %c0_41 = arith.constant 0 : index
    %c0_42 = arith.constant 0 : index
    %63 = vector.load %arg2[%c2, %c0_41, %c0_42] : memref<4x32x24xf32, #tpu.memory_space<vmem>>, vector<1x32x24xf32>
    %64 = vector.shape_cast %63 : vector<1x32x24xf32> to vector<32x24xf32>
    %cst_43 = arith.constant dense<0.000000e+00> : vector<256x24xf32>
    %65 = tpu.matmul %0, %64, %cst_43 {dimension_numbers = #tpu.dot_dimension_numbers<[1], [0], [0], [1], [0, 0, 1, 1], [], []>} : vector<256x32xf32>, vector<32x24xf32>, vector<256x24xf32> -> vector<256x24xf32>
    %66 = vector.extract_strided_slice %65 {offsets = [0, 0], sizes = [256, 8], strides = [1, 1]} : vector<256x24xf32> to vector<256x8xf32>
    %c2_44 = arith.constant 2 : index
    %c0_45 = arith.constant 0 : index
    %c0_46 = arith.constant 0 : index
    %67 = vector.load %arg3[%c2_44, %c0_45, %c0_46] : memref<4x1x8xf32, #tpu.memory_space<vmem>>, vector<1x1x8xf32>
    %68 = vector.shape_cast %67 : vector<1x1x8xf32> to vector<1x8xf32>
    %69 = vector.broadcast %68 : vector<1x8xf32> to vector<256x8xf32>
    %70 = arith.addf %66, %69 : vector<256x8xf32>
    %71 = vector.extract_strided_slice %65 {offsets = [0, 8], sizes = [256, 8], strides = [1, 1]} : vector<256x24xf32> to vector<256x8xf32>
    %72 = vector.extract_strided_slice %65 {offsets = [0, 16], sizes = [256, 8], strides = [1, 1]} : vector<256x24xf32> to vector<256x8xf32>
    %cst_47 = arith.constant dense<0.000000e+00> : vector<256x256xf32>
    %73 = tpu.matmul %70, %71, %cst_47 {dimension_numbers = #tpu.dot_dimension_numbers<[1], [1], [0], [0], [0, 0, 1, 0], [], []>} : vector<256x8xf32>, vector<256x8xf32>, vector<256x256xf32> -> vector<256x256xf32>
    %c2_48 = arith.constant 2 : index
    %c0_49 = arith.constant 0 : index
    %c0_50 = arith.constant 0 : index
    %74 = vector.load %arg6[%c2_48, %c0_49, %c0_50] : memref<4x256x256xbf16, #tpu.memory_space<vmem>>, vector<1x256x256xbf16>
    %75 = vector.shape_cast %74 : vector<1x256x256xbf16> to vector<256x256xbf16>
    %76 = arith.extf %75 : vector<256x256xbf16> to vector<256x256xf32>
    %77 = arith.addf %73, %76 : vector<256x256xf32>
    %cst_51 = arith.constant dense<0xFF800000> : vector<256xf32>
    %78 = vector.multi_reduction <maximumf>, %77, %cst_51 [1] : vector<256x256xf32> to vector<256xf32>
    %79 = vector.shape_cast %78 : vector<256xf32> to vector<256x1xf32>
    %80 = vector.broadcast %79 : vector<256x1xf32> to vector<256x256xf32>
    %81 = arith.subf %77, %80 : vector<256x256xf32>
    %82 = math.exp %81 : vector<256x256xf32>
    %cst_52 = arith.constant dense<0.000000e+00> : vector<256xf32>
    %83 = vector.multi_reduction <add>, %82, %cst_52 [1] : vector<256x256xf32> to vector<256xf32>
    %84 = vector.shape_cast %83 : vector<256xf32> to vector<256x1xf32>
    %85 = tpu.reciprocal %84 {approx = true} : vector<256x1xf32> -> vector<256x1xf32>
    %86 = vector.broadcast %85 : vector<256x1xf32> to vector<256x256xf32>
    %87 = arith.mulf %82, %86 : vector<256x256xf32>
    %cst_53 = arith.constant dense<0.000000e+00> : vector<256x8xf32>
    %88 = tpu.matmul %87, %72, %cst_53 {dimension_numbers = #tpu.dot_dimension_numbers<[1], [0], [0], [1], [0, 0, 1, 1], [], []>} : vector<256x256xf32>, vector<256x8xf32>, vector<256x8xf32> -> vector<256x8xf32>
    %c2_54 = arith.constant 2 : index
    %c0_55 = arith.constant 0 : index
    %c0_56 = arith.constant 0 : index
    %89 = vector.load %arg4[%c2_54, %c0_55, %c0_56] : memref<4x8x32xf32, #tpu.memory_space<vmem>>, vector<1x8x32xf32>
    %90 = vector.shape_cast %89 : vector<1x8x32xf32> to vector<8x32xf32>
    %cst_57 = arith.constant dense<0.000000e+00> : vector<256x32xf32>
    %91 = tpu.matmul %88, %90, %cst_57 {dimension_numbers = #tpu.dot_dimension_numbers<[1], [0], [0], [1], [0, 0, 1, 1], [], []>} : vector<256x8xf32>, vector<8x32xf32>, vector<256x32xf32> -> vector<256x32xf32>
    %c0_58 = arith.constant 0 : index
    %c0_59 = arith.constant 0 : index
    %92 = vector.load %arg8[%c0_58, %c0_59] : memref<256x32xf32, #tpu.memory_space<vmem>>, vector<256x32xf32>
    %93 = arith.addf %92, %91 : vector<256x32xf32>
    %c0_60 = arith.constant 0 : index
    %c0_61 = arith.constant 0 : index
    %94 = vector.load %arg8[%c0_60, %c0_61] : memref<256x32xf32, #tpu.memory_space<vmem>>, vector<256x32xf32>
    tpu.vector_store %arg8[%c0_60, %c0_61], %93 {strides = array<i32>} : memref<256x32xf32, #tpu.memory_space<vmem>>, vector<256x32xf32>,
    %c3 = arith.constant 3 : index
    %c0_62 = arith.constant 0 : index
    %c0_63 = arith.constant 0 : index
    %95 = vector.load %arg2[%c3, %c0_62, %c0_63] : memref<4x32x24xf32, #tpu.memory_space<vmem>>, vector<1x32x24xf32>
    %96 = vector.shape_cast %95 : vector<1x32x24xf32> to vector<32x24xf32>
    %cst_64 = arith.constant dense<0.000000e+00> : vector<256x24xf32>
    %97 = tpu.matmul %0, %96, %cst_64 {dimension_numbers = #tpu.dot_dimension_numbers<[1], [0], [0], [1], [0, 0, 1, 1], [], []>} : vector<256x32xf32>, vector<32x24xf32>, vector<256x24xf32> -> vector<256x24xf32>
    %98 = vector.extract_strided_slice %97 {offsets = [0, 0], sizes = [256, 8], strides = [1, 1]} : vector<256x24xf32> to vector<256x8xf32>
    %c3_65 = arith.constant 3 : index
    %c0_66 = arith.constant 0 : index
    %c0_67 = arith.constant 0 : index
    %99 = vector.load %arg3[%c3_65, %c0_66, %c0_67] : memref<4x1x8xf32, #tpu.memory_space<vmem>>, vector<1x1x8xf32>
    %100 = vector.shape_cast %99 : vector<1x1x8xf32> to vector<1x8xf32>
    %101 = vector.broadcast %100 : vector<1x8xf32> to vector<256x8xf32>
    %102 = arith.addf %98, %101 : vector<256x8xf32>
    %103 = vector.extract_strided_slice %97 {offsets = [0, 8], sizes = [256, 8], strides = [1, 1]} : vector<256x24xf32> to vector<256x8xf32>
    %104 = vector.extract_strided_slice %97 {offsets = [0, 16], sizes = [256, 8], strides = [1, 1]} : vector<256x24xf32> to vector<256x8xf32>
    %cst_68 = arith.constant dense<0.000000e+00> : vector<256x256xf32>
    %105 = tpu.matmul %102, %103, %cst_68 {dimension_numbers = #tpu.dot_dimension_numbers<[1], [1], [0], [0], [0, 0, 1, 0], [], []>} : vector<256x8xf32>, vector<256x8xf32>, vector<256x256xf32> -> vector<256x256xf32>
    %c3_69 = arith.constant 3 : index
    %c0_70 = arith.constant 0 : index
    %c0_71 = arith.constant 0 : index
    %106 = vector.load %arg6[%c3_69, %c0_70, %c0_71] : memref<4x256x256xbf16, #tpu.memory_space<vmem>>, vector<1x256x256xbf16>
    %107 = vector.shape_cast %106 : vector<1x256x256xbf16> to vector<256x256xbf16>
    %108 = arith.extf %107 : vector<256x256xbf16> to vector<256x256xf32>
    %109 = arith.addf %105, %108 : vector<256x256xf32>
    %cst_72 = arith.constant dense<0xFF800000> : vector<256xf32>
    %110 = vector.multi_reduction <maximumf>, %109, %cst_72 [1] : vector<256x256xf32> to vector<256xf32>
    %111 = vector.shape_cast %110 : vector<256xf32> to vector<256x1xf32>
    %112 = vector.broadcast %111 : vector<256x1xf32> to vector<256x256xf32>
    %113 = arith.subf %109, %112 : vector<256x256xf32>
    %114 = math.exp %113 : vector<256x256xf32>
    %cst_73 = arith.constant dense<0.000000e+00> : vector<256xf32>
    %115 = vector.multi_reduction <add>, %114, %cst_73 [1] : vector<256x256xf32> to vector<256xf32>
    %116 = vector.shape_cast %115 : vector<256xf32> to vector<256x1xf32>
    %117 = tpu.reciprocal %116 {approx = true} : vector<256x1xf32> -> vector<256x1xf32>
    %118 = vector.broadcast %117 : vector<256x1xf32> to vector<256x256xf32>
    %119 = arith.mulf %114, %118 : vector<256x256xf32>
    %cst_74 = arith.constant dense<0.000000e+00> : vector<256x8xf32>
    %120 = tpu.matmul %119, %104, %cst_74 {dimension_numbers = #tpu.dot_dimension_numbers<[1], [0], [0], [1], [0, 0, 1, 1], [], []>} : vector<256x256xf32>, vector<256x8xf32>, vector<256x8xf32> -> vector<256x8xf32>
    %c3_75 = arith.constant 3 : index
    %c0_76 = arith.constant 0 : index
    %c0_77 = arith.constant 0 : index
    %121 = vector.load %arg4[%c3_75, %c0_76, %c0_77] : memref<4x8x32xf32, #tpu.memory_space<vmem>>, vector<1x8x32xf32>
    %122 = vector.shape_cast %121 : vector<1x8x32xf32> to vector<8x32xf32>
    %cst_78 = arith.constant dense<0.000000e+00> : vector<256x32xf32>
    %123 = tpu.matmul %120, %122, %cst_78 {dimension_numbers = #tpu.dot_dimension_numbers<[1], [0], [0], [1], [0, 0, 1, 1], [], []>} : vector<256x8xf32>, vector<8x32xf32>, vector<256x32xf32> -> vector<256x32xf32>
    %c0_79 = arith.constant 0 : index
    %c0_80 = arith.constant 0 : index
    %124 = vector.load %arg8[%c0_79, %c0_80] : memref<256x32xf32, #tpu.memory_space<vmem>>, vector<256x32xf32>
    %125 = arith.addf %124, %123 : vector<256x32xf32>
    %c0_81 = arith.constant 0 : index
    %c0_82 = arith.constant 0 : index
    %126 = vector.load %arg8[%c0_81, %c0_82] : memref<256x32xf32, #tpu.memory_space<vmem>>, vector<256x32xf32>
    tpu.vector_store %arg8[%c0_81, %c0_82], %125 {strides = array<i32>} : memref<256x32xf32, #tpu.memory_space<vmem>>, vector<256x32xf32>,
    %c0_83 = arith.constant 0 : index
    %c0_84 = arith.constant 0 : index
    %127 = vector.load %arg8[%c0_83, %c0_84] : memref<256x32xf32, #tpu.memory_space<vmem>>, vector<256x32xf32>
    %c0_85 = arith.constant 0 : index
    %c0_86 = arith.constant 0 : index
    %128 = vector.load %arg5[%c0_85, %c0_86] : memref<1x32xf32, #tpu.memory_space<vmem>>, vector<1x32xf32>
    %129 = vector.broadcast %128 : vector<1x32xf32> to vector<256x32xf32>
    %130 = arith.addf %127, %129 : vector<256x32xf32>
    %c0_87 = arith.constant 0 : index
    %c0_88 = arith.constant 0 : index
    %131 = vector.load %arg7[%c0_87, %c0_88] : memref<256x32xf32, #tpu.memory_space<vmem>>, vector<256x32xf32>
    tpu.vector_store %arg7[%c0_87, %c0_88], %130 {strides = array<i32>} : memref<256x32xf32, #tpu.memory_space<vmem>>, vector<256x32xf32>,
    return
  }
  func.func @transform_0(%arg0: i32) -> (i32, i32) {
    %c0_i32 = arith.constant 0 : i32
    %c0_i32_0 = arith.constant 0 : i32
    return %arg0, %c0_i32 : i32, i32
  }
  func.func @transform_1(%arg0: i32) -> (i32, i32, i32) {
    %c0_i32 = arith.constant 0 : i32
    %c0_i32_0 = arith.constant 0 : i32
    %c0_i32_1 = arith.constant 0 : i32
    %c0_i32_2 = arith.constant 0 : i32
    return %c0_i32, %c0_i32_0, %c0_i32_1 : i32, i32, i32
  }
  func.func @transform_2(%arg0: i32) -> (i32, i32, i32) {
    %c0_i32 = arith.constant 0 : i32
    %c0_i32_0 = arith.constant 0 : i32
    %c0_i32_1 = arith.constant 0 : i32
    %c0_i32_2 = arith.constant 0 : i32
    return %c0_i32, %c0_i32_0, %c0_i32_1 : i32, i32, i32
  }
  func.func @transform_3(%arg0: i32) -> (i32, i32, i32) {
    %c0_i32 = arith.constant 0 : i32
    %c0_i32_0 = arith.constant 0 : i32
    %c0_i32_1 = arith.constant 0 : i32
    %c0_i32_2 = arith.constant 0 : i32
    return %c0_i32, %c0_i32_0, %c0_i32_1 : i32, i32, i32
  }
  func.func @transform_4(%arg0: i32) -> (i32, i32) {
    %c0_i32 = arith.constant 0 : i32
    %c0_i32_0 = arith.constant 0 : i32
    %c0_i32_1 = arith.constant 0 : i32
    return %c0_i32, %c0_i32_0 : i32, i32
  }
  func.func @transform_5(%arg0: i32) -> (i32, i32, i32) {
    %c0_i32 = arith.constant 0 : i32
    %c0_i32_0 = arith.constant 0 : i32
    %c0_i32_1 = arith.constant 0 : i32
    %c0_i32_2 = arith.constant 0 : i32
    return %c0_i32, %c0_i32_0, %c0_i32_1 : i32, i32, i32
  }
  func.func @transform_6(%arg0: i32) -> (i32, i32) {
    %c0_i32 = arith.constant 0 : i32
    %c0_i32_0 = arith.constant 0 : i32
    return %arg0, %c0_i32 : i32, i32
  }
}

</mosaic_0001>

<bundles_post_ra>
// kernel: tpu_custom_call.1
= control target key start
LH: loop header
LB: loop body
LE: loop exit
PB: predicated region body
PF: predicated region fallthrough
CT: control target
= control target key end

     0   :  { %s9859_s21 = smov 0   ;;  %s15547_s0 = inlined_call_operand.vmem [shape: f32[1024,32], index: 0, kind: input, shape index: {}]   ;;  %s15548_s1 = inlined_call_operand.vmem [shape: f32[4,32,24], index: 1, kind: input, shape index: {}]   ;;  %s15549_s2 = inlined_call_operand.vmem [shape: f32[4,1,8], index: 2, kind: input, shape index: {}]   ;;  %s15550_s3 = inlined_call_operand.vmem [shape: f32[4,8,32], index: 3, kind: input, shape index: {}]   ;;  %s15551_s4 = inlined_call_operand.vmem [shape: f32[1,32], index: 4, kind: input, shape index: {}]   ;;  %s15552_s5 = inlined_call_operand.vmem [shape: bf16[4,256,256], index: 5, kind: input, shape index: {}]   ;;  %s15553_s6 = inlined_call_operand.vmem [shape: f32[1024,32], index: 6, kind: output, shape index: {}]  }
   0x1 LB: > { %s7845_s22 = sadd.s32 4294967295, %s9820_s21   ;;  %p7849_p0 = scmp.ge.s32.totalorder %s9820_s21, 1  ;;  %s9820_s21 = sphi %s9859_s21, %s16_s21  }
   0x2   : > { %p213_p1 = scmp.lt.s32.totalorder %s9820_s21, 5 }
   0x4   : > { %p214_p2 = pnand %p7849_p0, %p213_p1 }
   0x6   : > { %217 = sbr.rel (%p214_p2) target bundleno = 4761 (0x1299), region = 44 }
   0xb   : > { %v290_v0 = vld [vmem:[%s15548_s1 + $0x18] sm:$0xff]  ;;  %v289_v1 = vld [vmem:[%s15548_s1 + $0x10] sm:$0xff]  ;;  %s7850_s27 = sshll.u32 %s7845_s22, 5  ;;  %v288_v2 = vld [vmem:[%s15548_s1 + $0x8] sm:$0xff]  ;;  %vm291_vm0 = vcmask 261120   ;;  %s9822_s12 = smov 120  }
   0xc   : > { %400 = vmatpush.msra.mxu0 %v290_v0  ;;  %p244_p3 = scmp.lt.s32.totalorder %s7850_s27, 127  ;;  %v287_v3 = vld [vmem:[%s15548_s1] sm:$0xff]  ;;  %vm729_vm1 = vcmask 64512   ;;  %s9823_s13 = smov 112  }
   0xe   : > { %401 = vmatpush.msra.mxu0 %v289_v1  ;;  %s15881_s27 = smov (!%p244_p3, %s7850_s27), 127 }
   0xf   : > { %s7851_s8 = sshll.u32 %s15881_s27, 3 }
  0x10   : > { %402 = vmatpush.msra.mxu0 %v288_v2  ;;  %s9887_s11 = scalar_lea.vmem %s15547_s0, %s7851_s8  ;;  %s15289_s15 = scalar_lea.vmem %s15553_s6, %s7851_s8 }
  0x11   : > { %v9890_v4 = vld [vmem:[%s9887_s11] sm:$0xff]  ;;  %v9895_v5 = vld [vmem:[%s9887_s11 + $0x8] sm:$0xff]  ;;  %v9900_v6 = vld [vmem:[%s9887_s11 + $0x10] sm:$0xff] }
  0x12   : > { %403 = vmatpush.msra.mxu0 %v287_v3  ;;  %15671 = vst [vmem:[#allocation3_spill] sm:$0xff] %v9890_v4  ;;  %v9905_v7 = vld [vmem:[%s9887_s11 + $0x18] sm:$0xff]  ;;  %v9910_v8 = vld [vmem:[%s9887_s11 + $0x20] sm:$0xff]  ;;  %v9915_v9 = vld [vmem:[%s9887_s11 + $0x28] sm:$0xff] }
  0x13   : > { %7854 = vmatmul.msk.f32.vlgmr.msra.gmra.mxu0 %vm291_vm0, %v9890_v4  ;;  %15672 = vst [vmem:[#allocation4_spill] sm:$0xff] %v9895_v5  ;;  %v9920_v10 = vld [vmem:[%s9887_s11 + $0x30] sm:$0xff]  ;;  %v9925_v11 = vld [vmem:[%s9887_s11 + $0x38] sm:$0xff]  ;;  %v9930_v12 = vld [vmem:[%s9887_s11 + $0x40] sm:$0xff] }
  0x14   : > { %15673 = vst [vmem:[#allocation5_spill] sm:$0xff] %v9900_v6  ;;  %v9935_v13 = vld [vmem:[%s9887_s11 + $0x48] sm:$0xff]  ;;  %v9940_v14 = vld [vmem:[%s9887_s11 + $0x50] sm:$0xff]  ;;  %v9945_v15 = vld [vmem:[%s9887_s11 + $0x58] sm:$0xff] }
  0x15   : > { %15674 = vst [vmem:[#allocation6_spill] sm:$0xff] %v9905_v7  ;;  %v9950_v16 = vld [vmem:[%s9887_s11 + $0x60] sm:$0xff]  ;;  %v268_v17 = vld [vmem:[%s9887_s11 + $0x68] sm:$0xff]  ;;  %v269_v18 = vld [vmem:[%s9887_s11 + $0x70] sm:$0xff] }
  0x16   : > { %15675 = vst [vmem:[#allocation7_spill] sm:$0xff] %v9910_v8  ;;  %v270_v19 = vld [vmem:[%s9887_s11 + $0x78] sm:$0xff]  ;;  %v271_v21 = vld [vmem:[%s9887_s11 + $0x80] sm:$0xff]  ;;  %v272_v23 = vld [vmem:[%s9887_s11 + $0x88] sm:$0xff] }
  0x17   : > { %15676 = vst [vmem:[#allocation8_spill] sm:$0xff] %v9915_v9  ;;  %v273_v25 = vld [vmem:[%s9887_s11 + $0x90] sm:$0xff]  ;;  %v274_v27 = vld [vmem:[%s9887_s11 + $0x98] sm:$0xff]  ;;  %v275_v29 = vld [vmem:[%s9887_s11 + $0xa0] sm:$0xff] }
  0x18   : > { %15677 = vst [vmem:[#allocation9_spill] sm:$0xff] %v9920_v10  ;;  %v276_v31 = vld [vmem:[%s9887_s11 + $0xa8] sm:$0xff]  ;;  %v277_v33 = vld [vmem:[%s9887_s11 + $0xb0] sm:$0xff]  ;;  %v278_v35 = vld [vmem:[%s9887_s11 + $0xb8] sm:$0xff] }
  0x19   : > { %15678 = vst [vmem:[#allocation10_spill] sm:$0xff] %v9925_v11  ;;  %v279_v37 = vld [vmem:[%s9887_s11 + $0xc0] sm:$0xff]  ;;  %v280_v39 = vld [vmem:[%s9887_s11 + $0xc8] sm:$0xff]  ;;  %v281_v41 = vld [vmem:[%s9887_s11 + $0xd0] sm:$0xff] }
  0x1a   : > { %15679 = vst [vmem:[#allocation11_spill] sm:$0xff] %v9930_v12  ;;  %v282_v43 = vld [vmem:[%s9887_s11 + $0xd8] sm:$0xff]  ;;  %v283_v45 = vld [vmem:[%s9887_s11 + $0xe0] sm:$0xff]  ;;  %v284_v47 = vld [vmem:[%s9887_s11 + $0xe8] sm:$0xff] }
  0x1b   : > { %7855 = vmatmul.msk.f32.gmra.mxu0 %vm291_vm0, %v9895_v5  ;;  %15680 = vst [vmem:[#allocation12_spill] sm:$0xff] %v9935_v13  ;;  %v285_v49 = vld [vmem:[%s9887_s11 + $0xf0] sm:$0xff]  ;;  %v286_v51 = vld [vmem:[%s9887_s11 + $0xf8] sm:$0xff] }
  0x1c   : > { %15681 = vst [vmem:[#allocation13_spill] sm:$0xff] %v9940_v14 }
  0x1d   : > { %15682 = vst [vmem:[#allocation14_spill] sm:$0xff] %v9945_v15 }
  0x1e   : > { %15683 = vst [vmem:[#allocation15_spill] sm:$0xff] %v9950_v16 }
  0x23   : > { %7856 = vmatmul.msk.f32.gmra.mxu0 %vm291_vm0, %v9900_v6 }
  0x2b   : > { %7857 = vmatmul.msk.f32.gmra.mxu0 %vm291_vm0, %v9905_v7 }
  0x33   : > { %7858 = vmatmul.msk.f32.gmra.mxu0 %vm291_vm0, %v9910_v8 }
  0x3b   : > { %7859 = vmatmul.msk.f32.gmra.mxu0 %vm291_vm0, %v9915_v9 }
  0x43   : > { %7860 = vmatmul.msk.f32.gmra.mxu0 %vm291_vm0, %v9920_v10 }
  0x4b   : > { %7861 = vmatmul.msk.f32.gmra.mxu0 %vm291_vm0, %v9925_v11 }
  0x53   : > { %7862 = vmatmul.msk.f32.gmra.mxu0 %vm291_vm0, %v9930_v12 }
  0x5b   : > { %7863 = vmatmul.msk.f32.gmra.mxu0 %vm291_vm0, %v9935_v13 }
  0x63   : > { %7864 = vmatmul.msk.f32.gmra.mxu0 %vm291_vm0, %v9940_v14 }
  0x6b   : > { %7865 = vmatmul.msk.f32.gmra.mxu0 %vm291_vm0, %v9945_v15 }
  0x73   : > { %7866 = vmatmul.msk.f32.gmra.mxu0 %vm291_vm0, %v9950_v16 }
  0x7b   : > { %7867 = vmatmul.msk.f32.gmra.mxu0 %vm291_vm0, %v268_v17 }
  0x83   : > { %7868 = vmatmul.msk.f32.gmra.mxu0 %vm291_vm0, %v269_v18 }
  0x8b   : > { %7869 = vmatmul.msk.f32.gmra.mxu0 %vm291_vm0, %v270_v19 }
  0x90   : > { %v9960_v20 = vpop.f32.mrf.mxu0 }
  0x93   : > { %7870 = vmatmul.msk.f32.gmra.mxu0 %vm291_vm0, %v271_v21 }
  0x98   : > { %v9964_v22 = vpop.f32.mrf.mxu0 }
  0x9b   : > { %7871 = vmatmul.msk.f32.gmra.mxu0 %vm291_vm0, %v272_v23 }
  0xa0   : > { %v9968_v24 = vpop.f32.mrf.mxu0 }
  0xa3   : > { %7872 = vmatmul.msk.f32.gmra.mxu0 %vm291_vm0, %v273_v25 }
  0xa8   : > { %v9972_v26 = vpop.f32.mrf.mxu0 }
  0xab   : > { %7873 = vmatmul.msk.f32.gmra.mxu0 %vm291_vm0, %v274_v27 }
  0xb0   : > { %v9976_v28 = vpop.f32.mrf.mxu0 }
  0xb3   : > { %7874 = vmatmul.msk.f32.gmra.mxu0 %vm291_vm0, %v275_v29 }
  0xb8   : > { %v9980_v30 = vpop.f32.mrf.mxu0 }
  0xbb   : > { %7875 = vmatmul.msk.f32.gmra.mxu0 %vm291_vm0, %v276_v31 }
  0xc0   : > { %v9984_v32 = vpop.f32.mrf.mxu0 }
  0xc3   : > { %7876 = vmatmul.msk.f32.gmra.mxu0 %vm291_vm0, %v277_v33 }
  0xc8   : > { %v9988_v34 = vpop.f32.mrf.mxu0 }
  0xcb   : > { %7877 = vmatmul.msk.f32.gmra.mxu0 %vm291_vm0, %v278_v35 }
  0xd0   : > { %v9992_v36 = vpop.f32.mrf.mxu0 }
  0xd3   : > { %7878 = vmatmul.msk.f32.gmra.mxu0 %vm291_vm0, %v279_v37 }
  0xd8   : > { %v9996_v38 = vpop.f32.mrf.mxu0 }
  0xdb   : > { %7879 = vmatmul.msk.f32.gmra.mxu0 %vm291_vm0, %v280_v39 }
  0xe0   : > { %v10000_v40 = vpop.f32.mrf.mxu0 }
  0xe3   : > { %7880 = vmatmul.msk.f32.gmra.mxu0 %vm291_vm0, %v281_v41 }
  0xe8   : > { %v10004_v42 = vpop.f32.mrf.mxu0 }
  0xe9   : > { %687 = vrot.lane.b32.xlu2 %v10004_v42, %s9822_s12 }
  0xeb   : > { %7881 = vmatmul.msk.f32.gmra.mxu0 %vm291_vm0, %v282_v43 }
  0xf0   : > { %v10010_v44 = vpop.f32.mrf.mxu0 }
  0xf1   : > { %685 = vrot.lane.b32.xlu2 %v10000_v40, %s9822_s12 }
  0xf3   : > { %7882 = vmatmul.msk.f32.gmra.mxu0 %vm291_vm0, %v283_v45 }
  0xf8   : > { %v10016_v46 = vpop.f32.mrf.mxu0 }
  0xf9   : > { %679 = vrot.lane.b32.xlu2 %v9988_v34, %s9822_s12  ;;  %691 = vrot.lane.b32.xlu1 %v10016_v46, %s9822_s12  ;;  %v8642_v23 = vpack.i.bf16 %v10010_v44, %v10016_v46 }
  0xfb   : > { %7883 = vmatmul.msk.f32.gmra.mxu0 %vm291_vm0, %v284_v47 }
 0x100   : > { %v10024_v48 = vpop.f32.mrf.mxu0 }
 0x101   : > { %673 = vrot.lane.b32.xlu2 %v9976_v28, %s9822_s12  ;;  %689 = vrot.lane.b32.xlu1 %v10010_v44, %s9822_s12 }
 0x103   : > { %7884 = vmatmul.msk.f32.gmra.mxu0 %vm291_vm0, %v285_v49 }
 0x108   : > { %v10032_v50 = vpop.f32.mrf.mxu0 }
 0x109   : > { %667 = vrot.lane.b32.xlu2 %v9964_v22, %s9822_s12  ;;  %681 = vrot.lane.b32.xlu1 %v9992_v36, %s9822_s12  ;;  %v8637_v33 = vpack.i.bf16 %v10024_v48, %v10032_v50 }
 0x10a   : > { %695 = vrot.lane.b32.xlu0 %v10032_v50, %s9822_s12 }
 0x10b   : > { %7885 = vmatmul.msk.f32.gmra.mxu0 %vm291_vm0, %v286_v51 }
 0x110   : > { %v10042_v52 = vpop.f32.mrf.mxu0 }
 0x111   : > { %675 = vrot.lane.b32.xlu1 %v9980_v30, %s9822_s12 }
 0x112   : > { %693 = vrot.lane.b32.xlu0 %v10024_v48, %s9822_s12 }
 0x118   : > { %v10048_v53 = vpop.f32.mrf.mxu0 }
 0x119   : > { %669 = vrot.lane.b32.xlu1 %v9968_v24, %s9822_s12 }
 0x11a   : > { %683 = vrot.lane.b32.xlu0 %v9996_v38, %s9822_s12 }
 0x120   : > { %v10054_v54 = vpop.f32.mrf.mxu0 }
 0x122   : > { %677 = vrot.lane.b32.xlu0 %v9984_v32, %s9822_s12 }
 0x128   : > { %v10058_v55 = vpop.f32.mrf.mxu0 }
 0x12a   : > { %671 = vrot.lane.b32.xlu0 %v9972_v26, %s9822_s12 }
 0x130   : > { %v10062_v56 = vpop.f32.mrf.mxu0 }
 0x132   : > { %665 = vrot.lane.b32.xlu0 %v9960_v20, %s9822_s12 }
 0x138   : > { %v10066_v57 = vpop.f32.mrf.mxu0 }
 0x139   : > { %707 = vrot.lane.b32.xlu2 %v10066_v57, %s9822_s12 }
 0x140   : > { %v10070_v58 = vpop.f32.mrf.mxu0 }
 0x141   : > { %709 = vrot.lane.b32.xlu1 %v10070_v58, %s9822_s12 }
 0x143   : > { %v688_v19 = vpop.permute.xlu2 %687 }
 0x148   : > { %v10074_v59 = vpop.f32.mrf.mxu0 }
 0x149   : > { %711 = vrot.lane.b32.xlu0 %v10074_v59, %s9822_s12  ;;  %v8682_v51 = vpack.i.bf16 %v9972_v26, %v10074_v59 }
 0x14b   : > { %v686_v29 = vpop.permute.xlu2 %685 }
 0x150   : > { %v10078_v60 = vpop.f32.mrf.mxu0 }
 0x151   : > { %713 = vrot.lane.b32.xlu2 %v10078_v60, %s9822_s12  ;;  %v8677_v43 = vpack.i.bf16 %v9976_v28, %v10078_v60 }
 0x153   : > { %v680_v37 = vpop.permute.xlu2 %679 }
 0x158   : > { %v10082_v61 = vpop.f32.mrf.mxu0 }
 0x159   : > { %715 = vrot.lane.b32.xlu1 %v10082_v61, %s9822_s12  ;;  %v8672_v45 = vpack.i.bf16 %v9980_v30, %v10082_v61 }
 0x160   : > { %v10086_v62 = vpop.f32.mrf.mxu0 }
 0x161   : > { %717 = vrot.lane.b32.xlu0 %v10086_v62, %s9822_s12  ;;  %v8667_v35 = vpack.i.bf16 %v9984_v32, %v10086_v62 }
 0x168   : > { %v10090_v63 = vpop.f32.mrf.mxu0 }
 0x169   : > { %719 = vrot.lane.b32.xlu2 %v10090_v63, %s9822_s12  ;;  %v8662_v25 = vpack.i.bf16 %v9988_v34, %v10090_v63 }
 0x16b   : > { %v692_v17 = vpop.permute.xlu1 %691 }
 0x170   : > { %v10094_v0 = vpop.f32.mrf.mxu0 }
 0x171   : > { %701 = vrot.lane.b32.xlu2 %v10054_v54, %s9822_s12  ;;  %721 = vrot.lane.b32.xlu1 %v10094_v0, %s9822_s12  ;;  %v8657_v49 = vpack.i.bf16 %v9992_v36, %v10094_v0 }
 0x173   : > { %v690_v27 = vpop.permute.xlu1 %689 }
 0x178   : > { %v10100_v1 = vpop.f32.mrf.mxu0 }
 0x179   : > { %703 = vrot.lane.b32.xlu1 %v10058_v55, %s9822_s12  ;;  %723 = vrot.lane.b32.xlu0 %v10100_v1, %s9822_s12  ;;  %v8647_v2 = vpack.i.bf16 %v9996_v38, %v10100_v1 }
 0x17b   : > { %8648 = vrot.lane.b32.xlu2 %v8647_v2, %s9823_s13  ;;  %v682_v47 = vpop.permute.xlu1 %681  ;;  %v674_v2 = vpop.permute.xlu2 %673 }
 0x17c   : > { %v696_v3 = vpop.permute.xlu0 %695 }
 0x17d   : > { %7886 = vmatpush.xpose.msk.msra.mxu1 %vm729_vm1, %v696_v3 }
 0x180   : > { %v10114_v18 = vpop.f32.mrf.mxu0 }
 0x181   : > { %697 = vrot.lane.b32.xlu1 %v10042_v52, %s9822_s12  ;;  %705 = vrot.lane.b32.xlu0 %v10062_v56, %s9822_s12  ;;  %v8652_v31 = vpack.i.bf16 %v10000_v40, %v10114_v18 }
 0x183   : > { %725 = vrot.lane.b32.xlu2 %v10114_v18, %s9822_s12 }
 0x184   : > { %v694_v21 = vpop.permute.xlu0 %693 }
 0x185   : > { %7887 = vmatpush.xpose.msk.msra.mxu1 %vm729_vm1, %v694_v21  ;;  %v676_v21 = vpop.permute.xlu1 %675 }
 0x188   : > { %v10140_v39 = vpop.f32.mrf.mxu0 }
 0x189   : > { %7888 = vmatpush.xpose.msk.msra.mxu1 %vm729_vm1, %v692_v17  ;;  %8643 = vrot.lane.b32.xlu1 %v8642_v23, %s9823_s13  ;;  %15684 = vst [vmem:[#allocation16_spill] sm:$0xff] %v10140_v39  ;;  %v8712_v3 = vpack.i.bf16 %v10004_v42, %v10140_v39  ;;  %v8687_v23 = vpack.i.bf16 %v9968_v24, %v10070_v58 }
 0x18a   : > { %699 = vrot.lane.b32.xlu0 %v10048_v53, %s9822_s12 }
 0x18b   : > { %8663 = vrot.lane.b32.xlu2 %v8662_v25, %s9823_s13  ;;  %v668_v25 = vpop.permute.xlu2 %667 }
 0x18c   : > { %v684_v41 = vpop.permute.xlu0 %683 }
 0x18d   : > { %7889 = vmatpush.xpose.msk.msra.mxu1 %vm729_vm1, %v690_v27 }
 0x191   : > { %7890 = vmatpush.xpose.msk.msra.mxu1 %vm729_vm1, %v688_v19  ;;  %8653 = vrot.lane.b32.xlu1 %v8652_v31, %s9823_s13  ;;  %v8692_v19 = vpack.i.bf16 %v9964_v22, %v10066_v57 }
 0x192   : > { %8638 = vrot.lane.b32.xlu0 %v8637_v33, %s9823_s13  ;;  %v670_v33 = vpop.permute.xlu1 %669 }
 0x193   : > { %8668 = vrot.lane.b32.xlu2 %v8667_v35, %s9823_s13  ;;  %v10175_v31 = vpop.permute.xlu2 %707  ;;  %v8702_v35 = vpack.i.bf16 %v10054_v54, %v10058_v55 }
 0x194   : > { %v678_v17 = vpop.permute.xlu0 %677 }
 0x195   : > { %7891 = vmatpush.xpose.msk.msra.mxu1 %vm729_vm1, %v686_v29  ;;  %v8697_v29 = vpack.i.bf16 %v9960_v20, %v10062_v56 }
 0x199   : > { %7892 = vmatpush.xpose.msk.msra.mxu1 %vm729_vm1, %v684_v41  ;;  %727 = vrot.lane.b32.xlu1 %v10140_v39, %s9822_s12 }
 0x19a   : > { %8678 = vrot.lane.b32.xlu0 %v8677_v43, %s9823_s13 }
 0x19b   : > { %8673 = vrot.lane.b32.xlu2 %v8672_v45, %s9823_s13 }
 0x19c   : > { %v672_v27 = vpop.permute.xlu0 %671 }
 0x19d   : > { %7893 = vmatpush.xpose.msk.msra.mxu1 %vm729_vm1, %v682_v47  ;;  %v8707_v47 = vpack.i.bf16 %v10042_v52, %v10048_v53 }
 0x1a1   : > { %7894 = vmatpush.xpose.msk.msra.mxu1 %vm729_vm1, %v680_v37  ;;  %8658 = vrot.lane.b32.xlu1 %v8657_v49, %s9823_s13  ;;  %v10184_v37 = vld [vmem:[%s15549_s2] ss:$0 sm:$0xff] }
 0x1a2   : > { %8683 = vrot.lane.b32.xlu0 %v8682_v51, %s9823_s13  ;;  %v10192_v45 = vadd.f32 %v10184_v37, %v9960_v20  ;;  %v10203_v51 = vadd.f32 %v10184_v37, %v9964_v22  ;;  %v10211_v20 = vadd.f32 %v10184_v37, %v9968_v24  ;;  %v10229_v24 = vadd.f32 %v10184_v37, %v9976_v28 }
 0x1a3   : > { %8713 = vrot.lane.b32.xlu2 %v8712_v3, %s9823_s13  ;;  %v10245_v28 = vadd.f32 %v10184_v37, %v9984_v32  ;;  %v10255_v15 = vadd.f32 %v10184_v37, %v9988_v34  ;;  %v10263_v12 = vadd.f32 %v10184_v37, %v9992_v36  ;;  %v10269_v7 = vadd.f32 %v10184_v37, %v9996_v38 }
 0x1a4   : > { %v666_v43 = vpop.permute.xlu0 %665  ;;  %v10276_v38 = vadd.f32 %v10184_v37, %v10000_v40  ;;  %v10284_v40 = vadd.f32 %v10184_v37, %v10004_v42 }
 0x1a5   : > { %7895 = vmatpush.xpose.msk.msra.mxu1 %vm729_vm1, %v678_v17 }
 0x1a9   : > { %7896 = vmatpush.xpose.msk.msra.mxu1 %vm729_vm1, %v676_v21  ;;  %8693 = vrot.lane.b32.xlu1 %v8692_v19, %s9823_s13  ;;  %v10219_v19 = vadd.f32 %v10184_v37, %v9972_v26 }
 0x1aa   : > { %8688 = vrot.lane.b32.xlu0 %v8687_v23, %s9823_s13 }
 0x1ab   : > { %v10187_v41 = vpop.permute.xlu2 %713 }
 0x1ad   : > { %7897 = vmatpush.xpose.msk.msra.mxu1 %vm729_vm1, %v674_v2 }
 0x1b1   : > { %7898 = vmatpush.xpose.msk.msra.mxu1 %vm729_vm1, %v672_v27 }
 0x1b2   : > { %8698 = vrot.lane.b32.xlu0 %v8697_v29, %s9823_s13  ;;  %v10237_v29 = vadd.f32 %v10184_v37, %v9980_v30 }
 0x1b3   : > { %v10215_v3 = vpop.permute.xlu1 %709 }
 0x1b5   : > { %7899 = vmatpush.xpose.msk.msra.mxu1 %vm729_vm1, %v670_v33 }
 0x1b9   : > { %7900 = vmatpush.xpose.msk.msra.mxu1 %vm729_vm1, %v668_v25 }
 0x1ba   : > { %8703 = vrot.lane.b32.xlu0 %v8702_v35, %s9823_s13 }
 0x1bb   : > { %v10223_v22 = vpop.permute.xlu0 %711 }
 0x1bd   : > { %7901 = vmatpush.xpose.msk.msra.mxu1 %vm729_vm1, %v666_v43 }
 0x1c0   : > { %7902 = vmatmul.msk.f32.vlgmr.msra.gmra.mxu1 %vm729_vm1, %v10192_v45 }
 0x1c2   : > { %8708 = vrot.lane.b32.xlu0 %v8707_v47, %s9823_s13 }
 0x1c3   : > { %v10199_v49 = vpop.permute.xlu2 %719 }
 0x1c8   : > { %7903 = vmatmul.msk.f32.gmra.mxu1 %vm729_vm1, %v10203_v51 }
 0x1cb   : > { %v10207_v2 = vpop.permute.xlu2 %701  ;;  %v10225_v21 = vpop.permute.xlu1 %715 }
 0x1d0   : > { %7904 = vmatmul.msk.f32.gmra.mxu1 %vm729_vm1, %v10211_v20 }
 0x1d3   : > { %v10233_v25 = vpop.permute.xlu0 %717 }
 0x1d5   : > { %v8649_v17 = vpop.permute.xlu2 %8648 }
 0x1d6   : > { %v8650_v6 = vunpack.i.l.bf16 %v8649_v17 }
 0x1d8   : > { %7905 = vmatmul.msk.f32.gmra.mxu1 %vm729_vm1, %v10219_v19 }
 0x1dd   : > { %v726_v23 = vpop.permute.xlu2 %725 }
 0x1e0   : > { %7906 = vmatmul.msk.f32.gmra.mxu1 %vm729_vm1, %v10229_v24 }
 0x1e3   : > { %v722_v27 = vpop.permute.xlu1 %721 }
 0x1e5   : > { %v8664_v26 = vpop.permute.xlu2 %8663 }
 0x1e8   : > { %7907 = vmatmul.msk.f32.gmra.mxu1 %vm729_vm1, %v10237_v29 }
 0x1eb   : > { %v10241_v33 = vpop.permute.xlu1 %703  ;;  %v724_v35 = vpop.permute.xlu0 %723 }
 0x1ed   : > { %v8669_v43 = vpop.permute.xlu2 %8668 }
 0x1f0   : > { %7908 = vmatmul.msk.f32.gmra.mxu1 %vm729_vm1, %v10245_v28 }
 0x1f3   : > { %v10249_v47 = vpop.permute.xlu1 %697  ;;  %v10251_v16 = vpop.permute.xlu0 %705 }
 0x1f5   : > { %v8674_v30 = vpop.permute.xlu2 %8673 }
 0x1f8   : > { %7909 = vmatmul.msk.f32.gmra.mxu1 %vm729_vm1, %v10255_v15 }
 0x1fb   : > { %v8644_v14 = vpop.permute.xlu1 %8643 }
 0x1fc   : > { %v10259_v13 = vpop.permute.xlu0 %699  ;;  %v8645_v36 = vunpack.i.l.bf16 %v8644_v14  ;;  %v8646_v4 = vunpack.i.h.bf16 %v8644_v14 }
 0x1fd   : > { %v8714_v32 = vpop.permute.xlu2 %8713 }
 0x1fe   : > { %v8715_v11 = vunpack.i.l.bf16 %v8714_v32 }
 0x200   : > { %7910 = vmatmul.msk.f32.gmra.mxu1 %vm729_vm1, %v10263_v12  ;;  %1805 = vmatpush.msrb.mxu0 %v8715_v11 }
 0x203   : > { %v8654_v10 = vpop.permute.xlu1 %8653 }
 0x204   : > { %v8639_v9 = vpop.permute.xlu0 %8638  ;;  %v8655_v34 = vunpack.i.l.bf16 %v8654_v10 }
 0x205   : > { %v8640_v8 = vunpack.i.l.bf16 %v8639_v9  ;;  %v8641_v5 = vunpack.i.h.bf16 %v8639_v9 }
 0x206   : > { %1806 = vmatpush.msrb.mxu0 %v8655_v34  ;;  %v8716_v34 = vunpack.i.h.bf16 %v8714_v32  ;;  %v8665_v32 = vunpack.i.l.bf16 %v8664_v26 }
 0x207   : > { %1692 = vmatpush.msra.mxu3 %v8640_v8  ;;  %v8656_v8 = vunpack.i.h.bf16 %v8654_v10  ;;  %v8666_v10 = vunpack.i.h.bf16 %v8664_v26 }
 0x208   : > { %7911 = vmatmul.msk.f32.gmra.mxu1 %vm729_vm1, %v10269_v7  ;;  %1807 = vmatpush.msrb.mxu0 %v8650_v6 }
 0x209   : > { %1693 = vmatpush.msra.mxu3 %v8641_v5  ;;  %v8651_v5 = vunpack.i.h.bf16 %v8649_v17  ;;  %v8671_v17 = vunpack.i.h.bf16 %v8669_v43 }
 0x20b   : > { %1694 = vmatpush.msra.mxu3 %v8645_v36  ;;  %v728_v11 = vpop.permute.xlu1 %727  ;;  %v8675_v36 = vunpack.i.l.bf16 %v8674_v30 }
 0x20c   : > { %v8679_v39 = vpop.permute.xlu0 %8678  ;;  %7934 = vmatpush.xpose.msk.msra.mxu2 %vm729_vm1, %v728_v11 }
 0x20d   : > { %1695 = vmatpush.msra.mxu3 %v8646_v4  ;;  %v8681_v42 = vunpack.i.h.bf16 %v8679_v39  ;;  %v8680_v26 = vunpack.i.l.bf16 %v8679_v39 }
 0x20f   : > { %1696 = vmatpush.msra.mxu3 %v8716_v34  ;;  %v10293_v34 = vadd.f32 %v10184_v37, %v10010_v44 }
 0x210   : > { %7912 = vmatmul.msk.f32.gmra.mxu1 %vm729_vm1, %v10276_v38  ;;  %7935 = vmatpush.xpose.msk.msra.mxu2 %vm729_vm1, %v726_v23  ;;  %v8670_v23 = vunpack.i.l.bf16 %v8669_v43 }
 0x211   : > { %1697 = vmatpush.msra.mxu3 %v8656_v8 }
 0x213   : > { %1698 = vmatpush.msra.mxu3 %v8651_v5  ;;  %v8659_v6 = vpop.permute.xlu1 %8658 }
 0x214   : > { %v8684_v9 = vpop.permute.xlu0 %8683  ;;  %7936 = vmatpush.xpose.msk.msra.mxu2 %vm729_vm1, %v724_v35  ;;  %v8661_v4 = vunpack.i.h.bf16 %v8659_v6  ;;  %v8660_v14 = vunpack.i.l.bf16 %v8659_v6  ;;  %v8676_v35 = vunpack.i.h.bf16 %v8674_v30 }
 0x215   : > { %v8685_v43 = vunpack.i.l.bf16 %v8684_v9 }
 0x216   : > { %1699 = vmatpush.msra.mxu3 %v8661_v4  ;;  %1808 = vmatpush.msrb.mxu0 %v8660_v14  ;;  %v10303_v4 = vadd.f32 %v10184_v37, %v10016_v46  ;;  %v10313_v14 = vadd.f32 %v10184_v37, %v10024_v48 }
 0x218   : > { %7913 = vmatmul.msk.f32.gmra.mxu1 %vm729_vm1, %v10284_v40  ;;  %7937 = vmatpush.xpose.msk.msra.mxu2 %vm729_vm1, %v722_v27  ;;  %v8686_v27 = vunpack.i.h.bf16 %v8684_v9 }
 0x219   : > { %1700 = vmatpush.msra.mxu3 %v8666_v10  ;;  %1809 = vmatpush.msrb.mxu0 %v8665_v32  ;;  %v10481_v32 = vadd.f32 %v10184_v37, %v10100_v1 }
 0x21b   : > { %1701 = vmatpush.msra.mxu3 %v8671_v17  ;;  %1810 = vmatpush.msrb.mxu0 %v8670_v23  ;;  %v8694_v8 = vpop.permute.xlu1 %8693  ;;  %v10491_v17 = vadd.f32 %v10184_v37, %v10114_v18 }
 0x21c   : > { %v8689_v11 = vpop.permute.xlu0 %8688  ;;  %7938 = vmatpush.xpose.msk.msra.mxu2 %vm729_vm1, %v10199_v49  ;;  %v8696_v39 = vunpack.i.h.bf16 %v8694_v8  ;;  %v8695_v44 = vunpack.i.l.bf16 %v8694_v8 }
 0x21d   : > { %1702 = vmatpush.msra.mxu3 %v8676_v35  ;;  %1811 = vmatpush.msrb.mxu0 %v8675_v36  ;;  %v8691_v49 = vunpack.i.h.bf16 %v8689_v11  ;;  %v8690_v30 = vunpack.i.l.bf16 %v8689_v11  ;;  %v15686_v35 = vld [vmem:[#allocation3_spill] sm:$0xff]  ;;  %v15687_v11 = vld [vmem:[#allocation4_spill] sm:$0xff] }
 0x21f   : > { %1703 = vmatpush.msra.mxu3 %v8681_v42  ;;  %1812 = vmatpush.msrb.mxu0 %v8680_v26 }
 0x220   : > { %7914 = vmatmul.msk.f32.gmra.mxu1 %vm729_vm1, %v10293_v34  ;;  %7939 = vmatpush.xpose.msk.msra.mxu2 %vm729_vm1, %v10233_v25 }
 0x221   : > { %1704 = vmatpush.msra.mxu3 %v8686_v27  ;;  %1813 = vmatpush.msrb.mxu0 %v8685_v43 }
 0x223   : > { %1705 = vmatpush.msra.mxu3 %v8691_v49  ;;  %1814 = vmatpush.msrb.mxu0 %v8690_v30  ;;  %v538_v49 = vld [vmem:[%s15552_s5 + $0x8] sm:$0xff]  ;;  %v15688_v30 = vld [vmem:[#allocation5_spill] sm:$0xff] }
 0x224   : > { %v8699_v5 = vpop.permute.xlu0 %8698  ;;  %7940 = vmatpush.xpose.msk.msra.mxu2 %vm729_vm1, %v10225_v21 }
 0x225   : > { %1706 = vmatpush.msra.mxu3 %v8696_v39  ;;  %1815 = vmatpush.msrb.mxu0 %v8695_v44  ;;  %v8701_v6 = vunpack.i.h.bf16 %v8699_v5  ;;  %v8700_v9 = vunpack.i.l.bf16 %v8699_v5  ;;  %v571_v44 = vunpack.c.l.bf16 %v538_v49  ;;  %v572_v5 = vunpack.c.h.bf16 %v538_v49 }
 0x227   : > { %1707 = vmatpush.msra.mxu3 %v8701_v6  ;;  %1816 = vmatpush.msrb.mxu0 %v8700_v9 }
 0x228   : > { %7915 = vmatmul.msk.f32.gmra.mxu1 %vm729_vm1, %v10303_v4  ;;  %7941 = vmatpush.xpose.msk.msra.mxu2 %vm729_vm1, %v10187_v41 }
 0x22c   : > { %v8704_v25 = vpop.permute.xlu0 %8703  ;;  %7942 = vmatpush.xpose.msk.msra.mxu2 %vm729_vm1, %v10223_v22  ;;  %v10323_v22 = vadd.f32 %v10184_v37, %v10032_v50  ;;  %v10347_v50 = vadd.f32 %v10184_v37, %v10048_v53 }
 0x22d   : > { %v8705_v21 = vunpack.i.l.bf16 %v8704_v25  ;;  %v8706_v46 = vunpack.i.h.bf16 %v8704_v25 }
 0x22f   : > { %1817 = vmatpush.msrb.mxu0 %v8705_v21  ;;  %v539_v21 = vld [vmem:[%s15552_s5 + $0x10] sm:$0xff] }
 0x230   : > { %7916 = vmatmul.msk.f32.gmra.mxu1 %vm729_vm1, %v10313_v14  ;;  %7943 = vmatpush.xpose.msk.msra.mxu2 %vm729_vm1, %v10215_v3 }
 0x231   : > { %1818 = vmatpush.msrb.mxu0 %v8706_v46 }
 0x234   : > { %v8709_v10 = vpop.permute.xlu0 %8708  ;;  %7944 = vmatpush.xpose.msk.msra.mxu2 %vm729_vm1, %v10175_v31  ;;  %v10335_v31 = vadd.f32 %v10184_v37, %v10042_v52 }
 0x235   : > { %v8710_v41 = vunpack.i.l.bf16 %v8709_v10  ;;  %v8711_v48 = vunpack.i.h.bf16 %v8709_v10  ;;  %v573_v10 = vunpack.c.l.bf16 %v539_v21 }
 0x237   : > { %1819 = vmatpush.msrb.mxu0 %v8710_v41  ;;  %v574_v41 = vunpack.c.h.bf16 %v539_v21 }
 0x238   : > { %7917 = vmatmul.msk.f32.gmra.mxu1 %vm729_vm1, %v10323_v22  ;;  %7945 = vmatpush.xpose.msk.msra.mxu2 %vm729_vm1, %v10251_v16 }
 0x239   : > { %1820 = vmatpush.msrb.mxu0 %v8711_v48 }
 0x23c   : > { %7946 = vmatpush.xpose.msk.msra.mxu2 %vm729_vm1, %v10241_v33  ;;  %v10432_v33 = vadd.f32 %v10184_v37, %v10082_v61  ;;  %v10452_v61 = vadd.f32 %v10184_v37, %v10090_v63  ;;  %v10468_v63 = vadd.f32 %v10184_v37, %v10094_v0 }
 0x23d   : > { %v10331_v3 = vpop.f32.mrf.mxu1 }
 0x240   : > { %7918 = vmatmul.msk.f32.gmra.mxu1 %vm729_vm1, %v10335_v31  ;;  %7947 = vmatpush.xpose.msk.msra.mxu2 %vm729_vm1, %v10207_v2  ;;  %v10369_v2 = vadd.f32 %v10184_v37, %v10058_v55 }
 0x244   : > { %7948 = vmatpush.xpose.msk.msra.mxu2 %vm729_vm1, %v10259_v13  ;;  %v10359_v13 = vadd.f32 %v10184_v37, %v10054_v54 }
 0x245   : > { %v10343_v16 = vpop.f32.mrf.mxu1 }
 0x248   : > { %7919 = vmatmul.msk.f32.gmra.mxu1 %vm729_vm1, %v10347_v50  ;;  %7949 = vmatpush.xpose.msk.msra.mxu2 %vm729_vm1, %v10249_v47  ;;  %v8014_v47 = vld [vmem:[%s15548_s1 + $0x20] sm:$0xff] }
 0x24b   : > { %7950 = vmatmul.msk.f32.vlgmr.msra.gmra.mxu2 %vm729_vm1, %v10192_v45  ;;  %v10379_v45 = vadd.f32 %v10184_v37, %v10062_v56 }
 0x24d   : > { %v10355_v52 = vpop.f32.mrf.mxu1 }
 0x250   : > { %7920 = vmatmul.msk.f32.gmra.mxu1 %vm729_vm1, %v10359_v13 }
 0x253   : > { %7951 = vmatmul.msk.f32.gmra.mxu2 %vm729_vm1, %v10203_v51  ;;  %v10389_v51 = vadd.f32 %v10184_v37, %v10066_v57 }
 0x255   : > { %v10365_v53 = vpop.f32.mrf.mxu1 }
 0x258   : > { %7921 = vmatmul.msk.f32.gmra.mxu1 %vm729_vm1, %v10369_v2 }
 0x25b   : > { %7952 = vmatmul.msk.f32.gmra.mxu2 %vm729_vm1, %v10211_v20  ;;  %v10399_v20 = vadd.f32 %v10184_v37, %v10070_v58  ;;  %v8017_v58 = vld [vmem:[%s15548_s1 + $0x38] sm:$0xff] }
 0x25c   : > { %2177 = vmatpush.msrb.mxu1 %v8017_v58 }
 0x25d   : > { %v10375_v54 = vpop.f32.mrf.mxu1 }
 0x260   : > { %7922 = vmatmul.msk.f32.gmra.mxu1 %vm729_vm1, %v10379_v45 }
 0x263   : > { %7953 = vmatmul.msk.f32.gmra.mxu2 %vm729_vm1, %v10219_v19  ;;  %v10409_v19 = vadd.f32 %v10184_v37, %v10074_v59 }
 0x265   : > { %v10385_v55 = vpop.f32.mrf.mxu1 }
 0x268   : > { %7923 = vmatmul.msk.f32.gmra.mxu1 %vm729_vm1, %v10389_v51 }
 0x26b   : > { %7954 = vmatmul.msk.f32.gmra.mxu2 %vm729_vm1, %v10229_v24 }
 0x26d   : > { %v10395_v56 = vpop.f32.mrf.mxu1 }
 0x270   : > { %7924 = vmatmul.msk.f32.gmra.mxu1 %vm729_vm1, %v10399_v20 }
 0x273   : > { %7955 = vmatmul.msk.f32.gmra.mxu2 %vm729_vm1, %v10237_v29  ;;  %v10422_v29 = vadd.f32 %v10184_v37, %v10078_v60 }
 0x275   : > { %v10405_v57 = vpop.f32.mrf.mxu1 }
 0x278   : > { %7925 = vmatmul.msk.f32.gmra.mxu1 %vm729_vm1, %v10409_v19 }
 0x27b   : > { %7956 = vmatmul.msk.f32.gmra.mxu2 %vm729_vm1, %v10245_v28  ;;  %v10442_v28 = vadd.f32 %v10184_v37, %v10086_v62 }
 0x27d   : > { %v10418_v24 = vpop.f32.mrf.mxu1 }
 0x280   : > { %7926 = vmatmul.msk.f32.gmra.mxu1 %vm729_vm1, %v10422_v29 }
 0x283   : > { %7957 = vmatmul.msk.f32.gmra.mxu2 %vm729_vm1, %v10255_v15 }
 0x285   : > { %v10428_v59 = vpop.f32.mrf.mxu1 }
 0x288   : > { %7927 = vmatmul.msk.f32.gmra.mxu1 %vm729_vm1, %v10432_v33 }
 0x28b   : > { %7958 = vmatmul.msk.f32.gmra.mxu2 %vm729_vm1, %v10263_v12  ;;  %v8016_v12 = vld [vmem:[%s15548_s1 + $0x30] sm:$0xff] }
 0x28c   : > { %2178 = vmatpush.msrb.mxu1 %v8016_v12 }
 0x28d   : > { %v10438_v60 = vpop.f32.mrf.mxu1 }
 0x290   : > { %7928 = vmatmul.msk.f32.gmra.mxu1 %vm729_vm1, %v10442_v28 }
 0x293   : > { %7959 = vmatmul.msk.f32.gmra.mxu2 %vm729_vm1, %v10269_v7  ;;  %v8015_v7 = vld [vmem:[%s15548_s1 + $0x28] sm:$0xff] }
 0x294   : > { %2179 = vmatpush.msrb.mxu1 %v8015_v7 }
 0x295   : > { %v10448_v15 = vpop.f32.mrf.mxu1 }
 0x296   : > { %2180 = vmatpush.msrb.mxu1 %v8014_v47 }
 0x298   : > { %7929 = vmatmul.msk.f32.gmra.mxu1 %vm729_vm1, %v10452_v61 }
 0x29b   : > { %7960 = vmatmul.msk.f32.gmra.mxu2 %vm729_vm1, %v10276_v38 }
 0x29d   : > { %v10464_v62 = vpop.f32.mrf.mxu1 }
 0x2a0   : > { %7930 = vmatmul.msk.f32.gmra.mxu1 %vm729_vm1, %v10468_v63 }
 0x2a3   : > { %7961 = vmatmul.msk.f32.gmra.mxu2 %vm729_vm1, %v10284_v40  ;;  %v15685_v40 = vld [vmem:[#allocation16_spill] sm:$0xff] }
 0x2a4   : > { %v10501_v23 = vadd.f32 %v10184_v37, %v15685_v40  ;;  %v537_v37 = vld [vmem:[%s15552_s5] sm:$0xff] }
 0x2a5   : > { %v10477_v38 = vpop.f32.mrf.mxu1  ;;  %v569_v42 = vunpack.c.l.bf16 %v537_v37  ;;  %v570_v26 = vunpack.c.h.bf16 %v537_v37  ;;  %v15691_v37 = vld [vmem:[#allocation8_spill] sm:$0xff] }
 0x2a7   : > { %v10525_v43 = vadd.f32 %v10331_v3, %v569_v42  ;;  %v10557_v3 = vadd.f32 %v10355_v52, %v573_v10  ;;  %v15693_v10 = vld [vmem:[#allocation10_spill] sm:$0xff] }
 0x2a8   : > { %7931 = vmatmul.msk.f32.gmra.mxu1 %vm729_vm1, %v10481_v32 }
 0x2ab   : > { %7962 = vmatmul.msk.f32.gmra.mxu2 %vm729_vm1, %v10293_v34 }
 0x2ad   : > { %v10487_v0 = vpop.f32.mrf.mxu1 }
 0x2b0   : > { %7932 = vmatmul.msk.f32.gmra.mxu1 %vm729_vm1, %v10491_v17 }
 0x2b3   : > { %7963 = vmatmul.msk.f32.gmra.mxu2 %vm729_vm1, %v10303_v4  ;;  %v10541_v4 = vadd.f32 %v10343_v16, %v571_v44  ;;  %v540_v16 = vld [vmem:[%s15552_s5 + $0x18] sm:$0xff] }
 0x2b4   : > { %v575_v58 = vunpack.c.l.bf16 %v540_v16  ;;  %v576_v12 = vunpack.c.h.bf16 %v540_v16 }
 0x2b5   : > { %v10497_v1 = vpop.f32.mrf.mxu1 }
 0x2b6   : > { %v10573_v47 = vadd.f32 %v10365_v53, %v575_v58  ;;  %v544_v58 = vld [vmem:[%s15552_s5 + $0x38] sm:$0xff] }
 0x2b8   : > { %7933 = vmatmul.msk.f32.gmra.mxu1 %vm729_vm1, %v10501_v23 }
 0x2bb   : > { %7964 = vmatmul.msk.f32.gmra.mxu2 %vm729_vm1, %v10313_v14  ;;  %v15689_v14 = vld [vmem:[#allocation6_spill] sm:$0xff] }
 0x2bd   : > { %v10507_v18 = vpop.f32.mrf.mxu1 }
 0x2c0   : > { %8018 = vmatmul.msk.f32.vlgmr.msrb.gmra.mxu1 %vm291_vm0, %v15686_v35  ;;  %v541_v35 = vld [vmem:[%s15552_s5 + $0x20] sm:$0xff] }
 0x2c1   : > { %v578_v42 = vunpack.c.h.bf16 %v541_v35 }
 0x2c3   : > { %7965 = vmatmul.msk.f32.gmra.mxu2 %vm729_vm1, %v10323_v22 }
 0x2c5   : > { %v10513_v36 = vpop.f32.mrf.mxu1 }
 0x2c8   : > { %8019 = vmatmul.msk.f32.gmra.mxu1 %vm291_vm0, %v15687_v11  ;;  %v577_v11 = vunpack.c.l.bf16 %v541_v35  ;;  %v584_v35 = vunpack.c.h.bf16 %v544_v58 }
 0x2cb   : > { %7966 = vmatmul.msk.f32.gmra.mxu2 %vm729_vm1, %v10335_v31 }
 0x2cd   : > { %v10522_v34 = vpop.f32.mrf.mxu1 }
 0x2ce   : > { %v1020_v27 = vpop.f32.mrf.mxu2 }
 0x2cf   : > { %v10527_v8 = vadd.f32 %v1020_v27, %v570_v26  ;;  %v10589_v27 = vadd.f32 %v10375_v54, %v577_v11 }
 0x2d0   : > { %8020 = vmatmul.msk.f32.gmra.mxu1 %vm291_vm0, %v15688_v30  ;;  %v542_v30 = vld [vmem:[%s15552_s5 + $0x28] sm:$0xff] }
 0x2d1   : > { %v1116_v39 = vmax.f32 %v10525_v43, %v10527_v8  ;;  %v579_v44 = vunpack.c.l.bf16 %v542_v30 }
 0x2d3   : > { %7967 = vmatmul.msk.f32.gmra.mxu2 %vm729_vm1, %v10347_v50  ;;  %1117 = vmax.xlane.f32.xlu2 %v1116_v39  ;;  %v15690_v50 = vld [vmem:[#allocation7_spill] sm:$0xff]  ;;  %v15692_v39 = vld [vmem:[#allocation9_spill] sm:$0xff]  ;;  %v10605_v21 = vadd.f32 %v10385_v55, %v579_v44 }
 0x2d5   : > { %v10538_v6 = vpop.f32.mrf.mxu1 }
 0x2d6   : > { %v1023_v9 = vpop.f32.mrf.mxu2 }
 0x2d7   : > { %v10543_v25 = vadd.f32 %v1023_v9, %v572_v5  ;;  %v580_v5 = vunpack.c.h.bf16 %v542_v30 }
 0x2d8   : > { %8021 = vmatmul.msk.f32.gmra.mxu1 %vm291_vm0, %v15689_v14 }
 0x2d9   : > { %v1119_v46 = vmax.f32 %v10541_v4, %v10543_v25 }
 0x2db   : > { %7968 = vmatmul.msk.f32.gmra.mxu2 %vm729_vm1, %v10359_v13  ;;  %1120 = vmax.xlane.f32.xlu0 %v1119_v46  ;;  %v543_v46 = vld [vmem:[%s15552_s5 + $0x30] sm:$0xff] }
 0x2dd   : > { %v10554_v22 = vpop.f32.mrf.mxu1 }
 0x2de   : > { %v1026_v48 = vpop.f32.mrf.mxu2 }
 0x2df   : > { %v10559_v31 = vadd.f32 %v1026_v48, %v574_v41  ;;  %v581_v41 = vunpack.c.l.bf16 %v543_v46  ;;  %v582_v48 = vunpack.c.h.bf16 %v543_v46  ;;  %v15696_v46 = vld [vmem:[#allocation13_spill] sm:$0xff] }
 0x2e0   : > { %8022 = vmatmul.msk.f32.gmra.mxu1 %vm291_vm0, %v15690_v50 }
 0x2e1   : > { %v1122_v13 = vmax.f32 %v10557_v3, %v10559_v31  ;;  %v10621_v50 = vadd.f32 %v10395_v56, %v581_v41 }
 0x2e3   : > { %7969 = vmatmul.msk.f32.gmra.mxu2 %vm729_vm1, %v10369_v2  ;;  %1123 = vmax.xlane.f32.xlu1 %v1122_v13 }
 0x2e5   : > { %v10570_v52 = vpop.f32.mrf.mxu1 }
 0x2e6   : > { %v1029_v7 = vpop.f32.mrf.mxu2 }
 0x2e7   : > { %v10575_v40 = vadd.f32 %v1029_v7, %v576_v12  ;;  %v15694_v12 = vld [vmem:[#allocation11_spill] sm:$0xff]  ;;  %v583_v7 = vunpack.c.l.bf16 %v544_v58  ;;  %v547_v58 = vld [vmem:[%s15552_s5 + $0x50] sm:$0xff] }
 0x2e8   : > { %8023 = vmatmul.msk.f32.gmra.mxu1 %vm291_vm0, %v15691_v37 }
 0x2e9   : > { %v1125_v2 = vmax.f32 %v10573_v47, %v10575_v40 }
 0x2eb   : > { %7970 = vmatmul.msk.f32.gmra.mxu2 %vm729_vm1, %v10379_v45  ;;  %1126 = vmax.xlane.f32.xlu2 %v1125_v2  ;;  %v10637_v2 = vadd.f32 %v10405_v57, %v583_v7  ;;  %v590_v7 = vunpack.c.h.bf16 %v547_v58 }
 0x2ed   : > { %v10586_v53 = vpop.f32.mrf.mxu1 }
 0x2ee   : > { %v1032_v26 = vpop.f32.mrf.mxu2 }
 0x2ef   : > { %v10591_v49 = vadd.f32 %v1032_v26, %v578_v42  ;;  %v545_v42 = vld [vmem:[%s15552_s5 + $0x40] sm:$0xff]  ;;  %v15695_v26 = vld [vmem:[#allocation12_spill] sm:$0xff] }
 0x2f0   : > { %8024 = vmatmul.msk.f32.gmra.mxu1 %vm291_vm0, %v15692_v39  ;;  %v585_v30 = vunpack.c.l.bf16 %v545_v42  ;;  %v586_v39 = vunpack.c.h.bf16 %v545_v42 }
 0x2f1   : > { %v1128_v45 = vmax.f32 %v10589_v27, %v10591_v49 }
 0x2f2   : > { %v10653_v44 = vadd.f32 %v10418_v24, %v585_v30 }
 0x2f3   : > { %7971 = vmatmul.msk.f32.gmra.mxu2 %vm729_vm1, %v10389_v51  ;;  %1129 = vmax.xlane.f32.xlu2 %v1128_v45 }
 0x2f5   : > { %v10602_v54 = vpop.f32.mrf.mxu1 }
 0x2f6   : > { %v1035_v9 = vpop.f32.mrf.mxu2 }
 0x2f7   : > { %v10607_v14 = vadd.f32 %v1035_v9, %v580_v5  ;;  %v546_v9 = vld [vmem:[%s15552_s5 + $0x48] sm:$0xff] }
 0x2f8   : > { %8025 = vmatmul.msk.f32.gmra.mxu1 %vm291_vm0, %v15693_v10  ;;  %v587_v10 = vunpack.c.l.bf16 %v546_v9 }
 0x2f9   : > { %v1131_v51 = vmax.f32 %v10605_v21, %v10607_v14 }
 0x2fb   : > { %7972 = vmatmul.msk.f32.gmra.mxu2 %vm729_vm1, %v10399_v20  ;;  %1132 = vmax.xlane.f32.xlu0 %v1131_v51  ;;  %v588_v51 = vunpack.c.h.bf16 %v546_v9 }
 0x2fd   : > { %v10618_v55 = vpop.f32.mrf.mxu1 }
 0x2fe   : > { %v1038_v16 = vpop.f32.mrf.mxu2 }
 0x2ff   : > { %v10623_v13 = vadd.f32 %v1038_v16, %v582_v48  ;;  %v10669_v48 = vadd.f32 %v10428_v59, %v587_v10  ;;  %v9730_v10 = vld [vmem:[%s9887_s11 + $0x68] sm:$0xff] }
 0x300   : > { %8026 = vmatmul.msk.f32.gmra.mxu1 %vm291_vm0, %v15694_v12  ;;  %v15697_v12 = vld [vmem:[#allocation14_spill] sm:$0xff] }
 0x301   : > { %v1134_v20 = vmax.f32 %v10621_v50, %v10623_v13 }
 0x303   : > { %7973 = vmatmul.msk.f32.gmra.mxu2 %vm729_vm1, %v10409_v19  ;;  %1135 = vmax.xlane.f32.xlu1 %v1134_v20  ;;  %v589_v20 = vunpack.c.l.bf16 %v547_v58 }
 0x305   : > { %v10634_v56 = vpop.f32.mrf.mxu1 }
 0x306   : > { %v1041_v37 = vpop.f32.mrf.mxu2 }
 0x307   : > { %v10639_v11 = vadd.f32 %v1041_v37, %v584_v35  ;;  %v10685_v37 = vadd.f32 %v10438_v60, %v589_v20  ;;  %v550_v20 = vld [vmem:[%s15552_s5 + $0x68] sm:$0xff] }
 0x308   : > { %8027 = vmatmul.msk.f32.gmra.mxu1 %vm291_vm0, %v15695_v26  ;;  %v548_v26 = vld [vmem:[%s15552_s5 + $0x58] sm:$0xff] }
 0x309   : > { %v1137_v19 = vmax.f32 %v10637_v2, %v10639_v11  ;;  %v591_v30 = vunpack.c.l.bf16 %v548_v26 }
 0x30b   : > { %7974 = vmatmul.msk.f32.gmra.mxu2 %vm729_vm1, %v10422_v29  ;;  %1138 = vmax.xlane.f32.xlu1 %v1137_v19  ;;  %v15698_v19 = vld [vmem:[#allocation15_spill] sm:$0xff]  ;;  %v10701_v9 = vadd.f32 %v10448_v15, %v591_v30 }
 0x30d   : > { %v10650_v57 = vpop.f32.mrf.mxu1 }
 0x30e   : > { %v1044_v45 = vpop.f32.mrf.mxu2 }
 0x30f   : > { %v10655_v5 = vadd.f32 %v1044_v45, %v586_v39  ;;  %v592_v39 = vunpack.c.h.bf16 %v548_v26  ;;  %v596_v26 = vunpack.c.h.bf16 %v550_v20 }
 0x310   : > { %8028 = vmatmul.msk.f32.gmra.mxu1 %vm291_vm0, %v15696_v46 }
 0x311   : > { %v1140_v29 = vmax.f32 %v10653_v44, %v10655_v5 }
 0x313   : > { %7975 = vmatmul.msk.f32.gmra.mxu2 %vm729_vm1, %v10432_v33  ;;  %1141 = vmax.xlane.f32.xlu2 %v1140_v29  ;;  %v549_v29 = vld [vmem:[%s15552_s5 + $0x60] sm:$0xff] }
 0x315   : > { %v10666_v24 = vpop.f32.mrf.mxu1 }
 0x316   : > { %v1047_v41 = vpop.f32.mrf.mxu2 }
 0x317   : > { %v10671_v16 = vadd.f32 %v1047_v41, %v588_v51  ;;  %v593_v51 = vunpack.c.l.bf16 %v549_v29  ;;  %v594_v41 = vunpack.c.h.bf16 %v549_v29 }
 0x318   : > { %8029 = vmatmul.msk.f32.gmra.mxu1 %vm291_vm0, %v15697_v12 }
 0x319   : > { %v1143_v33 = vmax.f32 %v10669_v48, %v10671_v16  ;;  %v10717_v12 = vadd.f32 %v10464_v62, %v593_v51 }
 0x31b   : > { %7976 = vmatmul.msk.f32.gmra.mxu2 %vm729_vm1, %v10442_v28  ;;  %1144 = vmax.xlane.f32.xlu2 %v1143_v33  ;;  %15700 = vst [vmem:[#allocation3_spill] sm:$0xff] %v10717_v12 }
 0x31d   : > { %v10682_v59 = vpop.f32.mrf.mxu1 }
 0x31e   : > { %v1050_v35 = vpop.f32.mrf.mxu2 }
 0x31f   : > { %v10687_v42 = vadd.f32 %v1050_v35, %v590_v7  ;;  %v9731_v7 = vld [vmem:[%s9887_s11 + $0x70] sm:$0xff]  ;;  %v595_v35 = vunpack.c.l.bf16 %v550_v20  ;;  %v9733_v20 = vld [vmem:[%s9887_s11 + $0x80] sm:$0xff] }
 0x320   : > { %8030 = vmatmul.msk.f32.gmra.mxu1 %vm291_vm0, %v15698_v19 }
 0x321   : > { %v1146_v28 = vmax.f32 %v10685_v37, %v10687_v42 }
 0x323   : > { %7977 = vmatmul.msk.f32.gmra.mxu2 %vm729_vm1, %v10452_v61  ;;  %1147 = vmax.xlane.f32.xlu2 %v1146_v28  ;;  %v10733_v28 = vadd.f32 %v10477_v38, %v595_v35 }
 0x325   : > { %v10698_v60 = vpop.f32.mrf.mxu1 }
 0x326   : > { %15699 = vst [vmem:[#allocation16_spill] sm:$0xff] %v10698_v60  ;;  %v1053_v45 = vpop.f32.mrf.mxu2 }
 0x327   : > { %v10703_v46 = vadd.f32 %v1053_v45, %v592_v39  ;;  %v551_v39 = vld [vmem:[%s15552_s5 + $0x70] sm:$0xff]  ;;  %v9732_v45 = vld [vmem:[%s9887_s11 + $0x78] sm:$0xff] }
 0x328   : > { %8031 = vmatmul.msk.f32.gmra.mxu1 %vm291_vm0, %v9730_v10  ;;  %v597_v29 = vunpack.c.l.bf16 %v551_v39  ;;  %v598_v10 = vunpack.c.h.bf16 %v551_v39 }
 0x329   : > { %v1149_v61 = vmax.f32 %v10701_v9, %v10703_v46 }
 0x32a   : > { %v10749_v51 = vadd.f32 %v10487_v0, %v597_v29  ;;  %v553_v29 = vld [vmem:[%s15552_s5 + $0x80] sm:$0xff] }
 0x32b   : > { %7978 = vmatmul.msk.f32.gmra.mxu2 %vm729_vm1, %v10468_v63  ;;  %1150 = vmax.xlane.f32.xlu2 %v1149_v61 }
 0x32d   : > { %v10714_v15 = vpop.f32.mrf.mxu1 }
 0x32e   : > { %v1056_v58 = vpop.f32.mrf.mxu2 }
 0x32f   : > { %v10719_v33 = vadd.f32 %v1056_v58, %v594_v41  ;;  %v552_v58 = vld [vmem:[%s15552_s5 + $0x78] sm:$0xff] }
 0x330   : > { %8032 = vmatmul.msk.f32.gmra.mxu1 %vm291_vm0, %v9731_v7  ;;  %v599_v7 = vunpack.c.l.bf16 %v552_v58  ;;  %v600_v0 = vunpack.c.h.bf16 %v552_v58  ;;  %v601_v58 = vunpack.c.l.bf16 %v553_v29 }
 0x331   : > { %15701 = vst [vmem:[#allocation4_spill] sm:$0xff] %v10719_v33  ;;  %v1152_v63 = vmax.f32 %v10717_v12, %v10719_v33 }
 0x333   : > { %7979 = vmatmul.msk.f32.gmra.mxu2 %vm729_vm1, %v10481_v32  ;;  %1153 = vmax.xlane.f32.xlu1 %v1152_v63 }
 0x335   : > { %v10730_v62 = vpop.f32.mrf.mxu1 }
 0x336   : > { %v1059_v19 = vpop.f32.mrf.mxu2 }
 0x337   : > { %v10735_v30 = vadd.f32 %v1059_v19, %v596_v26  ;;  %v10765_v19 = vadd.f32 %v10497_v1, %v599_v7 }
 0x338   : > { %8033 = vmatmul.msk.f32.gmra.mxu1 %vm291_vm0, %v9732_v45 }
 0x339   : > { %v1155_v32 = vmax.f32 %v10733_v28, %v10735_v30  ;;  %15704 = vst [vmem:[#allocation7_spill] sm:$0xff] %v10765_v19 }
 0x33b   : > { %7980 = vmatmul.msk.f32.gmra.mxu2 %vm729_vm1, %v10491_v17  ;;  %1156 = vmax.xlane.f32.xlu0 %v1155_v32 }
 0x33d   : > { %v10746_v38 = vpop.f32.mrf.mxu1 }
 0x33e   : > { %15702 = vst [vmem:[#allocation5_spill] sm:$0xff] %v10746_v38  ;;  %v1062_v61 = vpop.f32.mrf.mxu2 }
 0x33f   : > { %v10751_v41 = vadd.f32 %v1062_v61, %v598_v10  ;;  %v9734_v10 = vld [vmem:[%s9887_s11 + $0x88] sm:$0xff] }
 0x340   : > { %8034 = vmatmul.msk.f32.gmra.mxu1 %vm291_vm0, %v9733_v20  ;;  %v602_v20 = vunpack.c.h.bf16 %v553_v29 }
 0x341   : > { %v1158_v17 = vmax.f32 %v10749_v51, %v10751_v41 }
 0x343   : > { %1159 = vmax.xlane.f32.xlu2 %v1158_v17  ;;  %7981 = vmatmul.msk.f32.gmra.mxu2 %vm729_vm1, %v10501_v23  ;;  %v10779_v17 = vadd.f32 %v10507_v18, %v601_v58 }
 0x345   : > { %v10762_v63 = vpop.f32.mrf.mxu1 }
 0x346   : > { %15703 = vst [vmem:[#allocation6_spill] sm:$0xff] %v10762_v63  ;;  %v1065_v35 = vpop.f32.mrf.mxu2  ;;  %v1118_v26 = vpop.xlane.xlu2 %1117 }
 0x347   : > { %v10767_v39 = vadd.f32 %v1065_v35, %v600_v0  ;;  %v1212_v45 = vsub.f32 %v10525_v43, %v1118_v26  ;;  %v1213_v32 = vsub.f32 %v10527_v8, %v1118_v26  ;;  %v554_v0 = vld [vmem:[%s15552_s5 + $0x88] sm:$0xff]  ;;  %v9735_v26 = vld [vmem:[%s9887_s11 + $0x90] sm:$0xff] }
 0x348   : > { %8035 = vmatmul.msk.f32.gmra.mxu1 %vm291_vm0, %v9734_v10 }
 0x349   : > { %15705 = vst [vmem:[#allocation8_spill] sm:$0xff] %v10767_v39  ;;  %v1276_v23 = vmul.f32 1.442695, %v1212_v45  ;;  %v1278_v61 = vmul.f32 1.442695, %v1213_v32  ;;  %v1161_v1 = vmax.f32 %v10765_v19, %v10767_v39  ;;  %v9745_v39 = vld [vmem:[%s9887_s11 + $0xe0] sm:$0xff] }
 0x34b   : > { %8962 = vpow2.f32 %v1276_v23  ;;  %1162 = vmax.xlane.f32.xlu1 %v1161_v1  ;;  %v603_v23 = vunpack.c.l.bf16 %v554_v0  ;;  %v604_v1 = vunpack.c.h.bf16 %v554_v0 }
 0x34c   : > { %8964 = vpow2.f32 %v1278_v61 }
 0x34d   : > { %v10786_v35 = vpop.f32.mrf.mxu1 }
 0x34e   : > { %v1068_v43 = vpop.f32.mrf.mxu2  ;;  %v1121_v8 = vpop.xlane.xlu0 %1120  ;;  %15706 = vst [vmem:[#allocation9_spill] sm:$0xff] %v10786_v35 }
 0x34f   : > { %v10781_v7 = vadd.f32 %v1068_v43, %v602_v20  ;;  %v1214_v32 = vsub.f32 %v10541_v4, %v1121_v8  ;;  %v1215_v10 = vsub.f32 %v10543_v25, %v1121_v8  ;;  %v10801_v4 = vadd.f32 %v10513_v36, %v603_v23  ;;  %v555_v25 = vld [vmem:[%s15552_s5 + $0x90] sm:$0xff] }
 0x350   : > { %8036 = vmatmul.msk.f32.gmra.mxu1 %vm291_vm0, %v9735_v26 }
 0x351   : > { %v10790_v45 = vpop.eup %8962  ;;  %v1164_v29 = vmax.f32 %v10779_v17, %v10781_v7  ;;  %v1280_v58 = vmul.f32 1.442695, %v1214_v32  ;;  %v1282_v20 = vmul.f32 1.442695, %v1215_v10  ;;  %v605_v32 = vunpack.c.l.bf16 %v555_v25 }
 0x352   : > { %v10795_v18 = vpop.eup %8964 }
 0x353   : > { %1165 = vmax.xlane.f32.xlu0 %v1164_v29  ;;  %v1404_v61 = vadd.f32 %v10795_v18, %v10790_v45  ;;  %v9736_v29 = vld [vmem:[%s9887_s11 + $0x98] sm:$0xff]  ;;  %8966 = vpow2.f32 %v1280_v58 }
 0x354   : > { %8968 = vpow2.f32 %v1282_v20 }
 0x355   : > { %1405 = vadd.xlane.f32.xlu2 %v1404_v61  ;;  %v10814_v36 = vpop.f32.mrf.mxu1 }
 0x356   : > { %v1071_v43 = vpop.f32.mrf.mxu2  ;;  %v1124_v26 = vpop.xlane.xlu1 %1123  ;;  %15707 = vst [vmem:[#allocation10_spill] sm:$0xff] %v10814_v36  ;;  %v559_v36 = vld [vmem:[%s15552_s5 + $0xb0] sm:$0xff] }
 0x357   : > { %v10803_v63 = vadd.f32 %v1071_v43, %v604_v1  ;;  %v1216_v38 = vsub.f32 %v10557_v3, %v1124_v26  ;;  %v1217_v8 = vsub.f32 %v10559_v31, %v1124_v26  ;;  %v606_v3 = vunpack.c.h.bf16 %v555_v25 }
 0x358   : > { %8037 = vmatmul.msk.f32.gmra.mxu1 %vm291_vm0, %v9736_v29  ;;  %v10819_v31 = vadd.f32 %v10522_v34, %v605_v32 }
 0x359   : > { %v1167_v0 = vmax.f32 %v10801_v4, %v10803_v63  ;;  %v1284_v10 = vmul.f32 1.442695, %v1216_v38  ;;  %v1286_v23 = vmul.f32 1.442695, %v1217_v8  ;;  %v10816_v43 = vpop.eup %8966  ;;  %v556_v38 = vld [vmem:[%s15552_s5 + $0x98] sm:$0xff]  ;;  %v9737_v8 = vld [vmem:[%s9887_s11 + $0xa0] sm:$0xff] }
 0x35a   : > { %15708 = vst [vmem:[#allocation11_spill] sm:$0xff] %v10819_v31  ;;  %v10824_v26 = vpop.eup %8968  ;;  %v607_v29 = vunpack.c.l.bf16 %v556_v38  ;;  %v608_v32 = vunpack.c.h.bf16 %v556_v38 }
 0x35b   : > { %8970 = vpow2.f32 %v1284_v10 }
 0x35c   : > { %8972 = vpow2.f32 %v1286_v23 }
 0x35d   : > { %1168 = vmax.xlane.f32.xlu2 %v1167_v0  ;;  %v10836_v10 = vpop.f32.mrf.mxu1 }
 0x35e   : > { %v1074_v61 = vpop.f32.mrf.mxu2  ;;  %v1127_v1 = vpop.xlane.xlu2 %1126  ;;  %15710 = vst [vmem:[#allocation13_spill] sm:$0xff] %v10836_v10 }
 0x35f   : > { %v10821_v58 = vadd.f32 %v1074_v61, %v606_v3  ;;  %v1218_v20 = vsub.f32 %v10573_v47, %v1127_v1  ;;  %v1219_v25 = vsub.f32 %v10575_v40, %v1127_v1  ;;  %v1407_v47 = vadd.f32 %v10824_v26, %v10816_v43 }
 0x360   : > { %8038 = vmatmul.msk.f32.gmra.mxu1 %vm291_vm0, %v9737_v8  ;;  %v10843_v1 = vadd.f32 %v10538_v6, %v607_v29  ;;  %v9738_v8 = vld [vmem:[%s9887_s11 + $0xa8] sm:$0xff] }
 0x361   : > { %15709 = vst [vmem:[#allocation12_spill] sm:$0xff] %v10821_v58  ;;  %v1170_v34 = vmax.f32 %v10819_v31, %v10821_v58  ;;  %v1288_v0 = vmul.f32 1.442695, %v1218_v20  ;;  %v1290_v3 = vmul.f32 1.442695, %v1219_v25  ;;  %v10838_v23 = vpop.eup %8970  ;;  %v9741_v58 = vld [vmem:[%s9887_s11 + $0xc0] sm:$0xff] }
 0x362   : > { %v10840_v40 = vpop.eup %8972 }
 0x363   : > { %1171 = vmax.xlane.f32.xlu1 %v1170_v34  ;;  %8974 = vpow2.f32 %v1288_v0  ;;  %v1410_v25 = vadd.f32 %v10840_v40, %v10838_v23 }
 0x364   : > { %8976 = vpow2.f32 %v1290_v3 }
 0x365   : > { %1408 = vadd.xlane.f32.xlu2 %v1407_v47  ;;  %v10857_v29 = vpop.f32.mrf.mxu1  ;;  %v558_v47 = vld [vmem:[%s15552_s5 + $0xa8] sm:$0xff] }
 0x366   : > { %v1077_v61 = vpop.f32.mrf.mxu2  ;;  %15711 = vst [vmem:[#allocation14_spill] sm:$0xff] %v10857_v29 }
 0x367   : > { %v10845_v20 = vadd.f32 %v1077_v61, %v608_v32  ;;  %v9739_v32 = vld [vmem:[%s9887_s11 + $0xb0] sm:$0xff]  ;;  %v611_v61 = vunpack.c.l.bf16 %v558_v47 }
 0x368   : > { %8039 = vmatmul.msk.f32.gmra.mxu1 %vm291_vm0, %v9738_v8  ;;  %v612_v8 = vunpack.c.h.bf16 %v558_v47 }
 0x369   : > { %v1173_v38 = vmax.f32 %v10843_v1, %v10845_v20  ;;  %v10853_v34 = vpop.eup %8974 }
 0x36a   : > { %v10855_v6 = vpop.eup %8976 }
 0x36b   : > { %1174 = vmax.xlane.f32.xlu0 %v1173_v38  ;;  %1411 = vadd.xlane.f32.xlu1 %v1410_v25  ;;  %v1413_v3 = vadd.f32 %v10855_v6, %v10853_v34  ;;  %v10867_v25 = vadd.f32 %v10570_v52, %v611_v61  ;;  %v614_v52 = vunpack.c.h.bf16 %v559_v36 }
 0x36d   : > { %15712 = vst [vmem:[#allocation15_spill] sm:$0xff] %v10867_v25  ;;  %v10874_v10 = vpop.f32.mrf.mxu1 }
 0x36e   : > { %v1080_v0 = vpop.f32.mrf.mxu2  ;;  %15714 = vst [vmem:[#allocation18_spill] sm:$0xff] %v10874_v10 }
 0x370   : > { %8040 = vmatmul.msk.f32.gmra.mxu1 %vm291_vm0, %v9739_v32  ;;  %v9740_v32 = vld [vmem:[%s9887_s11 + $0xb8] sm:$0xff] }
 0x373   : > { %1414 = vadd.xlane.f32.xlu0 %v1413_v3  ;;  %v613_v3 = vunpack.c.l.bf16 %v559_v36  ;;  %v9742_v36 = vld [vmem:[%s9887_s11 + $0xc8] sm:$0xff] }
 0x376   : > { %v1083_v38 = vpop.f32.mrf.mxu2 }
 0x377   : > { %v10869_v35 = vadd.f32 %v1083_v38, %v612_v8  ;;  %v10883_v8 = vadd.f32 %v10586_v53, %v613_v3  ;;  %v1130_v53 = vpop.xlane.xlu2 %1129  ;;  %v9744_v3 = vld [vmem:[%s9887_s11 + $0xd8] sm:$0xff] }
 0x378   : > { %8041 = vmatmul.msk.f32.gmra.mxu1 %vm291_vm0, %v9740_v32 }
 0x379   : > { %15713 = vst [vmem:[#allocation17_spill] sm:$0xff] %v10869_v35  ;;  %v1179_v47 = vmax.f32 %v10867_v25, %v10869_v35  ;;  %v10891_v35 = vpop.f32.mrf.mxu1  ;;  %v10912_v25 = vpop.xlane.xlu1 %1135 }
 0x37a   : > { %15715 = vst [vmem:[#allocation19_spill] sm:$0xff] %v10883_v8 }
 0x37b   : > { %1180 = vmax.xlane.f32.xlu1 %v1179_v47  ;;  %15717 = vst [vmem:[#allocation21_spill] sm:$0xff] %v10891_v35 }
 0x37d   : > { %2454 = vrot.lane.b32.xlu2 %v10857_v29, %s9822_s12  ;;  %v9743_v29 = vld [vmem:[%s9887_s11 + $0xd0] sm:$0xff] }
 0x37e   : > { %v1086_v61 = vpop.f32.mrf.mxu2 }
 0x37f   : > { %v10885_v38 = vadd.f32 %v1086_v61, %v614_v52  ;;  %v1220_v52 = vsub.f32 %v10589_v27, %v1130_v53 }
 0x380   : > { %8042 = vmatmul.msk.f32.gmra.mxu1 %vm291_vm0, %v9741_v58 }
 0x381   : > { %15716 = vst [vmem:[#allocation20_spill] sm:$0xff] %v10885_v38  ;;  %v1182_v32 = vmax.f32 %v10883_v8, %v10885_v38  ;;  %v10895_v47 = vpop.f32.mrf.mxu1  ;;  %v1292_v31 = vmul.f32 1.442695, %v1220_v52  ;;  %v1139_v52 = vpop.xlane.xlu1 %1138 }
 0x382   : > { %15718 = vst [vmem:[#allocation22_spill] sm:$0xff] %v10895_v47 }
 0x383   : > { %1183 = vmax.xlane.f32.xlu0 %v1182_v32  ;;  %v1221_v32 = vsub.f32 %v10591_v49, %v1130_v53  ;;  %8978 = vpow2.f32 %v1292_v31 }
 0x385   : > { %v1294_v60 = vmul.f32 1.442695, %v1221_v32 }
 0x386   : > { %v1142_v61 = vpop.xlane.xlu2 %1141  ;;  %v10925_v53 = vpop.f32.mrf.mxu2 }
 0x387   : > { %8980 = vpow2.f32 %v1294_v60  ;;  %v1227_v60 = vsub.f32 %v10639_v11, %v1139_v52  ;;  %v1228_v31 = vsub.f32 %v10653_v44, %v1142_v61 }
 0x388   : > { %8043 = vmatmul.msk.f32.gmra.mxu1 %vm291_vm0, %v9742_v36 }
 0x389   : > { %v10901_v58 = vpop.f32.mrf.mxu1  ;;  %v1306_v19 = vmul.f32 1.442695, %v1227_v60  ;;  %v1308_v8 = vmul.f32 1.442695, %v1228_v31 }
 0x38a   : > { %15719 = vst [vmem:[#allocation23_spill] sm:$0xff] %v10901_v58 }
 0x38e   : > { %v1092_v38 = vpop.f32.mrf.mxu2 }
 0x390   : > { %8044 = vmatmul.msk.f32.gmra.mxu1 %vm291_vm0, %v9743_v29  ;;  %v557_v29 = vld [vmem:[%s15552_s5 + $0xa0] sm:$0xff] }
 0x391   : > { %v610_v36 = vunpack.c.h.bf16 %v557_v29 }
 0x394   : > { %2458 = vrot.lane.b32.xlu1 %v10891_v35, %s9822_s12  ;;  %v609_v35 = vunpack.c.l.bf16 %v557_v29  ;;  %v9746_v29 = vld [vmem:[%s9887_s11 + $0xe8] sm:$0xff] }
 0x396   : > { %v10919_v27 = vadd.f32 %v10554_v22, %v609_v35  ;;  %v1226_v22 = vsub.f32 %v10637_v2, %v1139_v52  ;;  %v9748_v52 = vld [vmem:[%s9887_s11 + $0xf8] sm:$0xff] }
 0x397   : > { %2462 = vrot.lane.b32.xlu0 %v10901_v58, %s9822_s12  ;;  %v10914_v58 = vadd.f32 %v1080_v0, %v610_v36  ;;  %v10927_v0 = vpop.eup %8978  ;;  %v1229_v36 = vsub.f32 %v10655_v5, %v1142_v61  ;;  %v10949_v61 = vpop.f32.mrf.mxu2 }
 0x398   : > { %8045 = vmatmul.msk.f32.gmra.mxu1 %vm291_vm0, %v9744_v3  ;;  %v10921_v3 = vpop.xlane.xlu2 %1144  ;;  %v1304_v32 = vmul.f32 1.442695, %v1226_v22 }
 0x399   : > { %v1176_v49 = vmax.f32 %v10919_v27, %v10914_v58  ;;  %v1310_v2 = vmul.f32 1.442695, %v1229_v36 }
 0x39a   : > { %8982 = vpow2.f32 %v1304_v32 }
 0x39b   : > { %8984 = vpow2.f32 %v1306_v19  ;;  %v561_v19 = vld [vmem:[%s15552_s5 + $0xc0] sm:$0xff] }
 0x39c   : > { %8986 = vpow2.f32 %v1308_v8  ;;  %v618_v31 = vunpack.c.h.bf16 %v561_v19  ;;  %v617_v36 = vunpack.c.l.bf16 %v561_v19  ;;  %v1133_v19 = vpop.xlane.xlu0 %1132 }
 0x39d   : > { %8988 = vpow2.f32 %v1310_v2 }
 0x3a0   : > { %8046 = vmatmul.msk.f32.gmra.mxu1 %vm291_vm0, %v9745_v39  ;;  %v10931_v39 = vpop.eup %8980 }
 0x3a1   : > { %v1416_v35 = vadd.f32 %v10931_v39, %v10927_v0  ;;  %v10941_v11 = vpop.eup %8982 }
 0x3a2   : > { %v10947_v5 = vpop.eup %8984 }
 0x3a3   : > { %v10952_v60 = vpop.eup %8986  ;;  %v1425_v32 = vadd.f32 %v10947_v5, %v10941_v11 }
 0x3a6   : > { %1177 = vmax.xlane.f32.xlu2 %v1176_v49  ;;  %v1148_v49 = vpop.xlane.xlu2 %1147 }
 0x3a7   : > { %v1232_v22 = vsub.f32 %v10685_v37, %v1148_v49  ;;  %v1233_v8 = vsub.f32 %v10687_v42, %v1148_v49  ;;  %v10969_v42 = vadd.f32 %v10618_v55, %v617_v36  ;;  %v10971_v49 = vpop.f32.mrf.mxu2  ;;  %v564_v55 = vld [vmem:[%s15552_s5 + $0xd8] sm:$0xff] }
 0x3a8   : > { %8047 = vmatmul.msk.f32.gmra.mxu1 %vm291_vm0, %v9746_v29  ;;  %v9747_v29 = vld [vmem:[%s9887_s11 + $0xf0] sm:$0xff]  ;;  %v624_v36 = vunpack.c.h.bf16 %v564_v55 }
 0x3a9   : > { %v1318_v2 = vmul.f32 1.442695, %v1233_v8  ;;  %15722 = vst [vmem:[#allocation26_spill] sm:$0xff] %v10969_v42  ;;  %v10975_v8 = vpop.xlane.xlu1 %1153 }
 0x3aa   : > { %15723 = vst [vmem:[#allocation27_spill] sm:$0xff] %v10975_v8 }
 0x3ae   : > { %1417 = vadd.xlane.f32.xlu2 %v1416_v35  ;;  %v10943_v44 = vpop.xlane.xlu2 %1150  ;;  %v10958_v35 = vpop.eup %8988 }
 0x3af   : > { %15720 = vst [vmem:[#allocation24_spill] sm:$0xff] %v10958_v35  ;;  %v1428_v37 = vadd.f32 %v10958_v35, %v10952_v60 }
 0x3b0   : > { %8048 = vmatmul.msk.f32.gmra.mxu1 %vm291_vm0, %v9747_v29  ;;  %v1316_v29 = vmul.f32 1.442695, %v1232_v22 }
 0x3b2   : > { %8990 = vpow2.f32 %v1316_v29 }
 0x3b3   : > { %8992 = vpow2.f32 %v1318_v2  ;;  %v10988_v2 = vpop.f32.mrf.mxu1 }
 0x3b4   : > { %15725 = vst [vmem:[#allocation29_spill] sm:$0xff] %v10988_v2 }
 0x3b6   : > { %v10966_v33 = vpop.xlane.xlu2 %1159 }
 0x3b8   : > { %8049 = vmatmul.msk.f32.gmra.mxu1 %vm291_vm0, %v9748_v52  ;;  %v10964_v52 = vadd.f32 %v1092_v38, %v618_v31  ;;  %v10979_v38 = vpop.eup %8990 }
 0x3ba   : > { %15721 = vst [vmem:[#allocation25_spill] sm:$0xff] %v10964_v52  ;;  %v1188_v22 = vmax.f32 %v10969_v42, %v10964_v52  ;;  %v623_v52 = vunpack.c.l.bf16 %v564_v55 }
 0x3be   : > { %1426 = vadd.xlane.f32.xlu1 %v1425_v32  ;;  %v10981_v32 = vpop.eup %8992 }
 0x3bf   : > { %15724 = vst [vmem:[#allocation28_spill] sm:$0xff] %v10981_v32  ;;  %v1434_v29 = vadd.f32 %v10981_v32, %v10979_v38  ;;  %v11001_v32 = vadd.f32 %v10666_v24, %v623_v52  ;;  %v1222_v24 = vsub.f32 %v10605_v21, %v1133_v19  ;;  %v1224_v21 = vsub.f32 %v10621_v50, %v10912_v25 }
 0x3c1   : > { %1429 = vadd.xlane.f32.xlu0 %v1428_v37  ;;  %v1101_v37 = vpop.f32.mrf.mxu2  ;;  %15727 = vst [vmem:[#allocation31_spill] sm:$0xff] %v11001_v32 }
 0x3c2   : > { %v10994_v12 = vadd.f32 %v1101_v37, %v624_v36  ;;  %v11011_v37 = vpop.f32.mrf.mxu1 }
 0x3c3   : > { %15728 = vst [vmem:[#allocation32_spill] sm:$0xff] %v11011_v37 }
 0x3c4   : > { %15726 = vst [vmem:[#allocation30_spill] sm:$0xff] %v10994_v12  ;;  %v1197_v55 = vmax.f32 %v11001_v32, %v10994_v12 }
 0x3c6   : > { %2456 = vrot.lane.b32.xlu2 %v10874_v10, %s9822_s12  ;;  %1189 = vmax.xlane.f32.xlu1 %v1188_v22  ;;  %v10990_v10 = vpop.xlane.xlu0 %1156  ;;  %v10992_v22 = vpop.xlane.xlu1 %1162 }
 0x3c8   : > { %v1406_v31 = vpop.xlane.xlu2 %1405 }
 0x3c9   : > { %8994 = vrcp.f32 %v1406_v31 }
 0x3ce   : > { %1435 = vadd.xlane.f32.xlu1 %v1434_v29  ;;  %v11007_v29 = vpop.xlane.xlu0 %1165 }
 0x3cf   : > { %v8995_v42 = vpop.eup %8994 }
 0x3d0   : > { %v10996_v31 = vpop.xlane.xlu2 %1168  ;;  %v1532_v8 = vmul.f32 %v8995_v42, %v10790_v45  ;;  %v1533_v35 = vmul.f32 %v8995_v42, %v10795_v18  ;;  %v1223_v18 = vsub.f32 %v10607_v14, %v1133_v19  ;;  %v1225_v14 = vsub.f32 %v10623_v13, %v10912_v25 }
 0x3d2   : > { %1708 = vmatmul.f32.vlgmr.msra.gmra.mxu3 %v1532_v8  ;;  %1821 = vmatmul.f32.vlgmr.msrb.gmra.mxu0 %v1533_v35  ;;  %v1296_v8 = vmul.f32 1.442695, %v1222_v24 }
 0x3d5   : > { %2464 = vrot.lane.b32.xlu0 %v10988_v2, %s9822_s12  ;;  %v1298_v2 = vmul.f32 1.442695, %v1223_v18  ;;  %v1300_v18 = vmul.f32 1.442695, %v1224_v21 }
 0x3d6   : > { %v11009_v36 = vpop.xlane.xlu1 %1171  ;;  %1198 = vmax.xlane.f32.xlu1 %v1197_v55  ;;  %v11019_v55 = vpop.f32.mrf.mxu1 }
 0x3d7   : > { %15729 = vst [vmem:[#allocation33_spill] sm:$0xff] %v11019_v55 }
 0x3d8   : > { %v1409_v45 = vpop.xlane.xlu2 %1408 }
 0x3d9   : > { %8996 = vrcp.f32 %v1409_v45 }
 0x3de   : > { %v11015_v35 = vpop.xlane.xlu0 %1174  ;;  %v1412_v52 = vpop.xlane.xlu1 %1411 }
 0x3df   : > { %v8997_v42 = vpop.eup %8996  ;;  %8998 = vrcp.f32 %v1412_v52  ;;  %v11031_v50 = vpop.f32.mrf.mxu1 }
 0x3e0   : > { %v1534_v12 = vmul.f32 %v8997_v42, %v10816_v43  ;;  %v1535_v32 = vmul.f32 %v8997_v42, %v10824_v26  ;;  %9000 = vpow2.f32 %v1296_v8  ;;  %v1302_v26 = vmul.f32 1.442695, %v1225_v14  ;;  %15730 = vst [vmem:[#allocation34_spill] sm:$0xff] %v11031_v50  ;;  %v562_v8 = vld [vmem:[%s15552_s5 + $0xc8] sm:$0xff] }
 0x3e1   : > { %9002 = vpow2.f32 %v1298_v2  ;;  %v1234_v42 = vsub.f32 %v10701_v9, %v10943_v44 }
 0x3e2   : > { %1711 = vmatmul.f32.gmra.mxu3 %v1534_v12  ;;  %1824 = vmatmul.f32.gmra.mxu0 %v1535_v32 }
 0x3e5   : > { %v8999_v19 = vpop.eup %8998 }
 0x3e6   : > { %v1415_v45 = vpop.xlane.xlu0 %1414  ;;  %v1536_v24 = vmul.f32 %v8999_v19, %v10838_v23  ;;  %v1537_v43 = vmul.f32 %v8999_v19, %v10840_v40  ;;  %v11027_v52 = vpop.eup %9000  ;;  %v619_v19 = vunpack.c.l.bf16 %v562_v8 }
 0x3e7   : > { %9004 = vrcp.f32 %v1415_v45  ;;  %v11029_v12 = vpop.eup %9002  ;;  %v11052_v14 = vpop.f32.mrf.mxu1  ;;  %v1320_v45 = vmul.f32 1.442695, %v1234_v42  ;;  %v1238_v42 = vsub.f32 %v10733_v28, %v10990_v10 }
 0x3e8   : > { %9006 = vpow2.f32 %v1300_v18  ;;  %v1419_v25 = vadd.f32 %v11029_v12, %v11027_v52  ;;  %15731 = vst [vmem:[#allocation35_spill] sm:$0xff] %v11052_v14 }
 0x3e9   : > { %9008 = vpow2.f32 %v1302_v26  ;;  %v565_v26 = vld [vmem:[%s15552_s5 + $0xe0] sm:$0xff] }
 0x3ea   : > { %1714 = vmatmul.f32.gmra.mxu3 %v1536_v24  ;;  %1827 = vmatmul.f32.gmra.mxu0 %v1537_v43  ;;  %v11060_v43 = vadd.f32 %v10634_v56, %v619_v19  ;;  %9010 = vpow2.f32 %v1320_v45  ;;  %v1104_v56 = vpop.f32.mrf.mxu2 }
 0x3ed   : > { %v9005_v13 = vpop.eup %9004 }
 0x3ee   : > { %v1538_v23 = vmul.f32 %v9005_v13, %v10853_v34  ;;  %v1539_v40 = vmul.f32 %v9005_v13, %v10855_v6  ;;  %v11039_v32 = vpop.eup %9006  ;;  %v1235_v34 = vsub.f32 %v10703_v46, %v10943_v44  ;;  %v620_v6 = vunpack.c.h.bf16 %v562_v8 }
 0x3ef   : > { %1420 = vadd.xlane.f32.xlu2 %v1419_v25  ;;  %2470 = vrot.lane.b32.xlu1 %v11031_v50, %s9822_s12  ;;  %v11041_v2 = vpop.eup %9008  ;;  %v626_v13 = vunpack.c.h.bf16 %v565_v26  ;;  %v625_v25 = vunpack.c.l.bf16 %v565_v26 }
 0x3f0   : > { %v1422_v21 = vadd.f32 %v11041_v2, %v11039_v32  ;;  %v1322_v9 = vmul.f32 1.442695, %v1235_v34  ;;  %v11057_v24 = vadd.f32 %v10949_v61, %v620_v6  ;;  %v11064_v44 = vpop.eup %9010  ;;  %v1239_v34 = vsub.f32 %v10735_v30, %v10990_v10  ;;  %v567_v10 = vld [vmem:[%s15552_s5 + $0xf0] sm:$0xff] }
 0x3f1   : > { %v1328_v6 = vmul.f32 1.442695, %v1238_v42  ;;  %v1244_v30 = vsub.f32 %v10779_v17, %v11007_v29  ;;  %v630_v26 = vunpack.c.h.bf16 %v567_v10 }
 0x3f2   : > { %1717 = vmatmul.f32.gmra.mxu3 %v1538_v23  ;;  %1830 = vmatmul.f32.gmra.mxu0 %v1539_v40  ;;  %9012 = vpow2.f32 %v1322_v9  ;;  %v1191_v46 = vmax.f32 %v11060_v43, %v11057_v24  ;;  %v11073_v23 = vadd.f32 %v1104_v56, %v626_v13  ;;  %v11076_v40 = vadd.f32 %v10682_v59, %v625_v25  ;;  %v11088_v59 = vpop.f32.mrf.mxu2 }
 0x3f3   : > { %v1330_v19 = vmul.f32 1.442695, %v1239_v34  ;;  %9014 = vpow2.f32 %v1328_v6  ;;  %v629_v56 = vunpack.c.l.bf16 %v567_v10  ;;  %v1340_v25 = vmul.f32 1.442695, %v1244_v30 }
 0x3f4   : > { %v1200_v8 = vmax.f32 %v11076_v40, %v11073_v23 }
 0x3f5   : > { %9016 = vpow2.f32 %v1330_v19 }
 0x3f7   : > { %1423 = vadd.xlane.f32.xlu2 %v1422_v21  ;;  %2472 = vrot.lane.b32.xlu1 %v11052_v14, %s9822_s12  ;;  %v11086_v21 = vpop.permute.xlu2 %2454 }
 0x3f8   : > { %v11066_v18 = vpop.eup %9012 }
 0x3f9   : > { %v1437_v61 = vadd.f32 %v11066_v18, %v11064_v44  ;;  %v11092_v28 = vpop.eup %9014 }
 0x3fb   : > { %v11094_v9 = vpop.eup %9016 }
 0x3fc   : > { %v1443_v13 = vadd.f32 %v11094_v9, %v11092_v28 }
 0x3ff   : > { %1192 = vmax.xlane.f32.xlu0 %v1191_v46  ;;  %v1245_v46 = vsub.f32 %v10781_v7, %v11007_v29  ;;  %v11112_v7 = vadd.f32 %v10714_v15, %v629_v56  ;;  %v1230_v15 = vsub.f32 %v10669_v48, %v10921_v3 }
 0x401   : > { %v1342_v34 = vmul.f32 1.442695, %v1245_v46  ;;  %15734 = vst [vmem:[#allocation38_spill] sm:$0xff] %v11112_v7  ;;  %v1312_v56 = vmul.f32 1.442695, %v1230_v15 }
 0x407   : > { %1438 = vadd.xlane.f32.xlu0 %v1437_v61  ;;  %v1110_v61 = vpop.f32.mrf.mxu2 }
 0x408   : > { %v11107_v17 = vadd.f32 %v1110_v61, %v630_v26  ;;  %v560_v26 = vld [vmem:[%s15552_s5 + $0xb8] sm:$0xff] }
 0x409   : > { %v616_v61 = vunpack.c.h.bf16 %v560_v26 }
 0x40a   : > { %15733 = vst [vmem:[#allocation37_spill] sm:$0xff] %v11107_v17  ;;  %v1206_v29 = vmax.f32 %v11112_v7, %v11107_v17 }
 0x40f   : > { %2460 = vrot.lane.b32.xlu2 %v10895_v47, %s9822_s12  ;;  %1201 = vmax.xlane.f32.xlu0 %v1200_v8  ;;  %v11105_v8 = vpop.f32.mrf.mxu1 }
 0x410   : > { %15732 = vst [vmem:[#allocation36_spill] sm:$0xff] %v11105_v8 }
 0x419   : > { %v11090_v45 = vpop.xlane.xlu2 %1177 }
 0x421   : > { %v1418_v42 = vpop.xlane.xlu2 %1417  ;;  %1444 = vadd.xlane.f32.xlu1 %v1443_v13  ;;  %v1231_v13 = vsub.f32 %v10671_v16, %v10921_v3  ;;  %v1240_v3 = vsub.f32 %v10749_v51, %v10966_v33 }
 0x422   : > { %9018 = vrcp.f32 %v1418_v42 }
 0x423   : > { %2474 = vrot.lane.b32.xlu0 %v11105_v8, %s9822_s12  ;;  %9020 = vpow2.f32 %v1340_v25  ;;  %v11131_v25 = vpop.f32.mrf.mxu1  ;;  %v1314_v42 = vmul.f32 1.442695, %v1231_v13 }
 0x424   : > { %9022 = vpow2.f32 %v1342_v34  ;;  %15735 = vst [vmem:[#allocation39_spill] sm:$0xff] %v11131_v25  ;;  %v11134_v34 = vadd.f32 %v10925_v53, %v616_v61  ;;  %v1247_v61 = vsub.f32 %v10803_v63, %v10996_v31  ;;  %v1252_v63 = vsub.f32 %v10919_v27, %v11090_v45 }
 0x425   : > { %9024 = vpow2.f32 %v1312_v56  ;;  %v1113_v56 = vpop.f32.mrf.mxu2 }
 0x426   : > { %9026 = vpow2.f32 %v1314_v42 }
 0x428   : > { %v9019_v6 = vpop.eup %9018 }
 0x429   : > { %1207 = vmax.xlane.f32.xlu1 %v1206_v29  ;;  %v1540_v19 = vmul.f32 %v9019_v6, %v10927_v0  ;;  %v1541_v30 = vmul.f32 %v9019_v6, %v10931_v39  ;;  %v11118_v10 = vpop.eup %9020  ;;  %v615_v39 = vunpack.c.l.bf16 %v560_v26  ;;  %v1241_v6 = vsub.f32 %v10751_v41, %v10966_v33  ;;  %v568_v41 = vld [vmem:[%s15552_s5 + $0xf8] sm:$0xff] }
 0x42a   : > { %v11120_v46 = vpop.eup %9022  ;;  %v1246_v33 = vsub.f32 %v10801_v4, %v10996_v31  ;;  %v631_v42 = vunpack.c.l.bf16 %v568_v41  ;;  %v1253_v31 = vsub.f32 %v10914_v58, %v11090_v45  ;;  %v11197_v58 = vpop.permute.xlu2 %2456 }
 0x42b   : > { %1720 = vmatmul.f32.gmra.mxu3 %v1540_v19  ;;  %1833 = vmatmul.f32.gmra.mxu0 %v1541_v30  ;;  %v1452_v0 = vadd.f32 %v11120_v46, %v11118_v10  ;;  %v11137_v48 = vadd.f32 %v10602_v54, %v615_v39  ;;  %v11143_v29 = vpop.eup %9024  ;;  %v11147_v19 = vpop.f32.mrf.mxu1  ;;  %v1332_v54 = vmul.f32 1.442695, %v1240_v3  ;;  %v1334_v30 = vmul.f32 1.442695, %v1241_v6 }
 0x42c   : > { %15736 = vst [vmem:[#allocation40_spill] sm:$0xff] %v11147_v19  ;;  %v11149_v53 = vpop.eup %9026  ;;  %v1346_v3 = vmul.f32 1.442695, %v1247_v61  ;;  %v11189_v61 = vpop.xlane.xlu1 %1180 }
 0x42d   : > { %v1185_v16 = vmax.f32 %v11137_v48, %v11134_v34  ;;  %v1431_v15 = vadd.f32 %v11149_v53, %v11143_v29  ;;  %9028 = vpow2.f32 %v1332_v54  ;;  %v11175_v54 = vadd.f32 %v10730_v62, %v631_v42 }
 0x42e   : > { %9030 = vpow2.f32 %v1334_v30  ;;  %v1358_v62 = vmul.f32 1.442695, %v1253_v31 }
 0x431   : > { %1453 = vadd.xlane.f32.xlu1 %v1452_v0  ;;  %v632_v0 = vunpack.c.h.bf16 %v568_v41 }
 0x433   : > { %v11153_v26 = vpop.f32.mrf.mxu1  ;;  %v11155_v51 = vpop.eup %9028  ;;  %v11172_v6 = vadd.f32 %v1113_v56, %v632_v0 }
 0x434   : > { %15737 = vst [vmem:[#allocation41_spill] sm:$0xff] %v11153_v26  ;;  %v11157_v13 = vpop.eup %9030  ;;  %v11207_v42 = vpop.permute.xlu1 %2458 }
 0x435   : > { %v1446_v39 = vadd.f32 %v11157_v13, %v11155_v51  ;;  %v1209_v30 = vmax.f32 %v11175_v54, %v11172_v6 }
 0x438   : > { %1186 = vmax.xlane.f32.xlu2 %v1185_v16  ;;  %v1344_v16 = vmul.f32 1.442695, %v1246_v33  ;;  %v1356_v33 = vmul.f32 1.442695, %v1252_v63 }
 0x43a   : > { %9032 = vpow2.f32 %v1344_v16 }
 0x43b   : > { %v11170_v4 = vpop.f32.mrf.mxu1  ;;  %9034 = vpow2.f32 %v1346_v3 }
 0x43c   : > { %15738 = vst [vmem:[#allocation42_spill] sm:$0xff] %v11170_v4  ;;  %9036 = vpow2.f32 %v1356_v33 }
 0x43d   : > { %9038 = vpow2.f32 %v1358_v62  ;;  %v1427_v62 = vpop.xlane.xlu1 %1426 }
 0x440   : > { %1432 = vadd.xlane.f32.xlu2 %v1431_v15  ;;  %v11185_v15 = vpop.xlane.xlu0 %1183  ;;  %v11187_v41 = vpop.eup %9032 }
 0x441   : > { %v11191_v27 = vpop.eup %9034 }
 0x442   : > { %v1455_v45 = vadd.f32 %v11191_v27, %v11187_v41  ;;  %v11205_v56 = vpop.eup %9036 }
 0x443   : > { %v11193_v0 = vpop.f32.mrf.mxu1  ;;  %15740 = vst [vmem:[#allocation44_spill] sm:$0xff] %v11205_v56  ;;  %v11209_v16 = vpop.eup %9038 }
 0x444   : > { %15739 = vst [vmem:[#allocation43_spill] sm:$0xff] %v11193_v0  ;;  %v1464_v31 = vadd.f32 %v11209_v16, %v11205_v56 }
 0x445   : > { %15741 = vst [vmem:[#allocation45_spill] sm:$0xff] %v11209_v16 }
 0x44a   : > { %2480 = vrot.lane.b32.xlu1 %v11153_v26, %s9822_s12 }
 0x44b   : > { %v11211_v3 = vpop.f32.mrf.mxu1 }
 0x44c   : > { %15742 = vst [vmem:[#allocation46_spill] sm:$0xff] %v11211_v3 }
 0x44d   : > { %1447 = vadd.xlane.f32.xlu0 %v1446_v39  ;;  %v11203_v39 = vpop.permute.xlu0 %2462 }
 0x452   : > { %2482 = vrot.lane.b32.xlu1 %v11170_v4, %s9822_s12 }
 0x453   : > { %v11217_v26 = vpop.f32.mrf.mxu1 }
 0x454   : > { %15743 = vst [vmem:[#allocation47_spill] sm:$0xff] %v11217_v26 }
 0x455   : > { %1210 = vmax.xlane.f32.xlu0 %v1209_v30  ;;  %v1430_v30 = vpop.xlane.xlu0 %1429 }
 0x458   : > { %2466 = vrot.lane.b32.xlu2 %v11011_v37, %s9822_s12 }
 0x45a   : > { %2484 = vrot.lane.b32.xlu1 %v11193_v0, %s9822_s12 }
 0x45d   : > { %1456 = vadd.xlane.f32.xlu0 %v1455_v45  ;;  %v11219_v25 = vpop.permute.xlu0 %2464 }
 0x462   : > { %v1421_v63 = vpop.xlane.xlu2 %1420 }
 0x463   : > { %9040 = vrcp.f32 %v1421_v63  ;;  %v1250_v63 = vsub.f32 %v10843_v1, %v11015_v35  ;;  %v11232_v1 = vpop.f32.mrf.mxu1 }
 0x464   : > { %15744 = vst [vmem:[#allocation48_spill] sm:$0xff] %v11232_v1 }
 0x465   : > { %1465 = vadd.xlane.f32.xlu0 %v1464_v31  ;;  %v1251_v31 = vsub.f32 %v10845_v20, %v11015_v35 }
 0x469   : > { %v9041_v33 = vpop.eup %9040 }
 0x46a   : > { %v1424_v0 = vpop.xlane.xlu2 %1423  ;;  %v1542_v45 = vmul.f32 %v9041_v33, %v11027_v52  ;;  %v1543_v4 = vmul.f32 %v9041_v33, %v11029_v12  ;;  %v11227_v12 = vpop.xlane.xlu1 %1189  ;;  %v1354_v33 = vmul.f32 1.442695, %v1251_v31 }
 0x46b   : > { %9042 = vrcp.f32 %v1424_v0  ;;  %v1352_v0 = vmul.f32 1.442695, %v1250_v63 }
 0x46c   : > { %1723 = vmatmul.f32.gmra.mxu3 %v1542_v45  ;;  %1836 = vmatmul.f32.gmra.mxu0 %v1543_v4  ;;  %9044 = vrcp.f32 %v1427_v62  ;;  %v563_v4 = vld [vmem:[%s15552_s5 + $0xd0] sm:$0xff] }
 0x46d   : > { %v622_v45 = vunpack.c.h.bf16 %v563_v4  ;;  %9046 = vpow2.f32 %v1352_v0  ;;  %v621_v20 = vunpack.c.l.bf16 %v563_v4 }
 0x46e   : > { %9048 = vrcp.f32 %v1430_v30 }
 0x46f   : > { %9050 = vpow2.f32 %v1354_v33 }
 0x471   : > { %v9043_v19 = vpop.eup %9042 }
 0x472   : > { %v1544_v17 = vmul.f32 %v9043_v19, %v11039_v32  ;;  %v1545_v52 = vmul.f32 %v9043_v19, %v11041_v2  ;;  %v9045_v62 = vpop.eup %9044  ;;  %v11234_v35 = vpop.xlane.xlu0 %1192  ;;  %v11244_v19 = vadd.f32 %v10650_v57, %v621_v20 }
 0x473   : > { %v1546_v32 = vmul.f32 %v9045_v62, %v10941_v11  ;;  %v1547_v2 = vmul.f32 %v9045_v62, %v10947_v5  ;;  %v1436_v63 = vpop.xlane.xlu1 %1435  ;;  %v11246_v30 = vpop.eup %9046 }
 0x474   : > { %1726 = vmatmul.f32.gmra.mxu3 %v1544_v17  ;;  %1839 = vmatmul.f32.gmra.mxu0 %v1545_v52  ;;  %v11241_v17 = vadd.f32 %v10971_v49, %v622_v45  ;;  %v9049_v31 = vpop.eup %9048  ;;  %v11252_v11 = vpop.f32.mrf.mxu1  ;;  %v15746_v49 = vld [vmem:[#allocation24_spill] sm:$0xff] }
 0x475   : > { %v11250_v0 = vpop.eup %9050  ;;  %15745 = vst [vmem:[#allocation49_spill] sm:$0xff] %v11252_v11  ;;  %v1548_v5 = vmul.f32 %v9049_v31, %v10952_v60  ;;  %v1549_v57 = vmul.f32 %v9049_v31, %v15746_v49  ;;  %v11273_v31 = vpop.permute.xlu2 %2460  ;;  %v15750_v49 = vld [vmem:[#allocation3_spill] sm:$0xff] }
 0x476   : > { %v1194_v52 = vmax.f32 %v11244_v19, %v11241_v17  ;;  %v1461_v33 = vadd.f32 %v11250_v0, %v11246_v30 }
 0x479   : > { %2488 = vrot.lane.b32.xlu0 %v11217_v26, %s9822_s12  ;;  %v15751_v26 = vld [vmem:[#allocation4_spill] sm:$0xff] }
 0x47a   : > { %v11258_v4 = vpop.xlane.xlu0 %1438 }
 0x47b   : > { %v11262_v62 = vpop.xlane.xlu1 %1198 }
 0x47c   : > { %1729 = vmatmul.f32.gmra.mxu3 %v1546_v32  ;;  %1842 = vmatmul.f32.gmra.mxu0 %v1547_v2  ;;  %v11268_v60 = vpop.f32.mrf.mxu1 }
 0x47d   : > { %15747 = vst [vmem:[#allocation24_spill] sm:$0xff] %v11268_v60 }
 0x481   : > { %1195 = vmax.xlane.f32.xlu2 %v1194_v52  ;;  %2492 = vrot.lane.b32.xlu0 %v11252_v11, %s9822_s12 }
 0x482   : > { %v1202_v45 = vpop.xlane.xlu0 %1201 }
 0x483   : > { %v2471_v20 = vpop.permute.xlu1 %2470 }
 0x484   : > { %1732 = vmatmul.f32.gmra.mxu3 %v1548_v5  ;;  %1845 = vmatmul.f32.gmra.mxu0 %v1549_v57  ;;  %v11275_v52 = vpop.f32.mrf.mxu1  ;;  %v15749_v5 = vld [vmem:[#allocation27_spill] sm:$0xff] }
 0x485   : > { %1462 = vadd.xlane.f32.xlu1 %v1461_v33  ;;  %15748 = vst [vmem:[#allocation50_spill] sm:$0xff] %v11275_v52  ;;  %v1236_v57 = vsub.f32 %v15750_v49, %v15749_v5 }
 0x48b   : > { %v2473_v2 = vpop.permute.xlu1 %2472 }
 0x48c   : > { %v11286_v50 = vpop.f32.mrf.mxu1 }
 0x48d   : > { %15752 = vst [vmem:[#allocation27_spill] sm:$0xff] %v11286_v50 }
 0x495   : > { %v2475_v32 = vpop.permute.xlu0 %2474 }
 0x496   : > { %8083 = vmatpush.xpose.msk.msrb.mxu2 %vm729_vm1, %v2475_v32 }
 0x499   : > { %2468 = vrot.lane.b32.xlu2 %v11019_v55, %s9822_s12  ;;  %v1324_v55 = vmul.f32 1.442695, %v1236_v57  ;;  %v15755_v57 = vld [vmem:[#allocation20_spill] sm:$0xff] }
 0x49a   : > { %8084 = vmatpush.xpose.msk.msrb.mxu2 %vm729_vm1, %v2473_v2 }
 0x49e   : > { %2486 = vrot.lane.b32.xlu1 %v11211_v3, %s9822_s12  ;;  %8085 = vmatpush.xpose.msk.msrb.mxu2 %vm729_vm1, %v2471_v20  ;;  %v1237_v3 = vsub.f32 %v15751_v26, %v15749_v5  ;;  %v1268_v20 = vsub.f32 %v11076_v40, %v1202_v45 }
 0x4a0   : > { %v1326_v16 = vmul.f32 1.442695, %v1237_v3  ;;  %v1388_v49 = vmul.f32 1.442695, %v1268_v20  ;;  %v15754_v3 = vld [vmem:[#allocation19_spill] sm:$0xff] }
 0x4a6   : > { %2490 = vrot.lane.b32.xlu1 %v11232_v1, %s9822_s12  ;;  %v1269_v1 = vsub.f32 %v11073_v23, %v1202_v45  ;;  %v11297_v23 = vpop.f32.mrf.mxu1 }
 0x4a7   : > { %15753 = vst [vmem:[#allocation3_spill] sm:$0xff] %v11297_v23 }
 0x4ab   : > { %v1187_v33 = vpop.xlane.xlu2 %1186 }
 0x4ac   : > { %v1258_v32 = vsub.f32 %v11137_v48, %v1187_v33  ;;  %v1259_v2 = vsub.f32 %v11134_v34, %v1187_v33  ;;  %v1390_v48 = vmul.f32 1.442695, %v1269_v1  ;;  %v1256_v1 = vsub.f32 %v15754_v3, %v11185_v15 }
 0x4ad   : > { %v1257_v33 = vsub.f32 %v15755_v57, %v11185_v15 }
 0x4ae   : > { %v1368_v7 = vmul.f32 1.442695, %v1258_v32  ;;  %v1370_v37 = vmul.f32 1.442695, %v1259_v2 }
 0x4b0   : > { %9052 = vpow2.f32 %v1368_v7 }
 0x4b1   : > { %9054 = vpow2.f32 %v1370_v37 }
 0x4b2   : > { %9056 = vpow2.f32 %v1324_v55 }
 0x4b3   : > { %v1433_v56 = vpop.xlane.xlu2 %1432 }
 0x4b4   : > { %9058 = vrcp.f32 %v1433_v56 }
 0x4b5   : > { %9060 = vpow2.f32 %v1326_v16 }
 0x4b6   : > { %v11289_v34 = vpop.eup %9052  ;;  %9062 = vpow2.f32 %v1388_v49 }
 0x4b7   : > { %v11291_v40 = vpop.eup %9054  ;;  %9064 = vpow2.f32 %v1390_v48  ;;  %v1364_v48 = vmul.f32 1.442695, %v1256_v1 }
 0x4b8   : > { %v1473_v26 = vadd.f32 %v11291_v40, %v11289_v34  ;;  %v11295_v5 = vpop.eup %9056  ;;  %9066 = vrcp.f32 %v1436_v63  ;;  %v15756_v63 = vld [vmem:[#allocation7_spill] sm:$0xff] }
 0x4b9   : > { %v1242_v32 = vsub.f32 %v15756_v63, %v10992_v22  ;;  %9068 = vrcp.f32 %v11258_v4  ;;  %v15759_v63 = vld [vmem:[#allocation28_spill] sm:$0xff] }
 0x4ba   : > { %v9059_v37 = vpop.eup %9058  ;;  %1474 = vadd.xlane.f32.xlu0 %v1473_v26  ;;  %9070 = vpow2.f32 %v1364_v48  ;;  %v15760_v4 = vld [vmem:[#allocation16_spill] sm:$0xff] }
 0x4bb   : > { %v11299_v55 = vpop.eup %9060  ;;  %v1550_v7 = vmul.f32 %v9059_v37, %v11143_v29  ;;  %v1551_v56 = vmul.f32 %v9059_v37, %v11149_v53  ;;  %v566_v29 = vld [vmem:[%s15552_s5 + $0xe8] sm:$0xff]  ;;  %v1366_v37 = vmul.f32 1.442695, %v1257_v33  ;;  %v1336_v3 = vmul.f32 1.442695, %v1242_v32 }
 0x4bc   : > { %v11303_v16 = vpop.eup %9062  ;;  %v15757_v53 = vld [vmem:[#allocation8_spill] sm:$0xff]  ;;  %v628_v49 = vunpack.c.h.bf16 %v566_v29  ;;  %v1440_v15 = vadd.f32 %v11299_v55, %v11295_v5  ;;  %v1262_v33 = vsub.f32 %v11060_v43, %v11234_v35  ;;  %v1263_v32 = vsub.f32 %v11057_v24, %v11234_v35 }
 0x4bd   : > { %v11307_v45 = vpop.eup %9064  ;;  %1735 = vmatmul.f32.gmra.mxu3 %v1550_v7  ;;  %1848 = vmatmul.f32.gmra.mxu0 %v1551_v56  ;;  %v1243_v2 = vsub.f32 %v15757_v53, %v10992_v22  ;;  %v11322_v7 = vpop.f32.mrf.mxu1  ;;  %v627_v56 = vunpack.c.l.bf16 %v566_v29  ;;  %9072 = vpow2.f32 %v1366_v37 }
 0x4be   : > { %v9067_v20 = vpop.eup %9066  ;;  %v1488_v26 = vadd.f32 %v11307_v45, %v11303_v16  ;;  %15758 = vst [vmem:[#allocation4_spill] sm:$0xff] %v11322_v7  ;;  %v11328_v53 = vadd.f32 %v11088_v59, %v628_v49  ;;  %9074 = vpow2.f32 %v1336_v3  ;;  %v15762_v59 = vld [vmem:[#allocation12_spill] sm:$0xff]  ;;  %v1376_v48 = vmul.f32 1.442695, %v1262_v33 }
 0x4bf   : > { %v1338_v57 = vmul.f32 1.442695, %v1243_v2  ;;  %v1552_v22 = vmul.f32 %v9067_v20, %v10979_v38  ;;  %v1553_v1 = vmul.f32 %v9067_v20, %v15759_v63  ;;  %v11335_v29 = vadd.f32 %v15760_v4, %v627_v56  ;;  %v15761_v38 = vld [vmem:[#allocation11_spill] sm:$0xff]  ;;  %v9069_v49 = vpop.eup %9068 }
 0x4c0   : > { %v1248_v2 = vsub.f32 %v15761_v38, %v11009_v36  ;;  %v1249_v20 = vsub.f32 %v15762_v59, %v11009_v36  ;;  %v11343_v24 = vpop.eup %9070  ;;  %v1554_v3 = vmul.f32 %v9069_v49, %v11064_v44  ;;  %v15764_v63 = vld [vmem:[#allocation15_spill] sm:$0xff]  ;;  %v15765_v44 = vld [vmem:[#allocation17_spill] sm:$0xff] }
 0x4c1   : > { %9076 = vpow2.f32 %v1338_v57  ;;  %v1203_v43 = vmax.f32 %v11335_v29, %v11328_v53  ;;  %v1555_v57 = vmul.f32 %v9069_v49, %v11066_v18 }
 0x4c2   : > { %1489 = vadd.xlane.f32.xlu0 %v1488_v26  ;;  %1441 = vadd.xlane.f32.xlu2 %v1440_v15  ;;  %v1378_v26 = vmul.f32 1.442695, %v1263_v32  ;;  %v1348_v35 = vmul.f32 1.442695, %v1248_v2  ;;  %v1350_v37 = vmul.f32 1.442695, %v1249_v20  ;;  %9078 = vpow2.f32 %v1376_v48 }
 0x4c3   : > { %v11345_v15 = vpop.eup %9072  ;;  %v1255_v32 = vsub.f32 %v15765_v44, %v11189_v61 }
 0x4c4   : > { %v11351_v36 = vpop.eup %9074  ;;  %9080 = vpow2.f32 %v1378_v26  ;;  %v1470_v33 = vadd.f32 %v11345_v15, %v11343_v24 }
 0x4c5   : > { %1738 = vmatmul.f32.gmra.mxu3 %v1552_v22  ;;  %1851 = vmatmul.f32.gmra.mxu0 %v1553_v1  ;;  %v11347_v56 = vpop.f32.mrf.mxu1  ;;  %9082 = vpow2.f32 %v1348_v35  ;;  %v1254_v1 = vsub.f32 %v15764_v63, %v11189_v61  ;;  %v1362_v59 = vmul.f32 1.442695, %v1255_v32  ;;  %v2467_v63 = vpop.permute.xlu2 %2466 }
 0x4c6   : > { %15763 = vst [vmem:[#allocation19_spill] sm:$0xff] %v11347_v56  ;;  %9084 = vpow2.f32 %v1350_v37  ;;  %v11383_v37 = vpop.xlane.xlu0 %1447 }
 0x4c7   : > { %v11353_v22 = vpop.eup %9076  ;;  %v1360_v38 = vmul.f32 1.442695, %v1254_v1 }
 0x4c8   : > { %v1449_v18 = vadd.f32 %v11353_v22, %v11351_v36  ;;  %v11363_v4 = vpop.eup %9078 }
 0x4c9   : > { %9086 = vpow2.f32 %v1360_v38 }
 0x4ca   : > { %1204 = vmax.xlane.f32.xlu2 %v1203_v43  ;;  %v11365_v2 = vpop.eup %9080  ;;  %9088 = vpow2.f32 %v1362_v59 }
 0x4cb   : > { %v11367_v20 = vpop.eup %9082  ;;  %v1479_v61 = vadd.f32 %v11365_v2, %v11363_v4 }
 0x4cc   : > { %v11369_v49 = vpop.eup %9084 }
 0x4cd   : > { %1741 = vmatmul.f32.gmra.mxu3 %v1554_v3  ;;  %1854 = vmatmul.f32.gmra.mxu0 %v1555_v57  ;;  %v11371_v48 = vpop.f32.mrf.mxu1  ;;  %v1458_v43 = vadd.f32 %v11369_v49, %v11367_v20 }
 0x4ce   : > { %15766 = vst [vmem:[#allocation20_spill] sm:$0xff] %v11371_v48  ;;  %v1211_v57 = vpop.xlane.xlu0 %1210 }
 0x4cf   : > { %v11379_v26 = vpop.eup %9086  ;;  %v1274_v1 = vsub.f32 %v11175_v54, %v1211_v57 }
 0x4d0   : > { %1471 = vadd.xlane.f32.xlu1 %v1470_v33  ;;  %v11381_v35 = vpop.eup %9088  ;;  %v1275_v33 = vsub.f32 %v11172_v6, %v1211_v57 }
 0x4d1   : > { %v1467_v3 = vadd.f32 %v11381_v35, %v11379_v26  ;;  %v1400_v44 = vmul.f32 1.442695, %v1274_v1 }
 0x4d2   : > { %1450 = vadd.xlane.f32.xlu2 %v1449_v18  ;;  %v1402_v32 = vmul.f32 1.442695, %v1275_v33 }
 0x4d3   : > { %9090 = vpow2.f32 %v1400_v44 }
 0x4d4   : > { %9092 = vpow2.f32 %v1402_v32 }
 0x4d6   : > { %2506 = vrot.lane.b32.xlu0 %v11371_v48, %s9822_s12  ;;  %v11415_v1 = vpop.xlane.xlu0 %1456 }
 0x4d8   : > { %1480 = vadd.xlane.f32.xlu1 %v1479_v61  ;;  %v15767_v61 = vld [vmem:[#allocation26_spill] sm:$0xff] }
 0x4d9   : > { %v11395_v38 = vpop.eup %9090 }
 0x4da   : > { %1459 = vadd.xlane.f32.xlu2 %v1458_v43  ;;  %v11399_v54 = vpop.eup %9092  ;;  %v1260_v43 = vsub.f32 %v15767_v61, %v11227_v12 }
 0x4db   : > { %v1497_v59 = vadd.f32 %v11399_v54, %v11395_v38 }
 0x4e2   : > { %1468 = vadd.xlane.f32.xlu2 %v1467_v3  ;;  %v15768_v3 = vld [vmem:[#allocation25_spill] sm:$0xff] }
 0x4e3   : > { %v1261_v57 = vsub.f32 %v15768_v3, %v11227_v12  ;;  %v8742_v12 = vpack.i.bf16 %v10895_v47, %v11297_v23 }
 0x4e5   : > { %v1374_v33 = vmul.f32 1.442695, %v1261_v57 }
 0x4f1   : > { %2500 = vrot.lane.b32.xlu1 %v11297_v23, %s9822_s12 }
 0x4f4   : > { %v11391_v18 = vpop.xlane.xlu2 %1195 }
 0x4f9   : > { %2504 = vrot.lane.b32.xlu1 %v11347_v56, %s9822_s12 }
 0x4fa   : > { %2494 = vrot.lane.b32.xlu2 %v11268_v60, %s9822_s12 }
 0x4fc   : > { %v2469_v6 = vpop.permute.xlu2 %2468 }
 0x4fd   : > { %8086 = vmatpush.xpose.msk.msrb.mxu2 %vm729_vm1, %v2469_v6 }
 0x500   : > { %1498 = vadd.xlane.f32.xlu0 %v1497_v59 }
 0x501   : > { %8087 = vmatpush.xpose.msk.msrb.mxu2 %vm729_vm1, %v2467_v63  ;;  %v1372_v63 = vmul.f32 1.442695, %v1260_v43 }
 0x503   : > { %9094 = vpow2.f32 %v1372_v63 }
 0x504   : > { %9096 = vpow2.f32 %v1374_v33 }
 0x505   : > { %8088 = vmatpush.xpose.msk.msrb.mxu2 %vm729_vm1, %v11219_v25  ;;  %v15769_v25 = vld [vmem:[#allocation13_spill] sm:$0xff] }
 0x506   : > { %v8762_v32 = vpack.i.bf16 %v15769_v25, %v11252_v11 }
 0x509   : > { %8089 = vmatpush.xpose.msk.msrb.mxu2 %vm729_vm1, %v11203_v39  ;;  %v11425_v39 = vpop.xlane.xlu0 %1465 }
 0x50d   : > { %8090 = vmatpush.xpose.msk.msrb.mxu2 %vm729_vm1, %v11273_v31 }
 0x511   : > { %8091 = vmatpush.xpose.msk.msrb.mxu2 %vm729_vm1, %v11207_v42  ;;  %v11430_v42 = vpop.eup %9094 }
 0x512   : > { %v11432_v31 = vpop.eup %9096 }
 0x513   : > { %v1476_v44 = vadd.f32 %v11432_v31, %v11430_v42 }
 0x514   : > { %2452 = vrot.lane.b32.xlu0 %v15769_v25, %s9822_s12 }
 0x515   : > { %8092 = vmatpush.xpose.msk.msrb.mxu2 %vm729_vm1, %v11197_v58  ;;  %v11436_v58 = vpop.permute.xlu0 %2488 }
 0x519   : > { %8093 = vmatpush.xpose.msk.msrb.mxu2 %vm729_vm1, %v11086_v21  ;;  %v1445_v21 = vpop.xlane.xlu1 %1444 }
 0x51c   : > { %8743 = vrot.lane.b32.xlu0 %v8742_v12, %s9823_s13 }
 0x51d   : > { %v11441_v6 = vpop.permute.xlu0 %2492 }
 0x521   : > { %v11443_v59 = vpop.xlane.xlu1 %1207 }
 0x523   : > { %1477 = vadd.xlane.f32.xlu2 %v1476_v44 }
 0x524   : > { %8763 = vrot.lane.b32.xlu0 %v8762_v32, %s9823_s13 }
 0x529   : > { %v1454_v3 = vpop.xlane.xlu1 %1453 }
 0x52d   : > { %v11445_v43 = vpop.xlane.xlu0 %1474 }
 0x535   : > { %v1442_v61 = vpop.xlane.xlu2 %1441  ;;  %v11453_v23 = vpop.xlane.xlu0 %1489 }
 0x536   : > { %9098 = vrcp.f32 %v1442_v61  ;;  %v11455_v61 = vpop.permute.xlu1 %2480 }
 0x537   : > { %9100 = vrcp.f32 %v1445_v21 }
 0x53b   : > { %2496 = vrot.lane.b32.xlu2 %v11275_v52, %s9822_s12 }
 0x53c   : > { %v9099_v57 = vpop.eup %9098 }
 0x53d   : > { %v1205_v63 = vpop.xlane.xlu2 %1204  ;;  %v1556_v44 = vmul.f32 %v9099_v57, %v11295_v5  ;;  %v1557_v32 = vmul.f32 %v9099_v57, %v11299_v55  ;;  %v9101_v25 = vpop.eup %9100 }
 0x53e   : > { %v1270_v33 = vsub.f32 %v11335_v29, %v1205_v63  ;;  %v1271_v12 = vsub.f32 %v11328_v53, %v1205_v63  ;;  %v1558_v5 = vmul.f32 %v9101_v25, %v11092_v28  ;;  %v1559_v55 = vmul.f32 %v9101_v25, %v11094_v9  ;;  %v11469_v63 = vpop.permute.xlu1 %2482 }
 0x53f   : > { %1744 = vmatmul.f32.gmra.mxu3 %v1556_v44  ;;  %1857 = vmatmul.f32.gmra.mxu0 %v1557_v32  ;;  %v1264_v44 = vsub.f32 %v11244_v19, %v11391_v18  ;;  %v15771_v19 = vld [vmem:[#allocation30_spill] sm:$0xff] }
 0x540   : > { %v1392_v11 = vmul.f32 1.442695, %v1270_v33  ;;  %v1394_v47 = vmul.f32 1.442695, %v1271_v12 }
 0x542   : > { %9102 = vpow2.f32 %v1392_v11 }
 0x543   : > { %9104 = vpow2.f32 %v1394_v47  ;;  %2498 = vrot.lane.b32.xlu2 %v11286_v50, %s9822_s12 }
 0x544   : > { %9106 = vrcp.f32 %v11383_v37 }
 0x545   : > { %v1451_v11 = vpop.xlane.xlu2 %1450 }
 0x546   : > { %9108 = vrcp.f32 %v1451_v11  ;;  %v11473_v25 = vpop.permute.xlu1 %2484  ;;  %v1267_v11 = vsub.f32 %v15771_v19, %v11262_v62 }
 0x547   : > { %1747 = vmatmul.f32.gmra.mxu3 %v1558_v5  ;;  %1860 = vmatmul.f32.gmra.mxu0 %v1559_v55  ;;  %9110 = vrcp.f32 %v1454_v3 }
 0x548   : > { %v11462_v53 = vpop.eup %9102  ;;  %v2507_v29 = vpop.permute.xlu0 %2506  ;;  %9112 = vrcp.f32 %v11415_v1  ;;  %v1386_v1 = vmul.f32 1.442695, %v1267_v11 }
 0x549   : > { %v11464_v21 = vpop.eup %9104  ;;  %8131 = vmatpush.xpose.msk.msra.mxu0 %vm729_vm1, %v2507_v29 }
 0x54a   : > { %v1491_v47 = vadd.f32 %v11464_v21, %v11462_v53  ;;  %v9107_v57 = vpop.eup %9106 }
 0x54b   : > { %v1560_v28 = vmul.f32 %v9107_v57, %v11155_v51  ;;  %v1561_v9 = vmul.f32 %v9107_v57, %v11157_v13  ;;  %v1265_v51 = vsub.f32 %v11241_v17, %v11391_v18  ;;  %v1380_v13 = vmul.f32 1.442695, %v1264_v44 }
 0x54c   : > { %1492 = vadd.xlane.f32.xlu1 %v1491_v47  ;;  %v9109_v37 = vpop.eup %9108 }
 0x54d   : > { %v1562_v33 = vmul.f32 %v9109_v37, %v11351_v36  ;;  %v1563_v12 = vmul.f32 %v9109_v37, %v11353_v22  ;;  %v9111_v32 = vpop.eup %9110  ;;  %v1382_v5 = vmul.f32 1.442695, %v1265_v51  ;;  %v15770_v22 = vld [vmem:[#allocation31_spill] sm:$0xff]  ;;  %9114 = vpow2.f32 %v1380_v13  ;;  %v1460_v17 = vpop.xlane.xlu2 %1459 }
 0x54e   : > { %v1564_v3 = vmul.f32 %v9111_v32, %v11118_v10  ;;  %v1565_v55 = vmul.f32 %v9111_v32, %v11120_v46  ;;  %v1463_v36 = vpop.xlane.xlu1 %1462  ;;  %v1266_v29 = vsub.f32 %v15770_v22, %v11262_v62  ;;  %v9113_v18 = vpop.eup %9112  ;;  %v15772_v10 = vld [vmem:[#allocation10_spill] sm:$0xff] }
 0x54f   : > { %1750 = vmatmul.f32.gmra.mxu3 %v1560_v28  ;;  %1863 = vmatmul.f32.gmra.mxu0 %v1561_v9  ;;  %9116 = vpow2.f32 %v1382_v5  ;;  %v1566_v57 = vmul.f32 %v9113_v18, %v11187_v41  ;;  %v1567_v28 = vmul.f32 %v9113_v18, %v11191_v27 }
 0x550   : > { %v1384_v47 = vmul.f32 1.442695, %v1266_v29  ;;  %9118 = vrcp.f32 %v1460_v17  ;;  %v8717_v29 = vpack.i.bf16 %v11052_v14, %v11105_v8  ;;  %v15776_v17 = vld [vmem:[#allocation45_spill] sm:$0xff] }
 0x552   : > { %9120 = vpow2.f32 %v1384_v47  ;;  %v15778_v47 = vld [vmem:[#allocation33_spill] sm:$0xff] }
 0x553   : > { %v11490_v46 = vpop.eup %9114  ;;  %9122 = vpow2.f32 %v1386_v1 }
 0x554   : > { %9124 = vrcp.f32 %v1463_v36 }
 0x555   : > { %v11494_v9 = vpop.eup %9116  ;;  %9126 = vrcp.f32 %v11425_v39  ;;  %v15775_v39 = vld [vmem:[#allocation44_spill] sm:$0xff] }
 0x556   : > { %v11496_v37 = vpop.permute.xlu1 %2486  ;;  %v1482_v62 = vadd.f32 %v11494_v9, %v11490_v46 }
 0x557   : > { %1753 = vmatmul.f32.gmra.mxu3 %v1562_v33  ;;  %1866 = vmatmul.f32.gmra.mxu0 %v1563_v12  ;;  %v9119_v33 = vpop.eup %9118  ;;  %v15773_v12 = vld [vmem:[#allocation9_spill] sm:$0xff] }
 0x558   : > { %v11502_v41 = vpop.eup %9120  ;;  %v1568_v27 = vmul.f32 %v9119_v33, %v11367_v20  ;;  %v1569_v44 = vmul.f32 %v9119_v33, %v11369_v49 }
 0x559   : > { %v11506_v51 = vpop.eup %9122 }
 0x55a   : > { %v1485_v13 = vadd.f32 %v11506_v51, %v11502_v41  ;;  %v9125_v5 = vpop.eup %9124 }
 0x55b   : > { %v1570_v20 = vmul.f32 %v9125_v5, %v11246_v30  ;;  %v1571_v49 = vmul.f32 %v9125_v5, %v11250_v0  ;;  %v9127_v36 = vpop.eup %9126  ;;  %v15777_v0 = vld [vmem:[#allocation34_spill] sm:$0xff] }
 0x55c   : > { %v1572_v11 = vmul.f32 %v9127_v36, %v15775_v39  ;;  %v1573_v18 = vmul.f32 %v9127_v36, %v15776_v17  ;;  %v8722_v1 = vpack.i.bf16 %v15778_v47, %v15777_v0 }
 0x55e   : > { %v11508_v32 = vpop.permute.xlu1 %2490 }
 0x55f   : > { %1756 = vmatmul.f32.gmra.mxu3 %v1564_v3  ;;  %1869 = vmatmul.f32.gmra.mxu0 %v1565_v55  ;;  %v15774_v3 = vld [vmem:[#allocation5_spill] sm:$0xff]  ;;  %v1469_v55 = vpop.xlane.xlu2 %1468 }
 0x560   : > { %9128 = vrcp.f32 %v1469_v55  ;;  %v15780_v55 = vld [vmem:[#allocation29_spill] sm:$0xff] }
 0x561   : > { %v8732_v36 = vpack.i.bf16 %v15780_v55, %v11347_v56 }
 0x565   : > { %2450 = vrot.lane.b32.xlu1 %v15772_v10, %s9822_s12 }
 0x566   : > { %v1472_v22 = vpop.xlane.xlu1 %1471  ;;  %v9129_v30 = vpop.eup %9128 }
 0x567   : > { %1759 = vmatmul.f32.gmra.mxu3 %v1566_v57  ;;  %1872 = vmatmul.f32.gmra.mxu0 %v1567_v28  ;;  %9130 = vrcp.f32 %v1472_v22  ;;  %v1575_v33 = vmul.f32 %v9129_v30, %v11381_v35  ;;  %v11544_v22 = vpop.f32.mrf.mxu0 }
 0x568   : > { %9132 = vrcp.f32 %v11445_v43 }
 0x56c   : > { %1483 = vadd.xlane.f32.xlu2 %v1482_v62  ;;  %v1574_v62 = vmul.f32 %v9129_v30, %v11379_v26  ;;  %v11538_v26 = vpop.permute.xlu2 %2494 }
 0x56d   : > { %2448 = vrot.lane.b32.xlu1 %v15773_v12, %s9822_s12 }
 0x56e   : > { %v1481_v57 = vpop.xlane.xlu1 %1480 }
 0x56f   : > { %1762 = vmatmul.f32.gmra.mxu3 %v1568_v27  ;;  %1875 = vmatmul.f32.gmra.mxu0 %v1569_v44  ;;  %v9131_v27 = vpop.eup %9130  ;;  %v15779_v44 = vld [vmem:[#allocation32_spill] sm:$0xff] }
 0x570   : > { %v1576_v35 = vmul.f32 %v9131_v27, %v11343_v24 }
 0x573   : > { %v11520_v19 = vpop.xlane.xlu0 %1498 }
 0x574   : > { %1486 = vadd.xlane.f32.xlu2 %v1485_v13  ;;  %v8727_v13 = vpack.i.bf16 %v15779_v44, %v11371_v48  ;;  %v15788_v48 = vld [vmem:[#allocation6_spill] sm:$0xff] }
 0x575   : > { %2444 = vrot.lane.b32.xlu1 %v15774_v3, %s9822_s12 }
 0x576   : > { %v11536_v5 = vpop.permute.xlu1 %2500 }
 0x577   : > { %1765 = vmatmul.f32.gmra.mxu3 %v1570_v20  ;;  %1878 = vmatmul.f32.gmra.mxu0 %v1571_v49  ;;  %v1577_v20 = vmul.f32 %v9131_v27, %v11345_v15  ;;  %v9133_v49 = vpop.eup %9132  ;;  %v15781_v15 = vld [vmem:[#allocation23_spill] sm:$0xff] }
 0x578   : > { %v1579_v24 = vmul.f32 %v9133_v49, %v11291_v40  ;;  %v8737_v17 = vpack.i.bf16 %v15781_v15, %v11322_v7 }
 0x57d   : > { %8718 = vrot.lane.b32.xlu1 %v8717_v29, %s9823_s13  ;;  %v11547_v29 = vpop.f32.mrf.mxu3 }
 0x57e   : > { %v2505_v43 = vpop.permute.xlu1 %2504 }
 0x57f   : > { %1768 = vmatmul.f32.gmra.mxu3 %v1572_v11  ;;  %1881 = vmatmul.f32.gmra.mxu0 %v1573_v18  ;;  %v1578_v11 = vmul.f32 %v9133_v49, %v11289_v34  ;;  %v11554_v18 = vpop.f32.mrf.mxu0 }
 0x580   : > { %8132 = vmatpush.xpose.msk.msra.mxu0 %vm729_vm1, %v2505_v43 }
 0x585   : > { %8723 = vrot.lane.b32.xlu1 %v8722_v1, %s9823_s13  ;;  %v11557_v1 = vpop.f32.mrf.mxu3 }
 0x586   : > { %v2453_v28 = vpop.permute.xlu0 %2452 }
 0x587   : > { %8094 = vmatpush.xpose.msk.msrb.mxu2 %vm729_vm1, %v2453_v28  ;;  %1771 = vmatmul.f32.gmra.mxu3 %v1574_v62  ;;  %v15782_v28 = vld [vmem:[#allocation38_spill] sm:$0xff]  ;;  %v11568_v49 = vpop.f32.mrf.mxu0 }
 0x588   : > { %1884 = vmatmul.f32.gmra.mxu0 %v1575_v33  ;;  %v1272_v62 = vsub.f32 %v15782_v28, %v11443_v59  ;;  %v15783_v33 = vld [vmem:[#allocation37_spill] sm:$0xff] }
 0x589   : > { %v1273_v27 = vsub.f32 %v15783_v33, %v11443_v59  ;;  %v15785_v59 = vld [vmem:[#allocation14_spill] sm:$0xff] }
 0x58c   : > { %2502 = vrot.lane.b32.xlu2 %v11322_v7, %s9822_s12 }
 0x58d   : > { %8728 = vrot.lane.b32.xlu1 %v8727_v13, %s9823_s13  ;;  %v11572_v43 = vpop.f32.mrf.mxu3 }
 0x58f   : > { %1774 = vmatmul.f32.gmra.mxu3 %v1576_v35  ;;  %v15784_v35 = vld [vmem:[#allocation21_spill] sm:$0xff] }
 0x590   : > { %1887 = vmatmul.f32.gmra.mxu0 %v1577_v20  ;;  %v1396_v20 = vmul.f32 1.442695, %v1272_v62 }
 0x595   : > { %8733 = vrot.lane.b32.xlu1 %v8732_v36, %s9823_s13 }
 0x596   : > { %v1478_v39 = vpop.xlane.xlu2 %1477 }
 0x597   : > { %9134 = vrcp.f32 %v1478_v39  ;;  %1777 = vmatmul.f32.gmra.mxu3 %v1578_v11  ;;  %v8757_v39 = vpack.i.bf16 %v15785_v59, %v11268_v60  ;;  %v15789_v60 = vld [vmem:[#allocation18_spill] sm:$0xff] }
 0x598   : > { %1890 = vmatmul.f32.gmra.mxu0 %v1579_v24  ;;  %9136 = vrcp.f32 %v1481_v57  ;;  %v8747_v57 = vpack.i.bf16 %v15784_v35, %v11286_v50 }
 0x599   : > { %9138 = vpow2.f32 %v1396_v20  ;;  %v1918_v20 = vld [vmem:[%s15550_s3] sm:$0xff] }
 0x59a   : > { %2030 = vmatpush.msrb.mxu3 %v1918_v20 }
 0x59d   : > { %v9135_v30 = vpop.eup %9134  ;;  %8738 = vrot.lane.b32.xlu1 %v8737_v17, %s9823_s13  ;;  %v11581_v17 = vpop.f32.mrf.mxu0 }
 0x59e   : > { %v1580_v34 = vmul.f32 %v9135_v30, %v11430_v42  ;;  %v1581_v40 = vmul.f32 %v9135_v30, %v11432_v31  ;;  %v9137_v13 = vpop.eup %9136  ;;  %v1398_v42 = vmul.f32 1.442695, %v1273_v27  ;;  %v2497_v27 = vpop.permute.xlu2 %2496 }
 0x59f   : > { %v1582_v31 = vmul.f32 %v9137_v13, %v11363_v4  ;;  %v1583_v36 = vmul.f32 %v9137_v13, %v11365_v2  ;;  %v11577_v11 = vpop.eup %9138  ;;  %v11583_v4 = vpop.f32.mrf.mxu3  ;;  %v15786_v13 = vld [vmem:[#allocation40_spill] sm:$0xff] }
 0x5a0   : > { %1780 = vmatmul.f32.gmra.mxu3 %v1580_v34  ;;  %1893 = vmatmul.f32.gmra.mxu0 %v1581_v40  ;;  %9140 = vpow2.f32 %v1398_v42 }
 0x5a5   : > { %8748 = vrot.lane.b32.xlu1 %v8747_v57, %s9823_s13  ;;  %v11587_v30 = vpop.f32.mrf.mxu0 }
 0x5a6   : > { %v11579_v24 = vpop.eup %9140 }
 0x5a7   : > { %v1494_v2 = vadd.f32 %v11579_v24, %v11577_v11  ;;  %v11589_v34 = vpop.f32.mrf.mxu3 }
 0x5a8   : > { %1783 = vmatmul.f32.gmra.mxu3 %v1582_v31  ;;  %1896 = vmatmul.f32.gmra.mxu0 %v1583_v36  ;;  %v15787_v31 = vld [vmem:[#allocation39_spill] sm:$0xff] }
 0x5ad   : > { %8758 = vrot.lane.b32.xlu1 %v8757_v39, %s9823_s13  ;;  %v11591_v40 = vpop.f32.mrf.mxu0  ;;  %v2499_v39 = vpop.permute.xlu2 %2498 }
 0x5af   : > { %v11593_v28 = vpop.f32.mrf.mxu3 }
 0x5b5   : > { %1495 = vadd.xlane.f32.xlu2 %v1494_v2  ;;  %v11595_v62 = vpop.f32.mrf.mxu0 }
 0x5b7   : > { %v11597_v33 = vpop.f32.mrf.mxu3 }
 0x5bd   : > { %v11604_v42 = vpop.f32.mrf.mxu0 }
 0x5bf   : > { %v1493_v57 = vpop.xlane.xlu1 %1492  ;;  %v11608_v36 = vpop.f32.mrf.mxu3 }
 0x5c5   : > { %v11613_v56 = vpop.f32.mrf.mxu0 }
 0x5c7   : > { %v11616_v20 = vpop.f32.mrf.mxu3 }
 0x5cd   : > { %2478 = vrot.lane.b32.xlu2 %v15786_v13, %s9822_s12  ;;  %v8752_v13 = vpack.i.bf16 %v15789_v60, %v11275_v52  ;;  %v11621_v8 = vpop.f32.mrf.mxu0 }
 0x5ce   : > { %15790 = vst [vmem:[#allocation7_spill] sm:$0xff] %v11621_v8 }
 0x5d5   : > { %2476 = vrot.lane.b32.xlu2 %v15787_v31, %s9822_s12 }
 0x5d7   : > { %v2451_v2 = vpop.permute.xlu1 %2450 }
 0x5d8   : > { %8095 = vmatpush.xpose.msk.msrb.mxu2 %vm729_vm1, %v2451_v2 }
 0x5dd   : > { %2446 = vrot.lane.b32.xlu2 %v15788_v48, %s9822_s12 }
 0x5df   : > { %v2449_v7 = vpop.permute.xlu1 %2448  ;;  %v1484_v50 = vpop.xlane.xlu2 %1483 }
 0x5e0   : > { %9142 = vrcp.f32 %v1484_v50  ;;  %8096 = vmatpush.xpose.msk.msrb.mxu2 %vm729_vm1, %v2449_v7  ;;  %v11627_v50 = vpop.f32.mrf.mxu3 }
 0x5e5   : > { %8753 = vrot.lane.b32.xlu2 %v8752_v13, %s9823_s13 }
 0x5e6   : > { %v9143_v31 = vpop.eup %9142 }
 0x5e7   : > { %v11623_v2 = vpop.permute.xlu1 %2444  ;;  %v1487_v14 = vpop.xlane.xlu2 %1486  ;;  %v1584_v0 = vmul.f32 %v9143_v31, %v11490_v46  ;;  %v1585_v47 = vmul.f32 %v9143_v31, %v11494_v9 }
 0x5e8   : > { %9144 = vrcp.f32 %v1487_v14  ;;  %v11633_v46 = vpop.f32.mrf.mxu0  ;;  %v11635_v9 = vpop.f32.mrf.mxu3 }
 0x5e9   : > { %1786 = vmatmul.f32.gmra.mxu3 %v1584_v0  ;;  %1899 = vmatmul.f32.gmra.mxu0 %v1585_v47  ;;  %9146 = vrcp.f32 %v11453_v23 }
 0x5ea   : > { %9148 = vrcp.f32 %v1493_v57 }
 0x5ee   : > { %v9145_v7 = vpop.eup %9144 }
 0x5ef   : > { %v8719_v52 = vpop.permute.xlu1 %8718  ;;  %v2503_v13 = vpop.permute.xlu2 %2502  ;;  %v1586_v44 = vmul.f32 %v9145_v7, %v11502_v41  ;;  %v1587_v55 = vmul.f32 %v9145_v7, %v11506_v51 }
 0x5f0   : > { %v8720_v8 = vunpack.i.l.bf16 %v8719_v52  ;;  %8133 = vmatpush.xpose.msk.msra.mxu0 %vm729_vm1, %v2503_v13  ;;  %v8721_v14 = vunpack.i.h.bf16 %v8719_v52  ;;  %v9147_v0 = vpop.eup %9146  ;;  %v8744_v13 = vpop.permute.xlu0 %8743 }
 0x5f1   : > { %1789 = vmatmul.f32.gmra.mxu3 %v1586_v44  ;;  %1902 = vmatmul.f32.gmra.mxu0 %v1587_v55  ;;  %v1588_v41 = vmul.f32 %v9147_v0, %v11303_v16  ;;  %v1589_v51 = vmul.f32 %v9147_v0, %v11307_v45  ;;  %v9149_v44 = vpop.eup %9148 }
 0x5f2   : > { %3470 = vmatpush.msra.mxu3 %v8720_v8  ;;  %v11642_v8 = vpop.f32.mrf.mxu0  ;;  %v1590_v16 = vmul.f32 %v9149_v44, %v11462_v53  ;;  %v1591_v45 = vmul.f32 %v9149_v44, %v11464_v21 }
 0x5f4   : > { %3471 = vmatpush.msra.mxu3 %v8721_v14  ;;  %8134 = vmatpush.xpose.msk.msra.mxu0 %vm729_vm1, %v11536_v5  ;;  %v11645_v5 = vpop.f32.mrf.mxu3 }
 0x5f7   : > { %v8724_v23 = vpop.permute.xlu1 %8723 }
 0x5f8   : > { %v8725_v47 = vunpack.i.l.bf16 %v8724_v23  ;;  %8135 = vmatpush.xpose.msk.msra.mxu0 %vm729_vm1, %v2499_v39  ;;  %v8726_v52 = vunpack.i.h.bf16 %v8724_v23 }
 0x5f9   : > { %1792 = vmatmul.f32.gmra.mxu3 %v1588_v41  ;;  %1905 = vmatmul.f32.gmra.mxu0 %v1589_v51  ;;  %v8746_v41 = vunpack.i.h.bf16 %v8744_v13  ;;  %v8745_v51 = vunpack.i.l.bf16 %v8744_v13 }
 0x5fa   : > { %3472 = vmatpush.msra.mxu3 %v8725_v47 }
 0x5fc   : > { %3473 = vmatpush.msra.mxu3 %v8726_v52  ;;  %8136 = vmatpush.xpose.msk.msra.mxu0 %vm729_vm1, %v2497_v27  ;;  %v11655_v27 = vpop.f32.mrf.mxu0  ;;  %v11659_v39 = vpop.f32.mrf.mxu3 }
 0x5ff   : > { %v11647_v55 = vpop.permute.xlu1 %8728 }
 0x600   : > { %v8731_v57 = vunpack.i.h.bf16 %v11647_v55  ;;  %v8730_v31 = vunpack.i.l.bf16 %v11647_v55  ;;  %8137 = vmatpush.xpose.msk.msra.mxu0 %vm729_vm1, %v11538_v26 }
 0x601   : > { %1795 = vmatmul.f32.gmra.mxu3 %v1590_v16  ;;  %1908 = vmatmul.f32.gmra.mxu0 %v1591_v45 }
 0x602   : > { %3474 = vmatpush.msra.mxu3 %v8731_v57  ;;  %8610 = vmatpush.msra.mxu1 %v8730_v31 }
 0x604   : > { %8138 = vmatpush.xpose.msk.msra.mxu0 %vm729_vm1, %v11441_v6  ;;  %v11665_v26 = vpop.f32.mrf.mxu0  ;;  %v11667_v14 = vpop.f32.mrf.mxu3 }
 0x607   : > { %v8734_v53 = vpop.permute.xlu1 %8733 }
 0x608   : > { %v8736_v21 = vunpack.i.h.bf16 %v8734_v53  ;;  %v8735_v7 = vunpack.i.l.bf16 %v8734_v53  ;;  %8139 = vmatpush.xpose.msk.msra.mxu0 %vm729_vm1, %v11508_v32 }
 0x60a   : > { %3475 = vmatpush.msra.mxu3 %v8736_v21  ;;  %8611 = vmatpush.msra.mxu1 %v8735_v7 }
 0x60c   : > { %8140 = vmatpush.xpose.msk.msra.mxu0 %vm729_vm1, %v11436_v58  ;;  %v11673_v58 = vpop.f32.mrf.mxu0  ;;  %v11675_v44 = vpop.f32.mrf.mxu3 }
 0x60f   : > { %v8739_v0 = vpop.permute.xlu1 %8738 }
 0x610   : > { %v8741_v6 = vunpack.i.h.bf16 %v8739_v0  ;;  %v8740_v23 = vunpack.i.l.bf16 %v8739_v0  ;;  %8141 = vmatpush.xpose.msk.msra.mxu0 %vm729_vm1, %v11496_v37 }
 0x612   : > { %3476 = vmatpush.msra.mxu3 %v8741_v6  ;;  %8612 = vmatpush.msra.mxu1 %v8740_v23 }
 0x614   : > { %3477 = vmatpush.msra.mxu3 %v8746_v41  ;;  %8613 = vmatpush.msra.mxu1 %v8745_v51  ;;  %v11681_v37 = vpop.f32.mrf.mxu0  ;;  %v11683_v55 = vpop.f32.mrf.mxu3 }
 0x615   : > { %8142 = vmatpush.xpose.msk.msra.mxu0 %vm729_vm1, %v11473_v25 }
 0x617   : > { %v8749_v32 = vpop.permute.xlu1 %8748 }
 0x618   : > { %v8751_v47 = vunpack.i.h.bf16 %v8749_v32  ;;  %v8750_v52 = vunpack.i.l.bf16 %v8749_v32 }
 0x619   : > { %8143 = vmatpush.xpose.msk.msra.mxu0 %vm729_vm1, %v11469_v63 }
 0x61a   : > { %3478 = vmatpush.msra.mxu3 %v8751_v47  ;;  %8614 = vmatpush.msra.mxu1 %v8750_v52 }
 0x61c   : > { %v11685_v16 = vpop.f32.mrf.mxu0  ;;  %v11687_v45 = vpop.f32.mrf.mxu3 }
 0x61d   : > { %8144 = vmatpush.xpose.msk.msra.mxu0 %vm729_vm1, %v11455_v61 }
 0x624   : > { %v11693_v13 = vpop.f32.mrf.mxu0  ;;  %v11695_v0 = vpop.f32.mrf.mxu3 }
 0x628   : > { %v1496_v25 = vpop.xlane.xlu2 %1495 }
 0x629   : > { %9150 = vrcp.f32 %v1496_v25 }
 0x62a   : > { %9152 = vrcp.f32 %v11520_v19  ;;  %v11703_v19 = vld [vmem:[%s15549_s2 + $0x1] ss:$0 sm:$0xff] }
 0x62c   : > { %v11711_v47 = vpop.f32.mrf.mxu3 }
 0x62f   : > { %v9151_v57 = vpop.eup %9150 }
 0x630   : > { %v2479_v53 = vpop.permute.xlu2 %2478  ;;  %v1592_v63 = vmul.f32 %v9151_v57, %v11577_v11  ;;  %v1593_v21 = vmul.f32 %v9151_v57, %v11579_v24  ;;  %v9153_v61 = vpop.eup %9152  ;;  %v2283_v24 = vadd.f32 %v11703_v19, %v15774_v3 }
 0x631   : > { %8145 = vmatpush.xpose.msk.msra.mxu0 %vm729_vm1, %v2479_v53  ;;  %v1594_v41 = vmul.f32 %v9153_v61, %v11395_v38  ;;  %v1595_v32 = vmul.f32 %v9153_v61, %v11399_v54  ;;  %v11705_v11 = vpop.f32.mrf.mxu0  ;;  %v1823_v38 = vadd.f32 %v11544_v22, %v11547_v29  ;;  %v1826_v22 = vadd.f32 %v11554_v18, %v11557_v1  ;;  %v8759_v29 = vpop.permute.xlu1 %8758 }
 0x632   : > { %1798 = vmatmul.f32.gmra.mxu3 %v1592_v63  ;;  %1911 = vmatmul.f32.gmra.mxu0 %v1593_v21  ;;  %v8764_v57 = vpop.permute.xlu0 %8763  ;;  %v8760_v53 = vunpack.i.l.bf16 %v8759_v29  ;;  %v2285_v63 = vadd.f32 %v11703_v19, %v15773_v12  ;;  %v1829_v21 = vadd.f32 %v11568_v49, %v11572_v43 }
 0x633   : > { %v8766_v18 = vunpack.i.h.bf16 %v8764_v57  ;;  %v8765_v1 = vunpack.i.l.bf16 %v8764_v57 }
 0x638   : > { %v2477_v6 = vpop.permute.xlu2 %2476 }
 0x639   : > { %8146 = vmatpush.xpose.msk.msra.mxu0 %vm729_vm1, %v2477_v6 }
 0x63a   : > { %1801 = vmatmul.f32.gmra.mxu3 %v1594_v41  ;;  %1914 = vmatmul.f32.gmra.mxu0 %v1595_v32  ;;  %v2286_v41 = vadd.f32 %v11703_v19, %v15772_v10  ;;  %v1832_v32 = vadd.f32 %v11581_v17, %v11583_v4  ;;  %v2288_v4 = vadd.f32 %v11703_v19, %v15785_v59 }
 0x63d   : > { %3583 = vmatpush.msrb.mxu0 %v8730_v31  ;;  %v2284_v31 = vadd.f32 %v11703_v19, %v15788_v48 }
 0x63f   : > { %3584 = vmatpush.msrb.mxu0 %v8735_v7 }
 0x640   : > { %v2447_v54 = vpop.permute.xlu2 %2446 }
 0x641   : > { %3585 = vmatpush.msrb.mxu0 %v8740_v23  ;;  %8097 = vmatpush.xpose.msk.msrb.mxu2 %vm729_vm1, %v2447_v54  ;;  %v11723_v23 = vpop.f32.mrf.mxu0  ;;  %v1835_v54 = vadd.f32 %v11587_v30, %v11589_v34  ;;  %v2289_v30 = vadd.f32 %v11703_v19, %v15789_v60  ;;  %v1841_v34 = vadd.f32 %v11595_v62, %v11597_v33  ;;  %v15792_v33 = vld [vmem:[#allocation22_spill] sm:$0xff] }
 0x642   : > { %7982 = vmatmul.msk.f32.vlgmr.msrb.gmra.mxu3 %vm729_vm1, %v1823_v38  ;;  %8147 = vmatmul.msk.f32.vlgmr.msra.gmra.mxu0 %vm729_vm1, %v2283_v24 }
 0x643   : > { %3586 = vmatpush.msrb.mxu0 %v8745_v51 }
 0x645   : > { %3587 = vmatpush.msrb.mxu0 %v8750_v52  ;;  %8098 = vmatpush.xpose.msk.msrb.mxu2 %vm729_vm1, %v11623_v2  ;;  %v11727_v2 = vpop.f32.mrf.mxu3  ;;  %v8761_v52 = vunpack.i.h.bf16 %v8759_v29  ;;  %v1844_v29 = vadd.f32 %v11604_v42, %v11608_v36  ;;  %v2292_v36 = vadd.f32 %v11703_v19, %v15781_v15 }
 0x648   : > { %v8754_v7 = vpop.permute.xlu2 %8753  ;;  %8099 = vmatmul.msk.f32.vlgmr.msrb.gmra.mxu2 %vm729_vm1, %v2283_v24  ;;  %v15791_v24 = vld [vmem:[#allocation13_spill] sm:$0xff] }
 0x649   : > { %v8756_v51 = vunpack.i.h.bf16 %v8754_v7  ;;  %v8755_v25 = vunpack.i.l.bf16 %v8754_v7  ;;  %v11736_v61 = vpop.f32.mrf.mxu0  ;;  %v2287_v38 = vadd.f32 %v11703_v19, %v15791_v24  ;;  %v2291_v7 = vadd.f32 %v11703_v19, %v15792_v33 }
 0x64a   : > { %7983 = vmatmul.msk.f32.gmra.mxu3 %vm729_vm1, %v1826_v22  ;;  %8148 = vmatmul.msk.f32.gmra.mxu0 %vm729_vm1, %v2284_v31 }
 0x64b   : > { %3479 = vmatpush.msra.mxu3 %v8756_v51  ;;  %3588 = vmatpush.msrb.mxu0 %v8755_v25  ;;  %v1847_v51 = vadd.f32 %v11613_v56, %v11616_v20 }
 0x64c   : > { %8615 = vmatpush.msra.mxu1 %v8755_v25  ;;  %v15793_v25 = vld [vmem:[#allocation7_spill] sm:$0xff] }
 0x64d   : > { %3480 = vmatpush.msra.mxu3 %v8761_v52  ;;  %3589 = vmatpush.msrb.mxu0 %v8760_v53  ;;  %v11738_v6 = vpop.f32.mrf.mxu3  ;;  %v1850_v57 = vadd.f32 %v15793_v25, %v11627_v50  ;;  %v15794_v52 = vld [vmem:[#allocation29_spill] sm:$0xff]  ;;  %v15795_v50 = vld [vmem:[#allocation32_spill] sm:$0xff] }
 0x64e   : > { %8616 = vmatpush.msra.mxu1 %v8760_v53  ;;  %v2293_v53 = vadd.f32 %v11703_v19, %v15794_v52 }
 0x64f   : > { %3481 = vmatpush.msra.mxu3 %v8766_v18  ;;  %3590 = vmatpush.msrb.mxu0 %v8765_v1  ;;  %v1853_v18 = vadd.f32 %v11633_v46, %v11635_v9  ;;  %v15796_v46 = vld [vmem:[#allocation33_spill] sm:$0xff] }
 0x650   : > { %8617 = vmatpush.msra.mxu1 %v8765_v1  ;;  %8100 = vmatmul.msk.f32.gmra.mxu2 %vm729_vm1, %v2284_v31  ;;  %v1838_v31 = vadd.f32 %v11591_v40, %v11593_v28  ;;  %v2290_v28 = vadd.f32 %v11703_v19, %v15784_v35  ;;  %v2294_v1 = vadd.f32 %v11703_v19, %v15795_v50 }
 0x651   : > { %v11747_v49 = vpop.f32.mrf.mxu0  ;;  %v2295_v9 = vadd.f32 %v11703_v19, %v15796_v46 }
 0x652   : > { %7984 = vmatmul.msk.f32.gmra.mxu3 %vm729_vm1, %v1829_v21  ;;  %8149 = vmatmul.msk.f32.gmra.mxu0 %vm729_vm1, %v2285_v63 }
 0x655   : > { %v11749_v43 = vpop.f32.mrf.mxu3 }
 0x658   : > { %8101 = vmatmul.msk.f32.gmra.mxu2 %vm729_vm1, %v2285_v63  ;;  %v1856_v63 = vadd.f32 %v11642_v8, %v11645_v5  ;;  %v15797_v5 = vld [vmem:[#allocation34_spill] sm:$0xff] }
 0x659   : > { %v11758_v17 = vpop.f32.mrf.mxu0  ;;  %v2296_v24 = vadd.f32 %v11703_v19, %v15797_v5 }
 0x65a   : > { %7985 = vmatmul.msk.f32.gmra.mxu3 %vm729_vm1, %v1832_v32  ;;  %8150 = vmatmul.msk.f32.gmra.mxu0 %vm729_vm1, %v2286_v41 }
 0x65d   : > { %v11765_v22 = vpop.f32.mrf.mxu3 }
 0x660   : > { %8102 = vmatmul.msk.f32.gmra.mxu2 %vm729_vm1, %v2286_v41  ;;  %v1859_v41 = vadd.f32 %v11655_v27, %v11659_v39 }
 0x661   : > { %v11774_v59 = vpop.f32.mrf.mxu0 }
 0x662   : > { %7986 = vmatmul.msk.f32.gmra.mxu3 %vm729_vm1, %v1835_v54  ;;  %8151 = vmatmul.msk.f32.gmra.mxu0 %vm729_vm1, %v2287_v38  ;;  %v15798_v54 = vld [vmem:[#allocation35_spill] sm:$0xff] }
 0x665   : > { %v11778_v40 = vpop.f32.mrf.mxu3 }
 0x668   : > { %8103 = vmatmul.msk.f32.gmra.mxu2 %vm729_vm1, %v2287_v38  ;;  %v1862_v38 = vadd.f32 %v11665_v26, %v11667_v14 }
 0x669   : > { %v11787_v60 = vpop.f32.mrf.mxu0 }
 0x66a   : > { %7987 = vmatmul.msk.f32.gmra.mxu3 %vm729_vm1, %v1838_v31  ;;  %8152 = vmatmul.msk.f32.gmra.mxu0 %vm729_vm1, %v2288_v4  ;;  %v1865_v31 = vadd.f32 %v11673_v58, %v11675_v44 }
 0x66d   : > { %v11789_v62 = vpop.f32.mrf.mxu3 }
 0x670   : > { %8104 = vmatmul.msk.f32.gmra.mxu2 %vm729_vm1, %v2288_v4  ;;  %v2297_v4 = vadd.f32 %v11703_v19, %v15798_v54 }
 0x671   : > { %v11798_v35 = vpop.f32.mrf.mxu0 }
 0x672   : > { %7988 = vmatmul.msk.f32.gmra.mxu3 %vm729_vm1, %v1841_v34  ;;  %8153 = vmatmul.msk.f32.gmra.mxu0 %vm729_vm1, %v2289_v30  ;;  %v15799_v34 = vld [vmem:[#allocation36_spill] sm:$0xff] }
 0x675   : > { %v11800_v42 = vpop.f32.mrf.mxu3 }
 0x678   : > { %8105 = vmatmul.msk.f32.gmra.mxu2 %vm729_vm1, %v2289_v30 }
 0x679   : > { %v11809_v56 = vpop.f32.mrf.mxu0 }
 0x67a   : > { %7989 = vmatmul.msk.f32.gmra.mxu3 %vm729_vm1, %v1844_v29  ;;  %8154 = vmatmul.msk.f32.gmra.mxu0 %vm729_vm1, %v2290_v28  ;;  %v1868_v29 = vadd.f32 %v11681_v37, %v11683_v55  ;;  %v8051_v37 = vld [vmem:[%s15552_s5 + $0x100] sm:$0xff] }
 0x67d   : > { %v11811_v20 = vpop.f32.mrf.mxu3 }
 0x680   : > { %8106 = vmatmul.msk.f32.gmra.mxu2 %vm729_vm1, %v2290_v28  ;;  %v2298_v28 = vadd.f32 %v11703_v19, %v15799_v34  ;;  %v1880_v34 = vadd.f32 %v11723_v23, %v11727_v2  ;;  %v15805_v23 = vld [vmem:[#allocation48_spill] sm:$0xff] }
 0x681   : > { %v11820_v15 = vpop.f32.mrf.mxu0  ;;  %v8767_v2 = vpack.i.bf16 %v15772_v10, %v15805_v23 }
 0x682   : > { %7990 = vmatmul.msk.f32.gmra.mxu3 %vm729_vm1, %v1847_v51  ;;  %8155 = vmatmul.msk.f32.gmra.mxu0 %vm729_vm1, %v2291_v7 }
 0x685   : > { %v11827_v21 = vpop.f32.mrf.mxu3 }
 0x688   : > { %8107 = vmatmul.msk.f32.gmra.mxu2 %vm729_vm1, %v2291_v7  ;;  %v15800_v7 = vld [vmem:[#allocation39_spill] sm:$0xff] }
 0x689   : > { %v11836_v32 = vpop.f32.mrf.mxu0  ;;  %v2299_v51 = vadd.f32 %v11703_v19, %v15800_v7 }
 0x68a   : > { %7991 = vmatmul.msk.f32.gmra.mxu3 %vm729_vm1, %v1850_v57  ;;  %8156 = vmatmul.msk.f32.gmra.mxu0 %vm729_vm1, %v2292_v36  ;;  %v15801_v57 = vld [vmem:[#allocation40_spill] sm:$0xff] }
 0x68b   : > { %v2300_v52 = vadd.f32 %v11703_v19, %v15801_v57 }
 0x68d   : > { %v11840_v8 = vpop.f32.mrf.mxu3 }
 0x690   : > { %8108 = vmatmul.msk.f32.gmra.mxu2 %vm729_vm1, %v2292_v36  ;;  %v1871_v36 = vadd.f32 %v11685_v16, %v11687_v45  ;;  %v1874_v16 = vadd.f32 %v11693_v13, %v11695_v0  ;;  %v2349_v45 = vunpack.c.h.bf16 %v8051_v37  ;;  %v15802_v0 = vld [vmem:[#allocation41_spill] sm:$0xff] }
 0x691   : > { %v11849_v27 = vpop.f32.mrf.mxu0 }
 0x692   : > { %7992 = vmatmul.msk.f32.gmra.mxu3 %vm729_vm1, %v1853_v18  ;;  %8157 = vmatmul.msk.f32.gmra.mxu0 %vm729_vm1, %v2293_v53 }
 0x695   : > { %v11851_v39 = vpop.f32.mrf.mxu3 }
 0x698   : > { %8109 = vmatmul.msk.f32.gmra.mxu2 %vm729_vm1, %v2293_v53  ;;  %v2348_v53 = vunpack.c.l.bf16 %v8051_v37 }
 0x69a   : > { %7993 = vmatmul.msk.f32.gmra.mxu3 %vm729_vm1, %v1856_v63  ;;  %8158 = vmatmul.msk.f32.gmra.mxu0 %vm729_vm1, %v2294_v1  ;;  %v8052_v63 = vld [vmem:[%s15552_s5 + $0x108] sm:$0xff] }
 0x69b   : > { %v2351_v5 = vunpack.c.h.bf16 %v8052_v63 }
 0x6a0   : > { %8110 = vmatmul.msk.f32.gmra.mxu2 %vm729_vm1, %v2294_v1 }
 0x6a2   : > { %7994 = vmatmul.msk.f32.gmra.mxu3 %vm729_vm1, %v1859_v41  ;;  %8159 = vmatmul.msk.f32.gmra.mxu0 %vm729_vm1, %v2295_v9  ;;  %v1877_v41 = vadd.f32 %v11705_v11, %v11711_v47  ;;  %v15803_v11 = vld [vmem:[#allocation42_spill] sm:$0xff] }
 0x6a3   : > { %v2302_v47 = vadd.f32 %v11703_v19, %v15803_v11 }
 0x6a8   : > { %8111 = vmatmul.msk.f32.gmra.mxu2 %vm729_vm1, %v2295_v9  ;;  %v2301_v9 = vadd.f32 %v11703_v19, %v15802_v0 }
 0x6aa   : > { %7995 = vmatmul.msk.f32.gmra.mxu3 %vm729_vm1, %v1862_v38  ;;  %8160 = vmatmul.msk.f32.gmra.mxu0 %vm729_vm1, %v2296_v24 }
 0x6af   : > { %v1912_v26 = vpop.f32.mrf.mxu0 }
 0x6b0   : > { %8112 = vmatmul.msk.f32.gmra.mxu2 %vm729_vm1, %v2296_v24  ;;  %v2350_v24 = vunpack.c.l.bf16 %v8052_v63 }
 0x6b2   : > { %7996 = vmatmul.msk.f32.gmra.mxu3 %vm729_vm1, %v1865_v31  ;;  %8161 = vmatmul.msk.f32.gmra.mxu0 %vm729_vm1, %v2297_v4 }
 0x6b5   : > { %v1799_v14 = vpop.f32.mrf.mxu3 }
 0x6b6   : > { %v11860_v30 = vadd.f32 %v1912_v26, %v1799_v14 }
 0x6b7   : > { %v1915_v58 = vpop.f32.mrf.mxu0 }
 0x6b8   : > { %8113 = vmatmul.msk.f32.gmra.mxu2 %vm729_vm1, %v2297_v4 }
 0x6ba   : > { %7997 = vmatmul.msk.f32.gmra.mxu3 %vm729_vm1, %v1868_v29  ;;  %8162 = vmatmul.msk.f32.gmra.mxu0 %vm729_vm1, %v2298_v28  ;;  %v15804_v29 = vld [vmem:[#allocation43_spill] sm:$0xff] }
 0x6bd   : > { %v1802_v44 = vpop.f32.mrf.mxu3 }
 0x6be   : > { %v11869_v33 = vadd.f32 %v1915_v58, %v1802_v44  ;;  %v2303_v58 = vadd.f32 %v11703_v19, %v15804_v29  ;;  %v1883_v44 = vadd.f32 %v11736_v61, %v11738_v6  ;;  %v1886_v61 = vadd.f32 %v11747_v49, %v11749_v43 }
 0x6bf   : > { %v2798_v25 = vpop.f32.mrf.mxu0  ;;  %v1889_v43 = vadd.f32 %v11758_v17, %v11765_v22  ;;  %v2306_v17 = vadd.f32 %v11703_v19, %v15805_v23  ;;  %v1892_v22 = vadd.f32 %v11774_v59, %v11778_v40  ;;  %v1895_v59 = vadd.f32 %v11787_v60, %v11789_v62 }
 0x6c0   : > { %8114 = vmatmul.msk.f32.gmra.mxu2 %vm729_vm1, %v2298_v28  ;;  %v11889_v50 = vadd.f32 %v2798_v25, %v2349_v45  ;;  %v1898_v60 = vadd.f32 %v11798_v35, %v11800_v42  ;;  %v1901_v35 = vadd.f32 %v11809_v56, %v11811_v20 }
 0x6c2   : > { %7998 = vmatmul.msk.f32.gmra.mxu3 %vm729_vm1, %v1871_v36  ;;  %8163 = vmatmul.msk.f32.gmra.mxu0 %vm729_vm1, %v2299_v51  ;;  %v15806_v36 = vld [vmem:[#allocation46_spill] sm:$0xff] }
 0x6c3   : > { %v2304_v37 = vadd.f32 %v11703_v19, %v15806_v36  ;;  %v8777_v10 = vpack.i.bf16 %v15788_v48, %v15806_v36 }
 0x6c5   : > { %v2032_v55 = vpop.f32.mrf.mxu3 }
 0x6c6   : > { %2128 = vst.msk [vmem:[#allocation2] sm:$0xff] %vm291_vm0, %v2032_v55 }
 0x6c7   : > { %v2801_v38 = vpop.f32.mrf.mxu0 }
 0x6c8   : > { %8115 = vmatmul.msk.f32.gmra.mxu2 %vm729_vm1, %v2299_v51  ;;  %v11906_v4 = vadd.f32 %v2801_v38, %v2351_v5 }
 0x6ca   : > { %7999 = vmatmul.msk.f32.gmra.mxu3 %vm729_vm1, %v1874_v16  ;;  %8164 = vmatmul.msk.f32.gmra.mxu0 %vm729_vm1, %v2300_v52 }
 0x6cb   : > { %v2685_v18 = vpop.f32.mrf.mxu2 }
 0x6cc   : > { %v11891_v1 = vadd.f32 %v2685_v18, %v2348_v53 }
 0x6cd   : > { %v2035_v46 = vpop.f32.mrf.mxu3 }
 0x6ce   : > { %2129 = vst.msk [vmem:[#allocation2 + $0x8] sm:$0xff] %vm291_vm0, %v2035_v46  ;;  %v2894_v13 = vmax.f32 %v11891_v1, %v11889_v50  ;;  %v15808_v46 = vld [vmem:[#allocation49_spill] sm:$0xff] }
 0x6cf   : > { %v11943_v55 = vpop.f32.mrf.mxu0 }
 0x6d0   : > { %8116 = vmatmul.msk.f32.gmra.mxu2 %vm729_vm1, %v2300_v52  ;;  %2895 = vmax.xlane.f32.xlu0 %v2894_v13  ;;  %v15807_v52 = vld [vmem:[#allocation47_spill] sm:$0xff]  ;;  %v2307_v13 = vadd.f32 %v11703_v19, %v15808_v46 }
 0x6d1   : > { %v8772_v16 = vpack.i.bf16 %v15773_v12, %v15807_v52  ;;  %v2305_v49 = vadd.f32 %v11703_v19, %v15807_v52  ;;  %v8782_v12 = vpack.i.bf16 %v15774_v3, %v15804_v29  ;;  %v8787_v3 = vpack.i.bf16 %v15802_v0, %v15803_v11  ;;  %v15814_v52 = vld [vmem:[#allocation19_spill] sm:$0xff] }
 0x6d2   : > { %8000 = vmatmul.msk.f32.gmra.mxu3 %vm729_vm1, %v1877_v41  ;;  %8165 = vmatmul.msk.f32.gmra.mxu0 %vm729_vm1, %v2301_v9  ;;  %v15809_v41 = vld [vmem:[#allocation24_spill] sm:$0xff] }
 0x6d3   : > { %v2688_v54 = vpop.f32.mrf.mxu2  ;;  %v2308_v5 = vadd.f32 %v11703_v19, %v15809_v41 }
 0x6d4   : > { %v11908_v31 = vadd.f32 %v2688_v54, %v2350_v24 }
 0x6d5   : > { %v2038_v26 = vpop.f32.mrf.mxu3 }
 0x6d6   : > { %v2897_v14 = vmax.f32 %v11908_v31, %v11906_v4  ;;  %2130 = vst.msk [vmem:[#allocation2 + $0x10] sm:$0xff] %vm291_vm0, %v2038_v26 }
 0x6d7   : > { %v11961_v53 = vpop.f32.mrf.mxu0 }
 0x6d8   : > { %8117 = vmatmul.msk.f32.gmra.mxu2 %vm729_vm1, %v2301_v9  ;;  %2898 = vmax.xlane.f32.xlu2 %v2897_v14  ;;  %v8792_v9 = vpack.i.bf16 %v15800_v7, %v15801_v57  ;;  %v15810_v57 = vld [vmem:[#allocation50_spill] sm:$0xff]  ;;  %v15811_v14 = vld [vmem:[#allocation27_spill] sm:$0xff] }
 0x6d9   : > { %v2309_v38 = vadd.f32 %v11703_v19, %v15810_v57  ;;  %v2310_v11 = vadd.f32 %v11703_v19, %v15811_v14 }
 0x6da   : > { %8001 = vmatmul.msk.f32.gmra.mxu3 %vm729_vm1, %v1880_v34  ;;  %8166 = vmatmul.msk.f32.gmra.mxu0 %vm729_vm1, %v2302_v47 }
 0x6db   : > { %v11937_v6 = vpop.f32.mrf.mxu2 }
 0x6dd   : > { %v2041_v28 = vpop.f32.mrf.mxu3 }
 0x6de   : > { %2131 = vst.msk [vmem:[#allocation2 + $0x18] sm:$0xff] %vm291_vm0, %v2041_v28  ;;  %v15812_v28 = vld [vmem:[#allocation3_spill] sm:$0xff] }
 0x6df   : > { %v11981_v40 = vpop.f32.mrf.mxu0  ;;  %v2311_v29 = vadd.f32 %v11703_v19, %v15812_v28 }
 0x6e0   : > { %8118 = vmatmul.msk.f32.gmra.mxu2 %vm729_vm1, %v2302_v47  ;;  %v1904_v47 = vadd.f32 %v11820_v15, %v11827_v21  ;;  %v8053_v21 = vld [vmem:[%s15552_s5 + $0x110] sm:$0xff] }
 0x6e1   : > { %v2352_v23 = vunpack.c.l.bf16 %v8053_v21  ;;  %v2353_v36 = vunpack.c.h.bf16 %v8053_v21 }
 0x6e2   : > { %8002 = vmatmul.msk.f32.gmra.mxu3 %vm729_vm1, %v1883_v44  ;;  %8167 = vmatmul.msk.f32.gmra.mxu0 %vm729_vm1, %v2303_v58 }
 0x6e3   : > { %v11957_v48 = vpop.f32.mrf.mxu2 }
 0x6e4   : > { %8768 = vrot.lane.b32.xlu0 %v8767_v2, %s9823_s13  ;;  %v15813_v2 = vld [vmem:[#allocation4_spill] sm:$0xff] }
 0x6e5   : > { %v2044_v51 = vpop.f32.mrf.mxu3 }
 0x6e6   : > { %2132 = vst.msk [vmem:[#allocation2 + $0x20] sm:$0xff] %vm291_vm0, %v2044_v51  ;;  %v2312_v51 = vadd.f32 %v11703_v19, %v15813_v2 }
 0x6e7   : > { %v11998_v24 = vpop.f32.mrf.mxu0 }
 0x6e8   : > { %8119 = vmatmul.msk.f32.gmra.mxu2 %vm729_vm1, %v2303_v58  ;;  %v1907_v58 = vadd.f32 %v11836_v32, %v11840_v8  ;;  %v1910_v32 = vadd.f32 %v11849_v27, %v11851_v39  ;;  %v8060_v27 = vld [vmem:[%s15552_s5 + $0x148] sm:$0xff] }
 0x6ea   : > { %8003 = vmatmul.msk.f32.gmra.mxu3 %vm729_vm1, %v1886_v61  ;;  %8168 = vmatmul.msk.f32.gmra.mxu0 %vm729_vm1, %v2304_v37  ;;  %v12053_v61 = vadd.f32 %v11943_v55, %v2353_v36 }
 0x6eb   : > { %v11974_v63 = vpop.f32.mrf.mxu2 }
 0x6ec   : > { %8778 = vrot.lane.b32.xlu0 %v8777_v10, %s9823_s13 }
 0x6ed   : > { %v2047_v25 = vpop.f32.mrf.mxu3 }
 0x6ee   : > { %2133 = vst.msk [vmem:[#allocation2 + $0x28] sm:$0xff] %vm291_vm0, %v2047_v25  ;;  %v2366_v25 = vunpack.c.l.bf16 %v8060_v27 }
 0x6ef   : > { %v12012_v54 = vpop.f32.mrf.mxu0 }
 0x6f0   : > { %8120 = vmatmul.msk.f32.gmra.mxu2 %vm729_vm1, %v2304_v37  ;;  %8773 = vrot.lane.b32.xlu2 %v8772_v16, %s9823_s13  ;;  %v12050_v37 = vadd.f32 %v11937_v6, %v2352_v23  ;;  %v2313_v16 = vadd.f32 %v11703_v19, %v15814_v52  ;;  %v2367_v6 = vunpack.c.h.bf16 %v8060_v27 }
 0x6f2   : > { %8004 = vmatmul.msk.f32.gmra.mxu3 %vm729_vm1, %v1889_v43  ;;  %8169 = vmatmul.msk.f32.gmra.mxu0 %vm729_vm1, %v2305_v49  ;;  %v2900_v39 = vmax.f32 %v12050_v37, %v12053_v61 }
 0x6f3   : > { %v11994_v62 = vpop.f32.mrf.mxu2 }
 0x6f5   : > { %v2050_v45 = vpop.f32.mrf.mxu3 }
 0x6f6   : > { %2134 = vst.msk [vmem:[#allocation2 + $0x30] sm:$0xff] %vm291_vm0, %v2050_v45 }
 0x6f7   : > { %v12024_v34 = vpop.f32.mrf.mxu0 }
 0x6f8   : > { %8121 = vmatmul.msk.f32.gmra.mxu2 %vm729_vm1, %v2305_v49  ;;  %8783 = vrot.lane.b32.xlu2 %v8782_v12, %s9823_s13 }
 0x6fa   : > { %8005 = vmatmul.msk.f32.gmra.mxu3 %vm729_vm1, %v1892_v22  ;;  %8170 = vmatmul.msk.f32.gmra.mxu0 %vm729_vm1, %v2306_v17  ;;  %v15815_v22 = vld [vmem:[#allocation20_spill] sm:$0xff] }
 0x6fb   : > { %v12008_v42 = vpop.f32.mrf.mxu2 }
 0x6fd   : > { %v2053_v18 = vpop.f32.mrf.mxu3 }
 0x6fe   : > { %2135 = vst.msk [vmem:[#allocation2 + $0x38] sm:$0xff] %vm291_vm0, %v2053_v18  ;;  %v2314_v18 = vadd.f32 %v11703_v19, %v15815_v22 }
 0x6ff   : > { %v12044_v8 = vpop.f32.mrf.mxu0 }
 0x700   : > { %8122 = vmatmul.msk.f32.gmra.mxu2 %vm729_vm1, %v2306_v17  ;;  %8788 = vrot.lane.b32.xlu2 %v8787_v3, %s9823_s13 }
 0x702   : > { %8006 = vmatmul.msk.f32.gmra.mxu3 %vm729_vm1, %v1895_v59  ;;  %8171 = vmatmul.msk.f32.gmra.mxu0 %vm729_vm1, %v2307_v13 }
 0x703   : > { %v12022_v56 = vpop.f32.mrf.mxu2 }
 0x705   : > { %v2056_v0 = vpop.f32.mrf.mxu3 }
 0x706   : > { %2136 = vst.msk [vmem:[#allocation2 + $0x40] sm:$0xff] %vm291_vm0, %v2056_v0 }
 0x707   : > { %v2825_v55 = vpop.f32.mrf.mxu0 }
 0x708   : > { %8123 = vmatmul.msk.f32.gmra.mxu2 %vm729_vm1, %v2307_v13  ;;  %8793 = vrot.lane.b32.xlu2 %v8792_v9, %s9823_s13  ;;  %v12069_v45 = vadd.f32 %v2825_v55, %v2367_v6 }
 0x70a   : > { %8007 = vmatmul.msk.f32.gmra.mxu3 %vm729_vm1, %v1898_v60  ;;  %8172 = vmatmul.msk.f32.gmra.mxu0 %vm729_vm1, %v2308_v5 }
 0x70b   : > { %v12037_v44 = vpop.f32.mrf.mxu2 }
 0x70d   : > { %v2059_v7 = vpop.f32.mrf.mxu3 }
 0x70e   : > { %2137 = vst.msk [vmem:[#allocation2 + $0x48] sm:$0xff] %vm291_vm0, %v2059_v7 }
 0x710   : > { %8124 = vmatmul.msk.f32.gmra.mxu2 %vm729_vm1, %v2308_v5 }
 0x712   : > { %8008 = vmatmul.msk.f32.gmra.mxu3 %vm729_vm1, %v1901_v35  ;;  %8173 = vmatmul.msk.f32.gmra.mxu0 %vm729_vm1, %v2309_v38 }
 0x713   : > { %v2712_v49 = vpop.f32.mrf.mxu2 }
 0x714   : > { %v12067_v43 = vadd.f32 %v2712_v49, %v2366_v25 }
 0x715   : > { %v2062_v26 = vpop.f32.mrf.mxu3 }
 0x716   : > { %2138 = vst.msk [vmem:[#allocation2 + $0x50] sm:$0xff] %vm291_vm0, %v2062_v26  ;;  %v2921_v17 = vmax.f32 %v12067_v43, %v12069_v45 }
 0x718   : > { %8125 = vmatmul.msk.f32.gmra.mxu2 %vm729_vm1, %v2309_v38 }
 0x71a   : > { %8009 = vmatmul.msk.f32.gmra.mxu3 %vm729_vm1, %v1904_v47  ;;  %8174 = vmatmul.msk.f32.gmra.mxu0 %vm729_vm1, %v2310_v11 }
 0x71d   : > { %v2065_v20 = vpop.f32.mrf.mxu3 }
 0x71e   : > { %2139 = vst.msk [vmem:[#allocation2 + $0x58] sm:$0xff] %vm291_vm0, %v2065_v20 }
 0x720   : > { %8126 = vmatmul.msk.f32.gmra.mxu2 %vm729_vm1, %v2310_v11 }
 0x722   : > { %8010 = vmatmul.msk.f32.gmra.mxu3 %vm729_vm1, %v1907_v58  ;;  %8175 = vmatmul.msk.f32.gmra.mxu0 %vm729_vm1, %v2311_v29 }
 0x725   : > { %v2068_v15 = vpop.f32.mrf.mxu3 }
 0x726   : > { %2140 = vst.msk [vmem:[#allocation2 + $0x60] sm:$0xff] %vm291_vm0, %v2068_v15 }
 0x728   : > { %8127 = vmatmul.msk.f32.gmra.mxu2 %vm729_vm1, %v2311_v29  ;;  %v8055_v29 = vld [vmem:[%s15552_s5 + $0x120] sm:$0xff] }
 0x72a   : > { %8011 = vmatmul.msk.f32.gmra.mxu3 %vm729_vm1, %v1910_v32  ;;  %8176 = vmatmul.msk.f32.gmra.mxu0 %vm729_vm1, %v2312_v51  ;;  %v2357_v32 = vunpack.c.h.bf16 %v8055_v29 }
 0x72d   : > { %v2071_v10 = vpop.f32.mrf.mxu3 }
 0x72e   : > { %2141 = vst.msk [vmem:[#allocation2 + $0x68] sm:$0xff] %vm291_vm0, %v2071_v10 }
 0x730   : > { %8128 = vmatmul.msk.f32.gmra.mxu2 %vm729_vm1, %v2312_v51 }
 0x731   : > { %2901 = vmax.xlane.f32.xlu2 %v2900_v39 }
 0x732   : > { %8012 = vmatmul.msk.f32.gmra.mxu3 %vm729_vm1, %v11860_v30  ;;  %8177 = vmatmul.msk.f32.gmra.mxu0 %vm729_vm1, %v2313_v16 }
 0x735   : > { %v2074_v12 = vpop.f32.mrf.mxu3 }
 0x736   : > { %2142 = vst.msk [vmem:[#allocation2 + $0x70] sm:$0xff] %vm291_vm0, %v2074_v12 }
 0x738   : > { %8129 = vmatmul.msk.f32.gmra.mxu2 %vm729_vm1, %v2313_v16  ;;  %v12125_v16 = vadd.f32 %v11981_v40, %v2357_v32 }
 0x739   : > { %2922 = vmax.xlane.f32.xlu2 %v2921_v17 }
 0x73a   : > { %8013 = vmatmul.msk.f32.gmra.mxu3 %vm729_vm1, %v11869_v33  ;;  %8178 = vmatmul.msk.f32.gmra.mxu0 %vm729_vm1, %v2314_v18 }
 0x73d   : > { %v2077_v30 = vpop.f32.mrf.mxu3 }
 0x73e   : > { %2143 = vst.msk [vmem:[#allocation2 + $0x78] sm:$0xff] %vm291_vm0, %v2077_v30 }
 0x740   : > { %8130 = vmatmul.msk.f32.gmra.mxu2 %vm729_vm1, %v2314_v18 }
 0x743   : > { %v2896_v3 = vpop.xlane.xlu0 %2895 }
 0x744   : > { %v2990_v46 = vsub.f32 %v11891_v1, %v2896_v3  ;;  %v2991_v13 = vsub.f32 %v11889_v50, %v2896_v3  ;;  %v8054_v1 = vld [vmem:[%s15552_s5 + $0x118] sm:$0xff] }
 0x745   : > { %v2080_v59 = vpop.f32.mrf.mxu3  ;;  %v2354_v38 = vunpack.c.l.bf16 %v8054_v1 }
 0x746   : > { %v3054_v19 = vmul.f32 1.442695, %v2990_v46  ;;  %v3056_v0 = vmul.f32 1.442695, %v2991_v13  ;;  %2144 = vst.msk [vmem:[#allocation2 + $0x80] sm:$0xff] %vm291_vm0, %v2080_v59 }
 0x747   : > { %v12098_v26 = vadd.f32 %v11957_v48, %v2354_v38  ;;  %v8057_v48 = vld [vmem:[%s15552_s5 + $0x130] sm:$0xff] }
 0x748   : > { %9154 = vpow2.f32 %v3054_v19  ;;  %v2360_v23 = vunpack.c.l.bf16 %v8057_v48  ;;  %v2361_v36 = vunpack.c.h.bf16 %v8057_v48 }
 0x749   : > { %9156 = vpow2.f32 %v3056_v0 }
 0x74a   : > { %v12122_v25 = vadd.f32 %v12008_v42, %v2360_v23  ;;  %v12128_v49 = vadd.f32 %v12012_v54, %v2361_v36  ;;  %v8059_v42 = vld [vmem:[%s15552_s5 + $0x140] sm:$0xff] }
 0x74b   : > { %v2899_v33 = vpop.xlane.xlu2 %2898  ;;  %v2364_v22 = vunpack.c.l.bf16 %v8059_v42  ;;  %v2365_v3 = vunpack.c.h.bf16 %v8059_v42 }
 0x74c   : > { %v2992_v9 = vsub.f32 %v11908_v31, %v2899_v33  ;;  %v2993_v41 = vsub.f32 %v11906_v4, %v2899_v33  ;;  %v2355_v4 = vunpack.c.h.bf16 %v8054_v1  ;;  %v2912_v54 = vmax.f32 %v12122_v25, %v12128_v49 }
 0x74d   : > { %v2083_v5 = vpop.f32.mrf.mxu3  ;;  %v12145_v19 = vadd.f32 %v12037_v44, %v2364_v22 }
 0x74e   : > { %v12087_v60 = vpop.eup %9154  ;;  %v3058_v7 = vmul.f32 1.442695, %v2992_v9  ;;  %v3060_v57 = vmul.f32 1.442695, %v2993_v41  ;;  %2145 = vst.msk [vmem:[#allocation2 + $0x88] sm:$0xff] %vm291_vm0, %v2083_v5  ;;  %v12103_v47 = vadd.f32 %v11961_v53, %v2355_v4  ;;  %v2356_v53 = vunpack.c.l.bf16 %v8055_v29  ;;  %v2828_v29 = vpop.f32.mrf.mxu0 }
 0x74f   : > { %v12090_v50 = vpop.eup %9156  ;;  %v12151_v41 = vadd.f32 %v12044_v8, %v2365_v3 }
 0x750   : > { %9158 = vpow2.f32 %v3058_v7  ;;  %v3182_v31 = vadd.f32 %v12090_v50, %v12087_v60  ;;  %v2903_v21 = vmax.f32 %v12098_v26, %v12103_v47  ;;  %v12119_v39 = vadd.f32 %v11974_v63, %v2356_v53  ;;  %v8056_v63 = vld [vmem:[%s15552_s5 + $0x128] sm:$0xff] }
 0x751   : > { %9160 = vpow2.f32 %v3060_v57  ;;  %v2358_v17 = vunpack.c.l.bf16 %v8056_v63  ;;  %v2359_v30 = vunpack.c.h.bf16 %v8056_v63 }
 0x752   : > { %3183 = vadd.xlane.f32.xlu1 %v3182_v31  ;;  %v2906_v40 = vmax.f32 %v12119_v39, %v12125_v16 }
 0x753   : > { %v8774_v35 = vpop.permute.xlu2 %8773  ;;  %v12142_v59 = vadd.f32 %v11994_v62, %v2358_v17  ;;  %v12148_v9 = vadd.f32 %v11998_v24, %v2359_v30  ;;  %v8058_v62 = vld [vmem:[%s15552_s5 + $0x138] sm:$0xff]  ;;  %v2918_v24 = vmax.f32 %v12145_v19, %v12151_v41 }
 0x754   : > { %v8776_v51 = vunpack.i.h.bf16 %v8774_v35  ;;  %v8775_v10 = vunpack.i.l.bf16 %v8774_v35  ;;  %v2362_v7 = vunpack.c.l.bf16 %v8058_v62  ;;  %v2363_v8 = vunpack.c.h.bf16 %v8058_v62  ;;  %v8064_v62 = vld [vmem:[%s15552_s5 + $0x168] sm:$0xff] }
 0x755   : > { %v2086_v14 = vpop.f32.mrf.mxu3  ;;  %v2909_v44 = vmax.f32 %v12142_v59, %v12148_v9 }
 0x756   : > { %v12100_v11 = vpop.eup %9158  ;;  %2146 = vst.msk [vmem:[#allocation2 + $0x90] sm:$0xff] %vm291_vm0, %v2086_v14  ;;  %v8769_v20 = vpop.permute.xlu0 %8768  ;;  %v12162_v1 = vadd.f32 %v12022_v56, %v2362_v7  ;;  %v12165_v4 = vadd.f32 %v12024_v34, %v2363_v8  ;;  %v2375_v8 = vunpack.c.h.bf16 %v8064_v62 }
 0x757   : > { %v12106_v28 = vpop.eup %9160  ;;  %v8771_v58 = vunpack.i.h.bf16 %v8769_v20  ;;  %v8770_v15 = vunpack.i.l.bf16 %v8769_v20  ;;  %v2715_v20 = vpop.f32.mrf.mxu2 }
 0x758   : > { %v3185_v2 = vadd.f32 %v12106_v28, %v12100_v11  ;;  %v2915_v14 = vmax.f32 %v12162_v1, %v12165_v4 }
 0x759   : > { %3482 = vmatpush.msra.mxu3 %v8771_v58  ;;  %3591 = vmatpush.msrb.mxu0 %v8770_v15  ;;  %v12174_v58 = vpop.f32.mrf.mxu0 }
 0x75a   : > { %3186 = vadd.xlane.f32.xlu0 %v3185_v2  ;;  %2904 = vmax.xlane.f32.xlu1 %v2903_v21 }
 0x75b   : > { %8618 = vmatpush.msra.mxu1 %v8770_v15  ;;  %v8784_v27 = vpop.permute.xlu2 %8783  ;;  %3483 = vmatpush.msra.mxu3 %v8776_v51 }
 0x75c   : > { %3592 = vmatpush.msrb.mxu0 %v8775_v10  ;;  %v8786_v18 = vunpack.i.h.bf16 %v8784_v27  ;;  %v8785_v46 = vunpack.i.l.bf16 %v8784_v27 }
 0x75d   : > { %8619 = vmatpush.msra.mxu1 %v8775_v10  ;;  %v2089_v52 = vpop.f32.mrf.mxu3 }
 0x75e   : > { %2147 = vst.msk [vmem:[#allocation2 + $0x98] sm:$0xff] %vm291_vm0, %v2089_v52  ;;  %v8779_v6 = vpop.permute.xlu0 %8778 }
 0x75f   : > { %v8781_v55 = vunpack.i.h.bf16 %v8779_v6  ;;  %v8780_v12 = vunpack.i.l.bf16 %v8779_v6  ;;  %v12171_v48 = vpop.f32.mrf.mxu2 }
 0x761   : > { %3484 = vmatpush.msra.mxu3 %v8781_v55  ;;  %3593 = vmatpush.msrb.mxu0 %v8780_v12  ;;  %v12179_v53 = vpop.f32.mrf.mxu0 }
 0x762   : > { %2913 = vmax.xlane.f32.xlu0 %v2912_v54  ;;  %2907 = vmax.xlane.f32.xlu1 %v2906_v40 }
 0x763   : > { %8620 = vmatpush.msra.mxu1 %v8780_v12  ;;  %v8789_v13 = vpop.permute.xlu2 %8788  ;;  %3485 = vmatpush.msra.mxu3 %v8786_v18 }
 0x764   : > { %v8790_v0 = vunpack.i.l.bf16 %v8789_v13  ;;  %3594 = vmatpush.msrb.mxu0 %v8785_v46  ;;  %v8791_v5 = vunpack.i.h.bf16 %v8789_v13 }
 0x765   : > { %8621 = vmatpush.msra.mxu1 %v8785_v46  ;;  %v2092_v33 = vpop.f32.mrf.mxu3 }
 0x766   : > { %2148 = vst.msk [vmem:[#allocation2 + $0xa0] sm:$0xff] %vm291_vm0, %v2092_v33  ;;  %3595 = vmatpush.msrb.mxu0 %v8790_v0 }
 0x767   : > { %8622 = vmatpush.msra.mxu1 %v8790_v0  ;;  %v12176_v21 = vpop.f32.mrf.mxu2 }
 0x768   : > { %3596 = vmatpush.msrb.mxu0 %v8791_v5 }
 0x769   : > { %8623 = vmatpush.msra.mxu1 %v8791_v5  ;;  %v2837_v51 = vpop.f32.mrf.mxu0 }
 0x76a   : > { %2919 = vmax.xlane.f32.xlu0 %v2918_v24  ;;  %2910 = vmax.xlane.f32.xlu1 %v2909_v44  ;;  %v2374_v24 = vunpack.c.l.bf16 %v8064_v62 }
 0x76b   : > { %v8794_v57 = vpop.permute.xlu2 %8793 }
 0x76c   : > { %v8795_v38 = vunpack.i.l.bf16 %v8794_v57  ;;  %v8796_v35 = vunpack.i.h.bf16 %v8794_v57 }
 0x76d   : > { %v2095_v31 = vpop.f32.mrf.mxu3 }
 0x76e   : > { %2149 = vst.msk [vmem:[#allocation2 + $0xa8] sm:$0xff] %vm291_vm0, %v2095_v31  ;;  %3597 = vmatpush.msrb.mxu0 %v8795_v38  ;;  %8624 = vmatpush.msra.mxu1 %v8795_v38 }
 0x76f   : > { %v2724_v2 = vpop.f32.mrf.mxu2 }
 0x770   : > { %3598 = vmatpush.msrb.mxu0 %v8796_v35  ;;  %8625 = vmatpush.msra.mxu1 %v8796_v35  ;;  %v12223_v38 = vadd.f32 %v2724_v2, %v2374_v24  ;;  %v12226_v35 = vadd.f32 %v2837_v51, %v2375_v8 }
 0x771   : > { %v12185_v10 = vpop.f32.mrf.mxu0 }
 0x772   : > { %2916 = vmax.xlane.f32.xlu1 %v2915_v14  ;;  %v2933_v14 = vmax.f32 %v12223_v38, %v12226_v35 }
 0x775   : > { %v2098_v56 = vpop.f32.mrf.mxu3 }
 0x776   : > { %2150 = vst.msk [vmem:[#allocation2 + $0xb0] sm:$0xff] %vm291_vm0, %v2098_v56 }
 0x777   : > { %v12183_v36 = vpop.f32.mrf.mxu2 }
 0x779   : > { %v12193_v12 = vpop.f32.mrf.mxu0 }
 0x77d   : > { %v2101_v34 = vpop.f32.mrf.mxu3 }
 0x77e   : > { %2151 = vst.msk [vmem:[#allocation2 + $0xb8] sm:$0xff] %vm291_vm0, %v2101_v34 }
 0x77f   : > { %v12188_v52 = vpop.f32.mrf.mxu2 }
 0x781   : > { %v12205_v3 = vpop.f32.mrf.mxu0 }
 0x785   : > { %v2104_v15 = vpop.f32.mrf.mxu3 }
 0x786   : > { %2152 = vst.msk [vmem:[#allocation2 + $0xc0] sm:$0xff] %vm291_vm0, %v2104_v15 }
 0x787   : > { %v12195_v22 = vpop.f32.mrf.mxu2 }
 0x789   : > { %v12221_v57 = vpop.f32.mrf.mxu0 }
 0x78d   : > { %v2107_v23 = vpop.f32.mrf.mxu3 }
 0x78e   : > { %2153 = vst.msk [vmem:[#allocation2 + $0xc8] sm:$0xff] %vm291_vm0, %v2107_v23 }
 0x78f   : > { %v12217_v44 = vpop.f32.mrf.mxu2 }
 0x795   : > { %v2110_v32 = vpop.f32.mrf.mxu3 }
 0x796   : > { %2154 = vst.msk [vmem:[#allocation2 + $0xd0] sm:$0xff] %vm291_vm0, %v2110_v32 }
 0x79d   : > { %v2113_v27 = vpop.f32.mrf.mxu3 }
 0x79e   : > { %2155 = vst.msk [vmem:[#allocation2 + $0xd8] sm:$0xff] %vm291_vm0, %v2113_v27 }
 0x7a4   : > { %v2902_v6 = vpop.xlane.xlu2 %2901 }
 0x7a5   : > { %v2994_v63 = vsub.f32 %v12050_v37, %v2902_v6  ;;  %v2995_v42 = vsub.f32 %v12053_v61, %v2902_v6  ;;  %v2116_v55 = vpop.f32.mrf.mxu3  ;;  %v8061_v37 = vld [vmem:[%s15552_s5 + $0x150] sm:$0xff] }
 0x7a6   : > { %2156 = vst.msk [vmem:[#allocation2 + $0xe0] sm:$0xff] %vm291_vm0, %v2116_v55  ;;  %v2368_v61 = vunpack.c.l.bf16 %v8061_v37  ;;  %v2369_v13 = vunpack.c.h.bf16 %v8061_v37 }
 0x7a7   : > { %v3062_v40 = vmul.f32 1.442695, %v2994_v63  ;;  %v3064_v17 = vmul.f32 1.442695, %v2995_v42 }
 0x7a8   : > { %v12209_v0 = vadd.f32 %v2715_v20, %v2368_v61  ;;  %v12212_v5 = vadd.f32 %v2828_v29, %v2369_v13  ;;  %v12230_v20 = vpop.f32.mrf.mxu2  ;;  %v12232_v29 = vpop.f32.mrf.mxu0 }
 0x7a9   : > { %9162 = vpow2.f32 %v3062_v40 }
 0x7aa   : > { %9164 = vpow2.f32 %v3064_v17  ;;  %v2924_v7 = vmax.f32 %v12209_v0, %v12212_v5 }
 0x7ad   : > { %v2119_v54 = vpop.f32.mrf.mxu3 }
 0x7ae   : > { %2157 = vst.msk [vmem:[#allocation2 + $0xe8] sm:$0xff] %vm291_vm0, %v2119_v54 }
 0x7af   : > { %v12198_v18 = vpop.eup %9162 }
 0x7b0   : > { %v12200_v30 = vpop.eup %9164  ;;  %v12234_v15 = vpop.f32.mrf.mxu2 }
 0x7b1   : > { %v3188_v46 = vadd.f32 %v12200_v30, %v12198_v18  ;;  %v12240_v63 = vpop.f32.mrf.mxu0 }
 0x7b3   : > { %3189 = vadd.xlane.f32.xlu1 %v3188_v46 }
 0x7b5   : > { %v2122_v33 = vpop.f32.mrf.mxu3 }
 0x7b6   : > { %2158 = vst.msk [vmem:[#allocation2 + $0xf0] sm:$0xff] %vm291_vm0, %v2122_v33 }
 0x7b9   : > { %v12255_v33 = vpop.f32.mrf.mxu0 }
 0x7bb   : > { %2925 = vmax.xlane.f32.xlu1 %v2924_v7 }
 0x7bd   : > { %v2125_v31 = vpop.f32.mrf.mxu3 }
 0x7be   : > { %2159 = vst.msk [vmem:[#allocation2 + $0xf8] sm:$0xff] %vm291_vm0, %v2125_v31 }
 0x7c3   : > { %2934 = vmax.xlane.f32.xlu1 %v2933_v14 }
 0x7c5   : > { %v3184_v56 = vpop.xlane.xlu1 %3183 }
 0x7c6   : > { %9166 = vrcp.f32 %v3184_v56 }
 0x7cc   : > { %v9167_v34 = vpop.eup %9166 }
 0x7cd   : > { %v3310_v23 = vmul.f32 %v9167_v34, %v12087_v60  ;;  %v3311_v2 = vmul.f32 %v9167_v34, %v12090_v50  ;;  %v2905_v32 = vpop.xlane.xlu1 %2904  ;;  %v3187_v51 = vpop.xlane.xlu0 %3186  ;;  %v8063_v34 = vld [vmem:[%s15552_s5 + $0x160] sm:$0xff] }
 0x7ce   : > { %v2996_v27 = vsub.f32 %v12098_v26, %v2905_v32  ;;  %v2997_v6 = vsub.f32 %v12103_v47, %v2905_v32  ;;  %9168 = vrcp.f32 %v3187_v51  ;;  %v12246_v47 = vpop.f32.mrf.mxu2 }
 0x7cf   : > { %3486 = vmatmul.f32.vlgmr.msra.gmra.mxu3 %v3310_v23  ;;  %3599 = vmatmul.f32.vlgmr.msrb.gmra.mxu0 %v3311_v2 }
 0x7d0   : > { %v3066_v42 = vmul.f32 1.442695, %v2996_v27  ;;  %v3068_v55 = vmul.f32 1.442695, %v2997_v6 }
 0x7d2   : > { %9170 = vpow2.f32 %v3066_v42  ;;  %v2373_v42 = vunpack.c.h.bf16 %v8063_v34 }
 0x7d3   : > { %9172 = vpow2.f32 %v3068_v55  ;;  %v12285_v55 = vpop.f32.mrf.mxu0 }
 0x7d4   : > { %v9169_v40 = vpop.eup %9168 }
 0x7d5   : > { %v2908_v17 = vpop.xlane.xlu1 %2907  ;;  %v3312_v60 = vmul.f32 %v9169_v40, %v12100_v11  ;;  %v3313_v50 = vmul.f32 %v9169_v40, %v12106_v28  ;;  %v8062_v11 = vld [vmem:[%s15552_s5 + $0x158] sm:$0xff]  ;;  %v2914_v62 = vpop.xlane.xlu0 %2913 }
 0x7d6   : > { %v2998_v54 = vsub.f32 %v12119_v39, %v2908_v17  ;;  %v2999_v26 = vsub.f32 %v12125_v16, %v2908_v17  ;;  %v2370_v28 = vunpack.c.l.bf16 %v8062_v11  ;;  %v2371_v16 = vunpack.c.h.bf16 %v8062_v11 }
 0x7d7   : > { %3489 = vmatmul.f32.gmra.mxu3 %v3312_v60  ;;  %3602 = vmatmul.f32.gmra.mxu0 %v3313_v50  ;;  %v3002_v23 = vsub.f32 %v12122_v25, %v2914_v62 }
 0x7d8   : > { %v12248_v37 = vpop.eup %9170  ;;  %v3070_v61 = vmul.f32 1.442695, %v2998_v54  ;;  %v3072_v46 = vmul.f32 1.442695, %v2999_v26  ;;  %v12260_v24 = vadd.f32 %v12171_v48, %v2370_v28  ;;  %v12267_v56 = vadd.f32 %v12174_v58, %v2371_v16 }
 0x7d9   : > { %v12250_v13 = vpop.eup %9172  ;;  %v2372_v48 = vunpack.c.l.bf16 %v8063_v34  ;;  %v3003_v58 = vsub.f32 %v12128_v49, %v2914_v62  ;;  %v3078_v17 = vmul.f32 1.442695, %v3002_v23 }
 0x7da   : > { %9174 = vpow2.f32 %v3070_v61  ;;  %v3191_v39 = vadd.f32 %v12250_v13, %v12248_v37  ;;  %v2927_v27 = vmax.f32 %v12260_v24, %v12267_v56 }
 0x7db   : > { %9176 = vpow2.f32 %v3072_v46  ;;  %v3080_v60 = vmul.f32 1.442695, %v3003_v58  ;;  %v12288_v49 = vadd.f32 %v12176_v21, %v2372_v48  ;;  %v12296_v46 = vadd.f32 %v12179_v53, %v2373_v42  ;;  %v8066_v48 = vld [vmem:[%s15552_s5 + $0x178] sm:$0xff] }
 0x7dc   : > { %3192 = vadd.xlane.f32.xlu0 %v3191_v39  ;;  %v8070_v42 = vld [vmem:[%s15552_s5 + $0x198] sm:$0xff] }
 0x7dd   : > { %v2911_v7 = vpop.xlane.xlu1 %2910  ;;  %v2920_v34 = vpop.xlane.xlu0 %2919 }
 0x7de   : > { %v3000_v8 = vsub.f32 %v12142_v59, %v2911_v7  ;;  %v3001_v31 = vsub.f32 %v12148_v9, %v2911_v7  ;;  %v8065_v59 = vld [vmem:[%s15552_s5 + $0x170] sm:$0xff]  ;;  %v12278_v9 = vpop.f32.mrf.mxu2 }
 0x7df   : > { %v2376_v6 = vunpack.c.l.bf16 %v8065_v59  ;;  %v2377_v40 = vunpack.c.h.bf16 %v8065_v59 }
 0x7e0   : > { %v12264_v14 = vpop.eup %9174  ;;  %v3074_v2 = vmul.f32 1.442695, %v3000_v8  ;;  %v3076_v32 = vmul.f32 1.442695, %v3001_v31  ;;  %v12316_v8 = vpop.f32.mrf.mxu0 }
 0x7e1   : > { %v12273_v51 = vpop.eup %9176  ;;  %v12291_v54 = vadd.f32 %v12183_v36, %v2376_v6  ;;  %v12301_v28 = vadd.f32 %v12185_v10, %v2377_v40  ;;  %v2930_v36 = vmax.f32 %v12288_v49, %v12296_v46  ;;  %v8068_v6 = vld [vmem:[%s15552_s5 + $0x188] sm:$0xff]  ;;  %v3007_v40 = vsub.f32 %v12151_v41, %v2920_v34 }
 0x7e2   : > { %9178 = vpow2.f32 %v3074_v2  ;;  %v3194_v25 = vadd.f32 %v12273_v51, %v12264_v14 }
 0x7e3   : > { %9180 = vpow2.f32 %v3076_v32 }
 0x7e4   : > { %2928 = vmax.xlane.f32.xlu0 %v2927_v27  ;;  %3195 = vadd.xlane.f32.xlu2 %v3194_v25  ;;  %9182 = vpow2.f32 %v3078_v17  ;;  %v2378_v27 = vunpack.c.l.bf16 %v8066_v48  ;;  %v3006_v25 = vsub.f32 %v12145_v19, %v2920_v34  ;;  %v2387_v19 = vunpack.c.h.bf16 %v8070_v42 }
 0x7e5   : > { %v2917_v50 = vpop.xlane.xlu1 %2916  ;;  %9184 = vpow2.f32 %v3080_v60 }
 0x7e6   : > { %v3004_v26 = vsub.f32 %v12162_v1, %v2917_v50  ;;  %v3005_v61 = vsub.f32 %v12165_v4, %v2917_v50  ;;  %v2936_v1 = vmax.f32 %v12291_v54, %v12301_v28  ;;  %v8067_v4 = vld [vmem:[%s15552_s5 + $0x180] sm:$0xff]  ;;  %v12314_v62 = vpop.f32.mrf.mxu2  ;;  %v2386_v50 = vunpack.c.l.bf16 %v8070_v42 }
 0x7e7   : > { %v2380_v10 = vunpack.c.l.bf16 %v8067_v4  ;;  %v2381_v7 = vunpack.c.h.bf16 %v8067_v4  ;;  %v12352_v41 = vadd.f32 %v12188_v52, %v2378_v27  ;;  %v3088_v4 = vmul.f32 1.442695, %v3007_v40 }
 0x7e8   : > { %v12298_v11 = vpop.eup %9178  ;;  %v3082_v39 = vmul.f32 1.442695, %v3004_v26  ;;  %v3084_v16 = vmul.f32 1.442695, %v3005_v61  ;;  %v2379_v26 = vunpack.c.h.bf16 %v8066_v48  ;;  %v2383_v61 = vunpack.c.h.bf16 %v8068_v6  ;;  %v8069_v48 = vld [vmem:[%s15552_s5 + $0x190] sm:$0xff] }
 0x7e9   : > { %v12303_v21 = vpop.eup %9180  ;;  %v12323_v2 = vadd.f32 %v12195_v22, %v2380_v10  ;;  %v12333_v58 = vadd.f32 %v12205_v3, %v2381_v7  ;;  %v2382_v22 = vunpack.c.l.bf16 %v8068_v6  ;;  %v2867_v10 = vpop.f32.mrf.mxu0  ;;  %v2384_v27 = vunpack.c.l.bf16 %v8069_v48 }
 0x7ea   : > { %9186 = vpow2.f32 %v3082_v39  ;;  %v3197_v53 = vadd.f32 %v12303_v21, %v12298_v11  ;;  %v12318_v31 = vpop.eup %9182  ;;  %v12361_v7 = vadd.f32 %v12193_v12, %v2379_v26  ;;  %v12364_v34 = vadd.f32 %v12221_v57, %v2383_v61 }
 0x7eb   : > { %9188 = vpow2.f32 %v3084_v16  ;;  %v12320_v23 = vpop.eup %9184  ;;  %v2942_v60 = vmax.f32 %v12323_v2, %v12333_v58  ;;  %v2923_v16 = vpop.xlane.xlu2 %2922 }
 0x7ec   : > { %2937 = vmax.xlane.f32.xlu0 %v2936_v1  ;;  %2931 = vmax.xlane.f32.xlu2 %v2930_v36  ;;  %v3200_v3 = vadd.f32 %v12320_v23, %v12318_v31  ;;  %v3086_v36 = vmul.f32 1.442695, %v3006_v25  ;;  %v12355_v1 = vadd.f32 %v12217_v44, %v2382_v22  ;;  %v3008_v52 = vsub.f32 %v12067_v43, %v2923_v16 }
 0x7ed   : > { %3198 = vadd.xlane.f32.xlu1 %v3197_v53  ;;  %v12358_v53 = vadd.f32 %v12234_v15, %v2386_v50  ;;  %v12371_v44 = vadd.f32 %v12240_v63, %v2387_v19  ;;  %v8071_v15 = vld [vmem:[%s15552_s5 + $0x1a0] sm:$0xff]  ;;  %v3009_v12 = vsub.f32 %v12069_v45, %v2923_v16  ;;  %v2939_v57 = vmax.f32 %v12352_v41, %v12361_v7  ;;  %v8073_v16 = vld [vmem:[%s15552_s5 + $0x1b0] sm:$0xff] }
 0x7ee   : > { %v12349_v39 = vpop.f32.mrf.mxu2  ;;  %9190 = vpow2.f32 %v3086_v36  ;;  %v2945_v6 = vmax.f32 %v12355_v1, %v12364_v34  ;;  %v2388_v25 = vunpack.c.l.bf16 %v8071_v15  ;;  %v2385_v63 = vunpack.c.h.bf16 %v8069_v48 }
 0x7ef   : > { %9192 = vpow2.f32 %v3088_v4  ;;  %v2951_v43 = vmax.f32 %v12358_v53, %v12371_v44  ;;  %v2389_v22 = vunpack.c.h.bf16 %v8071_v15  ;;  %v3090_v42 = vmul.f32 1.442695, %v3008_v52  ;;  %v8074_v15 = vld [vmem:[%s15552_s5 + $0x1b8] sm:$0xff] }
 0x7f0   : > { %v12325_v32 = vpop.eup %9186  ;;  %v3092_v40 = vmul.f32 1.442695, %v3009_v12  ;;  %v12384_v45 = vadd.f32 %v12230_v20, %v2384_v27  ;;  %v12396_v26 = vadd.f32 %v12232_v29, %v2385_v63  ;;  %v2392_v36 = vunpack.c.l.bf16 %v8073_v16 }
 0x7f1   : > { %v12330_v59 = vpop.eup %9188  ;;  %v12399_v61 = vadd.f32 %v12255_v33, %v2389_v22  ;;  %9194 = vpow2.f32 %v3090_v42  ;;  %v12401_v19 = vpop.f32.mrf.mxu0  ;;  %v2393_v33 = vunpack.c.h.bf16 %v8073_v16  ;;  %v8077_v16 = vld [vmem:[%s15552_s5 + $0x1d0] sm:$0xff] }
 0x7f2   : > { %v3203_v17 = vadd.f32 %v12330_v59, %v12325_v32  ;;  %9196 = vpow2.f32 %v3092_v40  ;;  %v2948_v20 = vmax.f32 %v12384_v45, %v12396_v26  ;;  %v12417_v52 = vadd.f32 %v12314_v62, %v2392_v36 }
 0x7f3   : > { %v12420_v27 = vadd.f32 %v12316_v8, %v2393_v33  ;;  %v2395_v8 = vunpack.c.h.bf16 %v8074_v15 }
 0x7f4   : > { %3204 = vadd.xlane.f32.xlu2 %v3203_v17  ;;  %3201 = vadd.xlane.f32.xlu0 %v3200_v3  ;;  %v12387_v17 = vadd.f32 %v12246_v47, %v2388_v25  ;;  %v12389_v3 = vpop.eup %9190 }
 0x7f5   : > { %2943 = vmax.xlane.f32.xlu1 %v2942_v60  ;;  %v12393_v50 = vpop.eup %9192  ;;  %v2960_v62 = vmax.f32 %v12417_v52, %v12420_v27 }
 0x7f6   : > { %v12391_v60 = vpop.f32.mrf.mxu2  ;;  %v2954_v47 = vmax.f32 %v12387_v17, %v12399_v61  ;;  %v3206_v29 = vadd.f32 %v12393_v50, %v12389_v3 }
 0x7f7   : > { %v12412_v4 = vpop.eup %9194 }
 0x7f8   : > { %v12414_v48 = vpop.eup %9196 }
 0x7f9   : > { %v3209_v25 = vadd.f32 %v12414_v48, %v12412_v4 }
 0x7fc   : > { %2940 = vmax.xlane.f32.xlu2 %v2939_v57  ;;  %2946 = vmax.xlane.f32.xlu0 %v2945_v6  ;;  %v2394_v57 = vunpack.c.l.bf16 %v8074_v15  ;;  %v8076_v6 = vld [vmem:[%s15552_s5 + $0x1c8] sm:$0xff] }
 0x7fd   : > { %2952 = vmax.xlane.f32.xlu1 %v2951_v43  ;;  %v2873_v43 = vpop.f32.mrf.mxu0  ;;  %v2398_v63 = vunpack.c.l.bf16 %v8076_v6  ;;  %v2399_v22 = vunpack.c.h.bf16 %v8076_v6 }
 0x7fe   : > { %v2760_v12 = vpop.f32.mrf.mxu2  ;;  %v12433_v42 = vadd.f32 %v12349_v39, %v2394_v57  ;;  %v2401_v39 = vunpack.c.h.bf16 %v8077_v16 }
 0x7ff   : > { %v12435_v40 = vadd.f32 %v2760_v12, %v2398_v63 }
 0x804   : > { %2949 = vmax.xlane.f32.xlu2 %v2948_v20  ;;  %2955 = vmax.xlane.f32.xlu0 %v2954_v47  ;;  %v12437_v20 = vadd.f32 %v2867_v10, %v2395_v8  ;;  %v12439_v47 = vadd.f32 %v2873_v43, %v2399_v22 }
 0x805   : > { %3207 = vadd.xlane.f32.xlu1 %v3206_v29  ;;  %v2400_v29 = vunpack.c.l.bf16 %v8077_v16  ;;  %v2876_v12 = vpop.f32.mrf.mxu0 }
 0x806   : > { %v2963_v36 = vmax.f32 %v12433_v42, %v12437_v20  ;;  %v2969_v33 = vmax.f32 %v12435_v40, %v12439_v47  ;;  %v2763_v15 = vpop.f32.mrf.mxu2  ;;  %v12450_v57 = vadd.f32 %v2876_v12, %v2401_v39  ;;  %v8179_v12 = vld [vmem:[%s15550_s3 + $0x8] sm:$0xff] }
 0x807   : > { %v12448_v10 = vadd.f32 %v2763_v15, %v2400_v29  ;;  %3809 = vmatpush.msra.mxu0 %v8179_v12  ;;  %8626 = vmatpush.msra.mxu2 %v8179_v12 }
 0x809   : > { %v2972_v6 = vmax.f32 %v12448_v10, %v12450_v57 }
 0x80c   : > { %3210 = vadd.xlane.f32.xlu0 %v3209_v25 }
 0x80d   : > { %2961 = vmax.xlane.f32.xlu1 %v2960_v62  ;;  %v12454_v25 = vpop.f32.mrf.mxu0 }
 0x814   : > { %2964 = vmax.xlane.f32.xlu0 %v2963_v36 }
 0x815   : > { %2970 = vmax.xlane.f32.xlu1 %v2969_v33  ;;  %v12456_v43 = vpop.f32.mrf.mxu0 }
 0x81c   : > { %2973 = vmax.xlane.f32.xlu0 %v2972_v6 }
 0x81d   : > { %v12462_v39 = vpop.f32.mrf.mxu0 }
 0x826   : > { %v3190_v62 = vpop.xlane.xlu1 %3189 }
 0x827   : > { %9198 = vrcp.f32 %v3190_v62 }
 0x82d   : > { %v9199_v63 = vpop.eup %9198 }
 0x82e   : > { %v3315_v8 = vmul.f32 %v9199_v63, %v12200_v30  ;;  %v2926_v22 = vpop.xlane.xlu1 %2925  ;;  %v3314_v16 = vmul.f32 %v9199_v63, %v12198_v18  ;;  %v2766_v63 = vpop.f32.mrf.mxu2 }
 0x82f   : > { %v3010_v36 = vsub.f32 %v12209_v0, %v2926_v22  ;;  %v3011_v29 = vsub.f32 %v12212_v5, %v2926_v22  ;;  %v8072_v0 = vld [vmem:[%s15552_s5 + $0x1a8] sm:$0xff] }
 0x830   : > { %3492 = vmatmul.f32.gmra.mxu3 %v3314_v16  ;;  %3605 = vmatmul.f32.vlgmr.msra.gmra.mxu1 %v3315_v8  ;;  %v2390_v5 = vunpack.c.l.bf16 %v8072_v0  ;;  %v2391_v62 = vunpack.c.h.bf16 %v8072_v0  ;;  %v12476_v8 = vpop.f32.mrf.mxu0 }
 0x831   : > { %v3094_v33 = vmul.f32 1.442695, %v3010_v36  ;;  %v3096_v15 = vmul.f32 1.442695, %v3011_v29 }
 0x832   : > { %v12479_v16 = vadd.f32 %v12278_v9, %v2390_v5  ;;  %v12482_v36 = vadd.f32 %v12285_v55, %v2391_v62  ;;  %v8214_v55 = vld [vmem:[%s15548_s1 + $0x50] sm:$0xff] }
 0x833   : > { %9200 = vpow2.f32 %v3094_v33  ;;  %v8215_v33 = vld [vmem:[%s15548_s1 + $0x58] sm:$0xff] }
 0x834   : > { %9202 = vpow2.f32 %v3096_v15  ;;  %15818 = vst [vmem:[#allocation16_spill] sm:$0xff] %v12479_v16  ;;  %v8075_v15 = vld [vmem:[%s15552_s5 + $0x1c0] sm:$0xff]  ;;  %4020 = vmatpush.msrb.mxu0 %v8215_v33  ;;  %v2957_v9 = vmax.f32 %v12479_v16, %v12482_v36 }
 0x835   : > { %15819 = vst [vmem:[#allocation11_spill] sm:$0xff] %v12482_v36  ;;  %v2396_v0 = vunpack.c.l.bf16 %v8075_v15 }
 0x836   : > { %v2935_v22 = vpop.xlane.xlu1 %2934  ;;  %4021 = vmatpush.msrb.mxu0 %v8214_v55  ;;  %v12506_v33 = vpop.f32.mrf.mxu2  ;;  %v8078_v55 = vld [vmem:[%s15552_s5 + $0x1d8] sm:$0xff] }
 0x837   : > { %v3016_v29 = vsub.f32 %v12223_v38, %v2935_v22  ;;  %v3017_v12 = vsub.f32 %v12226_v35, %v2935_v22  ;;  %v2397_v38 = vunpack.c.h.bf16 %v8075_v15  ;;  %v12501_v35 = vadd.f32 %v12391_v60, %v2396_v0  ;;  %v8212_v22 = vld [vmem:[%s15548_s1 + $0x40] sm:$0xff] }
 0x838   : > { %v12508_v36 = vpop.f32.mrf.mxu0 }
 0x839   : > { %v12467_v30 = vpop.eup %9200  ;;  %v3106_v5 = vmul.f32 1.442695, %v3016_v29  ;;  %v3108_v62 = vmul.f32 1.442695, %v3017_v12  ;;  %15820 = vst [vmem:[#allocation12_spill] sm:$0xff] %v12501_v35  ;;  %v12511_v29 = vadd.f32 %v12401_v19, %v2397_v38  ;;  %v2402_v38 = vunpack.c.l.bf16 %v8078_v55 }
 0x83a   : > { %15816 = vst [vmem:[#allocation8_spill] sm:$0xff] %v12467_v30  ;;  %v12469_v18 = vpop.eup %9202 }
 0x83b   : > { %15817 = vst [vmem:[#allocation28_spill] sm:$0xff] %v12469_v18  ;;  %v3212_v6 = vadd.f32 %v12469_v18, %v12467_v30  ;;  %9204 = vpow2.f32 %v3106_v5  ;;  %v2966_v15 = vmax.f32 %v12501_v35, %v12511_v29 }
 0x83c   : > { %15821 = vst [vmem:[#allocation15_spill] sm:$0xff] %v12511_v29  ;;  %9206 = vpow2.f32 %v3108_v62  ;;  %v12527_v29 = vadd.f32 %v2766_v63, %v2402_v38  ;;  %v8081_v63 = vld [vmem:[%s15552_s5 + $0x1f0] sm:$0xff] }
 0x83d   : > { %3213 = vadd.xlane.f32.xlu2 %v3212_v6  ;;  %v8213_v6 = vld [vmem:[%s15548_s1 + $0x48] sm:$0xff] }
 0x83e   : > { %4022 = vmatpush.msrb.mxu0 %v8213_v6  ;;  %v12522_v6 = vpop.f32.mrf.mxu2 }
 0x840   : > { %4023 = vmatpush.msrb.mxu0 %v8212_v22  ;;  %v2403_v22 = vunpack.c.h.bf16 %v8078_v55 }
 0x841   : > { %v12515_v60 = vpop.eup %9204 }
 0x845   : > { %2958 = vmax.xlane.f32.xlu2 %v2957_v9  ;;  %v12517_v9 = vpop.eup %9206 }
 0x846   : > { %v3221_v62 = vadd.f32 %v12517_v9, %v12515_v60 }
 0x84c   : > { %v3600_v0 = vpop.f32.mrf.mxu0 }
 0x84d   : > { %2967 = vmax.xlane.f32.xlu2 %v2966_v15 }
 0x84f   : > { %v3193_v12 = vpop.xlane.xlu0 %3192 }
 0x850   : > { %9208 = vrcp.f32 %v3193_v12 }
 0x852   : > { %v3487_v19 = vpop.f32.mrf.mxu3 }
 0x853   : > { %v3601_v5 = vadd.f32 %v3600_v0, %v3487_v19  ;;  %v12534_v19 = vadd.f32 %v12454_v25, %v2403_v22 }
 0x854   : > { %v3603_v55 = vpop.f32.mrf.mxu0 }
 0x855   : > { %3222 = vadd.xlane.f32.xlu2 %v3221_v62  ;;  %8180 = vmatmul.msk.f32.vlgmr.msra.gmra.mxu0 %vm729_vm1, %v3601_v5  ;;  %v2408_v62 = vunpack.c.l.bf16 %v8081_v63 }
 0x856   : > { %v9209_v15 = vpop.eup %9208 }
 0x857   : > { %v3196_v12 = vpop.xlane.xlu2 %3195  ;;  %v2929_v35 = vpop.xlane.xlu0 %2928  ;;  %v3316_v16 = vmul.f32 %v9209_v15, %v12248_v37  ;;  %v3317_v18 = vmul.f32 %v9209_v15, %v12250_v13  ;;  %v2975_v13 = vmax.f32 %v12527_v29, %v12534_v19 }
 0x858   : > { %9210 = vrcp.f32 %v3196_v12  ;;  %v3012_v30 = vsub.f32 %v12260_v24, %v2929_v35  ;;  %v3013_v0 = vsub.f32 %v12267_v56, %v2929_v35  ;;  %v2775_v15 = vpop.f32.mrf.mxu2  ;;  %v2409_v56 = vunpack.c.h.bf16 %v8081_v63 }
 0x859   : > { %3495 = vmatmul.f32.gmra.mxu3 %v3316_v16  ;;  %3608 = vmatmul.f32.gmra.mxu1 %v3317_v18  ;;  %v12542_v18 = vadd.f32 %v2775_v15, %v2408_v62 }
 0x85a   : > { %v3098_v38 = vmul.f32 1.442695, %v3012_v30  ;;  %v3100_v5 = vmul.f32 1.442695, %v3013_v0  ;;  %v3490_v37 = vpop.f32.mrf.mxu3  ;;  %v12549_v63 = vadd.f32 %v12476_v8, %v2409_v56 }
 0x85b   : > { %v3604_v24 = vadd.f32 %v3603_v55, %v3490_v37 }
 0x85c   : > { %9212 = vpow2.f32 %v3098_v38 }
 0x85d   : > { %9214 = vpow2.f32 %v3100_v5  ;;  %2976 = vmax.xlane.f32.xlu2 %v2975_v13  ;;  %8181 = vmatmul.msk.f32.gmra.mxu0 %vm729_vm1, %v3604_v24  ;;  %v9749_v24 = vld [vmem:[%s9887_s11] sm:$0xff] }
 0x85e   : > { %v9211_v25 = vpop.eup %9210 }
 0x85f   : > { %v2932_v16 = vpop.xlane.xlu2 %2931  ;;  %v2938_v35 = vpop.xlane.xlu0 %2937  ;;  %v3318_v30 = vmul.f32 %v9211_v25, %v12264_v14  ;;  %v3319_v22 = vmul.f32 %v9211_v25, %v12273_v51  ;;  %v8079_v51 = vld [vmem:[%s15552_s5 + $0x1e0] sm:$0xff] }
 0x860   : > { %v3014_v12 = vsub.f32 %v12288_v49, %v2932_v16  ;;  %v3015_v0 = vsub.f32 %v12296_v46, %v2932_v16  ;;  %v3199_v55 = vpop.xlane.xlu1 %3198  ;;  %v3018_v14 = vsub.f32 %v12291_v54, %v2938_v35  ;;  %v2984_v49 = vmax.f32 %v12542_v18, %v12549_v63 }
 0x861   : > { %9216 = vrcp.f32 %v3199_v55  ;;  %3498 = vmatmul.f32.gmra.mxu3 %v3318_v30  ;;  %3611 = vmatmul.f32.gmra.mxu1 %v3319_v22  ;;  %v3019_v46 = vsub.f32 %v12301_v28, %v2938_v35  ;;  %v2404_v8 = vunpack.c.l.bf16 %v8079_v51  ;;  %v2405_v54 = vunpack.c.h.bf16 %v8079_v51  ;;  %v9750_v51 = vld [vmem:[%s9887_s11 + $0x8] sm:$0xff] }
 0x862   : > { %v12551_v38 = vpop.eup %9212  ;;  %v3102_v5 = vmul.f32 1.442695, %v3014_v12  ;;  %v3104_v37 = vmul.f32 1.442695, %v3015_v0  ;;  %v3110_v15 = vmul.f32 1.442695, %v3018_v14 }
 0x863   : > { %v12554_v13 = vpop.eup %9214  ;;  %v3112_v25 = vmul.f32 1.442695, %v3019_v46  ;;  %v12567_v22 = vadd.f32 %v12506_v33, %v2404_v8  ;;  %v8080_v33 = vld [vmem:[%s15552_s5 + $0x1e8] sm:$0xff] }
 0x864   : > { %9218 = vpow2.f32 %v3102_v5  ;;  %v3215_v62 = vadd.f32 %v12554_v13, %v12551_v38 }
 0x865   : > { %9220 = vpow2.f32 %v3104_v37  ;;  %2985 = vmax.xlane.f32.xlu2 %v2984_v49  ;;  %8216 = vmatmul.msk.f32.vlgmr.msrb.gmra.mxu0 %vm291_vm0, %v9749_v24  ;;  %v12576_v37 = vadd.f32 %v12456_v43, %v2405_v54  ;;  %v2407_v49 = vunpack.c.h.bf16 %v8080_v33 }
 0x866   : > { %3216 = vadd.xlane.f32.xlu1 %v3215_v62 }
 0x867   : > { %v9217_v56 = vpop.eup %9216  ;;  %v3205_v16 = vpop.xlane.xlu2 %3204  ;;  %v2978_v14 = vmax.f32 %v12567_v22, %v12576_v37 }
 0x868   : > { %v3202_v30 = vpop.xlane.xlu0 %3201  ;;  %v2944_v28 = vpop.xlane.xlu1 %2943  ;;  %v3320_v35 = vmul.f32 %v9217_v56, %v12298_v11  ;;  %v3321_v12 = vmul.f32 %v9217_v56, %v12303_v21  ;;  %v2406_v21 = vunpack.c.l.bf16 %v8080_v33 }
 0x869   : > { %v3022_v0 = vsub.f32 %v12323_v2, %v2944_v28  ;;  %v3023_v55 = vsub.f32 %v12333_v58, %v2944_v28  ;;  %9222 = vrcp.f32 %v3202_v30 }
 0x86a   : > { %v12573_v5 = vpop.eup %9218  ;;  %9224 = vpow2.f32 %v3110_v15  ;;  %3501 = vmatmul.f32.gmra.mxu3 %v3320_v35  ;;  %3614 = vmatmul.f32.gmra.mxu1 %v3321_v12  ;;  %v12590_v8 = vadd.f32 %v12522_v6, %v2406_v21 }
 0x86b   : > { %v12581_v11 = vpop.eup %9220  ;;  %9226 = vpow2.f32 %v3112_v25  ;;  %v3118_v2 = vmul.f32 1.442695, %v3022_v0  ;;  %v3120_v58 = vmul.f32 1.442695, %v3023_v55  ;;  %v12604_v55 = vadd.f32 %v12462_v39, %v2407_v49 }
 0x86c   : > { %v3218_v43 = vadd.f32 %v12581_v11, %v12573_v5 }
 0x86d   : > { %9228 = vpow2.f32 %v3118_v2  ;;  %8217 = vmatmul.msk.f32.gmra.mxu0 %vm291_vm0, %v9750_v51 }
 0x86e   : > { %9230 = vpow2.f32 %v3120_v58  ;;  %3219 = vadd.xlane.f32.xlu0 %v3218_v43  ;;  %2979 = vmax.xlane.f32.xlu1 %v2978_v14  ;;  %v2778_v58 = vpop.f32.mrf.mxu2 }
 0x86f   : > { %v9223_v46 = vpop.eup %9222  ;;  %v2941_v62 = vpop.xlane.xlu2 %2940  ;;  %9232 = vrcp.f32 %v3205_v16 }
 0x870   : > { %v2947_v24 = vpop.xlane.xlu0 %2946  ;;  %v12592_v54 = vpop.eup %9224  ;;  %v3020_v15 = vsub.f32 %v12352_v41, %v2941_v62  ;;  %v3021_v56 = vsub.f32 %v12361_v7, %v2941_v62  ;;  %v3322_v6 = vmul.f32 %v9223_v46, %v12318_v31  ;;  %v3323_v0 = vmul.f32 %v9223_v46, %v12320_v23  ;;  %v8082_v41 = vld [vmem:[%s15552_s5 + $0x1f8] sm:$0xff] }
 0x871   : > { %v2953_v25 = vpop.xlane.xlu1 %2952  ;;  %v3024_v30 = vsub.f32 %v12355_v1, %v2947_v24  ;;  %v12597_v28 = vpop.eup %9226  ;;  %v2981_v23 = vmax.f32 %v12590_v8, %v12604_v55  ;;  %v2410_v39 = vunpack.c.l.bf16 %v8082_v41  ;;  %v2411_v2 = vunpack.c.h.bf16 %v8082_v41 }
 0x872   : > { %v3028_v35 = vsub.f32 %v12358_v53, %v2953_v25  ;;  %v3029_v12 = vsub.f32 %v12371_v44, %v2953_v25  ;;  %v3114_v7 = vmul.f32 1.442695, %v3020_v15  ;;  %v3116_v16 = vmul.f32 1.442695, %v3021_v56  ;;  %3504 = vmatmul.f32.gmra.mxu3 %v3322_v6  ;;  %3617 = vmatmul.f32.gmra.mxu1 %v3323_v0 }
 0x873   : > { %v12609_v1 = vpop.eup %9228  ;;  %v3025_v44 = vsub.f32 %v12364_v34, %v2947_v24  ;;  %v3224_v21 = vadd.f32 %v12597_v28, %v12592_v54  ;;  %v3122_v14 = vmul.f32 1.442695, %v3024_v30  ;;  %v9751_v34 = vld [vmem:[%s9887_s11 + $0x10] sm:$0xff]  ;;  %v12622_v24 = vadd.f32 %v2778_v58, %v2410_v39 }
 0x874   : > { %v3130_v33 = vmul.f32 1.442695, %v3028_v35  ;;  %v3132_v53 = vmul.f32 1.442695, %v3029_v12  ;;  %v12612_v31 = vpop.eup %9230  ;;  %9234 = vpow2.f32 %v3114_v7  ;;  %v12627_v30 = vadd.f32 %v12508_v36, %v2411_v2 }
 0x875   : > { %9236 = vpow2.f32 %v3116_v16  ;;  %v3230_v43 = vadd.f32 %v12612_v31, %v12609_v1  ;;  %8218 = vmatmul.msk.f32.gmra.mxu0 %vm291_vm0, %v9751_v34  ;;  %v9233_v51 = vpop.eup %9232  ;;  %v3124_v49 = vmul.f32 1.442695, %v3025_v44 }
 0x876   : > { %9238 = vpow2.f32 %v3130_v33  ;;  %2982 = vmax.xlane.f32.xlu0 %v2981_v23  ;;  %3225 = vadd.xlane.f32.xlu1 %v3224_v21  ;;  %v3324_v35 = vmul.f32 %v9233_v51, %v12325_v32  ;;  %v3325_v12 = vmul.f32 %v9233_v51, %v12330_v59  ;;  %v2987_v32 = vmax.f32 %v12622_v24, %v12627_v30 }
 0x877   : > { %9240 = vpow2.f32 %v3132_v53  ;;  %3231 = vadd.xlane.f32.xlu2 %v3230_v43  ;;  %v2950_v46 = vpop.xlane.xlu2 %2949 }
 0x878   : > { %v2956_v62 = vpop.xlane.xlu0 %2955  ;;  %v3026_v15 = vsub.f32 %v12384_v45, %v2950_v46  ;;  %v3027_v56 = vsub.f32 %v12396_v26, %v2950_v46  ;;  %9242 = vpow2.f32 %v3122_v14 }
 0x879   : > { %v3208_v25 = vpop.xlane.xlu1 %3207  ;;  %v3030_v7 = vsub.f32 %v12387_v17, %v2956_v62  ;;  %v3031_v26 = vsub.f32 %v12399_v61, %v2956_v62  ;;  %v9752_v17 = vld [vmem:[%s9887_s11 + $0x18] sm:$0xff] }
 0x87a   : > { %v12631_v6 = vpop.eup %9234  ;;  %v3126_v0 = vmul.f32 1.442695, %v3026_v15  ;;  %v3128_v41 = vmul.f32 1.442695, %v3027_v56  ;;  %9244 = vrcp.f32 %v3208_v25  ;;  %3507 = vmatmul.f32.gmra.mxu3 %v3324_v35  ;;  %3620 = vmatmul.f32.gmra.mxu1 %v3325_v12 }
 0x87b   : > { %v12634_v45 = vpop.eup %9236  ;;  %9246 = vpow2.f32 %v3124_v49  ;;  %v3134_v33 = vmul.f32 1.442695, %v3030_v7  ;;  %v3136_v44 = vmul.f32 1.442695, %v3031_v26 }
 0x87c   : > { %v12637_v36 = vpop.eup %9238  ;;  %9248 = vpow2.f32 %v3126_v0  ;;  %v3227_v59 = vadd.f32 %v12634_v45, %v12631_v6 }
 0x87d   : > { %v12643_v16 = vpop.eup %9240  ;;  %9250 = vpow2.f32 %v3128_v41  ;;  %8219 = vmatmul.msk.f32.gmra.mxu0 %vm291_vm0, %v9752_v17 }
 0x87e   : > { %v3239_v61 = vadd.f32 %v12643_v16, %v12637_v36  ;;  %3228 = vadd.xlane.f32.xlu0 %v3227_v59  ;;  %2988 = vmax.xlane.f32.xlu1 %v2987_v32  ;;  %v12649_v53 = vpop.eup %9242 }
 0x880   : > { %v3211_v23 = vpop.xlane.xlu0 %3210  ;;  %v9245_v39 = vpop.eup %9244  ;;  %3240 = vadd.xlane.f32.xlu2 %v3239_v61 }
 0x881   : > { %v2962_v21 = vpop.xlane.xlu1 %2961  ;;  %9252 = vrcp.f32 %v3211_v23  ;;  %v12651_v2 = vpop.eup %9246  ;;  %v3326_v43 = vmul.f32 %v9245_v39, %v12389_v3  ;;  %v3327_v34 = vmul.f32 %v9245_v39, %v12393_v50  ;;  %v9753_v3 = vld [vmem:[%s9887_s11 + $0x20] sm:$0xff] }
 0x882   : > { %v3034_v58 = vsub.f32 %v12417_v52, %v2962_v21  ;;  %v3035_v14 = vsub.f32 %v12420_v27, %v2962_v21  ;;  %v12657_v51 = vpop.eup %9248  ;;  %9254 = vpow2.f32 %v3134_v33  ;;  %v3233_v52 = vadd.f32 %v12651_v2, %v12649_v53 }
 0x883   : > { %v12659_v49 = vpop.eup %9250  ;;  %9256 = vpow2.f32 %v3136_v44  ;;  %3510 = vmatmul.f32.gmra.mxu3 %v3326_v43  ;;  %3623 = vmatmul.f32.gmra.mxu1 %v3327_v34 }
 0x884   : > { %v3142_v46 = vmul.f32 1.442695, %v3034_v58  ;;  %v3144_v62 = vmul.f32 1.442695, %v3035_v14  ;;  %v3236_v15 = vadd.f32 %v12659_v49, %v12657_v51 }
 0x885   : > { %8220 = vmatmul.msk.f32.gmra.mxu0 %vm291_vm0, %v9753_v3  ;;  %v9756_v3 = vld [vmem:[%s9887_s11 + $0x38] sm:$0xff] }
 0x886   : > { %9258 = vpow2.f32 %v3142_v46  ;;  %3237 = vadd.xlane.f32.xlu0 %v3236_v15  ;;  %3234 = vadd.xlane.f32.xlu1 %v3233_v52  ;;  %v9755_v46 = vld [vmem:[%s9887_s11 + $0x30] sm:$0xff] }
 0x887   : > { %v9253_v50 = vpop.eup %9252  ;;  %9260 = vpow2.f32 %v3144_v62 }
 0x888   : > { %v2965_v27 = vpop.xlane.xlu0 %2964  ;;  %v3328_v56 = vmul.f32 %v9253_v50, %v12412_v4  ;;  %v3329_v25 = vmul.f32 %v9253_v50, %v12414_v48  ;;  %v12669_v35 = vpop.eup %9254  ;;  %v9757_v50 = vld [vmem:[%s9887_s11 + $0x40] sm:$0xff] }
 0x889   : > { %v2971_v12 = vpop.xlane.xlu1 %2970  ;;  %v3036_v0 = vsub.f32 %v12433_v42, %v2965_v27  ;;  %v3037_v41 = vsub.f32 %v12437_v20, %v2965_v27  ;;  %v12673_v7 = vpop.eup %9256  ;;  %v9754_v20 = vld [vmem:[%s9887_s11 + $0x28] sm:$0xff] }
 0x88a   : > { %v3040_v26 = vsub.f32 %v12435_v40, %v2971_v12  ;;  %v3041_v32 = vsub.f32 %v12439_v47, %v2971_v12  ;;  %v3242_v42 = vadd.f32 %v12673_v7, %v12669_v35  ;;  %v9758_v27 = vld [vmem:[%s9887_s11 + $0x48] sm:$0xff] }
 0x88b   : > { %v3146_v59 = vmul.f32 1.442695, %v3036_v0  ;;  %v3148_v48 = vmul.f32 1.442695, %v3037_v41  ;;  %3513 = vmatmul.f32.gmra.mxu3 %v3328_v56  ;;  %3626 = vmatmul.f32.gmra.mxu1 %v3329_v25  ;;  %v9759_v41 = vld [vmem:[%s9887_s11 + $0x50] sm:$0xff] }
 0x88c   : > { %v12677_v17 = vpop.eup %9258  ;;  %v3154_v4 = vmul.f32 1.442695, %v3040_v26  ;;  %v3156_v33 = vmul.f32 1.442695, %v3041_v32 }
 0x88d   : > { %v12679_v61 = vpop.eup %9260  ;;  %9262 = vpow2.f32 %v3146_v59  ;;  %8221 = vmatmul.msk.f32.gmra.mxu0 %vm291_vm0, %v9754_v20  ;;  %v15822_v59 = vld [vmem:[#allocation8_spill] sm:$0xff]  ;;  %v15825_v20 = vld [vmem:[#allocation11_spill] sm:$0xff] }
 0x88e   : > { %9264 = vpow2.f32 %v3154_v4  ;;  %v3248_v40 = vadd.f32 %v12679_v61, %v12677_v17  ;;  %3243 = vadd.xlane.f32.xlu1 %v3242_v42  ;;  %v15824_v42 = vld [vmem:[#allocation16_spill] sm:$0xff] }
 0x88f   : > { %9266 = vpow2.f32 %v3156_v33  ;;  %v15823_v33 = vld [vmem:[#allocation28_spill] sm:$0xff] }
 0x890   : > { %9268 = vpow2.f32 %v3148_v48  ;;  %3249 = vadd.xlane.f32.xlu2 %v3248_v40  ;;  %v2974_v47 = vpop.xlane.xlu0 %2973 }
 0x891   : > { %v3042_v44 = vsub.f32 %v12448_v10, %v2974_v47  ;;  %v3043_v23 = vsub.f32 %v12450_v57, %v2974_v47 }
 0x893   : > { %v12689_v39 = vpop.eup %9262  ;;  %v3158_v21 = vmul.f32 1.442695, %v3042_v44  ;;  %v3160_v58 = vmul.f32 1.442695, %v3043_v23 }
 0x894   : > { %v12691_v14 = vpop.eup %9264 }
 0x895   : > { %v12693_v43 = vpop.eup %9266  ;;  %9270 = vpow2.f32 %v3158_v21  ;;  %8222 = vmatmul.msk.f32.gmra.mxu0 %vm291_vm0, %v9755_v46  ;;  %v9760_v21 = vld [vmem:[%s9887_s11 + $0x58] sm:$0xff] }
 0x896   : > { %v12695_v34 = vpop.eup %9268  ;;  %9272 = vpow2.f32 %v3160_v58  ;;  %v3257_v10 = vadd.f32 %v12693_v43, %v12691_v14 }
 0x897   : > { %v3251_v57 = vadd.f32 %v12695_v34, %v12689_v39 }
 0x898   : > { %3258 = vadd.xlane.f32.xlu2 %v3257_v10  ;;  %v15826_v10 = vld [vmem:[#allocation12_spill] sm:$0xff] }
 0x899   : > { %3252 = vadd.xlane.f32.xlu1 %v3251_v57  ;;  %v15827_v57 = vld [vmem:[#allocation15_spill] sm:$0xff] }
 0x89b   : > { %v12703_v62 = vpop.eup %9270 }
 0x89c   : > { %v12705_v15 = vpop.eup %9272 }
 0x89d   : > { %v3260_v52 = vadd.f32 %v12705_v15, %v12703_v62  ;;  %8223 = vmatmul.msk.f32.gmra.mxu0 %vm291_vm0, %v9756_v3 }
 0x8a0   : > { %3261 = vadd.xlane.f32.xlu2 %v3260_v52 }
 0x8a5   : > { %8224 = vmatmul.msk.f32.gmra.mxu0 %vm291_vm0, %v9757_v50 }
 0x8ad   : > { %8225 = vmatmul.msk.f32.gmra.mxu0 %vm291_vm0, %v9758_v27  ;;  %v3606_v25 = vpop.f32.mrf.mxu1 }
 0x8b0   : > { %v3214_v56 = vpop.xlane.xlu2 %3213 }
 0x8b1   : > { %9274 = vrcp.f32 %v3214_v56 }
 0x8b3   : > { %v3493_v12 = vpop.f32.mrf.mxu3 }
 0x8b4   : > { %v3607_v0 = vadd.f32 %v3606_v25, %v3493_v12  ;;  %v9761_v12 = vld [vmem:[%s9887_s11 + $0x60] sm:$0xff] }
 0x8b5   : > { %8226 = vmatmul.msk.f32.gmra.mxu0 %vm291_vm0, %v9759_v41 }
 0x8b6   : > { %8182 = vmatmul.msk.f32.vlgmr.msra.gmra.mxu2 %vm729_vm1, %v3607_v0 }
 0x8b7   : > { %v9275_v26 = vpop.eup %9274 }
 0x8b8   : > { %v2959_v32 = vpop.xlane.xlu2 %2958  ;;  %v3330_v4 = vmul.f32 %v9275_v26, %v15822_v59  ;;  %v3331_v48 = vmul.f32 %v9275_v26, %v15823_v33  ;;  %v9762_v59 = vld [vmem:[%s9887_s11 + $0x68] sm:$0xff] }
 0x8b9   : > { %v3032_v40 = vsub.f32 %v15824_v42, %v2959_v32  ;;  %v3033_v47 = vsub.f32 %v15825_v20, %v2959_v32 }
 0x8ba   : > { %3516 = vmatmul.f32.gmra.mxu3 %v3330_v4  ;;  %3629 = vmatmul.f32.gmra.mxu1 %v3331_v48 }
 0x8bb   : > { %v3138_v44 = vmul.f32 1.442695, %v3032_v40  ;;  %v3140_v23 = vmul.f32 1.442695, %v3033_v47  ;;  %v3907_v40 = vld [vmem:[#allocation2] sm:$0xff] }
 0x8bd   : > { %9276 = vpow2.f32 %v3138_v44  ;;  %8227 = vmatmul.msk.f32.gmra.mxu0 %vm291_vm0, %v9760_v21 }
 0x8be   : > { %9278 = vpow2.f32 %v3140_v23  ;;  %v9763_v23 = vld [vmem:[%s9887_s11 + $0x70] sm:$0xff] }
 0x8c0   : > { %v2968_v58 = vpop.xlane.xlu2 %2967 }
 0x8c1   : > { %v3038_v46 = vsub.f32 %v15826_v10, %v2968_v58  ;;  %v3039_v52 = vsub.f32 %v15827_v57, %v2968_v58 }
 0x8c3   : > { %v12726_v3 = vpop.eup %9276  ;;  %v3150_v50 = vmul.f32 1.442695, %v3038_v46  ;;  %v3152_v27 = vmul.f32 1.442695, %v3039_v52 }
 0x8c4   : > { %v12728_v56 = vpop.eup %9278 }
 0x8c5   : > { %9280 = vpow2.f32 %v3150_v50  ;;  %v3245_v25 = vadd.f32 %v12728_v56, %v12726_v3  ;;  %8228 = vmatmul.msk.f32.gmra.mxu0 %vm291_vm0, %v9761_v12 }
 0x8c6   : > { %9282 = vpow2.f32 %v3152_v27 }
 0x8c7   : > { %3246 = vadd.xlane.f32.xlu0 %v3245_v25  ;;  %v9764_v25 = vld [vmem:[%s9887_s11 + $0x78] sm:$0xff] }
 0x8c8   : > { %v3223_v0 = vpop.xlane.xlu2 %3222 }
 0x8cb   : > { %v12734_v41 = vpop.eup %9280 }
 0x8cc   : > { %v12736_v26 = vpop.eup %9282 }
 0x8cd   : > { %v3254_v32 = vadd.f32 %v12736_v26, %v12734_v41  ;;  %8229 = vmatmul.msk.f32.gmra.mxu0 %vm291_vm0, %v9762_v59 }
 0x8cf   : > { %3255 = vadd.xlane.f32.xlu0 %v3254_v32 }
 0x8d0   : > { %v2977_v4 = vpop.xlane.xlu2 %2976 }
 0x8d1   : > { %v3044_v33 = vsub.f32 %v12527_v29, %v2977_v4  ;;  %v3045_v48 = vsub.f32 %v12534_v19, %v2977_v4  ;;  %v3908_v29 = vld [vmem:[#allocation2 + $0x8] sm:$0xff] }
 0x8d2   : > { %v3811_v42 = vpop.f32.mrf.mxu0 }
 0x8d3   : > { %v3162_v20 = vmul.f32 1.442695, %v3044_v33  ;;  %v3164_v47 = vmul.f32 1.442695, %v3045_v48  ;;  %v3939_v44 = vadd.f32 %v3907_v40, %v3811_v42 }
 0x8d5   : > { %9284 = vpow2.f32 %v3162_v20  ;;  %3971 = vst.msk [vmem:[#allocation2] sm:$0xff] %vm291_vm0, %v3939_v44  ;;  %8230 = vmatmul.msk.f32.gmra.mxu0 %vm291_vm0, %v9763_v23 }
 0x8d6   : > { %9286 = vpow2.f32 %v3164_v47  ;;  %v3609_v21 = vpop.f32.mrf.mxu1 }
 0x8d9   : > { %v3217_v58 = vpop.xlane.xlu1 %3216 }
 0x8da   : > { %9288 = vrcp.f32 %v3217_v58  ;;  %v3814_v10 = vpop.f32.mrf.mxu0  ;;  %v9765_v58 = vld [vmem:[%s9887_s11 + $0x80] sm:$0xff] }
 0x8db   : > { %v12747_v46 = vpop.eup %9284  ;;  %v3940_v19 = vadd.f32 %v3908_v29, %v3814_v10 }
 0x8dc   : > { %v12749_v57 = vpop.eup %9286  ;;  %v3496_v52 = vpop.f32.mrf.mxu3 }
 0x8dd   : > { %3972 = vst.msk [vmem:[#allocation2 + $0x8] sm:$0xff] %vm291_vm0, %v3940_v19  ;;  %v3610_v50 = vadd.f32 %v3609_v21, %v3496_v52  ;;  %v3263_v27 = vadd.f32 %v12749_v57, %v12747_v46  ;;  %8231 = vmatmul.msk.f32.gmra.mxu0 %vm291_vm0, %v9764_v25  ;;  %v9766_v25 = vld [vmem:[%s9887_s11 + $0x88] sm:$0xff] }
 0x8de   : > { %v3612_v12 = vpop.f32.mrf.mxu1 }
 0x8df   : > { %3264 = vadd.xlane.f32.xlu1 %v3263_v27  ;;  %8183 = vmatmul.msk.f32.gmra.mxu2 %vm729_vm1, %v3610_v50 }
 0x8e0   : > { %v9289_v32 = vpop.eup %9288 }
 0x8e1   : > { %v2980_v59 = vpop.xlane.xlu1 %2979  ;;  %v3220_v4 = vpop.xlane.xlu0 %3219  ;;  %v3332_v33 = vmul.f32 %v9289_v32, %v12551_v38  ;;  %v3333_v48 = vmul.f32 %v9289_v32, %v12554_v13 }
 0x8e2   : > { %v3046_v42 = vsub.f32 %v12567_v22, %v2980_v59  ;;  %v3047_v40 = vsub.f32 %v12576_v37, %v2980_v59  ;;  %9290 = vrcp.f32 %v3220_v4  ;;  %v12761_v20 = vpop.f32.mrf.mxu0 }
 0x8e3   : > { %3519 = vmatmul.f32.gmra.mxu3 %v3332_v33  ;;  %3632 = vmatmul.f32.gmra.mxu1 %v3333_v48  ;;  %v12785_v33 = vpop.xlane.xlu2 %2985 }
 0x8e4   : > { %v3166_v47 = vmul.f32 1.442695, %v3046_v42  ;;  %v3168_v44 = vmul.f32 1.442695, %v3047_v40  ;;  %v3499_v23 = vpop.f32.mrf.mxu3  ;;  %v9767_v42 = vld [vmem:[%s9887_s11 + $0x90] sm:$0xff] }
 0x8e5   : > { %v3613_v21 = vadd.f32 %v3612_v12, %v3499_v23  ;;  %8232 = vmatmul.msk.f32.gmra.mxu0 %vm291_vm0, %v9765_v58 }
 0x8e6   : > { %9292 = vpow2.f32 %v3166_v47 }
 0x8e7   : > { %9294 = vpow2.f32 %v3168_v44  ;;  %v3615_v38 = vpop.f32.mrf.mxu1  ;;  %8184 = vmatmul.msk.f32.gmra.mxu2 %vm729_vm1, %v3613_v21 }
 0x8e8   : > { %v9291_v13 = vpop.eup %9290  ;;  %9296 = vrcp.f32 %v3223_v0 }
 0x8e9   : > { %v3334_v22 = vmul.f32 %v9291_v13, %v12573_v5  ;;  %v3335_v37 = vmul.f32 %v9291_v13, %v12581_v11  ;;  %v12770_v29 = vpop.xlane.xlu0 %2982  ;;  %v3226_v50 = vpop.xlane.xlu1 %3225  ;;  %v9768_v13 = vld [vmem:[%s9887_s11 + $0x98] sm:$0xff] }
 0x8ea   : > { %v12768_v10 = vpop.f32.mrf.mxu0  ;;  %9298 = vrcp.f32 %v3226_v50 }
 0x8eb   : > { %3522 = vmatmul.f32.gmra.mxu3 %v3334_v22  ;;  %3635 = vmatmul.f32.gmra.mxu1 %v3335_v37 }
 0x8ec   : > { %v12772_v19 = vpop.eup %9292 }
 0x8ed   : > { %v12774_v52 = vpop.eup %9294  ;;  %v3502_v27 = vpop.f32.mrf.mxu3  ;;  %8233 = vmatmul.msk.f32.gmra.mxu0 %vm291_vm0, %v9766_v25 }
 0x8ee   : > { %v9297_v0 = vpop.eup %9296  ;;  %v3616_v5 = vadd.f32 %v3615_v38, %v3502_v27  ;;  %v3266_v11 = vadd.f32 %v12774_v52, %v12772_v19  ;;  %v3232_v38 = vpop.xlane.xlu2 %3231 }
 0x8ef   : > { %v3618_v12 = vpop.f32.mrf.mxu1  ;;  %v3336_v32 = vmul.f32 %v9297_v0, %v12515_v60  ;;  %v3337_v59 = vmul.f32 %v9297_v0, %v12517_v9 }
 0x8f0   : > { %3267 = vadd.xlane.f32.xlu2 %v3266_v11  ;;  %8185 = vmatmul.msk.f32.gmra.mxu2 %vm729_vm1, %v3616_v5  ;;  %v9299_v40 = vpop.eup %9298  ;;  %v9769_v5 = vld [vmem:[%s9887_s11 + $0xa0] sm:$0xff] }
 0x8f1   : > { %v3229_v48 = vpop.xlane.xlu0 %3228  ;;  %v3338_v60 = vmul.f32 %v9299_v40, %v12592_v54  ;;  %v3339_v9 = vmul.f32 %v9299_v40, %v12597_v28  ;;  %v12794_v58 = vpop.xlane.xlu1 %2988 }
 0x8f2   : > { %v12783_v4 = vpop.f32.mrf.mxu0  ;;  %9300 = vrcp.f32 %v3229_v48 }
 0x8f3   : > { %3525 = vmatmul.f32.gmra.mxu3 %v3336_v32  ;;  %3638 = vmatmul.f32.gmra.mxu1 %v3337_v59  ;;  %9302 = vrcp.f32 %v3232_v38  ;;  %v9771_v38 = vld [vmem:[%s9887_s11 + $0xb0] sm:$0xff] }
 0x8f5   : > { %8234 = vmatmul.msk.f32.gmra.mxu0 %vm291_vm0, %v9767_v42  ;;  %v3505_v47 = vpop.f32.mrf.mxu3  ;;  %v9770_v42 = vld [vmem:[%s9887_s11 + $0xa8] sm:$0xff] }
 0x8f6   : > { %v3619_v44 = vadd.f32 %v3618_v12, %v3505_v47 }
 0x8f7   : > { %v3621_v23 = vpop.f32.mrf.mxu1 }
 0x8f8   : > { %8186 = vmatmul.msk.f32.gmra.mxu2 %vm729_vm1, %v3619_v44  ;;  %v9301_v22 = vpop.eup %9300 }
 0x8f9   : > { %v3340_v54 = vmul.f32 %v9301_v22, %v12631_v6  ;;  %v3341_v28 = vmul.f32 %v9301_v22, %v12634_v45  ;;  %v3235_v0 = vpop.xlane.xlu1 %3234  ;;  %v9303_v11 = vpop.eup %9302 }
 0x8fa   : > { %v12792_v21 = vpop.f32.mrf.mxu0  ;;  %9304 = vrcp.f32 %v3235_v0  ;;  %v3342_v6 = vmul.f32 %v9303_v11, %v12609_v1  ;;  %v3343_v45 = vmul.f32 %v9303_v11, %v12612_v31  ;;  %v3238_v48 = vpop.xlane.xlu0 %3237 }
 0x8fb   : > { %3528 = vmatmul.f32.gmra.mxu3 %v3338_v60  ;;  %3641 = vmatmul.f32.gmra.mxu1 %v3339_v9  ;;  %9306 = vrcp.f32 %v3238_v48 }
 0x8fd   : > { %8235 = vmatmul.msk.f32.gmra.mxu0 %vm291_vm0, %v9768_v13  ;;  %v3508_v37 = vpop.f32.mrf.mxu3 }
 0x8fe   : > { %v3622_v50 = vadd.f32 %v3621_v23, %v3508_v37  ;;  %v3241_v23 = vpop.xlane.xlu2 %3240 }
 0x8ff   : > { %9308 = vrcp.f32 %v3241_v23 }
 0x900   : > { %8187 = vmatmul.msk.f32.gmra.mxu2 %vm729_vm1, %v3622_v50  ;;  %v3624_v25 = vpop.f32.mrf.mxu1  ;;  %v9305_v40 = vpop.eup %9304 }
 0x901   : > { %v3344_v1 = vmul.f32 %v9305_v40, %v12649_v53  ;;  %v3345_v31 = vmul.f32 %v9305_v40, %v12651_v2  ;;  %v9307_v13 = vpop.eup %9306  ;;  %v3244_v53 = vpop.xlane.xlu1 %3243  ;;  %v9772_v2 = vld [vmem:[%s9887_s11 + $0xb8] sm:$0xff] }
 0x902   : > { %v12801_v27 = vpop.f32.mrf.mxu0  ;;  %v3346_v22 = vmul.f32 %v9307_v13, %v12657_v51  ;;  %v3347_v37 = vmul.f32 %v9307_v13, %v12659_v49  ;;  %9310 = vrcp.f32 %v3244_v53  ;;  %v9773_v51 = vld [vmem:[%s9887_s11 + $0xc0] sm:$0xff] }
 0x903   : > { %3531 = vmatmul.f32.gmra.mxu3 %v3340_v54  ;;  %3644 = vmatmul.f32.gmra.mxu1 %v3341_v28  ;;  %v9777_v13 = vld [vmem:[%s9887_s11 + $0xe0] sm:$0xff] }
 0x905   : > { %8236 = vmatmul.msk.f32.gmra.mxu0 %vm291_vm0, %v9769_v5  ;;  %v9309_v54 = vpop.eup %9308 }
 0x906   : > { %v3511_v12 = vpop.f32.mrf.mxu3  ;;  %v3348_v28 = vmul.f32 %v9309_v54, %v12637_v36  ;;  %v9774_v36 = vld [vmem:[%s9887_s11 + $0xc8] sm:$0xff] }
 0x907   : > { %v3625_v32 = vadd.f32 %v3624_v25, %v3511_v12  ;;  %v3349_v25 = vmul.f32 %v9309_v54, %v12643_v16 }
 0x908   : > { %v3627_v47 = vpop.f32.mrf.mxu1  ;;  %v9311_v49 = vpop.eup %9310 }
 0x909   : > { %8188 = vmatmul.msk.f32.gmra.mxu2 %vm729_vm1, %v3625_v32  ;;  %v3350_v5 = vmul.f32 %v9311_v49, %v12669_v35  ;;  %v3351_v11 = vmul.f32 %v9311_v49, %v12673_v7  ;;  %v9775_v32 = vld [vmem:[%s9887_s11 + $0xd0] sm:$0xff] }
 0x90a   : > { %v12808_v59 = vpop.f32.mrf.mxu0 }
 0x90b   : > { %3534 = vmatmul.f32.gmra.mxu3 %v3342_v6  ;;  %3647 = vmatmul.f32.gmra.mxu1 %v3343_v45  ;;  %v3909_v45 = vld [vmem:[#allocation2 + $0x10] sm:$0xff] }
 0x90d   : > { %8237 = vmatmul.msk.f32.gmra.mxu0 %vm291_vm0, %v9770_v42 }
 0x90e   : > { %v3514_v44 = vpop.f32.mrf.mxu3 }
 0x90f   : > { %v3628_v60 = vadd.f32 %v3627_v47, %v3514_v44  ;;  %v9776_v47 = vld [vmem:[%s9887_s11 + $0xd8] sm:$0xff]  ;;  %v3250_v44 = vpop.xlane.xlu2 %3249 }
 0x911   : > { %8189 = vmatmul.msk.f32.gmra.mxu2 %vm729_vm1, %v3628_v60 }
 0x912   : > { %v12815_v9 = vpop.f32.mrf.mxu0 }
 0x913   : > { %3537 = vmatmul.f32.gmra.mxu3 %v3344_v1  ;;  %3650 = vmatmul.f32.gmra.mxu1 %v3345_v31 }
 0x915   : > { %8238 = vmatmul.msk.f32.gmra.mxu0 %vm291_vm0, %v9771_v38 }
 0x91a   : > { %v12821_v50 = vpop.f32.mrf.mxu0 }
 0x91b   : > { %3540 = vmatmul.f32.gmra.mxu3 %v3346_v22  ;;  %3653 = vmatmul.f32.gmra.mxu1 %v3347_v37  ;;  %v3253_v22 = vpop.xlane.xlu1 %3252 }
 0x91d   : > { %8239 = vmatmul.msk.f32.gmra.mxu0 %vm291_vm0, %v9772_v2 }
 0x922   : > { %v12827_v0 = vpop.f32.mrf.mxu0 }
 0x923   : > { %3543 = vmatmul.f32.gmra.mxu3 %v3348_v28  ;;  %3656 = vmatmul.f32.gmra.mxu1 %v3349_v25 }
 0x925   : > { %8240 = vmatmul.msk.f32.gmra.mxu0 %vm291_vm0, %v9773_v51 }
 0x92a   : > { %v12833_v12 = vpop.f32.mrf.mxu0 }
 0x92b   : > { %3546 = vmatmul.f32.gmra.mxu3 %v3350_v5  ;;  %3659 = vmatmul.f32.gmra.mxu1 %v3351_v11 }
 0x92d   : > { %8241 = vmatmul.msk.f32.gmra.mxu0 %vm291_vm0, %v9774_v36 }
 0x932   : > { %v12837_v16 = vpop.f32.mrf.mxu0 }
 0x935   : > { %8242 = vmatmul.msk.f32.gmra.mxu0 %vm291_vm0, %v9775_v32 }
 0x937   : > { %v3630_v7 = vpop.f32.mrf.mxu1 }
 0x939   : > { %v3817_v6 = vpop.f32.mrf.mxu2 }
 0x93a   : > { %v3247_v48 = vpop.xlane.xlu0 %3246  ;;  %v3941_v42 = vadd.f32 %v3909_v45, %v3817_v6  ;;  %v12841_v35 = vpop.f32.mrf.mxu0 }
 0x93b   : > { %9312 = vrcp.f32 %v3247_v48 }
 0x93c   : > { %3973 = vst.msk [vmem:[#allocation2 + $0x10] sm:$0xff] %vm291_vm0, %v3941_v42  ;;  %9314 = vrcp.f32 %v3250_v44  ;;  %v3910_v42 = vld [vmem:[#allocation2 + $0x18] sm:$0xff] }
 0x93d   : > { %v3517_v40 = vpop.f32.mrf.mxu3  ;;  %8243 = vmatmul.msk.f32.gmra.mxu0 %vm291_vm0, %v9776_v47  ;;  %9316 = vrcp.f32 %v3253_v22 }
 0x93e   : > { %v3631_v60 = vadd.f32 %v3630_v7, %v3517_v40 }
 0x940   : > { %8190 = vmatmul.msk.f32.gmra.mxu2 %vm729_vm1, %v3631_v60 }
 0x941   : > { %v9313_v1 = vpop.eup %9312 }
 0x942   : > { %v3352_v31 = vmul.f32 %v9313_v1, %v12726_v3  ;;  %v3353_v23 = vmul.f32 %v9313_v1, %v12728_v56  ;;  %v12849_v38 = vpop.f32.mrf.mxu0  ;;  %v9315_v37 = vpop.eup %9314  ;;  %v9778_v3 = vld [vmem:[%s9887_s11 + $0xe8] sm:$0xff] }
 0x943   : > { %v3354_v53 = vmul.f32 %v9315_v37, %v12677_v17  ;;  %v3355_v2 = vmul.f32 %v9315_v37, %v12679_v61  ;;  %v3256_v56 = vpop.xlane.xlu0 %3255  ;;  %v9317_v28 = vpop.eup %9316  ;;  %v9779_v61 = vld [vmem:[%s9887_s11 + $0xf0] sm:$0xff] }
 0x944   : > { %3549 = vmatmul.f32.gmra.mxu3 %v3352_v31  ;;  %3662 = vmatmul.f32.gmra.mxu1 %v3353_v23  ;;  %9318 = vrcp.f32 %v3256_v56  ;;  %v3356_v25 = vmul.f32 %v9317_v28, %v12689_v39  ;;  %v3357_v51 = vmul.f32 %v9317_v28, %v12695_v34  ;;  %v3259_v17 = vpop.xlane.xlu2 %3258  ;;  %v9780_v39 = vld [vmem:[%s9887_s11 + $0xf8] sm:$0xff] }
 0x945   : > { %8244 = vmatmul.msk.f32.gmra.mxu0 %vm291_vm0, %v9777_v13  ;;  %9320 = vrcp.f32 %v3259_v17  ;;  %v3911_v13 = vld [vmem:[#allocation2 + $0x20] sm:$0xff]  ;;  %v3912_v17 = vld [vmem:[#allocation2 + $0x28] sm:$0xff] }
 0x94a   : > { %v12855_v54 = vpop.f32.mrf.mxu0  ;;  %v9319_v5 = vpop.eup %9318 }
 0x94b   : > { %v3358_v11 = vmul.f32 %v9319_v5, %v12734_v41  ;;  %v3359_v36 = vmul.f32 %v9319_v5, %v12736_v26  ;;  %v9321_v6 = vpop.eup %9320 }
 0x94c   : > { %3552 = vmatmul.f32.gmra.mxu3 %v3354_v53  ;;  %3665 = vmatmul.f32.gmra.mxu1 %v3355_v2  ;;  %v3262_v34 = vpop.xlane.xlu2 %3261  ;;  %v3360_v7 = vmul.f32 %v9321_v6, %v12691_v14  ;;  %v3361_v40 = vmul.f32 %v9321_v6, %v12693_v43 }
 0x94d   : > { %8245 = vmatmul.msk.f32.gmra.mxu0 %vm291_vm0, %v9778_v3  ;;  %9322 = vrcp.f32 %v3262_v34 }
 0x952   : > { %v12861_v49 = vpop.f32.mrf.mxu0  ;;  %v3265_v47 = vpop.xlane.xlu1 %3264 }
 0x953   : > { %v9323_v60 = vpop.eup %9322  ;;  %9324 = vrcp.f32 %v3265_v47 }
 0x954   : > { %3555 = vmatmul.f32.gmra.mxu3 %v3356_v25  ;;  %3668 = vmatmul.f32.gmra.mxu1 %v3357_v51  ;;  %v3362_v14 = vmul.f32 %v9323_v60, %v12703_v62  ;;  %v3363_v43 = vmul.f32 %v9323_v60, %v12705_v15 }
 0x955   : > { %8246 = vmatmul.msk.f32.gmra.mxu0 %vm291_vm0, %v9779_v61 }
 0x959   : > { %v9325_v3 = vpop.eup %9324 }
 0x95a   : > { %v12867_v32 = vpop.f32.mrf.mxu0  ;;  %v3364_v25 = vmul.f32 %v9325_v3, %v12747_v46  ;;  %v3365_v62 = vmul.f32 %v9325_v3, %v12749_v57 }
 0x95c   : > { %3558 = vmatmul.f32.gmra.mxu3 %v3358_v11  ;;  %3671 = vmatmul.f32.gmra.mxu1 %v3359_v36 }
 0x95d   : > { %8247 = vmatmul.msk.f32.gmra.mxu0 %vm291_vm0, %v9780_v39 }
 0x960   : > { %v3633_v45 = vpop.f32.mrf.mxu1 }
 0x962   : > { %v3820_v48 = vpop.f32.mrf.mxu2  ;;  %v12873_v41 = vpop.f32.mrf.mxu0 }
 0x963   : > { %v3942_v26 = vadd.f32 %v3910_v42, %v3820_v48  ;;  %v3268_v53 = vpop.xlane.xlu2 %3267 }
 0x964   : > { %3561 = vmatmul.f32.gmra.mxu3 %v3360_v7  ;;  %3674 = vmatmul.f32.gmra.mxu1 %v3361_v40  ;;  %9326 = vrcp.f32 %v3268_v53 }
 0x965   : > { %3974 = vst.msk [vmem:[#allocation2 + $0x18] sm:$0xff] %vm291_vm0, %v3942_v26 }
 0x966   : > { %v3520_v44 = vpop.f32.mrf.mxu3 }
 0x967   : > { %v3634_v1 = vadd.f32 %v3633_v45, %v3520_v44  ;;  %v3913_v45 = vld [vmem:[#allocation2 + $0x30] sm:$0xff] }
 0x968   : > { %v3636_v31 = vpop.f32.mrf.mxu1 }
 0x969   : > { %8191 = vmatmul.msk.f32.gmra.mxu2 %vm729_vm1, %v3634_v1 }
 0x96a   : > { %v3823_v23 = vpop.f32.mrf.mxu2  ;;  %v12879_v22 = vpop.f32.mrf.mxu0 }
 0x96b   : > { %v3943_v37 = vadd.f32 %v3911_v13, %v3823_v23  ;;  %v9327_v11 = vpop.eup %9326  ;;  %v3915_v13 = vld [vmem:[#allocation2 + $0x40] sm:$0xff] }
 0x96c   : > { %3564 = vmatmul.f32.gmra.mxu3 %v3362_v14  ;;  %3677 = vmatmul.f32.gmra.mxu1 %v3363_v43  ;;  %v3366_v34 = vmul.f32 %v9327_v11, %v12772_v19  ;;  %v3367_v46 = vmul.f32 %v9327_v11, %v12774_v52  ;;  %v3914_v19 = vld [vmem:[#allocation2 + $0x38] sm:$0xff] }
 0x96d   : > { %3975 = vst.msk [vmem:[#allocation2 + $0x20] sm:$0xff] %vm291_vm0, %v3943_v37 }
 0x96e   : > { %v3523_v2 = vpop.f32.mrf.mxu3 }
 0x96f   : > { %v3637_v56 = vadd.f32 %v3636_v31, %v3523_v2 }
 0x970   : > { %v3639_v28 = vpop.f32.mrf.mxu1 }
 0x971   : > { %8192 = vmatmul.msk.f32.gmra.mxu2 %vm729_vm1, %v3637_v56  ;;  %v3916_v56 = vld [vmem:[#allocation2 + $0x48] sm:$0xff] }
 0x972   : > { %v12885_v15 = vpop.f32.mrf.mxu0 }
 0x973   : > { %v3826_v51 = vpop.f32.mrf.mxu2 }
 0x974   : > { %v3944_v61 = vadd.f32 %v3912_v17, %v3826_v51  ;;  %3567 = vmatmul.f32.gmra.mxu3 %v3364_v25  ;;  %3680 = vmatmul.f32.gmra.mxu1 %v3365_v62 }
 0x976   : > { %3976 = vst.msk [vmem:[#allocation2 + $0x28] sm:$0xff] %vm291_vm0, %v3944_v61  ;;  %v3526_v5 = vpop.f32.mrf.mxu3 }
 0x977   : > { %v3640_v36 = vadd.f32 %v3639_v28, %v3526_v5 }
 0x978   : > { %v3642_v39 = vpop.f32.mrf.mxu1 }
 0x979   : > { %8193 = vmatmul.msk.f32.gmra.mxu2 %vm729_vm1, %v3640_v36 }
 0x97a   : > { %v12891_v57 = vpop.f32.mrf.mxu0 }
 0x97b   : > { %v3829_v6 = vpop.f32.mrf.mxu2 }
 0x97c   : > { %3570 = vmatmul.f32.gmra.mxu3 %v3366_v34  ;;  %3683 = vmatmul.f32.gmra.mxu1 %v3367_v46  ;;  %v3945_v48 = vadd.f32 %v3913_v45, %v3829_v6 }
 0x97e   : > { %v3529_v42 = vpop.f32.mrf.mxu3  ;;  %3977 = vst.msk [vmem:[#allocation2 + $0x30] sm:$0xff] %vm291_vm0, %v3945_v48 }
 0x97f   : > { %v3643_v7 = vadd.f32 %v3642_v39, %v3529_v42 }
 0x980   : > { %v3645_v40 = vpop.f32.mrf.mxu1 }
 0x981   : > { %8194 = vmatmul.msk.f32.gmra.mxu2 %vm729_vm1, %v3643_v7 }
 0x982   : > { %v12895_v26 = vpop.f32.mrf.mxu0 }
 0x983   : > { %v3832_v47 = vpop.f32.mrf.mxu2 }
 0x984   : > { %v3946_v44 = vadd.f32 %v3914_v19, %v3832_v47 }
 0x986   : > { %v3532_v52 = vpop.f32.mrf.mxu3  ;;  %3978 = vst.msk [vmem:[#allocation2 + $0x38] sm:$0xff] %vm291_vm0, %v3946_v44  ;;  %v3917_v44 = vld [vmem:[#allocation2 + $0x50] sm:$0xff] }
 0x987   : > { %v3646_v60 = vadd.f32 %v3645_v40, %v3532_v52 }
 0x988   : > { %v3648_v1 = vpop.f32.mrf.mxu1 }
 0x989   : > { %8195 = vmatmul.msk.f32.gmra.mxu2 %vm729_vm1, %v3646_v60 }
 0x98a   : > { %v12899_v31 = vpop.f32.mrf.mxu0 }
 0x98c   : > { %v3835_v23 = vpop.f32.mrf.mxu2 }
 0x98d   : > { %v3947_v14 = vadd.f32 %v3915_v13, %v3835_v23 }
 0x98e   : > { %v3535_v43 = vpop.f32.mrf.mxu3 }
 0x98f   : > { %3979 = vst.msk [vmem:[#allocation2 + $0x40] sm:$0xff] %vm291_vm0, %v3947_v14  ;;  %v3649_v37 = vadd.f32 %v3648_v1, %v3535_v43 }
 0x990   : > { %v3651_v53 = vpop.f32.mrf.mxu1 }
 0x991   : > { %8196 = vmatmul.msk.f32.gmra.mxu2 %vm729_vm1, %v3649_v37 }
 0x992   : > { %v12903_v2 = vpop.f32.mrf.mxu0 }
 0x994   : > { %v3838_v3 = vpop.f32.mrf.mxu2 }
 0x995   : > { %v3948_v28 = vadd.f32 %v3916_v56, %v3838_v3 }
 0x996   : > { %v3538_v25 = vpop.f32.mrf.mxu3 }
 0x997   : > { %3980 = vst.msk [vmem:[#allocation2 + $0x48] sm:$0xff] %vm291_vm0, %v3948_v28  ;;  %v3652_v62 = vadd.f32 %v3651_v53, %v3538_v25 }
 0x998   : > { %v3654_v51 = vpop.f32.mrf.mxu1 }
 0x999   : > { %8197 = vmatmul.msk.f32.gmra.mxu2 %vm729_vm1, %v3652_v62 }
 0x99a   : > { %v12907_v17 = vpop.f32.mrf.mxu0 }
 0x99e   : > { %v3541_v61 = vpop.f32.mrf.mxu3 }
 0x99f   : > { %v3655_v5 = vadd.f32 %v3654_v51, %v3541_v61 }
 0x9a0   : > { %v3657_v36 = vpop.f32.mrf.mxu1 }
 0x9a1   : > { %8198 = vmatmul.msk.f32.gmra.mxu2 %vm729_vm1, %v3655_v5 }
 0x9a2   : > { %v12910_v11 = vpop.f32.mrf.mxu0 }
 0x9a3   : > { %4335 = vrot.lane.b32.xlu0 %v12910_v11, %s9822_s12 }
 0x9a6   : > { %v3544_v39 = vpop.f32.mrf.mxu3 }
 0x9a7   : > { %v3658_v34 = vadd.f32 %v3657_v36, %v3544_v39 }
 0x9a8   : > { %v3660_v6 = vpop.f32.mrf.mxu1 }
 0x9a9   : > { %8199 = vmatmul.msk.f32.gmra.mxu2 %vm729_vm1, %v3658_v34 }
 0x9aa   : > { %v12915_v46 = vpop.f32.mrf.mxu0 }
 0x9ab   : > { %4337 = vrot.lane.b32.xlu0 %v12915_v46, %s9822_s12 }
 0x9ae   : > { %v3547_v45 = vpop.f32.mrf.mxu3 }
 0x9af   : > { %v3661_v48 = vadd.f32 %v3660_v6, %v3547_v45  ;;  %v3918_v6 = vld [vmem:[#allocation2 + $0x58] sm:$0xff] }
 0x9b1   : > { %8200 = vmatmul.msk.f32.gmra.mxu2 %vm729_vm1, %v3661_v48  ;;  %v3050_v48 = vsub.f32 %v12542_v18, %v12785_v33 }
 0x9b2   : > { %v12920_v42 = vpop.f32.mrf.mxu0 }
 0x9b3   : > { %4339 = vrot.lane.b32.xlu0 %v12920_v42, %s9822_s12 }
 0x9ba   : > { %v12924_v7 = vpop.f32.mrf.mxu0 }
 0x9bb   : > { %4341 = vrot.lane.b32.xlu0 %v12924_v7, %s9822_s12 }
 0x9c1   : > { %v3663_v40 = vpop.f32.mrf.mxu1 }
 0x9c2   : > { %v12928_v47 = vpop.f32.mrf.mxu0 }
 0x9c3   : > { %v3841_v19 = vpop.f32.mrf.mxu2  ;;  %4343 = vrot.lane.b32.xlu0 %v12928_v47, %s9822_s12 }
 0x9c4   : > { %v3949_v52 = vadd.f32 %v3917_v44, %v3841_v19  ;;  %v3052_v44 = vsub.f32 %v12622_v24, %v12794_v58 }
 0x9c6   : > { %3981 = vst.msk [vmem:[#allocation2 + $0x50] sm:$0xff] %vm291_vm0, %v3949_v52 }
 0x9c7   : > { %v3550_v60 = vpop.f32.mrf.mxu3 }
 0x9c8   : > { %v3664_v1 = vadd.f32 %v3663_v40, %v3550_v60  ;;  %v3051_v40 = vsub.f32 %v12549_v63, %v12785_v33  ;;  %v3053_v60 = vsub.f32 %v12627_v30, %v12794_v58  ;;  %v3049_v63 = vsub.f32 %v12604_v55, %v12770_v29 }
 0x9c9   : > { %v3666_v23 = vpop.f32.mrf.mxu1  ;;  %v3178_v33 = vmul.f32 1.442695, %v3052_v44  ;;  %v3921_v44 = vld [vmem:[#allocation2 + $0x70] sm:$0xff] }
 0x9ca   : > { %8201 = vmatmul.msk.f32.gmra.mxu2 %vm729_vm1, %v3664_v1  ;;  %v12934_v13 = vpop.f32.mrf.mxu0  ;;  %v3174_v1 = vmul.f32 1.442695, %v3050_v48  ;;  %v3176_v18 = vmul.f32 1.442695, %v3051_v40  ;;  %v3172_v30 = vmul.f32 1.442695, %v3049_v63 }
 0x9cb   : > { %4345 = vrot.lane.b32.xlu2 %v12934_v13, %s9822_s12 }
 0x9cc   : > { %9328 = vpow2.f32 %v3174_v1 }
 0x9cd   : > { %9330 = vpow2.f32 %v3176_v18 }
 0x9ce   : > { %9332 = vpow2.f32 %v3178_v33  ;;  %v3923_v33 = vld [vmem:[#allocation2 + $0x80] sm:$0xff] }
 0x9cf   : > { %v3553_v14 = vpop.f32.mrf.mxu3 }
 0x9d0   : > { %v3667_v43 = vadd.f32 %v3666_v23, %v3553_v14  ;;  %v3048_v23 = vsub.f32 %v12590_v8, %v12770_v29 }
 0x9d1   : > { %v3669_v37 = vpop.f32.mrf.mxu1 }
 0x9d2   : > { %8202 = vmatmul.msk.f32.gmra.mxu2 %vm729_vm1, %v3667_v43  ;;  %v12939_v53 = vpop.f32.mrf.mxu0  ;;  %v3919_v43 = vld [vmem:[#allocation2 + $0x60] sm:$0xff]  ;;  %v12972_v55 = vpop.eup %9328 }
 0x9d3   : > { %4331 = vrot.lane.b32.xlu2 %v12903_v2, %s9822_s12  ;;  %4347 = vrot.lane.b32.xlu1 %v12939_v53, %s9822_s12 }
 0x9d7   : > { %v3556_v3 = vpop.f32.mrf.mxu3 }
 0x9d8   : > { %v3670_v56 = vadd.f32 %v3669_v37, %v3556_v3  ;;  %v3180_v37 = vmul.f32 1.442695, %v3053_v60 }
 0x9d9   : > { %v3672_v28 = vpop.f32.mrf.mxu1 }
 0x9da   : > { %8203 = vmatmul.msk.f32.gmra.mxu2 %vm729_vm1, %v3670_v56  ;;  %v12946_v25 = vpop.f32.mrf.mxu0  ;;  %v3170_v56 = vmul.f32 1.442695, %v3048_v23  ;;  %9334 = vpow2.f32 %v3180_v37  ;;  %v3922_v23 = vld [vmem:[#allocation2 + $0x78] sm:$0xff]  ;;  %v3924_v37 = vld [vmem:[#allocation2 + $0x88] sm:$0xff] }
 0x9db   : > { %4327 = vrot.lane.b32.xlu2 %v12895_v26, %s9822_s12  ;;  %4333 = vrot.lane.b32.xlu1 %v12907_v17, %s9822_s12 }
 0x9dc   : > { %4349 = vrot.lane.b32.xlu0 %v12946_v25, %s9822_s12  ;;  %9336 = vpow2.f32 %v3170_v56 }
 0x9dd   : > { %9338 = vpow2.f32 %v3172_v30  ;;  %v3925_v30 = vld [vmem:[#allocation2 + $0x90] sm:$0xff] }
 0x9df   : > { %v3559_v62 = vpop.f32.mrf.mxu3 }
 0x9e0   : > { %v3673_v51 = vadd.f32 %v3672_v28, %v3559_v62  ;;  %v3920_v28 = vld [vmem:[#allocation2 + $0x68] sm:$0xff]  ;;  %v12974_v62 = vpop.eup %9330 }
 0x9e1   : > { %v3675_v61 = vpop.f32.mrf.mxu1  ;;  %v3272_v40 = vadd.f32 %v12974_v62, %v12972_v55 }
 0x9e2   : > { %8204 = vmatmul.msk.f32.gmra.mxu2 %vm729_vm1, %v3673_v51 }
 0x9e7   : > { %v3562_v5 = vpop.f32.mrf.mxu3 }
 0x9e8   : > { %v3676_v36 = vadd.f32 %v3675_v61, %v3562_v5  ;;  %v12976_v61 = vpop.eup %9332 }
 0x9e9   : > { %v3678_v39 = vpop.f32.mrf.mxu1  ;;  %v12978_v5 = vpop.eup %9334 }
 0x9ea   : > { %8205 = vmatmul.msk.f32.gmra.mxu2 %vm729_vm1, %v3676_v36  ;;  %v3275_v48 = vadd.f32 %v12978_v5, %v12976_v61 }
 0x9ec   : > { %v3844_v34 = vpop.f32.mrf.mxu2 }
 0x9ed   : > { %v3950_v45 = vadd.f32 %v3918_v6, %v3844_v34  ;;  %v12981_v34 = vpop.eup %9336 }
 0x9ef   : > { %3982 = vst.msk [vmem:[#allocation2 + $0x58] sm:$0xff] %vm291_vm0, %v3950_v45  ;;  %v3565_v19 = vpop.f32.mrf.mxu3  ;;  %v12983_v45 = vpop.eup %9338 }
 0x9f0   : > { %v3679_v52 = vadd.f32 %v3678_v39, %v3565_v19 }
 0x9f1   : > { %v3681_v3 = vpop.f32.mrf.mxu1 }
 0x9f2   : > { %8206 = vmatmul.msk.f32.gmra.mxu2 %vm729_vm1, %v3679_v52  ;;  %v3269_v52 = vadd.f32 %v12983_v45, %v12981_v34 }
 0x9f4   : > { %v3847_v14 = vpop.f32.mrf.mxu2 }
 0x9f5   : > { %v3951_v24 = vadd.f32 %v3919_v43, %v3847_v14 }
 0x9f7   : > { %3983 = vst.msk [vmem:[#allocation2 + $0x60] sm:$0xff] %vm291_vm0, %v3951_v24  ;;  %v3568_v58 = vpop.f32.mrf.mxu3 }
 0x9f8   : > { %v3682_v8 = vadd.f32 %v3681_v3, %v3568_v58 }
 0x9f9   : > { %v3684_v36 = vpop.f32.mrf.mxu1 }
 0x9fa   : > { %8207 = vmatmul.msk.f32.gmra.mxu2 %vm729_vm1, %v3682_v8 }
 0x9fc   : > { %v3850_v29 = vpop.f32.mrf.mxu2 }
 0x9fd   : > { %v3952_v51 = vadd.f32 %v3920_v28, %v3850_v29  ;;  %v3926_v28 = vld [vmem:[#allocation2 + $0x98] sm:$0xff] }
 0x9ff   : > { %3984 = vst.msk [vmem:[#allocation2 + $0x68] sm:$0xff] %vm291_vm0, %v3952_v51  ;;  %v3571_v39 = vpop.f32.mrf.mxu3 }
 0xa00   : > { %v3685_v6 = vadd.f32 %v3684_v36, %v3571_v39 }
 0xa02   : > { %8208 = vmatmul.msk.f32.gmra.mxu2 %vm729_vm1, %v3685_v6  ;;  %v3927_v6 = vld [vmem:[#allocation2 + $0xa0] sm:$0xff] }
 0xa04   : > { %v3853_v19 = vpop.f32.mrf.mxu2  ;;  %3276 = vadd.xlane.f32.xlu2 %v3275_v48 }
 0xa05   : > { %v3953_v60 = vadd.f32 %v3921_v44, %v3853_v19  ;;  %3273 = vadd.xlane.f32.xlu1 %v3272_v40  ;;  %v8812_v40 = vpack.i.bf16 %v12833_v12, %v12934_v13  ;;  %v8822_v44 = vpack.i.bf16 %v12821_v50, %v12924_v7 }
 0xa06   : > { %3270 = vadd.xlane.f32.xlu0 %v3269_v52 }
 0xa07   : > { %3985 = vst.msk [vmem:[#allocation2 + $0x70] sm:$0xff] %vm291_vm0, %v3953_v60  ;;  %v8827_v60 = vpack.i.bf16 %v12815_v9, %v12920_v42 }
 0xa0c   : > { %v3856_v1 = vpop.f32.mrf.mxu2 }
 0xa0d   : > { %v3954_v18 = vadd.f32 %v3922_v23, %v3856_v1  ;;  %v8802_v1 = vpack.i.bf16 %v12849_v38, %v12855_v54 }
 0xa0f   : > { %3986 = vst.msk [vmem:[#allocation2 + $0x78] sm:$0xff] %vm291_vm0, %v3954_v18  ;;  %v3928_v18 = vld [vmem:[#allocation2 + $0xa8] sm:$0xff] }
 0xa14   : > { %v3859_v63 = vpop.f32.mrf.mxu2 }
 0xa15   : > { %v3955_v14 = vadd.f32 %v3923_v33, %v3859_v63  ;;  %v12999_v24 = vpop.permute.xlu0 %4335 }
 0xa17   : > { %3987 = vst.msk [vmem:[#allocation2 + $0x80] sm:$0xff] %vm291_vm0, %v3955_v14  ;;  %v8832_v14 = vpack.i.bf16 %v12808_v59, %v12915_v46 }
 0xa1a   : > { %4329 = vrot.lane.b32.xlu0 %v12899_v31, %s9822_s12 }
 0xa1c   : > { %v3862_v43 = vpop.f32.mrf.mxu2  ;;  %4315 = vrot.lane.b32.xlu2 %v12861_v49, %s9822_s12 }
 0xa1d   : > { %v3956_v3 = vadd.f32 %v3924_v37, %v3862_v43  ;;  %v13011_v8 = vpop.permute.xlu0 %4337  ;;  %v8807_v37 = vpack.i.bf16 %v12837_v16, %v12939_v53 }
 0xa1e   : > { %4321 = vrot.lane.b32.xlu1 %v12879_v22, %s9822_s12 }
 0xa1f   : > { %3988 = vst.msk [vmem:[#allocation2 + $0x88] sm:$0xff] %vm291_vm0, %v3956_v3 }
 0xa22   : > { %4325 = vrot.lane.b32.xlu0 %v12891_v57, %s9822_s12 }
 0xa24   : > { %v3865_v56 = vpop.f32.mrf.mxu2  ;;  %4301 = vrot.lane.b32.xlu2 %v12821_v50, %s9822_s12 }
 0xa25   : > { %v3957_v58 = vadd.f32 %v3925_v30, %v3865_v56  ;;  %v4340_v36 = vpop.permute.xlu0 %4339  ;;  %v3929_v56 = vld [vmem:[#allocation2 + $0xb0] sm:$0xff]  ;;  %v4346_v30 = vpop.permute.xlu2 %4345 }
 0xa26   : > { %4311 = vrot.lane.b32.xlu1 %v12849_v38, %s9822_s12 }
 0xa27   : > { %3989 = vst.msk [vmem:[#allocation2 + $0x90] sm:$0xff] %vm291_vm0, %v3957_v58 }
 0xa2a   : > { %4323 = vrot.lane.b32.xlu0 %v12885_v15, %s9822_s12 }
 0xa2c   : > { %v3868_v29 = vpop.f32.mrf.mxu2  ;;  %4295 = vrot.lane.b32.xlu2 %v12801_v27, %s9822_s12 }
 0xa2d   : > { %v3958_v51 = vadd.f32 %v3926_v28, %v3868_v29  ;;  %v4342_v19 = vpop.permute.xlu0 %4341  ;;  %v8872_v29 = vpack.i.bf16 %v12841_v35, %v12946_v25  ;;  %v8817_v28 = vpack.i.bf16 %v12827_v0, %v12928_v47 }
 0xa2e   : > { %4307 = vrot.lane.b32.xlu1 %v12837_v16, %s9822_s12 }
 0xa2f   : > { %3990 = vst.msk [vmem:[#allocation2 + $0x98] sm:$0xff] %vm291_vm0, %v3958_v51 }
 0xa32   : > { %4319 = vrot.lane.b32.xlu0 %v12873_v41, %s9822_s12 }
 0xa34   : > { %v3871_v39 = vpop.f32.mrf.mxu2  ;;  %4289 = vrot.lane.b32.xlu2 %v12768_v10, %s9822_s12 }
 0xa35   : > { %v3959_v48 = vadd.f32 %v3927_v6, %v3871_v39  ;;  %v4344_v52 = vpop.permute.xlu0 %4343  ;;  %v3930_v39 = vld [vmem:[#allocation2 + $0xb8] sm:$0xff] }
 0xa36   : > { %4303 = vrot.lane.b32.xlu1 %v12827_v0, %s9822_s12 }
 0xa37   : > { %3991 = vst.msk [vmem:[#allocation2 + $0xa0] sm:$0xff] %vm291_vm0, %v3959_v48  ;;  %v8852_v48 = vpack.i.bf16 %v12768_v10, %v12899_v31 }
 0xa3a   : > { %4317 = vrot.lane.b32.xlu0 %v12867_v32, %s9822_s12 }
 0xa3c   : > { %8813 = vrot.lane.b32.xlu2 %v8812_v40, %s9823_s13  ;;  %v4332_v40 = vpop.permute.xlu2 %4331 }
 0xa3e   : > { %4297 = vrot.lane.b32.xlu1 %v12808_v59, %s9822_s12 }
 0xa42   : > { %4313 = vrot.lane.b32.xlu0 %v12855_v54, %s9822_s12 }
 0xa44   : > { %8823 = vrot.lane.b32.xlu2 %v8822_v44, %s9823_s13 }
 0xa45   : > { %v4348_v43 = vpop.permute.xlu1 %4347 }
 0xa46   : > { %4291 = vrot.lane.b32.xlu1 %v12783_v4, %s9822_s12 }
 0xa4a   : > { %4309 = vrot.lane.b32.xlu0 %v12841_v35, %s9822_s12 }
 0xa4c   : > { %8828 = vrot.lane.b32.xlu2 %v8827_v60, %s9823_s13 }
 0xa4d   : > { %v3874_v23 = vpop.f32.mrf.mxu2 }
 0xa4e   : > { %v3960_v63 = vadd.f32 %v3928_v18, %v3874_v23  ;;  %v4350_v33 = vpop.permute.xlu0 %4349  ;;  %8803 = vrot.lane.b32.xlu1 %v8802_v1, %s9823_s13  ;;  %v4334_v1 = vpop.permute.xlu1 %4333 }
 0xa4f   : > { %8329 = vmatpush.xpose.msk.msrb.mxu1 %vm729_vm1, %v4350_v33  ;;  %v4328_v18 = vpop.permute.xlu2 %4327  ;;  %v3933_v33 = vld [vmem:[#allocation2 + $0xd0] sm:$0xff] }
 0xa50   : > { %3992 = vst.msk [vmem:[#allocation2 + $0xa8] sm:$0xff] %vm291_vm0, %v3960_v63  ;;  %v8797_v63 = vpack.i.bf16 %v12861_v49, %v12867_v32 }
 0xa52   : > { %4305 = vrot.lane.b32.xlu0 %v12833_v12, %s9822_s12 }
 0xa53   : > { %8330 = vmatpush.xpose.msk.msrb.mxu1 %vm729_vm1, %v4348_v43  ;;  %v8837_v43 = vpack.i.bf16 %v12801_v27, %v12910_v11 }
 0xa54   : > { %8833 = vrot.lane.b32.xlu2 %v8832_v14, %s9823_s13 }
 0xa55   : > { %v3877_v3 = vpop.f32.mrf.mxu2 }
 0xa56   : > { %v3961_v58 = vadd.f32 %v3929_v56, %v3877_v3  ;;  %8808 = vrot.lane.b32.xlu1 %v8807_v37, %s9823_s13 }
 0xa57   : > { %8331 = vmatpush.xpose.msk.msrb.mxu1 %vm729_vm1, %v4346_v30  ;;  %v3934_v30 = vld [vmem:[#allocation2 + $0xd8] sm:$0xff] }
 0xa58   : > { %3993 = vst.msk [vmem:[#allocation2 + $0xb0] sm:$0xff] %vm291_vm0, %v3961_v58 }
 0xa5a   : > { %4299 = vrot.lane.b32.xlu0 %v12815_v9, %s9822_s12 }
 0xa5b   : > { %8332 = vmatpush.xpose.msk.msrb.mxu1 %vm729_vm1, %v4344_v52  ;;  %v3931_v52 = vld [vmem:[#allocation2 + $0xc0] sm:$0xff] }
 0xa5c   : > { %8873 = vrot.lane.b32.xlu2 %v8872_v29, %s9823_s13 }
 0xa5d   : > { %v3880_v51 = vpop.f32.mrf.mxu2 }
 0xa5e   : > { %v3962_v6 = vadd.f32 %v3930_v39, %v3880_v51  ;;  %8818 = vrot.lane.b32.xlu1 %v8817_v28, %s9823_s13  ;;  %v8842_v51 = vpack.i.bf16 %v12792_v21, %v12907_v17 }
 0xa5f   : > { %8333 = vmatpush.xpose.msk.msrb.mxu1 %vm729_vm1, %v4342_v19  ;;  %v3932_v19 = vld [vmem:[#allocation2 + $0xc8] sm:$0xff] }
 0xa60   : > { %3994 = vst.msk [vmem:[#allocation2 + $0xb8] sm:$0xff] %vm291_vm0, %v3962_v6 }
 0xa62   : > { %4293 = vrot.lane.b32.xlu0 %v12792_v21, %s9822_s12 }
 0xa63   : > { %8334 = vmatpush.xpose.msk.msrb.mxu1 %vm729_vm1, %v4340_v36 }
 0xa65   : > { %v3883_v44 = vpop.f32.mrf.mxu2 }
 0xa66   : > { %v3963_v60 = vadd.f32 %v3931_v52, %v3883_v44  ;;  %8853 = vrot.lane.b32.xlu1 %v8852_v48, %s9823_s13 }
 0xa67   : > { %8335 = vmatpush.xpose.msk.msrb.mxu1 %vm729_vm1, %v13011_v8 }
 0xa68   : > { %3995 = vst.msk [vmem:[#allocation2 + $0xc0] sm:$0xff] %vm291_vm0, %v3963_v60 }
 0xa6a   : > { %4287 = vrot.lane.b32.xlu0 %v12761_v20, %s9822_s12 }
 0xa6b   : > { %8336 = vmatpush.xpose.msk.msrb.mxu1 %vm729_vm1, %v12999_v24 }
 0xa6d   : > { %v3886_v36 = vpop.f32.mrf.mxu2 }
 0xa6e   : > { %v3964_v23 = vadd.f32 %v3932_v19, %v3886_v36  ;;  %v8847_v36 = vpack.i.bf16 %v12783_v4, %v12903_v2 }
 0xa6f   : > { %8337 = vmatpush.xpose.msk.msrb.mxu1 %vm729_vm1, %v4334_v1 }
 0xa70   : > { %3996 = vst.msk [vmem:[#allocation2 + $0xc8] sm:$0xff] %vm291_vm0, %v3964_v23 }
 0xa72   : > { %8798 = vrot.lane.b32.xlu0 %v8797_v63, %s9823_s13  ;;  %v8857_v63 = vpack.i.bf16 %v12761_v20, %v12895_v26 }
 0xa73   : > { %8338 = vmatpush.xpose.msk.msrb.mxu1 %vm729_vm1, %v4332_v40  ;;  %v3935_v40 = vld [vmem:[#allocation2 + $0xe0] sm:$0xff] }
 0xa75   : > { %v3889_v8 = vpop.f32.mrf.mxu2 }
 0xa76   : > { %v3965_v14 = vadd.f32 %v3933_v33, %v3889_v8 }
 0xa77   : > { %v3277_v24 = vpop.xlane.xlu2 %3276 }
 0xa78   : > { %3997 = vst.msk [vmem:[#allocation2 + $0xd0] sm:$0xff] %vm291_vm0, %v3965_v14  ;;  %v3274_v3 = vpop.xlane.xlu1 %3273 }
 0xa79   : > { %v3271_v37 = vpop.xlane.xlu0 %3270 }
 0xa7a   : > { %9340 = vrcp.f32 %v3271_v37  ;;  %8838 = vrot.lane.b32.xlu0 %v8837_v43, %s9823_s13 }
 0xa7b   : > { %9342 = vrcp.f32 %v3274_v3  ;;  %v13134_v3 = vld [vmem:[%s15549_s2 + $0x2] ss:$0 sm:$0xff] }
 0xa7c   : > { %9344 = vrcp.f32 %v3277_v24  ;;  %v8862_v24 = vpack.i.bf16 %v12885_v15, %v12891_v57 }
 0xa7d   : > { %v3892_v56 = vpop.f32.mrf.mxu2 }
 0xa7e   : > { %v3966_v58 = vadd.f32 %v3934_v30, %v3892_v56  ;;  %v13140_v30 = vadd.f32 %v13134_v3, %v12761_v20 }
 0xa7f   : > { %v4316_v29 = vpop.permute.xlu2 %4315 }
 0xa80   : > { %v9341_v28 = vpop.eup %9340  ;;  %3998 = vst.msk [vmem:[#allocation2 + $0xd8] sm:$0xff] %vm291_vm0, %v3966_v58 }
 0xa81   : > { %v3368_v39 = vmul.f32 %v9341_v28, %v12981_v34  ;;  %v3369_v6 = vmul.f32 %v9341_v28, %v12983_v45  ;;  %v9343_v44 = vpop.eup %9342 }
 0xa82   : > { %8843 = vrot.lane.b32.xlu0 %v8842_v51, %s9823_s13  ;;  %v3370_v34 = vmul.f32 %v9343_v44, %v12972_v55  ;;  %v3371_v45 = vmul.f32 %v9343_v44, %v12974_v62  ;;  %v9345_v1 = vpop.eup %9344 }
 0xa83   : > { %3573 = vmatmul.f32.gmra.mxu3 %v3368_v39  ;;  %3686 = vmatmul.f32.gmra.mxu1 %v3369_v6  ;;  %v3372_v55 = vmul.f32 %v9345_v1, %v12976_v61  ;;  %v3373_v62 = vmul.f32 %v9345_v1, %v12978_v5  ;;  %v8867_v5 = vpack.i.bf16 %v12873_v41, %v12879_v22 }
 0xa84   : > { %v13149_v39 = vadd.f32 %v13134_v3, %v12768_v10 }
 0xa85   : > { %v3895_v48 = vpop.f32.mrf.mxu2 }
 0xa86   : > { %v3967_v52 = vadd.f32 %v3935_v40, %v3895_v48  ;;  %v13159_v40 = vadd.f32 %v13134_v3, %v12783_v4 }
 0xa87   : > { %v13102_v60 = vpop.permute.xlu2 %4301 }
 0xa88   : > { %3999 = vst.msk [vmem:[#allocation2 + $0xe0] sm:$0xff] %vm291_vm0, %v3967_v52 }
 0xa8a   : > { %8848 = vrot.lane.b32.xlu0 %v8847_v36, %s9823_s13 }
 0xa8b   : > { %3576 = vmatmul.f32.gmra.mxu3 %v3370_v34  ;;  %3689 = vmatmul.f32.gmra.mxu1 %v3371_v45 }
 0xa8c   : > { %v4330_v19 = vpop.permute.xlu0 %4329 }
 0xa8d   : > { %8339 = vmatpush.xpose.msk.msrb.mxu1 %vm729_vm1, %v4330_v19  ;;  %v13177_v19 = vadd.f32 %v13134_v3, %v12801_v27 }
 0xa8f   : > { %v13111_v23 = vpop.permute.xlu2 %4295 }
 0xa90   : > { %v4322_v8 = vpop.permute.xlu1 %4321 }
 0xa91   : > { %8340 = vmatpush.xpose.msk.msrb.mxu1 %vm729_vm1, %v4328_v18 }
 0xa92   : > { %8858 = vrot.lane.b32.xlu0 %v8857_v63, %s9823_s13 }
 0xa93   : > { %3579 = vmatmul.f32.gmra.mxu3 %v3372_v55  ;;  %3692 = vmatmul.f32.gmra.mxu1 %v3373_v62  ;;  %v13187_v55 = vadd.f32 %v13134_v3, %v12808_v59  ;;  %v13197_v59 = vadd.f32 %v13134_v3, %v12815_v9 }
 0xa94   : > { %v4326_v33 = vpop.permute.xlu0 %4325 }
 0xa95   : > { %8341 = vmatpush.xpose.msk.msrb.mxu1 %vm729_vm1, %v4326_v33 }
 0xa97   : > { %v13120_v14 = vpop.permute.xlu2 %4289 }
 0xa98   : > { %v4312_v43 = vpop.permute.xlu1 %4311 }
 0xa9a   : > { %8863 = vrot.lane.b32.xlu0 %v8862_v24, %s9823_s13 }
 0xa9c   : > { %v4324_v18 = vpop.permute.xlu0 %4323 }
 0xa9d   : > { %8342 = vmatpush.xpose.msk.msrb.mxu1 %vm729_vm1, %v4324_v18 }
 0xa9f   : > { %v13126_v61 = vpop.permute.xlu2 %8813 }
 0xaa0   : > { %v4308_v37 = vpop.permute.xlu1 %4307  ;;  %v8815_v63 = vunpack.i.l.bf16 %v13126_v61 }
 0xaa1   : > { %8343 = vmatpush.xpose.msk.msrb.mxu1 %vm729_vm1, %v4322_v8 }
 0xaa2   : > { %8868 = vrot.lane.b32.xlu0 %v8867_v5, %s9823_s13  ;;  %v13207_v5 = vadd.f32 %v13134_v3, %v12821_v50 }
 0xaa4   : > { %v4320_v56 = vpop.permute.xlu0 %4319 }
 0xaa5   : > { %8344 = vmatpush.xpose.msk.msrb.mxu1 %vm729_vm1, %v4320_v56 }
 0xaa7   : > { %v13142_v58 = vpop.permute.xlu2 %8823 }
 0xaa8   : > { %8345 = vmatmul.msk.f32.vlgmr.msrb.gmra.mxu1 %vm729_vm1, %v13140_v30  ;;  %v4304_v28 = vpop.permute.xlu1 %4303  ;;  %v8825_v33 = vunpack.i.l.bf16 %v13142_v58 }
 0xaac   : > { %v4318_v51 = vpop.permute.xlu0 %4317 }
 0xaad   : > { %8281 = vmatpush.xpose.msk.msrb.mxu3 %vm729_vm1, %v4318_v51 }
 0xaaf   : > { %v13151_v6 = vpop.permute.xlu2 %8828 }
 0xab0   : > { %8346 = vmatmul.msk.f32.gmra.mxu1 %vm729_vm1, %v13149_v39  ;;  %v4298_v20 = vpop.permute.xlu1 %4297 }
 0xab1   : > { %8282 = vmatpush.xpose.msk.msrb.mxu3 %vm729_vm1, %v4316_v29  ;;  %v13169_v29 = vadd.f32 %v13134_v3, %v12792_v21 }
 0xab4   : > { %v4314_v48 = vpop.permute.xlu0 %4313 }
 0xab5   : > { %8283 = vmatpush.xpose.msk.msrb.mxu3 %vm729_vm1, %v4314_v48 }
 0xab7   : > { %v13161_v44 = vpop.permute.xlu2 %8833 }
 0xab8   : > { %8347 = vmatmul.msk.f32.gmra.mxu1 %vm729_vm1, %v13159_v40  ;;  %v4292_v10 = vpop.permute.xlu1 %4291 }
 0xab9   : > { %8284 = vmatpush.xpose.msk.msrb.mxu3 %vm729_vm1, %v4312_v43  ;;  %v8830_v43 = vunpack.i.l.bf16 %v13151_v6 }
 0xabc   : > { %v4310_v52 = vpop.permute.xlu0 %4309 }
 0xabd   : > { %8285 = vmatpush.xpose.msk.msrb.mxu3 %vm729_vm1, %v4310_v52 }
 0xabf   : > { %v8874_v36 = vpop.permute.xlu2 %8873 }
 0xac0   : > { %v8875_v34 = vunpack.i.l.bf16 %v8874_v36  ;;  %8348 = vmatmul.msk.f32.gmra.mxu1 %vm729_vm1, %v13169_v29  ;;  %v8804_v4 = vpop.permute.xlu1 %8803 }
 0xac1   : > { %8286 = vmatpush.xpose.msk.msrb.mxu3 %vm729_vm1, %v4308_v37  ;;  %v8805_v50 = vunpack.i.l.bf16 %v8804_v4 }
 0xac2   : > { %5426 = vmatpush.msra.mxu0 %v8875_v34 }
 0xac4   : > { %v4306_v45 = vpop.permute.xlu0 %4305 }
 0xac5   : > { %8287 = vmatpush.xpose.msk.msrb.mxu3 %vm729_vm1, %v4306_v45 }
 0xac8   : > { %8349 = vmatmul.msk.f32.gmra.mxu1 %vm729_vm1, %v13177_v19  ;;  %v8809_v21 = vpop.permute.xlu1 %8808 }
 0xac9   : > { %v8810_v1 = vunpack.i.l.bf16 %v8809_v21  ;;  %8288 = vmatpush.xpose.msk.msrb.mxu3 %vm729_vm1, %v4304_v28  ;;  %v8806_v28 = vunpack.i.h.bf16 %v8804_v4  ;;  %v8811_v48 = vunpack.i.h.bf16 %v8809_v21  ;;  %v8831_v4 = vunpack.i.h.bf16 %v13151_v6 }
 0xaca   : > { %v13245_v6 = vadd.f32 %v13134_v3, %v12841_v35  ;;  %v4138_v35 = vadd.f32 %v13134_v3, %v12849_v38 }
 0xacb   : > { %5427 = vmatpush.msra.mxu0 %v8810_v1 }
 0xacc   : > { %v4300_v8 = vpop.permute.xlu0 %4299 }
 0xacd   : > { %8289 = vmatpush.xpose.msk.msrb.mxu3 %vm729_vm1, %v13102_v60  ;;  %5428 = vmatpush.msra.mxu0 %v8815_v63  ;;  %v8835_v60 = vunpack.i.l.bf16 %v13161_v44 }
 0xad0   : > { %8350 = vmatmul.msk.f32.gmra.mxu1 %vm729_vm1, %v13187_v55  ;;  %v8819_v27 = vpop.permute.xlu1 %8818 }
 0xad1   : > { %v8820_v62 = vunpack.i.l.bf16 %v8819_v27  ;;  %8290 = vmatpush.xpose.msk.msrb.mxu3 %vm729_vm1, %v4300_v8  ;;  %v8821_v52 = vunpack.i.h.bf16 %v8819_v27 }
 0xad3   : > { %5429 = vmatpush.msra.mxu0 %v8820_v62 }
 0xad4   : > { %v4294_v24 = vpop.permute.xlu0 %4293 }
 0xad5   : > { %8291 = vmatpush.xpose.msk.msrb.mxu3 %vm729_vm1, %v4298_v20  ;;  %5430 = vmatpush.msra.mxu0 %v8825_v33 }
 0xad7   : > { %5431 = vmatpush.msra.mxu0 %v8830_v43 }
 0xad8   : > { %8351 = vmatmul.msk.f32.gmra.mxu1 %vm729_vm1, %v13197_v59  ;;  %v8854_v45 = vpop.permute.xlu1 %8853 }
 0xad9   : > { %8292 = vmatpush.xpose.msk.msrb.mxu3 %vm729_vm1, %v13111_v23  ;;  %5432 = vmatpush.msra.mxu0 %v8835_v60  ;;  %v13216_v23 = vadd.f32 %v13134_v3, %v12827_v0  ;;  %v13225_v0 = vadd.f32 %v13134_v3, %v12833_v12  ;;  %v13235_v12 = vadd.f32 %v13134_v3, %v12837_v16  ;;  %v8855_v1 = vunpack.i.l.bf16 %v8854_v45 }
 0xadc   : > { %v4288_v18 = vpop.permute.xlu0 %4287 }
 0xadd   : > { %8293 = vmatpush.xpose.msk.msrb.mxu3 %vm729_vm1, %v4294_v24 }
 0xae0   : > { %8352 = vmatmul.msk.f32.gmra.mxu1 %vm729_vm1, %v13207_v5 }
 0xae1   : > { %8294 = vmatpush.xpose.msk.msrb.mxu3 %vm729_vm1, %v4292_v10  ;;  %v8816_v10 = vunpack.i.h.bf16 %v13126_v61  ;;  %v8836_v61 = vunpack.i.h.bf16 %v13161_v44  ;;  %v8856_v44 = vunpack.i.h.bf16 %v8854_v45 }
 0xae4   : > { %v8799_v9 = vpop.permute.xlu0 %8798 }
 0xae5   : > { %v8800_v37 = vunpack.i.l.bf16 %v8799_v9  ;;  %8295 = vmatpush.xpose.msk.msrb.mxu3 %vm729_vm1, %v13120_v14  ;;  %v8801_v56 = vunpack.i.h.bf16 %v8799_v9  ;;  %v8876_v14 = vunpack.i.h.bf16 %v8874_v36  ;;  %v8826_v36 = vunpack.i.h.bf16 %v13142_v58 }
 0xae7   : > { %5313 = vmatpush.msrb.mxu2 %v8800_v37 }
 0xae8   : > { %8353 = vmatmul.msk.f32.gmra.mxu1 %vm729_vm1, %v13216_v23 }
 0xae9   : > { %8296 = vmatpush.xpose.msk.msrb.mxu3 %vm729_vm1, %v4288_v18  ;;  %5314 = vmatpush.msrb.mxu2 %v8801_v56  ;;  %v4139_v18 = vadd.f32 %v13134_v3, %v12855_v54 }
 0xaeb   : > { %5315 = vmatpush.msrb.mxu2 %v8805_v50 }
 0xaec   : > { %8297 = vmatmul.msk.f32.vlgmr.msrb.gmra.mxu3 %vm729_vm1, %v13140_v30  ;;  %v8839_v51 = vpop.permute.xlu0 %8838 }
 0xaed   : > { %v8840_v20 = vunpack.i.l.bf16 %v8839_v51  ;;  %5316 = vmatpush.msrb.mxu2 %v8806_v28 }
 0xaef   : > { %5317 = vmatpush.msrb.mxu2 %v8876_v14  ;;  %5433 = vmatpush.msra.mxu0 %v8840_v20  ;;  %v4142_v20 = vadd.f32 %v13134_v3, %v12873_v41 }
 0xaf0   : > { %8354 = vmatmul.msk.f32.gmra.mxu1 %vm729_vm1, %v13225_v0 }
 0xaf1   : > { %5318 = vmatpush.msrb.mxu2 %v8811_v48 }
 0xaf3   : > { %5319 = vmatpush.msrb.mxu2 %v8816_v10 }
 0xaf4   : > { %8298 = vmatmul.msk.f32.gmra.mxu3 %vm729_vm1, %v13149_v39  ;;  %v8844_v30 = vpop.permute.xlu0 %8843  ;;  %v8841_v39 = vunpack.i.h.bf16 %v8839_v51 }
 0xaf5   : > { %v8845_v34 = vunpack.i.l.bf16 %v8844_v30  ;;  %5320 = vmatpush.msrb.mxu2 %v8821_v52  ;;  %v8846_v21 = vunpack.i.h.bf16 %v8844_v30  ;;  %v8413_v52 = vld [vmem:[%s15548_s1 + $0x78] sm:$0xff]  ;;  %v13333_v30 = vadd.f32 %v13134_v3, %v12907_v17 }
 0xaf6   : > { %5863 = vmatpush.msra.mxu1 %v8413_v52 }
 0xaf7   : > { %5321 = vmatpush.msrb.mxu2 %v8826_v36  ;;  %5434 = vmatpush.msra.mxu0 %v8845_v34  ;;  %v13342_v36 = vadd.f32 %v13134_v3, %v12910_v11  ;;  %v8249_v34 = vld [vmem:[%s15552_s5 + $0x200] sm:$0xff] }
 0xaf8   : > { %8355 = vmatmul.msk.f32.gmra.mxu1 %vm729_vm1, %v13235_v12  ;;  %v4192_v17 = vunpack.c.h.bf16 %v8249_v34 }
 0xaf9   : > { %5322 = vmatpush.msrb.mxu2 %v8831_v4 }
 0xafb   : > { %5323 = vmatpush.msrb.mxu2 %v8836_v61  ;;  %v13354_v61 = vadd.f32 %v13134_v3, %v12915_v46 }
 0xafc   : > { %8299 = vmatmul.msk.f32.gmra.mxu3 %vm729_vm1, %v13159_v40  ;;  %v8849_v58 = vpop.permute.xlu0 %8848 }
 0xafd   : > { %v8850_v16 = vunpack.i.l.bf16 %v8849_v58  ;;  %5324 = vmatpush.msrb.mxu2 %v8841_v39  ;;  %v8851_v63 = vunpack.i.h.bf16 %v8849_v58  ;;  %v8250_v58 = vld [vmem:[%s15552_s5 + $0x208] sm:$0xff] }
 0xafe   : > { %v4193_v46 = vunpack.c.l.bf16 %v8250_v58 }
 0xaff   : > { %5325 = vmatpush.msrb.mxu2 %v8846_v21  ;;  %5435 = vmatpush.msra.mxu0 %v8850_v16  ;;  %v4194_v16 = vunpack.c.h.bf16 %v8250_v58 }
 0xb00   : > { %8356 = vmatmul.msk.f32.gmra.mxu1 %vm729_vm1, %v13245_v6  ;;  %v3687_v8 = vpop.f32.mrf.mxu1 }
 0xb01   : > { %5326 = vmatpush.msrb.mxu2 %v8851_v63  ;;  %5436 = vmatpush.msra.mxu0 %v8855_v1  ;;  %v13372_v1 = vadd.f32 %v13134_v3, %v12920_v42 }
 0xb03   : > { %5327 = vmatpush.msrb.mxu2 %v8856_v44 }
 0xb04   : > { %8300 = vmatmul.msk.f32.gmra.mxu3 %vm729_vm1, %v13169_v29  ;;  %v8859_v40 = vpop.permute.xlu0 %8858 }
 0xb05   : > { %v8861_v27 = vunpack.i.h.bf16 %v8859_v40  ;;  %v8860_v62 = vunpack.i.l.bf16 %v8859_v40  ;;  %v8251_v40 = vld [vmem:[%s15552_s5 + $0x210] sm:$0xff] }
 0xb06   : > { %v3574_v33 = vpop.f32.mrf.mxu3  ;;  %v4195_v42 = vunpack.c.l.bf16 %v8251_v40 }
 0xb07   : > { %v3688_v24 = vadd.f32 %v3687_v8, %v3574_v33  ;;  %5328 = vmatpush.msrb.mxu2 %v8861_v27  ;;  %5437 = vmatpush.msra.mxu0 %v8860_v62  ;;  %v4196_v62 = vunpack.c.h.bf16 %v8251_v40  ;;  %v13390_v33 = vadd.f32 %v13134_v3, %v12924_v7  ;;  %v8412_v7 = vld [vmem:[%s15548_s1 + $0x70] sm:$0xff] }
 0xb08   : > { %8357 = vmatmul.msk.f32.gmra.mxu1 %vm729_vm1, %v4138_v35  ;;  %v3690_v43 = vpop.f32.mrf.mxu1 }
 0xb09   : > { %8209 = vmatmul.msk.f32.gmra.mxu2 %vm729_vm1, %v3688_v24  ;;  %5864 = vmatpush.msra.mxu1 %v8412_v7 }
 0xb0c   : > { %8301 = vmatmul.msk.f32.gmra.mxu3 %vm729_vm1, %v13177_v19  ;;  %v8864_v60 = vpop.permute.xlu0 %8863  ;;  %v4140_v19 = vadd.f32 %v13134_v3, %v12861_v49 }
 0xb0d   : > { %v8865_v29 = vunpack.i.l.bf16 %v8864_v60  ;;  %v8866_v37 = vunpack.i.h.bf16 %v8864_v60 }
 0xb0e   : > { %v3577_v9 = vpop.f32.mrf.mxu3 }
 0xb0f   : > { %v3691_v38 = vadd.f32 %v3690_v43, %v3577_v9  ;;  %5438 = vmatpush.msra.mxu0 %v8865_v29  ;;  %v8252_v29 = vld [vmem:[%s15552_s5 + $0x218] sm:$0xff] }
 0xb10   : > { %8358 = vmatmul.msk.f32.gmra.mxu1 %vm729_vm1, %v4139_v18  ;;  %v3693_v28 = vpop.f32.mrf.mxu1  ;;  %v4198_v9 = vunpack.c.h.bf16 %v8252_v29 }
 0xb11   : > { %8210 = vmatmul.msk.f32.gmra.mxu2 %vm729_vm1, %v3691_v38  ;;  %5439 = vmatpush.msra.mxu0 %v8866_v37  ;;  %v4197_v37 = vunpack.c.l.bf16 %v8252_v29  ;;  %v13480_v29 = vadd.f32 %v13134_v3, %v12946_v25 }
 0xb14   : > { %8302 = vmatmul.msk.f32.gmra.mxu3 %vm729_vm1, %v13187_v55  ;;  %v8869_v56 = vpop.permute.xlu0 %8868  ;;  %v4141_v55 = vadd.f32 %v13134_v3, %v12867_v32 }
 0xb15   : > { %v8870_v50 = vunpack.i.l.bf16 %v8869_v56  ;;  %v8871_v54 = vunpack.i.h.bf16 %v8869_v56  ;;  %v13412_v56 = vadd.f32 %v13134_v3, %v12928_v47 }
 0xb16   : > { %v3580_v51 = vpop.f32.mrf.mxu3 }
 0xb17   : > { %v3694_v14 = vadd.f32 %v3693_v28, %v3580_v51  ;;  %5440 = vmatpush.msra.mxu0 %v8870_v50  ;;  %v8411_v50 = vld [vmem:[%s15548_s1 + $0x68] sm:$0xff] }
 0xb18   : > { %8359 = vmatmul.msk.f32.gmra.mxu1 %vm729_vm1, %v4140_v19 }
 0xb19   : > { %8211 = vmatmul.msk.f32.gmra.mxu2 %vm729_vm1, %v3694_v14  ;;  %5441 = vmatpush.msra.mxu0 %v8871_v54  ;;  %v8253_v54 = vld [vmem:[%s15552_s5 + $0x220] sm:$0xff] }
 0xb1a   : > { %5865 = vmatpush.msra.mxu1 %v8411_v50  ;;  %v8410_v14 = vld [vmem:[%s15548_s1 + $0x60] sm:$0xff] }
 0xb1c   : > { %8303 = vmatmul.msk.f32.gmra.mxu3 %vm729_vm1, %v13197_v59  ;;  %v4143_v59 = vadd.f32 %v13134_v3, %v12879_v22  ;;  %5866 = vmatpush.msra.mxu1 %v8410_v14  ;;  %v8257_v14 = vld [vmem:[%s15552_s5 + $0x240] sm:$0xff] }
 0xb20   : > { %8360 = vmatmul.msk.f32.gmra.mxu1 %vm729_vm1, %v4141_v55 }
 0xb24   : > { %8304 = vmatmul.msk.f32.gmra.mxu3 %vm729_vm1, %v13207_v5  ;;  %v4144_v5 = vadd.f32 %v13134_v3, %v12885_v15  ;;  %v13303_v15 = vadd.f32 %v13134_v3, %v12895_v26  ;;  %v13321_v26 = vadd.f32 %v13134_v3, %v12903_v2 }
 0xb25   : > { %v4641_v49 = vpop.f32.mrf.mxu1 }
 0xb26   : > { %v13356_v11 = vadd.f32 %v4641_v49, %v4192_v17 }
 0xb28   : > { %8361 = vmatmul.msk.f32.gmra.mxu1 %vm729_vm1, %v4142_v20 }
 0xb2c   : > { %8305 = vmatmul.msk.f32.gmra.mxu3 %vm729_vm1, %v13216_v23  ;;  %v13293_v23 = vadd.f32 %v13134_v3, %v12891_v57  ;;  %v13312_v57 = vadd.f32 %v13134_v3, %v12899_v31 }
 0xb2d   : > { %v4644_v48 = vpop.f32.mrf.mxu1 }
 0xb2e   : > { %v13374_v44 = vadd.f32 %v4644_v48, %v4194_v16  ;;  %v4199_v48 = vunpack.c.l.bf16 %v8253_v54 }
 0xb30   : > { %8362 = vmatmul.msk.f32.gmra.mxu1 %vm729_vm1, %v4143_v59 }
 0xb34   : > { %8306 = vmatmul.msk.f32.gmra.mxu3 %vm729_vm1, %v13225_v0 }
 0xb35   : > { %v4647_v32 = vpop.f32.mrf.mxu1 }
 0xb36   : > { %v13392_v43 = vadd.f32 %v4647_v32, %v4196_v62  ;;  %v3938_v62 = vld [vmem:[#allocation2 + $0xf8] sm:$0xff] }
 0xb38   : > { %8363 = vmatmul.msk.f32.gmra.mxu1 %vm729_vm1, %v4144_v5 }
 0xb3c   : > { %8307 = vmatmul.msk.f32.gmra.mxu3 %vm729_vm1, %v13235_v12  ;;  %v4191_v12 = vunpack.c.l.bf16 %v8249_v34 }
 0xb3d   : > { %v13289_v41 = vpop.f32.mrf.mxu1 }
 0xb3e   : > { %v13418_v28 = vadd.f32 %v13289_v41, %v4198_v9 }
 0xb40   : > { %8364 = vmatmul.msk.f32.gmra.mxu1 %vm729_vm1, %v13293_v23 }
 0xb44   : > { %8308 = vmatmul.msk.f32.gmra.mxu3 %vm729_vm1, %v13245_v6 }
 0xb45   : > { %v13299_v22 = vpop.f32.mrf.mxu1 }
 0xb48   : > { %8365 = vmatmul.msk.f32.gmra.mxu1 %vm729_vm1, %v13303_v15 }
 0xb4c   : > { %8309 = vmatmul.msk.f32.gmra.mxu3 %vm729_vm1, %v4138_v35 }
 0xb4d   : > { %v13308_v0 = vpop.f32.mrf.mxu1 }
 0xb50   : > { %8366 = vmatmul.msk.f32.gmra.mxu1 %vm729_vm1, %v13312_v57 }
 0xb54   : > { %8310 = vmatmul.msk.f32.gmra.mxu3 %vm729_vm1, %v4139_v18 }
 0xb55   : > { %v13317_v10 = vpop.f32.mrf.mxu1 }
 0xb58   : > { %8367 = vmatmul.msk.f32.gmra.mxu1 %vm729_vm1, %v13321_v26 }
 0xb5c   : > { %8311 = vmatmul.msk.f32.gmra.mxu3 %vm729_vm1, %v4140_v19 }
 0xb5d   : > { %v13329_v31 = vpop.f32.mrf.mxu1 }
 0xb60   : > { %8368 = vmatmul.msk.f32.gmra.mxu1 %vm729_vm1, %v13333_v30 }
 0xb64   : > { %8312 = vmatmul.msk.f32.gmra.mxu3 %vm729_vm1, %v4141_v55  ;;  %v4200_v55 = vunpack.c.h.bf16 %v8253_v54 }
 0xb65   : > { %v13338_v2 = vpop.f32.mrf.mxu1 }
 0xb68   : > { %8369 = vmatmul.msk.f32.gmra.mxu1 %vm729_vm1, %v13342_v36 }
 0xb6c   : > { %8313 = vmatmul.msk.f32.gmra.mxu3 %vm729_vm1, %v4142_v20  ;;  %v3936_v20 = vld [vmem:[#allocation2 + $0xe8] sm:$0xff] }
 0xb6d   : > { %v13350_v4 = vpop.f32.mrf.mxu1 }
 0xb6f   : > { %v4528_v39 = vpop.f32.mrf.mxu3 }
 0xb70   : > { %v13358_v45 = vadd.f32 %v4528_v39, %v4191_v12  ;;  %8370 = vmatmul.msk.f32.gmra.mxu1 %vm729_vm1, %v13354_v61  ;;  %v3937_v12 = vld [vmem:[#allocation2 + $0xf0] sm:$0xff] }
 0xb72   : > { %v4737_v21 = vmax.f32 %v13358_v45, %v13356_v11 }
 0xb74   : > { %8314 = vmatmul.msk.f32.gmra.mxu3 %vm729_vm1, %v4143_v59  ;;  %4738 = vmax.xlane.f32.xlu1 %v4737_v21  ;;  %v13459_v21 = vadd.f32 %v13134_v3, %v12939_v53 }
 0xb75   : > { %v13368_v6 = vpop.f32.mrf.mxu1 }
 0xb77   : > { %v4531_v63 = vpop.f32.mrf.mxu3 }
 0xb78   : > { %v13376_v8 = vadd.f32 %v4531_v63, %v4193_v46  ;;  %8371 = vmatmul.msk.f32.gmra.mxu1 %vm729_vm1, %v13372_v1 }
 0xb7a   : > { %v4740_v27 = vmax.f32 %v13376_v8, %v13374_v44 }
 0xb7c   : > { %8315 = vmatmul.msk.f32.gmra.mxu3 %vm729_vm1, %v4144_v5  ;;  %4741 = vmax.xlane.f32.xlu2 %v4740_v27  ;;  %v13438_v5 = vadd.f32 %v13134_v3, %v12934_v13 }
 0xb7d   : > { %v13386_v35 = vpop.f32.mrf.mxu1 }
 0xb7f   : > { %v4534_v24 = vpop.f32.mrf.mxu3 }
 0xb80   : > { %v13394_v60 = vadd.f32 %v4534_v24, %v4195_v42  ;;  %8372 = vmatmul.msk.f32.gmra.mxu1 %vm729_vm1, %v13390_v33 }
 0xb82   : > { %v4743_v18 = vmax.f32 %v13394_v60, %v13392_v43 }
 0xb84   : > { %8316 = vmatmul.msk.f32.gmra.mxu3 %vm729_vm1, %v13293_v23  ;;  %4744 = vmax.xlane.f32.xlu0 %v4743_v18  ;;  %v13442_v23 = vadd.f32 %v13299_v22, %v4200_v55  ;;  %v4208_v55 = vunpack.c.h.bf16 %v8257_v14 }
 0xb85   : > { %v13408_v38 = vpop.f32.mrf.mxu1 }
 0xb87   : > { %v4537_v19 = vpop.f32.mrf.mxu3 }
 0xb88   : > { %v13420_v51 = vadd.f32 %v4537_v19, %v4197_v37  ;;  %8373 = vmatmul.msk.f32.gmra.mxu1 %vm729_vm1, %v13412_v56 }
 0xb8a   : > { %v4746_v47 = vmax.f32 %v13420_v51, %v13418_v28 }
 0xb8c   : > { %v3898_v49 = vpop.f32.mrf.mxu2  ;;  %8317 = vmatmul.msk.f32.gmra.mxu3 %vm729_vm1, %v13303_v15  ;;  %4747 = vmax.xlane.f32.xlu1 %v4746_v47  ;;  %v8254_v15 = vld [vmem:[%s15552_s5 + $0x228] sm:$0xff]  ;;  %v9781_v47 = vld [vmem:[%s9887_s11] sm:$0xff] }
 0xb8d   : > { %v3968_v59 = vadd.f32 %v3936_v20, %v3898_v49  ;;  %v13434_v32 = vpop.f32.mrf.mxu1  ;;  %v4202_v13 = vunpack.c.h.bf16 %v8254_v15  ;;  %v4201_v22 = vunpack.c.l.bf16 %v8254_v15  ;;  %v4207_v49 = vunpack.c.l.bf16 %v8257_v14  ;;  %v8258_v15 = vld [vmem:[%s15552_s5 + $0x248] sm:$0xff] }
 0xb8f   : > { %4000 = vst.msk [vmem:[#allocation2 + $0xe8] sm:$0xff] %vm291_vm0, %v3968_v59  ;;  %v4540_v41 = vpop.f32.mrf.mxu3  ;;  %v13463_v46 = vadd.f32 %v13308_v0, %v4202_v13  ;;  %v4209_v13 = vunpack.c.l.bf16 %v8258_v15 }
 0xb90   : > { %v13444_v52 = vadd.f32 %v4540_v41, %v4199_v48  ;;  %8374 = vmatmul.msk.f32.gmra.mxu1 %vm729_vm1, %v13438_v5  ;;  %v13516_v48 = vadd.f32 %v13338_v2, %v4208_v55  ;;  %v9782_v41 = vld [vmem:[%s9887_s11 + $0x8] sm:$0xff] }
 0xb92   : > { %v4749_v34 = vmax.f32 %v13444_v52, %v13442_v23 }
 0xb94   : > { %v3901_v17 = vpop.f32.mrf.mxu2  ;;  %8318 = vmatmul.msk.f32.gmra.mxu3 %vm729_vm1, %v13312_v57  ;;  %4750 = vmax.xlane.f32.xlu2 %v4749_v34  ;;  %v8255_v57 = vld [vmem:[%s15552_s5 + $0x230] sm:$0xff]  ;;  %v4210_v34 = vunpack.c.h.bf16 %v8258_v15  ;;  %v8262_v15 = vld [vmem:[%s15552_s5 + $0x268] sm:$0xff] }
 0xb95   : > { %v3969_v39 = vadd.f32 %v3937_v12, %v3901_v17  ;;  %v13455_v58 = vpop.f32.mrf.mxu1  ;;  %v4204_v53 = vunpack.c.h.bf16 %v8255_v57  ;;  %v4203_v0 = vunpack.c.l.bf16 %v8255_v57 }
 0xb96   : > { %v13532_v12 = vadd.f32 %v13350_v4, %v4210_v34  ;;  %v4217_v34 = vunpack.c.l.bf16 %v8262_v15 }
 0xb97   : > { %4001 = vst.msk [vmem:[#allocation2 + $0xf0] sm:$0xff] %vm291_vm0, %v3969_v39  ;;  %v4543_v16 = vpop.f32.mrf.mxu3  ;;  %v13484_v7 = vadd.f32 %v13317_v10, %v4204_v53  ;;  %v9783_v39 = vld [vmem:[%s9887_s11 + $0x10] sm:$0xff] }
 0xb98   : > { %v13465_v63 = vadd.f32 %v4543_v16, %v4201_v22  ;;  %8375 = vmatmul.msk.f32.gmra.mxu1 %vm729_vm1, %v13459_v21  ;;  %v8259_v16 = vld [vmem:[%s15552_s5 + $0x250] sm:$0xff] }
 0xb99   : > { %v4212_v57 = vunpack.c.h.bf16 %v8259_v16 }
 0xb9a   : > { %v4752_v40 = vmax.f32 %v13465_v63, %v13463_v46 }
 0xb9c   : > { %v3904_v27 = vpop.f32.mrf.mxu2  ;;  %8319 = vmatmul.msk.f32.gmra.mxu3 %vm729_vm1, %v13321_v26  ;;  %4753 = vmax.xlane.f32.xlu0 %v4752_v40  ;;  %v8256_v26 = vld [vmem:[%s15552_s5 + $0x238] sm:$0xff]  ;;  %v4211_v40 = vunpack.c.l.bf16 %v8259_v16  ;;  %v9787_v16 = vld [vmem:[%s9887_s11 + $0x30] sm:$0xff] }
 0xb9d   : > { %v3970_v42 = vadd.f32 %v3938_v62, %v3904_v27  ;;  %v13476_v24 = vpop.f32.mrf.mxu1  ;;  %v4206_v3 = vunpack.c.h.bf16 %v8256_v26  ;;  %v4205_v37 = vunpack.c.l.bf16 %v8256_v26  ;;  %v13548_v27 = vadd.f32 %v13368_v6, %v4212_v57 }
 0xb9f   : > { %4002 = vst.msk [vmem:[#allocation2 + $0xf8] sm:$0xff] %vm291_vm0, %v3970_v42  ;;  %v4546_v18 = vpop.f32.mrf.mxu3  ;;  %v13500_v19 = vadd.f32 %v13329_v31, %v4206_v3  ;;  %v8260_v42 = vld [vmem:[%s15552_s5 + $0x258] sm:$0xff] }
 0xba0   : > { %v13486_v9 = vadd.f32 %v4546_v18, %v4203_v0  ;;  %8376 = vmatmul.msk.f32.gmra.mxu1 %vm729_vm1, %v13480_v29  ;;  %v9784_v0 = vld [vmem:[%s9887_s11 + $0x18] sm:$0xff]  ;;  %v4214_v18 = vunpack.c.h.bf16 %v8260_v42  ;;  %v4213_v26 = vunpack.c.l.bf16 %v8260_v42 }
 0xba2   : > { %v4755_v25 = vmax.f32 %v13486_v9, %v13484_v7  ;;  %v13564_v3 = vadd.f32 %v13386_v35, %v4214_v18  ;;  %v8264_v18 = vld [vmem:[%s15552_s5 + $0x278] sm:$0xff] }
 0xba4   : > { %8320 = vmatmul.msk.f32.gmra.mxu3 %vm729_vm1, %v13333_v30  ;;  %4756 = vmax.xlane.f32.xlu1 %v4755_v25 }
 0xba5   : > { %v13497_v10 = vpop.f32.mrf.mxu1 }
 0xba7   : > { %v4549_v50 = vpop.f32.mrf.mxu3 }
 0xba8   : > { %v13502_v54 = vadd.f32 %v4549_v50, %v4205_v37  ;;  %8414 = vmatmul.msk.f32.vlgmr.msra.gmra.mxu1 %vm291_vm0, %v9781_v47  ;;  %v9785_v50 = vld [vmem:[%s9887_s11 + $0x20] sm:$0xff] }
 0xba9   : > { %v8261_v47 = vld [vmem:[%s15552_s5 + $0x260] sm:$0xff] }
 0xbaa   : > { %v4758_v30 = vmax.f32 %v13502_v54, %v13500_v19  ;;  %v4216_v14 = vunpack.c.h.bf16 %v8261_v47 }
 0xbac   : > { %8321 = vmatmul.msk.f32.gmra.mxu3 %vm729_vm1, %v13342_v36  ;;  %4759 = vmax.xlane.f32.xlu1 %v4758_v30  ;;  %v4215_v30 = vunpack.c.l.bf16 %v8261_v47 }
 0xbad   : > { %v13513_v31 = vpop.f32.mrf.mxu1 }
 0xbaf   : > { %v4552_v20 = vpop.f32.mrf.mxu3 }
 0xbb0   : > { %v13518_v59 = vadd.f32 %v4552_v20, %v4207_v49  ;;  %8415 = vmatmul.msk.f32.gmra.mxu1 %vm291_vm0, %v9782_v41  ;;  %v13580_v49 = vadd.f32 %v13408_v38, %v4216_v14  ;;  %v9786_v41 = vld [vmem:[%s9887_s11 + $0x28] sm:$0xff] }
 0xbb2   : > { %v4761_v36 = vmax.f32 %v13518_v59, %v13516_v48 }
 0xbb4   : > { %8322 = vmatmul.msk.f32.gmra.mxu3 %vm729_vm1, %v13354_v61  ;;  %4762 = vmax.xlane.f32.xlu2 %v4761_v36  ;;  %v4218_v36 = vunpack.c.h.bf16 %v8262_v15 }
 0xbb5   : > { %v13529_v2 = vpop.f32.mrf.mxu1 }
 0xbb7   : > { %v4555_v17 = vpop.f32.mrf.mxu3 }
 0xbb8   : > { %v13534_v22 = vadd.f32 %v4555_v17, %v4209_v13  ;;  %8416 = vmatmul.msk.f32.gmra.mxu1 %vm291_vm0, %v9783_v39  ;;  %v13596_v17 = vadd.f32 %v13434_v32, %v4218_v36 }
 0xbba   : > { %v4764_v61 = vmax.f32 %v13534_v22, %v13532_v12 }
 0xbbc   : > { %8323 = vmatmul.msk.f32.gmra.mxu3 %vm729_vm1, %v13372_v1  ;;  %4765 = vmax.xlane.f32.xlu1 %v4764_v61  ;;  %v8263_v61 = vld [vmem:[%s15552_s5 + $0x270] sm:$0xff] }
 0xbbd   : > { %v13545_v4 = vpop.f32.mrf.mxu1  ;;  %v4220_v57 = vunpack.c.h.bf16 %v8263_v61 }
 0xbbf   : > { %v4558_v53 = vpop.f32.mrf.mxu3 }
 0xbc0   : > { %v13550_v62 = vadd.f32 %v4558_v53, %v4211_v40  ;;  %8417 = vmatmul.msk.f32.gmra.mxu1 %vm291_vm0, %v9784_v0  ;;  %v4219_v40 = vunpack.c.l.bf16 %v8263_v61  ;;  %v13612_v0 = vadd.f32 %v13455_v58, %v4220_v57  ;;  %v4221_v58 = vunpack.c.l.bf16 %v8264_v18 }
 0xbc2   : > { %v4767_v1 = vmax.f32 %v13550_v62, %v13548_v27 }
 0xbc4   : > { %8324 = vmatmul.msk.f32.gmra.mxu3 %vm729_vm1, %v13390_v33  ;;  %4768 = vmax.xlane.f32.xlu2 %v4767_v1  ;;  %v9788_v1 = vld [vmem:[%s9887_s11 + $0x38] sm:$0xff] }
 0xbc5   : > { %v13561_v6 = vpop.f32.mrf.mxu1 }
 0xbc7   : > { %v4561_v25 = vpop.f32.mrf.mxu3 }
 0xbc8   : > { %v13566_v37 = vadd.f32 %v4561_v25, %v4213_v26  ;;  %8418 = vmatmul.msk.f32.gmra.mxu1 %vm291_vm0, %v9785_v50  ;;  %v4222_v26 = vunpack.c.h.bf16 %v8264_v18 }
 0xbca   : > { %v4770_v33 = vmax.f32 %v13566_v37, %v13564_v3 }
 0xbcc   : > { %8325 = vmatmul.msk.f32.gmra.mxu3 %vm729_vm1, %v13412_v56  ;;  %4771 = vmax.xlane.f32.xlu2 %v4770_v33  ;;  %v13628_v33 = vadd.f32 %v13476_v24, %v4222_v26 }
 0xbcd   : > { %v13577_v35 = vpop.f32.mrf.mxu1 }
 0xbcf   : > { %v4564_v55 = vpop.f32.mrf.mxu3 }
 0xbd0   : > { %v13582_v20 = vadd.f32 %v4564_v55, %v4215_v30  ;;  %8419 = vmatmul.msk.f32.gmra.mxu1 %vm291_vm0, %v9786_v41  ;;  %v9789_v41 = vld [vmem:[%s9887_s11 + $0x40] sm:$0xff] }
 0xbd2   : > { %v4773_v56 = vmax.f32 %v13582_v20, %v13580_v49 }
 0xbd4   : > { %8326 = vmatmul.msk.f32.gmra.mxu3 %vm729_vm1, %v13438_v5  ;;  %4774 = vmax.xlane.f32.xlu2 %v4773_v56 }
 0xbd5   : > { %v13593_v38 = vpop.f32.mrf.mxu1 }
 0xbd7   : > { %v4567_v13 = vpop.f32.mrf.mxu3 }
 0xbd8   : > { %v13598_v39 = vadd.f32 %v4567_v13, %v4217_v34  ;;  %8420 = vmatmul.msk.f32.gmra.mxu1 %vm291_vm0, %v9787_v16 }
 0xbda   : > { %v4776_v5 = vmax.f32 %v13598_v39, %v13596_v17 }
 0xbdc   : > { %8327 = vmatmul.msk.f32.gmra.mxu3 %vm729_vm1, %v13459_v21  ;;  %4777 = vmax.xlane.f32.xlu0 %v4776_v5 }
 0xbdd   : > { %v13609_v32 = vpop.f32.mrf.mxu1 }
 0xbdf   : > { %v4570_v53 = vpop.f32.mrf.mxu3 }
 0xbe0   : > { %v13614_v42 = vadd.f32 %v4570_v53, %v4219_v40  ;;  %8421 = vmatmul.msk.f32.gmra.mxu1 %vm291_vm0, %v9788_v1  ;;  %v9790_v40 = vld [vmem:[%s9887_s11 + $0x48] sm:$0xff] }
 0xbe1   : > { %v8266_v53 = vld [vmem:[%s15552_s5 + $0x288] sm:$0xff] }
 0xbe2   : > { %v4779_v21 = vmax.f32 %v13614_v42, %v13612_v0 }
 0xbe4   : > { %4780 = vmax.xlane.f32.xlu1 %v4779_v21  ;;  %8328 = vmatmul.msk.f32.gmra.mxu3 %vm729_vm1, %v13480_v29  ;;  %v8265_v29 = vld [vmem:[%s15552_s5 + $0x280] sm:$0xff] }
 0xbe5   : > { %v13625_v25 = vpop.f32.mrf.mxu1  ;;  %v4224_v36 = vunpack.c.h.bf16 %v8265_v29  ;;  %v4223_v34 = vunpack.c.l.bf16 %v8265_v29  ;;  %v9791_v29 = vld [vmem:[%s9887_s11 + $0x50] sm:$0xff] }
 0xbe7   : > { %v4573_v50 = vpop.f32.mrf.mxu3  ;;  %v4739_v47 = vpop.xlane.xlu1 %4738  ;;  %v13644_v16 = vadd.f32 %v13497_v10, %v4224_v36 }
 0xbe8   : > { %v13630_v14 = vadd.f32 %v4573_v50, %v4221_v58  ;;  %v4833_v30 = vsub.f32 %v13358_v45, %v4739_v47  ;;  %v4834_v55 = vsub.f32 %v13356_v11, %v4739_v47  ;;  %8422 = vmatmul.msk.f32.gmra.mxu1 %vm291_vm0, %v9789_v41  ;;  %v4225_v58 = vunpack.c.l.bf16 %v8266_v53 }
 0xbea   : > { %v4782_v15 = vmax.f32 %v13630_v14, %v13628_v33  ;;  %v4897_v56 = vmul.f32 1.442695, %v4833_v30  ;;  %v4899_v24 = vmul.f32 1.442695, %v4834_v55 }
 0xbec   : > { %9346 = vpow2.f32 %v4897_v56  ;;  %4783 = vmax.xlane.f32.xlu2 %v4782_v15  ;;  %v8267_v15 = vld [vmem:[%s15552_s5 + $0x290] sm:$0xff] }
 0xbed   : > { %9348 = vpow2.f32 %v4899_v24  ;;  %v13641_v45 = vpop.f32.mrf.mxu1 }
 0xbef   : > { %v4576_v11 = vpop.f32.mrf.mxu3  ;;  %v4742_v13 = vpop.xlane.xlu2 %4741 }
 0xbf0   : > { %v13646_v61 = vadd.f32 %v4576_v11, %v4223_v34  ;;  %v4835_v5 = vsub.f32 %v13376_v8, %v4742_v13  ;;  %v4836_v57 = vsub.f32 %v13374_v44, %v4742_v13  ;;  %8423 = vmatmul.msk.f32.gmra.mxu1 %vm291_vm0, %v9790_v40  ;;  %v4226_v8 = vunpack.c.h.bf16 %v8266_v53 }
 0xbf1   : > { %v4228_v11 = vunpack.c.h.bf16 %v8267_v15 }
 0xbf2   : > { %v13655_v1 = vpop.eup %9346  ;;  %v4785_v18 = vmax.f32 %v13646_v61, %v13644_v16  ;;  %v4901_v10 = vmul.f32 1.442695, %v4835_v5  ;;  %v4903_v21 = vmul.f32 1.442695, %v4836_v57  ;;  %v13666_v55 = vadd.f32 %v13513_v31, %v4226_v8 }
 0xbf3   : > { %v13659_v26 = vpop.eup %9348  ;;  %v4227_v5 = vunpack.c.l.bf16 %v8267_v15 }
 0xbf4   : > { %9350 = vpow2.f32 %v4901_v10  ;;  %4786 = vmax.xlane.f32.xlu0 %v4785_v18  ;;  %v5025_v44 = vadd.f32 %v13659_v26, %v13655_v1 }
 0xbf5   : > { %9352 = vpow2.f32 %v4903_v21  ;;  %v13663_v50 = vpop.f32.mrf.mxu1 }
 0xbf6   : > { %5026 = vadd.xlane.f32.xlu2 %v5025_v44  ;;  %v9792_v44 = vld [vmem:[%s9887_s11 + $0x58] sm:$0xff] }
 0xbf7   : > { %v4579_v47 = vpop.f32.mrf.mxu3  ;;  %v4745_v30 = vpop.xlane.xlu0 %4744 }
 0xbf8   : > { %v13668_v41 = vadd.f32 %v4579_v47, %v4225_v58  ;;  %8424 = vmatmul.msk.f32.gmra.mxu1 %vm291_vm0, %v9791_v29  ;;  %v4837_v36 = vsub.f32 %v13394_v60, %v4745_v30  ;;  %v4838_v31 = vsub.f32 %v13392_v43, %v4745_v30  ;;  %v13688_v60 = vadd.f32 %v13529_v2, %v4228_v11  ;;  %v8268_v43 = vld [vmem:[%s15552_s5 + $0x298] sm:$0xff] }
 0xbf9   : > { %v4230_v2 = vunpack.c.h.bf16 %v8268_v43  ;;  %v4229_v29 = vunpack.c.l.bf16 %v8268_v43 }
 0xbfa   : > { %v13675_v56 = vpop.eup %9350  ;;  %v4788_v24 = vmax.f32 %v13668_v41, %v13666_v55  ;;  %v4905_v40 = vmul.f32 1.442695, %v4837_v36  ;;  %v4907_v53 = vmul.f32 1.442695, %v4838_v31 }
 0xbfb   : > { %v13680_v34 = vpop.eup %9352 }
 0xbfc   : > { %4789 = vmax.xlane.f32.xlu1 %v4788_v24  ;;  %v5028_v13 = vadd.f32 %v13680_v34, %v13675_v56  ;;  %9354 = vpow2.f32 %v4905_v40  ;;  %v9793_v40 = vld [vmem:[%s9887_s11 + $0x60] sm:$0xff] }
 0xbfd   : > { %v13685_v57 = vpop.f32.mrf.mxu1  ;;  %9356 = vpow2.f32 %v4907_v53 }
 0xbfe   : > { %5029 = vadd.xlane.f32.xlu2 %v5028_v13 }
 0xbff   : > { %v4582_v18 = vpop.f32.mrf.mxu3  ;;  %v4748_v10 = vpop.xlane.xlu1 %4747 }
 0xc00   : > { %v13693_v21 = vadd.f32 %v4582_v18, %v4227_v5  ;;  %v4839_v8 = vsub.f32 %v13420_v51, %v4748_v10  ;;  %8425 = vmatmul.msk.f32.gmra.mxu1 %vm291_vm0, %v9792_v44  ;;  %v4840_v58 = vsub.f32 %v13418_v28, %v4748_v10  ;;  %v13704_v51 = vadd.f32 %v13545_v4, %v4230_v2  ;;  %v8269_v4 = vld [vmem:[%s15552_s5 + $0x2a0] sm:$0xff] }
 0xc02   : > { %v4791_v47 = vmax.f32 %v13693_v21, %v13688_v60  ;;  %v4909_v30 = vmul.f32 1.442695, %v4839_v8  ;;  %v4911_v15 = vmul.f32 1.442695, %v4840_v58  ;;  %v13706_v11 = vpop.eup %9354  ;;  %v4232_v8 = vunpack.c.h.bf16 %v8269_v4 }
 0xc03   : > { %v13714_v53 = vpop.eup %9356 }
 0xc04   : > { %9358 = vpow2.f32 %v4909_v30 }
 0xc05   : > { %v13701_v24 = vpop.f32.mrf.mxu1  ;;  %9360 = vpow2.f32 %v4911_v15 }
 0xc06   : > { %4792 = vmax.xlane.f32.xlu2 %v4791_v47 }
 0xc07   : > { %v4585_v36 = vpop.f32.mrf.mxu3  ;;  %v4751_v31 = vpop.xlane.xlu2 %4750 }
 0xc08   : > { %v13708_v28 = vadd.f32 %v4585_v36, %v4229_v29  ;;  %v4841_v13 = vsub.f32 %v13444_v52, %v4751_v31  ;;  %v4842_v5 = vsub.f32 %v13442_v23, %v4751_v31  ;;  %8426 = vmatmul.msk.f32.gmra.mxu1 %vm291_vm0, %v9793_v40  ;;  %v5031_v23 = vadd.f32 %v13714_v53, %v13706_v11  ;;  %v9794_v36 = vld [vmem:[%s9887_s11 + $0x68] sm:$0xff] }
 0xc09   : > { %v4231_v52 = vunpack.c.l.bf16 %v8269_v4  ;;  %v13730_v29 = vadd.f32 %v13561_v6, %v4232_v8  ;;  %v8270_v31 = vld [vmem:[%s15552_s5 + $0x2a8] sm:$0xff] }
 0xc0a   : > { %v4794_v18 = vmax.f32 %v13708_v28, %v13704_v51  ;;  %v4913_v10 = vmul.f32 1.442695, %v4841_v13  ;;  %v4915_v43 = vmul.f32 1.442695, %v4842_v5  ;;  %v13725_v58 = vpop.eup %9358  ;;  %v4233_v8 = vunpack.c.l.bf16 %v8270_v31 }
 0xc0b   : > { %15828 = vst [vmem:[#allocation17_spill] sm:$0xff] %v13725_v58  ;;  %v13727_v47 = vpop.eup %9360 }
 0xc0c   : > { %9362 = vpow2.f32 %v4913_v10  ;;  %4795 = vmax.xlane.f32.xlu0 %v4794_v18  ;;  %15829 = vst [vmem:[#allocation26_spill] sm:$0xff] %v13727_v47  ;;  %v5034_v6 = vadd.f32 %v13727_v47, %v13725_v58  ;;  %v4234_v10 = vunpack.c.h.bf16 %v8270_v31  ;;  %v8271_v31 = vld [vmem:[%s15552_s5 + $0x2b0] sm:$0xff] }
 0xc0d   : > { %9364 = vpow2.f32 %v4915_v43  ;;  %v13723_v44 = vpop.f32.mrf.mxu1 }
 0xc0e   : > { %5032 = vadd.xlane.f32.xlu2 %v5031_v23  ;;  %v13754_v47 = vadd.f32 %v13577_v35, %v4234_v10 }
 0xc0f   : > { %v4588_v2 = vpop.f32.mrf.mxu3  ;;  %v4754_v30 = vpop.xlane.xlu0 %4753 }
 0xc10   : > { %v13732_v15 = vadd.f32 %v4588_v2, %v4231_v52  ;;  %8427 = vmatmul.msk.f32.gmra.mxu1 %vm291_vm0, %v9794_v36  ;;  %v4843_v40 = vsub.f32 %v13465_v63, %v4754_v30  ;;  %v4844_v18 = vsub.f32 %v13463_v46, %v4754_v30 }
 0xc12   : > { %v13739_v13 = vpop.eup %9362  ;;  %v4797_v5 = vmax.f32 %v13732_v15, %v13730_v29  ;;  %v4917_v52 = vmul.f32 1.442695, %v4843_v40  ;;  %v4919_v63 = vmul.f32 1.442695, %v4844_v18  ;;  %v4236_v18 = vunpack.c.h.bf16 %v8271_v31 }
 0xc13   : > { %v13746_v4 = vpop.eup %9364 }
 0xc14   : > { %4798 = vmax.xlane.f32.xlu1 %v4797_v5  ;;  %5035 = vadd.xlane.f32.xlu0 %v5034_v6  ;;  %v5037_v43 = vadd.f32 %v13746_v4, %v13739_v13  ;;  %v9795_v5 = vld [vmem:[%s9887_s11 + $0x70] sm:$0xff]  ;;  %9366 = vpow2.f32 %v4917_v52  ;;  %v13772_v52 = vadd.f32 %v13593_v38, %v4236_v18 }
 0xc15   : > { %v13751_v23 = vpop.f32.mrf.mxu1  ;;  %9368 = vpow2.f32 %v4919_v63 }
 0xc16   : > { %5038 = vadd.xlane.f32.xlu2 %v5037_v43 }
 0xc17   : > { %v4591_v2 = vpop.f32.mrf.mxu3  ;;  %v4757_v36 = vpop.xlane.xlu1 %4756 }
 0xc18   : > { %v13756_v58 = vadd.f32 %v4591_v2, %v4233_v8  ;;  %v4845_v46 = vsub.f32 %v13486_v9, %v4757_v36  ;;  %v4846_v30 = vsub.f32 %v13484_v7, %v4757_v36  ;;  %8428 = vmatmul.msk.f32.gmra.mxu1 %vm291_vm0, %v9795_v5  ;;  %v4235_v9 = vunpack.c.l.bf16 %v8271_v31  ;;  %v8272_v2 = vld [vmem:[%s15552_s5 + $0x2b8] sm:$0xff] }
 0xc19   : > { %v4238_v18 = vunpack.c.h.bf16 %v8272_v2 }
 0xc1a   : > { %v4800_v40 = vmax.f32 %v13756_v58, %v13754_v47  ;;  %v4921_v6 = vmul.f32 1.442695, %v4845_v46  ;;  %v4923_v35 = vmul.f32 1.442695, %v4846_v30  ;;  %v13769_v8 = vpop.eup %9366  ;;  %v9796_v30 = vld [vmem:[%s9887_s11 + $0x78] sm:$0xff] }
 0xc1b   : > { %v13783_v5 = vpop.eup %9368 }
 0xc1c   : > { %9370 = vpow2.f32 %v4921_v6 }
 0xc1d   : > { %9372 = vpow2.f32 %v4923_v35  ;;  %v13767_v7 = vpop.f32.mrf.mxu1 }
 0xc1e   : > { %4801 = vmax.xlane.f32.xlu2 %v4800_v40 }
 0xc1f   : > { %v4594_v10 = vpop.f32.mrf.mxu3  ;;  %v4760_v43 = vpop.xlane.xlu1 %4759 }
 0xc20   : > { %v13777_v36 = vadd.f32 %v4594_v10, %v4235_v9  ;;  %v4847_v63 = vsub.f32 %v13502_v54, %v4760_v43  ;;  %v4848_v46 = vsub.f32 %v13500_v19, %v4760_v43  ;;  %8429 = vmatmul.msk.f32.gmra.mxu1 %vm291_vm0, %v9796_v30  ;;  %v5040_v54 = vadd.f32 %v13783_v5, %v13769_v8 }
 0xc21   : > { %v4237_v9 = vunpack.c.l.bf16 %v8272_v2  ;;  %v8273_v2 = vld [vmem:[%s15552_s5 + $0x2c0] sm:$0xff] }
 0xc22   : > { %v13785_v31 = vpop.eup %9370  ;;  %v4803_v38 = vmax.f32 %v13777_v36, %v13772_v52  ;;  %v4925_v40 = vmul.f32 1.442695, %v4847_v63  ;;  %v4927_v6 = vmul.f32 1.442695, %v4848_v46  ;;  %v13798_v46 = vadd.f32 %v13609_v32, %v4238_v18 }
 0xc23   : > { %15830 = vst [vmem:[#allocation25_spill] sm:$0xff] %v13785_v31  ;;  %v13789_v35 = vpop.eup %9372 }
 0xc24   : > { %15831 = vst [vmem:[#allocation31_spill] sm:$0xff] %v13789_v35  ;;  %9374 = vpow2.f32 %v4925_v40  ;;  %4804 = vmax.xlane.f32.xlu0 %v4803_v38  ;;  %v5043_v19 = vadd.f32 %v13789_v35, %v13785_v31  ;;  %v9797_v35 = vld [vmem:[%s9887_s11 + $0x80] sm:$0xff]  ;;  %v9798_v31 = vld [vmem:[%s9887_s11 + $0x88] sm:$0xff] }
 0xc25   : > { %9376 = vpow2.f32 %v4927_v6  ;;  %v13795_v10 = vpop.f32.mrf.mxu1 }
 0xc26   : > { %15832 = vst [vmem:[#allocation30_spill] sm:$0xff] %v13795_v10  ;;  %5044 = vadd.xlane.f32.xlu1 %v5043_v19  ;;  %5041 = vadd.xlane.f32.xlu2 %v5040_v54 }
 0xc27   : > { %v4597_v43 = vpop.f32.mrf.mxu3  ;;  %v4763_v63 = vpop.xlane.xlu2 %4762 }
 0xc28   : > { %v13800_v30 = vadd.f32 %v4597_v43, %v4237_v9  ;;  %v4849_v38 = vsub.f32 %v13518_v59, %v4763_v63  ;;  %v4850_v40 = vsub.f32 %v13516_v48, %v4763_v63  ;;  %8430 = vmatmul.msk.f32.gmra.mxu1 %vm291_vm0, %v9797_v35  ;;  %v4240_v59 = vunpack.c.h.bf16 %v8273_v2 }
 0xc29   : > { %v4239_v35 = vunpack.c.l.bf16 %v8273_v2  ;;  %v8274_v2 = vld [vmem:[%s15552_s5 + $0x2c8] sm:$0xff] }
 0xc2a   : > { %v13809_v6 = vpop.eup %9374  ;;  %v4806_v19 = vmax.f32 %v13800_v30, %v13798_v46  ;;  %v4929_v32 = vmul.f32 1.442695, %v4849_v38  ;;  %v4931_v18 = vmul.f32 1.442695, %v4850_v40  ;;  %v13820_v10 = vadd.f32 %v13625_v25, %v4240_v59 }
 0xc2b   : > { %v13813_v54 = vpop.eup %9376 }
 0xc2c   : > { %9378 = vpow2.f32 %v4929_v32  ;;  %v5046_v48 = vadd.f32 %v13813_v54, %v13809_v6  ;;  %15834 = vst [vmem:[#allocation9_spill] sm:$0xff] %v13820_v10 }
 0xc2d   : > { %9380 = vpow2.f32 %v4931_v18  ;;  %v13817_v9 = vpop.f32.mrf.mxu1 }
 0xc2e   : > { %15833 = vst [vmem:[#allocation10_spill] sm:$0xff] %v13817_v9  ;;  %4807 = vmax.xlane.f32.xlu1 %v4806_v19  ;;  %5047 = vadd.xlane.f32.xlu2 %v5046_v48 }
 0xc2f   : > { %v4600_v43 = vpop.f32.mrf.mxu3  ;;  %v4766_v63 = vpop.xlane.xlu1 %4765 }
 0xc30   : > { %v13822_v38 = vadd.f32 %v4600_v43, %v4239_v35  ;;  %v4851_v40 = vsub.f32 %v13534_v22, %v4766_v63  ;;  %v4852_v32 = vsub.f32 %v13532_v12, %v4766_v63  ;;  %8431 = vmatmul.msk.f32.gmra.mxu1 %vm291_vm0, %v9798_v31  ;;  %v4242_v22 = vunpack.c.h.bf16 %v8274_v2 }
 0xc31   : > { %v4241_v31 = vunpack.c.l.bf16 %v8274_v2  ;;  %v8275_v2 = vld [vmem:[%s15552_s5 + $0x2d0] sm:$0xff] }
 0xc32   : > { %15835 = vst [vmem:[#allocation5_spill] sm:$0xff] %v13822_v38  ;;  %v13831_v19 = vpop.eup %9378  ;;  %v4809_v18 = vmax.f32 %v13822_v38, %v13820_v10  ;;  %v4933_v25 = vmul.f32 1.442695, %v4851_v40  ;;  %v4935_v59 = vmul.f32 1.442695, %v4852_v32  ;;  %v13842_v9 = vadd.f32 %v13641_v45, %v4242_v22  ;;  %v9799_v10 = vld [vmem:[%s9887_s11 + $0x90] sm:$0xff] }
 0xc33   : > { %v13835_v48 = vpop.eup %9380  ;;  %v9800_v38 = vld [vmem:[%s9887_s11 + $0x98] sm:$0xff] }
 0xc34   : > { %9382 = vpow2.f32 %v4933_v25  ;;  %v5049_v12 = vadd.f32 %v13835_v48, %v13831_v19 }
 0xc35   : > { %9384 = vpow2.f32 %v4935_v59  ;;  %v13839_v35 = vpop.f32.mrf.mxu1 }
 0xc36   : > { %15836 = vst [vmem:[#allocation44_spill] sm:$0xff] %v13839_v35  ;;  %5050 = vadd.xlane.f32.xlu0 %v5049_v12  ;;  %4810 = vmax.xlane.f32.xlu2 %v4809_v18 }
 0xc37   : > { %v4603_v43 = vpop.f32.mrf.mxu3  ;;  %v4769_v63 = vpop.xlane.xlu2 %4768 }
 0xc38   : > { %v13844_v40 = vadd.f32 %v4603_v43, %v4241_v31  ;;  %v4853_v32 = vsub.f32 %v13550_v62, %v4769_v63  ;;  %v4854_v25 = vsub.f32 %v13548_v27, %v4769_v63  ;;  %8432 = vmatmul.msk.f32.gmra.mxu1 %vm291_vm0, %v9799_v10  ;;  %v4244_v62 = vunpack.c.h.bf16 %v8275_v2 }
 0xc39   : > { %v4243_v10 = vunpack.c.l.bf16 %v8275_v2  ;;  %v8276_v2 = vld [vmem:[%s15552_s5 + $0x2d8] sm:$0xff] }
 0xc3a   : > { %v13853_v59 = vpop.eup %9382  ;;  %v4812_v18 = vmax.f32 %v13844_v40, %v13842_v9  ;;  %v4937_v45 = vmul.f32 1.442695, %v4853_v32  ;;  %v4939_v22 = vmul.f32 1.442695, %v4854_v25  ;;  %v13864_v35 = vadd.f32 %v13663_v50, %v4244_v62 }
 0xc3b   : > { %v13857_v12 = vpop.eup %9384 }
 0xc3c   : > { %15837 = vst [vmem:[#allocation45_spill] sm:$0xff] %v13857_v12  ;;  %9386 = vpow2.f32 %v4937_v45  ;;  %v5052_v27 = vadd.f32 %v13857_v12, %v13853_v59  ;;  %v9801_v12 = vld [vmem:[%s9887_s11 + $0xa0] sm:$0xff] }
 0xc3d   : > { %9388 = vpow2.f32 %v4939_v22  ;;  %v13861_v31 = vpop.f32.mrf.mxu1 }
 0xc3e   : > { %15838 = vst [vmem:[#allocation23_spill] sm:$0xff] %v13861_v31  ;;  %4813 = vmax.xlane.f32.xlu0 %v4812_v18  ;;  %5053 = vadd.xlane.f32.xlu1 %v5052_v27 }
 0xc3f   : > { %v4606_v43 = vpop.f32.mrf.mxu3  ;;  %v4772_v63 = vpop.xlane.xlu2 %4771 }
 0xc40   : > { %v13866_v32 = vadd.f32 %v4606_v43, %v4243_v10  ;;  %v4855_v25 = vsub.f32 %v13566_v37, %v4772_v63  ;;  %v4856_v45 = vsub.f32 %v13564_v3, %v4772_v63  ;;  %8433 = vmatmul.msk.f32.gmra.mxu1 %vm291_vm0, %v9800_v38  ;;  %v4246_v37 = vunpack.c.h.bf16 %v8276_v2 }
 0xc41   : > { %v4245_v38 = vunpack.c.l.bf16 %v8276_v2  ;;  %v8277_v2 = vld [vmem:[%s15552_s5 + $0x2e0] sm:$0xff] }
 0xc42   : > { %v13875_v18 = vpop.eup %9386  ;;  %v4815_v22 = vmax.f32 %v13866_v32, %v13864_v35  ;;  %v4941_v50 = vmul.f32 1.442695, %v4855_v25  ;;  %v4943_v62 = vmul.f32 1.442695, %v4856_v45  ;;  %v13886_v31 = vadd.f32 %v13685_v57, %v4246_v37 }
 0xc43   : > { %v13879_v27 = vpop.eup %9388 }
 0xc44   : > { %9390 = vpow2.f32 %v4941_v50  ;;  %v5055_v3 = vadd.f32 %v13879_v27, %v13875_v18  ;;  %15840 = vst [vmem:[#allocation37_spill] sm:$0xff] %v13886_v31 }
 0xc45   : > { %9392 = vpow2.f32 %v4943_v62  ;;  %v13883_v10 = vpop.f32.mrf.mxu1 }
 0xc46   : > { %15839 = vst [vmem:[#allocation38_spill] sm:$0xff] %v13883_v10  ;;  %4816 = vmax.xlane.f32.xlu1 %v4815_v22  ;;  %5056 = vadd.xlane.f32.xlu2 %v5055_v3 }
 0xc47   : > { %v4609_v43 = vpop.f32.mrf.mxu3  ;;  %v4775_v63 = vpop.xlane.xlu2 %4774 }
 0xc48   : > { %v13888_v25 = vadd.f32 %v4609_v43, %v4245_v38  ;;  %v4857_v45 = vsub.f32 %v13582_v20, %v4775_v63  ;;  %v4858_v50 = vsub.f32 %v13580_v49, %v4775_v63  ;;  %8434 = vmatmul.msk.f32.gmra.mxu1 %vm291_vm0, %v9801_v12  ;;  %v4248_v20 = vunpack.c.h.bf16 %v8277_v2 }
 0xc49   : > { %v4247_v12 = vunpack.c.l.bf16 %v8277_v2  ;;  %v8278_v2 = vld [vmem:[%s15552_s5 + $0x2e8] sm:$0xff] }
 0xc4a   : > { %15841 = vst [vmem:[#allocation21_spill] sm:$0xff] %v13888_v25  ;;  %v13897_v22 = vpop.eup %9390  ;;  %v4818_v62 = vmax.f32 %v13888_v25, %v13886_v31  ;;  %v4945_v57 = vmul.f32 1.442695, %v4857_v45  ;;  %v4947_v37 = vmul.f32 1.442695, %v4858_v50  ;;  %v13908_v10 = vadd.f32 %v13701_v24, %v4248_v20  ;;  %v9802_v31 = vld [vmem:[%s9887_s11 + $0xa8] sm:$0xff] }
 0xc4b   : > { %v13901_v3 = vpop.eup %9392  ;;  %v9803_v25 = vld [vmem:[%s9887_s11 + $0xb0] sm:$0xff] }
 0xc4c   : > { %9394 = vpow2.f32 %v4945_v57  ;;  %v5058_v49 = vadd.f32 %v13901_v3, %v13897_v22 }
 0xc4d   : > { %9396 = vpow2.f32 %v4947_v37  ;;  %v13905_v38 = vpop.f32.mrf.mxu1 }
 0xc4e   : > { %15842 = vst [vmem:[#allocation14_spill] sm:$0xff] %v13905_v38  ;;  %5059 = vadd.xlane.f32.xlu0 %v5058_v49  ;;  %4819 = vmax.xlane.f32.xlu2 %v4818_v62 }
 0xc4f   : > { %v4612_v43 = vpop.f32.mrf.mxu3  ;;  %v4778_v63 = vpop.xlane.xlu0 %4777 }
 0xc50   : > { %v13910_v45 = vadd.f32 %v4612_v43, %v4247_v12  ;;  %v4859_v50 = vsub.f32 %v13598_v39, %v4778_v63  ;;  %v4860_v57 = vsub.f32 %v13596_v17, %v4778_v63  ;;  %8435 = vmatmul.msk.f32.gmra.mxu1 %vm291_vm0, %v9802_v31  ;;  %v4250_v39 = vunpack.c.h.bf16 %v8278_v2 }
 0xc51   : > { %v4249_v31 = vunpack.c.l.bf16 %v8278_v2  ;;  %v8279_v2 = vld [vmem:[%s15552_s5 + $0x2f0] sm:$0xff] }
 0xc52   : > { %v13919_v37 = vpop.eup %9394  ;;  %v4821_v62 = vmax.f32 %v13910_v45, %v13908_v10  ;;  %v4949_v24 = vmul.f32 1.442695, %v4859_v50  ;;  %v4951_v20 = vmul.f32 1.442695, %v4860_v57  ;;  %v13930_v38 = vadd.f32 %v13723_v44, %v4250_v39 }
 0xc53   : > { %v13923_v49 = vpop.eup %9396 }
 0xc54   : > { %9398 = vpow2.f32 %v4949_v24  ;;  %v5061_v17 = vadd.f32 %v13923_v49, %v13919_v37  ;;  %15843 = vst [vmem:[#allocation6_spill] sm:$0xff] %v13930_v38 }
 0xc55   : > { %9400 = vpow2.f32 %v4951_v20  ;;  %v13927_v12 = vpop.f32.mrf.mxu1 }
 0xc56   : > { %4822 = vmax.xlane.f32.xlu0 %v4821_v62  ;;  %5062 = vadd.xlane.f32.xlu1 %v5061_v17 }
 0xc57   : > { %v4615_v43 = vpop.f32.mrf.mxu3  ;;  %v4781_v63 = vpop.xlane.xlu1 %4780 }
 0xc58   : > { %v13932_v50 = vadd.f32 %v4615_v43, %v4249_v31  ;;  %v4861_v57 = vsub.f32 %v13614_v42, %v4781_v63  ;;  %v4862_v24 = vsub.f32 %v13612_v0, %v4781_v63  ;;  %8436 = vmatmul.msk.f32.gmra.mxu1 %vm291_vm0, %v9803_v25  ;;  %v4252_v42 = vunpack.c.h.bf16 %v8279_v2 }
 0xc59   : > { %v4251_v25 = vunpack.c.l.bf16 %v8279_v2  ;;  %v8280_v2 = vld [vmem:[%s15552_s5 + $0x2f8] sm:$0xff] }
 0xc5a   : > { %15844 = vst [vmem:[#allocation18_spill] sm:$0xff] %v13932_v50  ;;  %v13941_v62 = vpop.eup %9398  ;;  %v4824_v20 = vmax.f32 %v13932_v50, %v13930_v38  ;;  %v4953_v44 = vmul.f32 1.442695, %v4861_v57  ;;  %v4955_v39 = vmul.f32 1.442695, %v4862_v24  ;;  %v13952_v38 = vadd.f32 %v13751_v23, %v4252_v42  ;;  %v9804_v50 = vld [vmem:[%s9887_s11 + $0xb8] sm:$0xff] }
 0xc5b   : > { %v13945_v17 = vpop.eup %9400 }
 0xc5c   : > { %9402 = vpow2.f32 %v4953_v44  ;;  %v5064_v0 = vadd.f32 %v13945_v17, %v13941_v62  ;;  %15845 = vst [vmem:[#allocation13_spill] sm:$0xff] %v13952_v38 }
 0xc5d   : > { %9404 = vpow2.f32 %v4955_v39  ;;  %v13949_v31 = vpop.f32.mrf.mxu1 }
 0xc5e   : > { %4825 = vmax.xlane.f32.xlu1 %v4824_v20  ;;  %5065 = vadd.xlane.f32.xlu2 %v5064_v0 }
 0xc5f   : > { %v4618_v43 = vpop.f32.mrf.mxu3  ;;  %v4784_v63 = vpop.xlane.xlu2 %4783 }
 0xc60   : > { %v13954_v57 = vadd.f32 %v4618_v43, %v4251_v25  ;;  %v4863_v24 = vsub.f32 %v13630_v14, %v4784_v63  ;;  %v4864_v44 = vsub.f32 %v13628_v33, %v4784_v63  ;;  %8437 = vmatmul.msk.f32.gmra.mxu1 %vm291_vm0, %v9804_v50  ;;  %v4254_v14 = vunpack.c.h.bf16 %v8280_v2 }
 0xc61   : > { %v4253_v50 = vunpack.c.l.bf16 %v8280_v2 }
 0xc62   : > { %15846 = vst [vmem:[#allocation22_spill] sm:$0xff] %v13954_v57  ;;  %v13963_v20 = vpop.eup %9402  ;;  %v4827_v39 = vmax.f32 %v13954_v57, %v13952_v38  ;;  %v4957_v23 = vmul.f32 1.442695, %v4863_v24  ;;  %v4959_v42 = vmul.f32 1.442695, %v4864_v44  ;;  %v13974_v38 = vadd.f32 %v13767_v7, %v4254_v14 }
 0xc63   : > { %v13967_v0 = vpop.eup %9404 }
 0xc64   : > { %15847 = vst [vmem:[#allocation7_spill] sm:$0xff] %v13967_v0  ;;  %9406 = vpow2.f32 %v4957_v23  ;;  %v5067_v33 = vadd.f32 %v13967_v0, %v13963_v20  ;;  %v9805_v23 = vld [vmem:[%s9887_s11 + $0xc0] sm:$0xff] }
 0xc65   : > { %9408 = vpow2.f32 %v4959_v42  ;;  %v13971_v25 = vpop.f32.mrf.mxu1  ;;  %15848 = vst [vmem:[#allocation29_spill] sm:$0xff] %v13974_v38 }
 0xc66   : > { %5068 = vadd.xlane.f32.xlu0 %v5067_v33  ;;  %4828 = vmax.xlane.f32.xlu2 %v4827_v39 }
 0xc67   : > { %v4787_v43 = vpop.xlane.xlu0 %4786  ;;  %v4621_v63 = vpop.f32.mrf.mxu3 }
 0xc68   : > { %v4865_v24 = vsub.f32 %v13646_v61, %v4787_v43  ;;  %v4866_v44 = vsub.f32 %v13644_v16, %v4787_v43  ;;  %v13978_v57 = vadd.f32 %v4621_v63, %v4253_v50  ;;  %8438 = vmatmul.msk.f32.gmra.mxu1 %vm291_vm0, %v9805_v23 }
 0xc69   : > { %v5027_v2 = vpop.xlane.xlu2 %5026 }
 0xc6a   : > { %v13982_v42 = vpop.eup %9406  ;;  %v4961_v33 = vmul.f32 1.442695, %v4865_v24  ;;  %v4963_v39 = vmul.f32 1.442695, %v4866_v44  ;;  %v4830_v0 = vmax.f32 %v13978_v57, %v13974_v38  ;;  %9410 = vrcp.f32 %v5027_v2  ;;  %v9806_v24 = vld [vmem:[%s9887_s11 + $0xc8] sm:$0xff] }
 0xc6b   : > { %v13986_v7 = vpop.eup %9408 }
 0xc6c   : > { %9412 = vpow2.f32 %v4961_v33  ;;  %v5070_v16 = vadd.f32 %v13986_v7, %v13982_v42 }
 0xc6d   : > { %9414 = vpow2.f32 %v4963_v39  ;;  %v13990_v61 = vpop.f32.mrf.mxu1 }
 0xc6e   : > { %5071 = vadd.xlane.f32.xlu1 %v5070_v16  ;;  %4831 = vmax.xlane.f32.xlu0 %v4830_v0 }
 0xc6f   : > { %v4790_v14 = vpop.xlane.xlu1 %4789 }
 0xc70   : > { %v9411_v50 = vpop.eup %9410  ;;  %v4867_v43 = vsub.f32 %v13668_v41, %v4790_v14  ;;  %v4868_v63 = vsub.f32 %v13666_v55, %v4790_v14  ;;  %8439 = vmatmul.msk.f32.gmra.mxu1 %vm291_vm0, %v9806_v24 }
 0xc71   : > { %v5153_v44 = vmul.f32 %v9411_v50, %v13655_v1  ;;  %v5154_v23 = vmul.f32 %v9411_v50, %v13659_v26  ;;  %v5030_v2 = vpop.xlane.xlu2 %5029  ;;  %v9807_v26 = vld [vmem:[%s9887_s11 + $0xd0] sm:$0xff] }
 0xc72   : > { %v13998_v33 = vpop.eup %9412  ;;  %v4965_v39 = vmul.f32 1.442695, %v4867_v43  ;;  %v4967_v16 = vmul.f32 1.442695, %v4868_v63  ;;  %9416 = vrcp.f32 %v5030_v2 }
 0xc73   : > { %v14000_v0 = vpop.eup %9414  ;;  %5329 = vmatmul.f32.vlgmr.msrb.gmra.mxu2 %v5153_v44  ;;  %5442 = vmatmul.f32.vlgmr.msra.gmra.mxu0 %v5154_v23 }
 0xc74   : > { %9418 = vpow2.f32 %v4965_v39  ;;  %v5073_v55 = vadd.f32 %v14000_v0, %v13998_v33 }
 0xc75   : > { %9420 = vpow2.f32 %v4967_v16  ;;  %v14004_v41 = vpop.f32.mrf.mxu1 }
 0xc76   : > { %5074 = vadd.xlane.f32.xlu2 %v5073_v55 }
 0xc78   : > { %v9417_v1 = vpop.eup %9416  ;;  %8440 = vmatmul.msk.f32.gmra.mxu1 %vm291_vm0, %v9807_v26 }
 0xc79   : > { %v4793_v14 = vpop.xlane.xlu2 %4792  ;;  %v5155_v50 = vmul.f32 %v9417_v1, %v13675_v56  ;;  %v5156_v43 = vmul.f32 %v9417_v1, %v13680_v34 }
 0xc7a   : > { %v14010_v63 = vpop.eup %9418  ;;  %v4869_v24 = vsub.f32 %v13693_v21, %v4793_v14  ;;  %v4870_v44 = vsub.f32 %v13688_v60, %v4793_v14  ;;  %v9808_v60 = vld [vmem:[%s9887_s11 + $0xd8] sm:$0xff] }
 0xc7b   : > { %v14014_v23 = vpop.eup %9420  ;;  %5332 = vmatmul.f32.gmra.mxu2 %v5155_v50  ;;  %5445 = vmatmul.f32.gmra.mxu0 %v5156_v43 }
 0xc7c   : > { %v4969_v2 = vmul.f32 1.442695, %v4869_v24  ;;  %v4971_v39 = vmul.f32 1.442695, %v4870_v44  ;;  %v5076_v16 = vadd.f32 %v14014_v23, %v14010_v63 }
 0xc7d   : > { %v14018_v55 = vpop.f32.mrf.mxu1 }
 0xc7e   : > { %15849 = vst [vmem:[#allocation32_spill] sm:$0xff] %v14018_v55  ;;  %9422 = vpow2.f32 %v4969_v2  ;;  %5077 = vadd.xlane.f32.xlu0 %v5076_v16 }
 0xc7f   : > { %9424 = vpow2.f32 %v4971_v39  ;;  %v4796_v56 = vpop.xlane.xlu0 %4795 }
 0xc80   : > { %v4871_v34 = vsub.f32 %v13708_v28, %v4796_v56  ;;  %v4872_v21 = vsub.f32 %v13704_v51, %v4796_v56  ;;  %8441 = vmatmul.msk.f32.gmra.mxu1 %vm291_vm0, %v9808_v60  ;;  %v9809_v56 = vld [vmem:[%s9887_s11 + $0xe0] sm:$0xff] }
 0xc81   : > { %v5033_v1 = vpop.xlane.xlu2 %5032 }
 0xc82   : > { %v4973_v26 = vmul.f32 1.442695, %v4871_v34  ;;  %v4975_v14 = vmul.f32 1.442695, %v4872_v21  ;;  %9426 = vrcp.f32 %v5033_v1 }
 0xc84   : > { %v14024_v50 = vpop.eup %9422  ;;  %9428 = vpow2.f32 %v4973_v26 }
 0xc85   : > { %v14026_v43 = vpop.eup %9424  ;;  %9430 = vpow2.f32 %v4975_v14  ;;  %v14028_v24 = vpop.f32.mrf.mxu1 }
 0xc86   : > { %v5079_v28 = vadd.f32 %v14026_v43, %v14024_v50 }
 0xc87   : > { %v4799_v51 = vpop.xlane.xlu1 %4798  ;;  %v5036_v44 = vpop.xlane.xlu0 %5035 }
 0xc88   : > { %v9427_v2 = vpop.eup %9426  ;;  %5080 = vadd.xlane.f32.xlu1 %v5079_v28  ;;  %v4873_v39 = vsub.f32 %v13732_v15, %v4799_v51  ;;  %v4874_v16 = vsub.f32 %v13730_v29, %v4799_v51  ;;  %9432 = vrcp.f32 %v5036_v44  ;;  %8442 = vmatmul.msk.f32.gmra.mxu1 %vm291_vm0, %v9809_v56  ;;  %v15851_v51 = vld [vmem:[#allocation26_spill] sm:$0xff] }
 0xc89   : > { %v5039_v34 = vpop.xlane.xlu2 %5038  ;;  %v5157_v21 = vmul.f32 %v9427_v2, %v13706_v11  ;;  %v5158_v60 = vmul.f32 %v9427_v2, %v13714_v53  ;;  %v15850_v11 = vld [vmem:[#allocation17_spill] sm:$0xff]  ;;  %v9810_v2 = vld [vmem:[%s9887_s11 + $0xe8] sm:$0xff] }
 0xc8a   : > { %v14038_v1 = vpop.eup %9428  ;;  %v4977_v26 = vmul.f32 1.442695, %v4873_v39  ;;  %v4979_v14 = vmul.f32 1.442695, %v4874_v16 }
 0xc8b   : > { %v14040_v38 = vpop.eup %9430  ;;  %5335 = vmatmul.f32.gmra.mxu2 %v5157_v21  ;;  %5448 = vmatmul.f32.gmra.mxu0 %v5158_v60 }
 0xc8c   : > { %9434 = vpow2.f32 %v4977_v26  ;;  %v5082_v29 = vadd.f32 %v14040_v38, %v14038_v1 }
 0xc8d   : > { %9436 = vpow2.f32 %v4979_v14  ;;  %v14044_v15 = vpop.f32.mrf.mxu1 }
 0xc8e   : > { %v9433_v28 = vpop.eup %9432  ;;  %5083 = vadd.xlane.f32.xlu2 %v5082_v29  ;;  %9438 = vrcp.f32 %v5039_v34 }
 0xc8f   : > { %v5159_v53 = vmul.f32 %v9433_v28, %v15850_v11  ;;  %v5160_v44 = vmul.f32 %v9433_v28, %v15851_v51  ;;  %v9811_v51 = vld [vmem:[%s9887_s11 + $0xf0] sm:$0xff] }
 0xc90   : > { %8443 = vmatmul.msk.f32.gmra.mxu1 %vm291_vm0, %v9810_v2 }
 0xc91   : > { %v4802_v39 = vpop.xlane.xlu2 %4801 }
 0xc92   : > { %v14050_v16 = vpop.eup %9434  ;;  %v4875_v56 = vsub.f32 %v13756_v58, %v4802_v39  ;;  %v4876_v21 = vsub.f32 %v13754_v47, %v4802_v39 }
 0xc93   : > { %v14054_v60 = vpop.eup %9436  ;;  %5338 = vmatmul.f32.gmra.mxu2 %v5159_v53  ;;  %5451 = vmatmul.f32.gmra.mxu0 %v5160_v44 }
 0xc94   : > { %v4981_v26 = vmul.f32 1.442695, %v4875_v56  ;;  %v4983_v14 = vmul.f32 1.442695, %v4876_v21  ;;  %v5085_v34 = vadd.f32 %v14054_v60, %v14050_v16  ;;  %v9439_v28 = vpop.eup %9438 }
 0xc95   : > { %v14058_v29 = vpop.f32.mrf.mxu1  ;;  %v5161_v2 = vmul.f32 %v9439_v28, %v13739_v13  ;;  %v5162_v39 = vmul.f32 %v9439_v28, %v13746_v4  ;;  %v9812_v13 = vld [vmem:[%s9887_s11 + $0xf8] sm:$0xff] }
 0xc96   : > { %9440 = vpow2.f32 %v4981_v26  ;;  %5086 = vadd.xlane.f32.xlu0 %v5085_v34 }
 0xc97   : > { %9442 = vpow2.f32 %v4983_v14  ;;  %v4805_v11 = vpop.xlane.xlu0 %4804 }
 0xc98   : > { %v4877_v58 = vsub.f32 %v13777_v36, %v4805_v11  ;;  %v4878_v47 = vsub.f32 %v13772_v52, %v4805_v11  ;;  %8444 = vmatmul.msk.f32.gmra.mxu1 %vm291_vm0, %v9811_v51 }
 0xc99   : > { %v5045_v53 = vpop.xlane.xlu1 %5044  ;;  %v5042_v44 = vpop.xlane.xlu2 %5041 }
 0xc9a   : > { %v4985_v56 = vmul.f32 1.442695, %v4877_v58  ;;  %v4987_v21 = vmul.f32 1.442695, %v4878_v47  ;;  %9444 = vrcp.f32 %v5042_v44 }
 0xc9b   : > { %5341 = vmatmul.f32.gmra.mxu2 %v5161_v2  ;;  %5454 = vmatmul.f32.gmra.mxu0 %v5162_v39 }
 0xc9c   : > { %v14066_v26 = vpop.eup %9440  ;;  %9446 = vpow2.f32 %v4985_v56 }
 0xc9d   : > { %v14068_v36 = vpop.eup %9442  ;;  %9448 = vpow2.f32 %v4987_v21  ;;  %v14070_v52 = vpop.f32.mrf.mxu1 }
 0xc9e   : > { %v5088_v14 = vadd.f32 %v14068_v36, %v14066_v26  ;;  %9450 = vrcp.f32 %v5045_v53 }
 0xca0   : > { %5089 = vadd.xlane.f32.xlu1 %v5088_v14  ;;  %8445 = vmatmul.msk.f32.gmra.mxu1 %vm291_vm0, %v9812_v13  ;;  %v9445_v4 = vpop.eup %9444  ;;  %v15853_v13 = vld [vmem:[#allocation31_spill] sm:$0xff] }
 0xca1   : > { %v4808_v34 = vpop.xlane.xlu1 %4807  ;;  %v5163_v47 = vmul.f32 %v9445_v4, %v13769_v8  ;;  %v5164_v44 = vmul.f32 %v9445_v4, %v13783_v5  ;;  %v5048_v21 = vpop.xlane.xlu2 %5047 }
 0xca2   : > { %v14076_v28 = vpop.eup %9446  ;;  %v4879_v11 = vsub.f32 %v13800_v30, %v4808_v34  ;;  %v4880_v58 = vsub.f32 %v13798_v46, %v4808_v34  ;;  %v15852_v46 = vld [vmem:[#allocation25_spill] sm:$0xff] }
 0xca3   : > { %v14081_v51 = vpop.eup %9448  ;;  %5344 = vmatmul.f32.gmra.mxu2 %v5163_v47  ;;  %5457 = vmatmul.f32.gmra.mxu0 %v5164_v44 }
 0xca4   : > { %v4989_v2 = vmul.f32 1.442695, %v4879_v11  ;;  %v4991_v39 = vmul.f32 1.442695, %v4880_v58  ;;  %v5091_v56 = vadd.f32 %v14081_v51, %v14076_v28  ;;  %v9451_v30 = vpop.eup %9450 }
 0xca5   : > { %v14086_v53 = vpop.f32.mrf.mxu1  ;;  %v5165_v14 = vmul.f32 %v9451_v30, %v15852_v46  ;;  %v5166_v5 = vmul.f32 %v9451_v30, %v15853_v13 }
 0xca6   : > { %9452 = vpow2.f32 %v4989_v2  ;;  %5092 = vadd.xlane.f32.xlu2 %v5091_v56 }
 0xca7   : > { %9454 = vpow2.f32 %v4991_v39 }
 0xca8   : > { %9456 = vrcp.f32 %v5048_v21 }
 0xca9   : > { %v5051_v8 = vpop.xlane.xlu0 %5050 }
 0xcaa   : > { %9458 = vrcp.f32 %v5051_v8 }
 0xcab   : > { %5347 = vmatmul.f32.gmra.mxu2 %v5165_v14  ;;  %5460 = vmatmul.f32.gmra.mxu0 %v5166_v5  ;;  %v14104_v5 = vpop.xlane.xlu2 %4810 }
 0xcac   : > { %v14090_v4 = vpop.eup %9452 }
 0xcad   : > { %v14092_v34 = vpop.eup %9454  ;;  %v14094_v11 = vpop.f32.mrf.mxu1 }
 0xcae   : > { %v5094_v58 = vadd.f32 %v14092_v34, %v14090_v4  ;;  %v9457_v47 = vpop.eup %9456 }
 0xcaf   : > { %v5167_v21 = vmul.f32 %v9457_v47, %v13809_v6  ;;  %v5168_v30 = vmul.f32 %v9457_v47, %v13813_v54 }
 0xcb0   : > { %5095 = vadd.xlane.f32.xlu0 %v5094_v58  ;;  %v9459_v8 = vpop.eup %9458 }
 0xcb1   : > { %v5054_v44 = vpop.xlane.xlu1 %5053  ;;  %v4814_v2 = vpop.xlane.xlu0 %4813  ;;  %v5170_v58 = vmul.f32 %v9459_v8, %v13835_v48 }
 0xcb2   : > { %v4883_v39 = vsub.f32 %v13844_v40, %v4814_v2  ;;  %v4884_v56 = vsub.f32 %v13842_v9, %v4814_v2  ;;  %v5169_v40 = vmul.f32 %v9459_v8, %v13831_v19 }
 0xcb3   : > { %5350 = vmatmul.f32.gmra.mxu2 %v5167_v21  ;;  %5463 = vmatmul.f32.gmra.mxu0 %v5168_v30  ;;  %v15854_v30 = vld [vmem:[#allocation45_spill] sm:$0xff] }
 0xcb4   : > { %v4997_v46 = vmul.f32 1.442695, %v4883_v39  ;;  %v4999_v14 = vmul.f32 1.442695, %v4884_v56 }
 0xcb5   : > { %v14102_v13 = vpop.f32.mrf.mxu1 }
 0xcb6   : > { %9460 = vpow2.f32 %v4997_v46 }
 0xcb7   : > { %9462 = vpow2.f32 %v4999_v14 }
 0xcb8   : > { %9464 = vrcp.f32 %v5054_v44 }
 0xcb9   : > { %6142 = vrot.lane.b32.xlu1 %v13927_v12, %s9822_s12  ;;  %v4817_v9 = vpop.xlane.xlu1 %4816  ;;  %v5057_v21 = vpop.xlane.xlu2 %5056 }
 0xcba   : > { %v4885_v6 = vsub.f32 %v13866_v32, %v4817_v9  ;;  %v4886_v54 = vsub.f32 %v13864_v35, %v4817_v9 }
 0xcbb   : > { %5353 = vmatmul.f32.gmra.mxu2 %v5169_v40  ;;  %5466 = vmatmul.f32.gmra.mxu0 %v5170_v58 }
 0xcbc   : > { %v14112_v47 = vpop.eup %9460  ;;  %v5001_v2 = vmul.f32 1.442695, %v4885_v6  ;;  %v5003_v39 = vmul.f32 1.442695, %v4886_v54 }
 0xcbd   : > { %v14114_v56 = vpop.eup %9462  ;;  %v14116_v44 = vpop.f32.mrf.mxu1 }
 0xcbe   : > { %9466 = vpow2.f32 %v5001_v2  ;;  %v5100_v32 = vadd.f32 %v14114_v56, %v14112_v47  ;;  %v9465_v35 = vpop.eup %9464 }
 0xcbf   : > { %9468 = vpow2.f32 %v5003_v39  ;;  %v5171_v48 = vmul.f32 %v9465_v35, %v13853_v59  ;;  %v5172_v46 = vmul.f32 %v9465_v35, %v15854_v30 }
 0xcc0   : > { %5101 = vadd.xlane.f32.xlu2 %v5100_v32  ;;  %9470 = vrcp.f32 %v5057_v21 }
 0xcc1   : > { %6144 = vrot.lane.b32.xlu1 %v13949_v31, %s9822_s12  ;;  %v5060_v19 = vpop.xlane.xlu0 %5059 }
 0xcc2   : > { %9472 = vrcp.f32 %v5060_v19  ;;  %v4820_v19 = vpop.xlane.xlu2 %4819 }
 0xcc3   : > { %5356 = vmatmul.f32.gmra.mxu2 %v5171_v48  ;;  %5469 = vmatmul.f32.gmra.mxu0 %v5172_v46 }
 0xcc4   : > { %v14124_v14 = vpop.eup %9466  ;;  %6148 = vrot.lane.b32.xlu0 %v13990_v61, %s9822_s12 }
 0xcc5   : > { %v14128_v8 = vpop.eup %9468  ;;  %v14130_v9 = vpop.f32.mrf.mxu1 }
 0xcc6   : > { %v5103_v6 = vadd.f32 %v14128_v8, %v14124_v14  ;;  %v9471_v54 = vpop.eup %9470 }
 0xcc7   : > { %v5173_v2 = vmul.f32 %v9471_v54, %v13875_v18  ;;  %v5174_v39 = vmul.f32 %v9471_v54, %v13879_v27 }
 0xcc8   : > { %5104 = vadd.xlane.f32.xlu2 %v5103_v6  ;;  %v9473_v30 = vpop.eup %9472 }
 0xcc9   : > { %6146 = vrot.lane.b32.xlu1 %v13971_v25, %s9822_s12  ;;  %v4823_v59 = vpop.xlane.xlu0 %4822  ;;  %v5063_v48 = vpop.xlane.xlu1 %5062  ;;  %v5176_v18 = vmul.f32 %v9473_v30, %v13901_v3 }
 0xcca   : > { %v4889_v40 = vsub.f32 %v13910_v45, %v4823_v59  ;;  %v4890_v58 = vsub.f32 %v13908_v10, %v4823_v59  ;;  %v5175_v10 = vmul.f32 %v9473_v30, %v13897_v22  ;;  %v8377_v22 = vld [vmem:[%s15550_s3 + $0x10] sm:$0xff] }
 0xccb   : > { %5359 = vmatmul.f32.gmra.mxu2 %v5173_v2  ;;  %5472 = vmatmul.f32.gmra.mxu0 %v5174_v39  ;;  %v15858_v30 = vld [vmem:[#allocation9_spill] sm:$0xff] }
 0xccc   : > { %v5009_v21 = vmul.f32 1.442695, %v4889_v40  ;;  %v5011_v32 = vmul.f32 1.442695, %v4890_v58  ;;  %6150 = vrot.lane.b32.xlu0 %v14004_v41, %s9822_s12  ;;  %5652 = vmatpush.msra.mxu3 %v8377_v22 }
 0xccd   : > { %v14142_v35 = vpop.f32.mrf.mxu1 }
 0xcce   : > { %9474 = vpow2.f32 %v5009_v21 }
 0xccf   : > { %9476 = vpow2.f32 %v5011_v32  ;;  %v15857_v32 = vld [vmem:[#allocation5_spill] sm:$0xff] }
 0xcd0   : > { %9478 = vrcp.f32 %v5063_v48  ;;  %v4881_v48 = vsub.f32 %v15857_v32, %v14104_v5  ;;  %v15861_v32 = vld [vmem:[#allocation7_spill] sm:$0xff] }
 0xcd1   : > { %v5066_v6 = vpop.xlane.xlu2 %5065  ;;  %v14165_v2 = vpop.xlane.xlu1 %4825 }
 0xcd2   : > { %9480 = vrcp.f32 %v5066_v6 }
 0xcd3   : > { %5362 = vmatmul.f32.gmra.mxu2 %v5175_v10  ;;  %5475 = vmatmul.f32.gmra.mxu0 %v5176_v18  ;;  %v4882_v10 = vsub.f32 %v15858_v30, %v14104_v5  ;;  %v15859_v5 = vld [vmem:[#allocation21_spill] sm:$0xff] }
 0xcd4   : > { %v14146_v27 = vpop.eup %9474  ;;  %6152 = vrot.lane.b32.xlu0 %v14018_v55, %s9822_s12 }
 0xcd5   : > { %v14150_v45 = vpop.eup %9476  ;;  %v14152_v46 = vpop.f32.mrf.mxu1  ;;  %v4995_v6 = vmul.f32 1.442695, %v4882_v10 }
 0xcd6   : > { %15855 = vst [vmem:[#allocation33_spill] sm:$0xff] %v14150_v45  ;;  %v5109_v54 = vadd.f32 %v14150_v45, %v14146_v27  ;;  %v9479_v59 = vpop.eup %9478 }
 0xcd7   : > { %15856 = vst [vmem:[#allocation34_spill] sm:$0xff] %v14152_v46  ;;  %v5177_v3 = vmul.f32 %v9479_v59, %v13919_v37  ;;  %v5178_v40 = vmul.f32 %v9479_v59, %v13923_v49  ;;  %v4993_v49 = vmul.f32 1.442695, %v4881_v48 }
 0xcd8   : > { %5110 = vadd.xlane.f32.xlu2 %v5109_v54  ;;  %v9481_v21 = vpop.eup %9480 }
 0xcd9   : > { %v5069_v39 = vpop.xlane.xlu0 %5068  ;;  %v5179_v37 = vmul.f32 %v9481_v21, %v13941_v62  ;;  %v5180_v18 = vmul.f32 %v9481_v21, %v13945_v17  ;;  %v14177_v59 = vpop.xlane.xlu2 %4828  ;;  %v15860_v62 = vld [vmem:[#allocation37_spill] sm:$0xff] }
 0xcda   : > { %9482 = vrcp.f32 %v5069_v39  ;;  %v4888_v39 = vsub.f32 %v15860_v62, %v4820_v19 }
 0xcdb   : > { %5365 = vmatmul.f32.gmra.mxu2 %v5177_v3  ;;  %5478 = vmatmul.f32.gmra.mxu0 %v5178_v40  ;;  %9484 = vpow2.f32 %v4993_v49  ;;  %v4887_v40 = vsub.f32 %v15859_v5, %v4820_v19 }
 0xcdc   : > { %6154 = vrot.lane.b32.xlu0 %v14028_v24, %s9822_s12  ;;  %9486 = vpow2.f32 %v4995_v6  ;;  %v5007_v30 = vmul.f32 1.442695, %v4888_v39 }
 0xcdd   : > { %v14163_v58 = vpop.f32.mrf.mxu1  ;;  %v5005_v21 = vmul.f32 1.442695, %v4887_v40 }
 0xce0   : > { %v9483_v3 = vpop.eup %9482 }
 0xce1   : > { %v5072_v22 = vpop.xlane.xlu1 %5071  ;;  %v5181_v17 = vmul.f32 %v9483_v3, %v13963_v20  ;;  %v5182_v48 = vmul.f32 %v9483_v3, %v15861_v32  ;;  %v14183_v10 = vpop.eup %9484 }
 0xce2   : > { %9488 = vrcp.f32 %v5072_v22  ;;  %v14189_v49 = vpop.xlane.xlu0 %4831 }
 0xce3   : > { %5368 = vmatmul.f32.gmra.mxu2 %v5179_v37  ;;  %5481 = vmatmul.f32.gmra.mxu0 %v5180_v18  ;;  %v14187_v18 = vpop.eup %9486  ;;  %9490 = vpow2.f32 %v5005_v21 }
 0xce4   : > { %6156 = vrot.lane.b32.xlu0 %v14044_v15, %s9822_s12  ;;  %9492 = vpow2.f32 %v5007_v30  ;;  %v5097_v20 = vadd.f32 %v14187_v18, %v14183_v10 }
 0xce5   : > { %v14175_v54 = vpop.f32.mrf.mxu1 }
 0xce8   : > { %v9489_v5 = vpop.eup %9488 }
 0xce9   : > { %v5075_v6 = vpop.xlane.xlu2 %5074  ;;  %v5183_v19 = vmul.f32 %v9489_v5, %v13982_v42  ;;  %v5184_v3 = vmul.f32 %v9489_v5, %v13986_v7  ;;  %v14197_v40 = vpop.eup %9490  ;;  %v15863_v7 = vld [vmem:[#allocation18_spill] sm:$0xff] }
 0xcea   : > { %9494 = vrcp.f32 %v5075_v6  ;;  %v14201_v39 = vpop.eup %9492  ;;  %v4891_v30 = vsub.f32 %v15863_v7, %v14165_v2  ;;  %v15864_v5 = vld [vmem:[#allocation6_spill] sm:$0xff] }
 0xceb   : > { %5371 = vmatmul.f32.gmra.mxu2 %v5181_v17  ;;  %5484 = vmatmul.f32.gmra.mxu0 %v5182_v48  ;;  %v5106_v42 = vadd.f32 %v14201_v39, %v14197_v40 }
 0xced   : > { %v14185_v37 = vpop.f32.mrf.mxu1 }
 0xcee   : > { %15862 = vst [vmem:[#allocation35_spill] sm:$0xff] %v14185_v37 }
 0xcf0   : > { %6180 = vrot.lane.b32.xlu2 %v14185_v37, %s9822_s12  ;;  %v5443_v22 = vpop.f32.mrf.mxu0  ;;  %v9495_v32 = vpop.eup %9494 }
 0xcf1   : > { %v5078_v17 = vpop.xlane.xlu0 %5077  ;;  %v5185_v6 = vmul.f32 %v9495_v32, %v13998_v33 }
 0xcf2   : > { %9496 = vrcp.f32 %v5078_v17  ;;  %v5013_v17 = vmul.f32 1.442695, %v4891_v30 }
 0xcf3   : > { %5098 = vadd.xlane.f32.xlu1 %v5097_v20  ;;  %5374 = vmatmul.f32.gmra.mxu2 %v5183_v19  ;;  %v4892_v20 = vsub.f32 %v15864_v5, %v14165_v2  ;;  %v5186_v19 = vmul.f32 %v9495_v32, %v14000_v0 }
 0xcf4   : > { %5487 = vmatmul.f32.gmra.mxu0 %v5184_v3 }
 0xcf5   : > { %v14199_v62 = vpop.f32.mrf.mxu1  ;;  %v5015_v37 = vmul.f32 1.442695, %v4892_v20 }
 0xcf6   : > { %v5330_v21 = vpop.f32.mrf.mxu2 }
 0xcf7   : > { %v5444_v48 = vadd.f32 %v5443_v22, %v5330_v21 }
 0xcf8   : > { %v5446_v3 = vpop.f32.mrf.mxu0  ;;  %v9497_v55 = vpop.eup %9496 }
 0xcf9   : > { %8378 = vmatmul.msk.f32.vlgmr.msra.gmra.mxu3 %vm729_vm1, %v5444_v48  ;;  %v5187_v33 = vmul.f32 %v9497_v55, %v14010_v63  ;;  %v5188_v0 = vmul.f32 %v9497_v55, %v14014_v23 }
 0xcfb   : > { %5107 = vadd.xlane.f32.xlu1 %v5106_v42  ;;  %5377 = vmatmul.f32.gmra.mxu2 %v5185_v6  ;;  %v5081_v21 = vpop.xlane.xlu1 %5080 }
 0xcfc   : > { %5490 = vmatmul.f32.gmra.mxu0 %v5186_v19  ;;  %9498 = vrcp.f32 %v5081_v21 }
 0xcfd   : > { %v14212_v22 = vpop.f32.mrf.mxu1  ;;  %9500 = vpow2.f32 %v5013_v17 }
 0xcfe   : > { %v5333_v48 = vpop.f32.mrf.mxu2  ;;  %9502 = vpow2.f32 %v5015_v37 }
 0xcff   : > { %v5447_v45 = vadd.f32 %v5446_v3, %v5333_v48 }
 0xd01   : > { %8379 = vmatmul.msk.f32.gmra.mxu3 %vm729_vm1, %v5447_v45  ;;  %v5084_v32 = vpop.xlane.xlu2 %5083 }
 0xd02   : > { %v9499_v42 = vpop.eup %9498  ;;  %9504 = vrcp.f32 %v5084_v32 }
 0xd03   : > { %5380 = vmatmul.f32.gmra.mxu2 %v5187_v33  ;;  %v14221_v7 = vpop.eup %9500  ;;  %v5189_v63 = vmul.f32 %v9499_v42, %v14024_v50  ;;  %v5190_v45 = vmul.f32 %v9499_v42, %v14026_v43 }
 0xd04   : > { %5493 = vmatmul.f32.gmra.mxu0 %v5188_v0  ;;  %v14223_v6 = vpop.eup %9502 }
 0xd05   : > { %v14217_v2 = vpop.f32.mrf.mxu1  ;;  %v5112_v23 = vadd.f32 %v14223_v6, %v14221_v7 }
 0xd06   : > { %6186 = vrot.lane.b32.xlu2 %v14217_v2, %s9822_s12 }
 0xd08   : > { %v5449_v30 = vpop.f32.mrf.mxu0  ;;  %v9505_v20 = vpop.eup %9504 }
 0xd09   : > { %v5087_v37 = vpop.xlane.xlu0 %5086  ;;  %v5191_v50 = vmul.f32 %v9505_v20, %v14038_v1  ;;  %v5192_v43 = vmul.f32 %v9505_v20, %v14040_v38 }
 0xd0a   : > { %9506 = vrcp.f32 %v5087_v37 }
 0xd0b   : > { %5383 = vmatmul.f32.gmra.mxu2 %v5189_v63 }
 0xd0c   : > { %5496 = vmatmul.f32.gmra.mxu0 %v5190_v45 }
 0xd0d   : > { %v14229_v55 = vpop.f32.mrf.mxu1 }
 0xd0e   : > { %15865 = vst [vmem:[#allocation36_spill] sm:$0xff] %v14229_v55  ;;  %5113 = vadd.xlane.f32.xlu0 %v5112_v23  ;;  %v5336_v5 = vpop.f32.mrf.mxu2  ;;  %6188 = vrot.lane.b32.xlu2 %v14229_v55, %s9822_s12 }
 0xd0f   : > { %v5450_v19 = vadd.f32 %v5449_v30, %v5336_v5 }
 0xd10   : > { %v5452_v3 = vpop.f32.mrf.mxu0  ;;  %v9507_v33 = vpop.eup %9506 }
 0xd11   : > { %8380 = vmatmul.msk.f32.gmra.mxu3 %vm729_vm1, %v5450_v19  ;;  %v5193_v42 = vmul.f32 %v9507_v33, %v14050_v16  ;;  %v5194_v1 = vmul.f32 %v9507_v33, %v14054_v60 }
 0xd13   : > { %5386 = vmatmul.f32.gmra.mxu2 %v5191_v50  ;;  %v5090_v21 = vpop.xlane.xlu1 %5089 }
 0xd14   : > { %6160 = vrot.lane.b32.xlu1 %v14070_v52, %s9822_s12  ;;  %5499 = vmatmul.f32.gmra.mxu0 %v5192_v43  ;;  %9508 = vrcp.f32 %v5090_v21  ;;  %v15866_v43 = vld [vmem:[#allocation14_spill] sm:$0xff] }
 0xd15   : > { %v14238_v17 = vpop.f32.mrf.mxu1 }
 0xd16   : > { %v5339_v48 = vpop.f32.mrf.mxu2 }
 0xd17   : > { %v5453_v0 = vadd.f32 %v5452_v3, %v5339_v48 }
 0xd18   : > { %v5455_v32 = vpop.f32.mrf.mxu0 }
 0xd19   : > { %8381 = vmatmul.msk.f32.gmra.mxu3 %vm729_vm1, %v5453_v0  ;;  %v5093_v30 = vpop.xlane.xlu2 %5092 }
 0xd1a   : > { %v9509_v45 = vpop.eup %9508  ;;  %9510 = vrcp.f32 %v5093_v30 }
 0xd1b   : > { %5389 = vmatmul.f32.gmra.mxu2 %v5193_v42  ;;  %v5195_v60 = vmul.f32 %v9509_v45, %v14066_v26  ;;  %v5196_v37 = vmul.f32 %v9509_v45, %v14068_v36 }
 0xd1c   : > { %6178 = vrot.lane.b32.xlu1 %v14175_v54, %s9822_s12  ;;  %5502 = vmatmul.f32.gmra.mxu0 %v5194_v1  ;;  %v15868_v1 = vld [vmem:[#allocation13_spill] sm:$0xff] }
 0xd1d   : > { %v14245_v38 = vpop.f32.mrf.mxu1  ;;  %v4894_v30 = vsub.f32 %v15868_v1, %v14177_v59 }
 0xd1e   : > { %v5342_v63 = vpop.f32.mrf.mxu2  ;;  %6192 = vrot.lane.b32.xlu2 %v14245_v38, %s9822_s12 }
 0xd1f   : > { %v5456_v23 = vadd.f32 %v5455_v32, %v5342_v63 }
 0xd20   : > { %v5458_v16 = vpop.f32.mrf.mxu0  ;;  %v9511_v20 = vpop.eup %9510 }
 0xd21   : > { %8382 = vmatmul.msk.f32.gmra.mxu3 %vm729_vm1, %v5456_v23  ;;  %v5197_v26 = vmul.f32 %v9511_v20, %v14076_v28  ;;  %v5198_v36 = vmul.f32 %v9511_v20, %v14081_v51  ;;  %v15867_v28 = vld [vmem:[#allocation22_spill] sm:$0xff]  ;;  %v5019_v23 = vmul.f32 1.442695, %v4894_v30 }
 0xd22   : > { %6158 = vrot.lane.b32.xlu0 %v14058_v29, %s9822_s12  ;;  %v4893_v42 = vsub.f32 %v15867_v28, %v14177_v59  ;;  %v15869_v20 = vld [vmem:[#allocation38_spill] sm:$0xff] }
 0xd23   : > { %5392 = vmatmul.f32.gmra.mxu2 %v5195_v60  ;;  %v5096_v5 = vpop.xlane.xlu0 %5095 }
 0xd24   : > { %6190 = vrot.lane.b32.xlu1 %v14238_v17, %s9822_s12  ;;  %5505 = vmatmul.f32.gmra.mxu0 %v5196_v37  ;;  %9512 = vrcp.f32 %v5096_v5  ;;  %v5017_v63 = vmul.f32 1.442695, %v4893_v42 }
 0xd26   : > { %v5345_v19 = vpop.f32.mrf.mxu2  ;;  %9514 = vpow2.f32 %v5017_v63 }
 0xd27   : > { %v5459_v3 = vadd.f32 %v5458_v16, %v5345_v19  ;;  %9516 = vpow2.f32 %v5019_v23 }
 0xd28   : > { %v5461_v50 = vpop.f32.mrf.mxu0 }
 0xd29   : > { %8383 = vmatmul.msk.f32.gmra.mxu3 %vm729_vm1, %v5459_v3 }
 0xd2a   : > { %6182 = vrot.lane.b32.xlu0 %v14199_v62, %s9822_s12  ;;  %v9513_v21 = vpop.eup %9512 }
 0xd2b   : > { %5395 = vmatmul.f32.gmra.mxu2 %v5197_v26  ;;  %v5199_v32 = vmul.f32 %v9513_v21, %v14090_v4  ;;  %v5200_v51 = vmul.f32 %v9513_v21, %v14092_v34  ;;  %v14288_v21 = vpop.permute.xlu1 %6142 }
 0xd2c   : > { %6140 = vrot.lane.b32.xlu1 %v15866_v43, %s9822_s12  ;;  %5508 = vmatmul.f32.gmra.mxu0 %v5198_v36  ;;  %v14277_v59 = vpop.eup %9514  ;;  %v4895_v36 = vsub.f32 %v13978_v57, %v14189_v49  ;;  %v15871_v57 = vld [vmem:[#allocation23_spill] sm:$0xff] }
 0xd2d   : > { %v14279_v37 = vpop.eup %9516 }
 0xd2e   : > { %v5348_v48 = vpop.f32.mrf.mxu2  ;;  %v5115_v3 = vadd.f32 %v14279_v37, %v14277_v59 }
 0xd2f   : > { %v5462_v33 = vadd.f32 %v5461_v50, %v5348_v48 }
 0xd30   : > { %v5464_v0 = vpop.f32.mrf.mxu0 }
 0xd31   : > { %8384 = vmatmul.msk.f32.gmra.mxu3 %vm729_vm1, %v5462_v33  ;;  %v15870_v33 = vld [vmem:[#allocation29_spill] sm:$0xff] }
 0xd32   : > { %6184 = vrot.lane.b32.xlu0 %v14212_v22, %s9822_s12 }
 0xd33   : > { %5398 = vmatmul.f32.gmra.mxu2 %v5199_v32  ;;  %v5102_v19 = vpop.xlane.xlu2 %5101  ;;  %v5021_v32 = vmul.f32 1.442695, %v4895_v36  ;;  %v14298_v63 = vpop.permute.xlu1 %6144 }
 0xd34   : > { %6174 = vrot.lane.b32.xlu1 %v14152_v46, %s9822_s12  ;;  %5511 = vmatmul.f32.gmra.mxu0 %v5200_v51 }
 0xd35   : > { %9518 = vpow2.f32 %v5021_v32 }
 0xd36   : > { %v5351_v45 = vpop.f32.mrf.mxu2 }
 0xd37   : > { %v5465_v16 = vadd.f32 %v5464_v0, %v5351_v45  ;;  %v4896_v0 = vsub.f32 %v15870_v33, %v14189_v49 }
 0xd38   : > { %v5467_v60 = vpop.f32.mrf.mxu0 }
 0xd39   : > { %8385 = vmatmul.msk.f32.gmra.mxu3 %vm729_vm1, %v5465_v16  ;;  %v5023_v42 = vmul.f32 1.442695, %v4896_v0 }
 0xd3a   : > { %6176 = vrot.lane.b32.xlu0 %v14163_v58, %s9822_s12 }
 0xd3b   : > { %v5105_v28 = vpop.xlane.xlu2 %5104  ;;  %9520 = vpow2.f32 %v5023_v42  ;;  %v14302_v16 = vpop.eup %9518 }
 0xd3e   : > { %v5354_v4 = vpop.f32.mrf.mxu2 }
 0xd3f   : > { %v5468_v34 = vadd.f32 %v5467_v60, %v5354_v4  ;;  %v14306_v4 = vpop.permute.xlu0 %6148 }
 0xd40   : > { %v5470_v5 = vpop.f32.mrf.mxu0 }
 0xd41   : > { %8386 = vmatmul.msk.f32.gmra.mxu3 %vm729_vm1, %v5468_v34  ;;  %v14304_v60 = vpop.eup %9520 }
 0xd42   : > { %6138 = vrot.lane.b32.xlu0 %v15869_v20, %s9822_s12 }
 0xd46   : > { %v5357_v50 = vpop.f32.mrf.mxu2 }
 0xd47   : > { %5116 = vadd.xlane.f32.xlu2 %v5115_v3  ;;  %v5471_v26 = vadd.f32 %v5470_v5, %v5357_v50  ;;  %v15872_v5 = vld [vmem:[#allocation44_spill] sm:$0xff]  ;;  %v5118_v3 = vadd.f32 %v14304_v60, %v14302_v16  ;;  %v14313_v50 = vpop.permute.xlu1 %6146  ;;  %v14322_v0 = vpop.permute.xlu0 %6150 }
 0xd48   : > { %v5473_v48 = vpop.f32.mrf.mxu0 }
 0xd49   : > { %8387 = vmatmul.msk.f32.gmra.mxu3 %vm729_vm1, %v5471_v26 }
 0xd4a   : > { %6172 = vrot.lane.b32.xlu0 %v14142_v35, %s9822_s12 }
 0xd4b   : > { %v14300_v45 = vpop.xlane.xlu2 %5110 }
 0xd4e   : > { %v5360_v51 = vpop.f32.mrf.mxu2 }
 0xd4f   : > { %v5474_v1 = vadd.f32 %v5473_v48, %v5360_v51 }
 0xd50   : > { %v5476_v30 = vpop.f32.mrf.mxu0 }
 0xd51   : > { %8388 = vmatmul.msk.f32.gmra.mxu3 %vm729_vm1, %v5474_v1  ;;  %v15873_v1 = vld [vmem:[#allocation30_spill] sm:$0xff] }
 0xd52   : > { %6136 = vrot.lane.b32.xlu0 %v15871_v57, %s9822_s12 }
 0xd53   : > { %v14315_v26 = vpop.permute.xlu2 %6180 }
 0xd56   : > { %v5363_v23 = vpop.f32.mrf.mxu2 }
 0xd57   : > { %v5477_v49 = vadd.f32 %v5476_v30, %v5363_v23 }
 0xd58   : > { %v5479_v34 = vpop.f32.mrf.mxu0 }
 0xd59   : > { %8389 = vmatmul.msk.f32.gmra.mxu3 %vm729_vm1, %v5477_v49  ;;  %v15874_v49 = vld [vmem:[#allocation10_spill] sm:$0xff] }
 0xd5a   : > { %6134 = vrot.lane.b32.xlu0 %v15872_v5, %s9822_s12 }
 0xd5e   : > { %5119 = vadd.xlane.f32.xlu1 %v5118_v3  ;;  %v5366_v36 = vpop.f32.mrf.mxu2  ;;  %v14331_v3 = vpop.permute.xlu0 %6152 }
 0xd5f   : > { %6170 = vrot.lane.b32.xlu2 %v14130_v9, %s9822_s12  ;;  %v5480_v48 = vadd.f32 %v5479_v34, %v5366_v36 }
 0xd60   : > { %v5482_v33 = vpop.f32.mrf.mxu0  ;;  %v14324_v42 = vpop.permute.xlu2 %6186 }
 0xd61   : > { %8390 = vmatmul.msk.f32.gmra.mxu3 %vm729_vm1, %v5480_v48 }
 0xd62   : > { %6168 = vrot.lane.b32.xlu0 %v14116_v44, %s9822_s12 }
 0xd66   : > { %v5099_v32 = vpop.xlane.xlu1 %5098  ;;  %v5369_v51 = vpop.f32.mrf.mxu2 }
 0xd67   : > { %9522 = vrcp.f32 %v5099_v32  ;;  %6130 = vrot.lane.b32.xlu2 %v15873_v1, %s9822_s12  ;;  %v5483_v30 = vadd.f32 %v5482_v33, %v5369_v51 }
 0xd68   : > { %v5485_v23 = vpop.f32.mrf.mxu0  ;;  %9524 = vrcp.f32 %v5102_v19  ;;  %v14337_v33 = vpop.permute.xlu2 %6188 }
 0xd69   : > { %8391 = vmatmul.msk.f32.gmra.mxu3 %vm729_vm1, %v5483_v30  ;;  %9526 = vrcp.f32 %v5105_v28 }
 0xd6a   : > { %6132 = vrot.lane.b32.xlu0 %v15874_v49, %s9822_s12 }
 0xd6d   : > { %v9523_v34 = vpop.eup %9522 }
 0xd6e   : > { %v5201_v36 = vmul.f32 %v9523_v34, %v14183_v10  ;;  %v5202_v48 = vmul.f32 %v9523_v34, %v14187_v18  ;;  %v5372_v32 = vpop.f32.mrf.mxu2  ;;  %v9525_v19 = vpop.eup %9524  ;;  %v8882_v10 = vpack.i.bf16 %v14028_v24, %v14044_v15 }
 0xd6f   : > { %6162 = vrot.lane.b32.xlu2 %v14086_v53, %s9822_s12  ;;  %v5486_v46 = vadd.f32 %v5485_v23, %v5372_v32  ;;  %v5203_v18 = vmul.f32 %v9525_v19, %v14112_v47  ;;  %v5204_v30 = vmul.f32 %v9525_v19, %v14114_v56  ;;  %v14351_v34 = vpop.permute.xlu0 %6154  ;;  %v5108_v47 = vpop.xlane.xlu1 %5107  ;;  %v5750_v19 = vld [vmem:[#allocation2] sm:$0xff] }
 0xd70   : > { %5401 = vmatmul.f32.gmra.mxu2 %v5201_v36  ;;  %5514 = vmatmul.f32.gmra.mxu0 %v5202_v48  ;;  %v9527_v56 = vpop.eup %9526  ;;  %9528 = vrcp.f32 %v5108_v47 }
 0xd71   : > { %v5488_v51 = vpop.f32.mrf.mxu0  ;;  %8392 = vmatmul.msk.f32.gmra.mxu3 %vm729_vm1, %v5486_v46  ;;  %v8877_v46 = vpack.i.bf16 %v14058_v29, %v14070_v52  ;;  %9530 = vrcp.f32 %v14300_v45 }
 0xd72   : > { %6164 = vrot.lane.b32.xlu0 %v14094_v11, %s9822_s12 }
 0xd76   : > { %v5375_v23 = vpop.f32.mrf.mxu2  ;;  %v9529_v47 = vpop.eup %9528 }
 0xd77   : > { %6166 = vrot.lane.b32.xlu1 %v14102_v13, %s9822_s12  ;;  %8883 = vrot.lane.b32.xlu2 %v8882_v10, %s9823_s13  ;;  %v5489_v36 = vadd.f32 %v5488_v51, %v5375_v23  ;;  %v8892_v10 = vpack.i.bf16 %v13990_v61, %v14229_v55  ;;  %v8887_v51 = vpack.i.bf16 %v14004_v41, %v14238_v17 }
 0xd78   : > { %5404 = vmatmul.f32.gmra.mxu2 %v5203_v18  ;;  %5517 = vmatmul.f32.gmra.mxu0 %v5204_v30  ;;  %v6193_v48 = vpop.permute.xlu2 %6192  ;;  %v5205_v30 = vmul.f32 %v9527_v56, %v14124_v14  ;;  %v5206_v23 = vmul.f32 %v9527_v56, %v14128_v8  ;;  %v8902_v14 = vpack.i.bf16 %v13949_v31, %v14212_v22 }
 0xd79   : > { %8527 = vmatpush.xpose.msk.msrb.mxu0 %vm729_vm1, %v6193_v48  ;;  %v5491_v28 = vpop.f32.mrf.mxu0  ;;  %8393 = vmatmul.msk.f32.gmra.mxu3 %vm729_vm1, %v5489_v36  ;;  %v6157_v48 = vpop.permute.xlu0 %6156 }
 0xd7a   : > { %8878 = vrot.lane.b32.xlu0 %v8877_v46, %s9823_s13 }
 0xd7c   : > { %v5654_v32 = vpop.f32.mrf.mxu3 }
 0xd7d   : > { %v5782_v18 = vadd.f32 %v5750_v19, %v5654_v32  ;;  %v5751_v19 = vld [vmem:[#allocation2 + $0x8] sm:$0xff] }
 0xd7e   : > { %v5378_v36 = vpop.f32.mrf.mxu2 }
 0xd7f   : > { %5814 = vst.msk [vmem:[#allocation2] sm:$0xff] %vm291_vm0, %v5782_v18  ;;  %8893 = vrot.lane.b32.xlu1 %v8892_v10, %s9823_s13  ;;  %8888 = vrot.lane.b32.xlu2 %v8887_v51, %s9823_s13  ;;  %v5492_v46 = vadd.f32 %v5491_v28, %v5378_v36  ;;  %v5207_v10 = vmul.f32 %v9529_v47, %v14197_v40  ;;  %v9531_v40 = vpop.eup %9530 }
 0xd80   : > { %5407 = vmatmul.f32.gmra.mxu2 %v5205_v30  ;;  %5520 = vmatmul.f32.gmra.mxu0 %v5206_v23  ;;  %v5208_v28 = vmul.f32 %v9529_v47, %v14201_v39  ;;  %v8897_v51 = vpack.i.bf16 %v13971_v25, %v14217_v2  ;;  %v8907_v39 = vpack.i.bf16 %v13927_v12, %v14199_v62  ;;  %v15875_v47 = vld [vmem:[#allocation33_spill] sm:$0xff] }
 0xd81   : > { %v5494_v55 = vpop.f32.mrf.mxu0  ;;  %8394 = vmatmul.msk.f32.gmra.mxu3 %vm729_vm1, %v5492_v46  ;;  %v5114_v45 = vpop.xlane.xlu0 %5113  ;;  %v5209_v46 = vmul.f32 %v9531_v40, %v14146_v27 }
 0xd82   : > { %9532 = vrcp.f32 %v5114_v45 }
 0xd84   : > { %v5657_v32 = vpop.f32.mrf.mxu3 }
 0xd85   : > { %v5783_v8 = vadd.f32 %v5751_v19, %v5657_v32  ;;  %v5210_v32 = vmul.f32 %v9531_v40, %v15875_v47  ;;  %v5753_v47 = vld [vmem:[#allocation2 + $0x18] sm:$0xff] }
 0xd86   : > { %v6161_v56 = vpop.permute.xlu1 %6160  ;;  %v5381_v18 = vpop.f32.mrf.mxu2 }
 0xd87   : > { %5815 = vst.msk [vmem:[#allocation2 + $0x8] sm:$0xff] %vm291_vm0, %v5783_v8  ;;  %8479 = vmatpush.xpose.msk.msra.mxu2 %vm729_vm1, %v6161_v56  ;;  %8903 = vrot.lane.b32.xlu1 %v8902_v14, %s9823_s13  ;;  %v5495_v30 = vadd.f32 %v5494_v55, %v5381_v18 }
 0xd88   : > { %5410 = vmatmul.f32.gmra.mxu2 %v5207_v10  ;;  %5523 = vmatmul.f32.gmra.mxu0 %v5208_v28  ;;  %v9533_v8 = vpop.eup %9532  ;;  %v5752_v28 = vld [vmem:[#allocation2 + $0x10] sm:$0xff] }
 0xd89   : > { %8898 = vrot.lane.b32.xlu2 %v8897_v51, %s9823_s13  ;;  %v5497_v23 = vpop.f32.mrf.mxu0  ;;  %8395 = vmatmul.msk.f32.gmra.mxu3 %vm729_vm1, %v5495_v30  ;;  %v15876_v51 = vld [vmem:[#allocation35_spill] sm:$0xff]  ;;  %v5211_v45 = vmul.f32 %v9533_v8, %v14221_v7 }
 0xd8a   : > { %v8912_v18 = vpack.i.bf16 %v15866_v43, %v15876_v51 }
 0xd8e   : > { %v14380_v36 = vpop.permute.xlu1 %6178  ;;  %v5384_v55 = vpop.f32.mrf.mxu2 }
 0xd8f   : > { %8908 = vrot.lane.b32.xlu1 %v8907_v39, %s9823_s13  ;;  %v5498_v19 = vadd.f32 %v5497_v23, %v5384_v55  ;;  %v5212_v23 = vmul.f32 %v9533_v8, %v14223_v6 }
 0xd90   : > { %5413 = vmatmul.f32.gmra.mxu2 %v5209_v46  ;;  %5526 = vmatmul.f32.gmra.mxu0 %v5210_v32  ;;  %v8917_v32 = vpack.i.bf16 %v15869_v20, %v14175_v54 }
 0xd91   : > { %v5500_v14 = vpop.f32.mrf.mxu0  ;;  %8396 = vmatmul.msk.f32.gmra.mxu3 %vm729_vm1, %v5498_v19 }
 0xd94   : > { %v6159_v56 = vpop.permute.xlu0 %6158  ;;  %v5660_v10 = vpop.f32.mrf.mxu3 }
 0xd95   : > { %v5784_v30 = vadd.f32 %v5752_v28, %v5660_v10  ;;  %8480 = vmatpush.xpose.msk.msra.mxu2 %vm729_vm1, %v6159_v56  ;;  %v5754_v56 = vld [vmem:[#allocation2 + $0x20] sm:$0xff] }
 0xd96   : > { %v6191_v27 = vpop.permute.xlu1 %6190  ;;  %v5387_v40 = vpop.f32.mrf.mxu2 }
 0xd97   : > { %5816 = vst.msk [vmem:[#allocation2 + $0x10] sm:$0xff] %vm291_vm0, %v5784_v30  ;;  %8528 = vmatpush.xpose.msk.msrb.mxu0 %vm729_vm1, %v6191_v27  ;;  %8913 = vrot.lane.b32.xlu1 %v8912_v18, %s9823_s13  ;;  %v5501_v39 = vadd.f32 %v5500_v14, %v5387_v40  ;;  %v15877_v18 = vld [vmem:[#allocation32_spill] sm:$0xff] }
 0xd98   : > { %5416 = vmatmul.f32.gmra.mxu2 %v5211_v45  ;;  %5529 = vmatmul.f32.gmra.mxu0 %v5212_v23  ;;  %v8927_v30 = vpack.i.bf16 %v15877_v18, %v14245_v38  ;;  %v5755_v45 = vld [vmem:[#allocation2 + $0x28] sm:$0xff] }
 0xd99   : > { %8481 = vmatpush.xpose.msk.msra.mxu2 %vm729_vm1, %v6157_v48  ;;  %v5503_v46 = vpop.f32.mrf.mxu0  ;;  %8397 = vmatmul.msk.f32.gmra.mxu3 %vm729_vm1, %v5501_v39 }
 0xd9b   : > { %8529 = vmatpush.xpose.msk.msrb.mxu0 %vm729_vm1, %v14337_v33 }
 0xd9c   : > { %v6183_v7 = vpop.permute.xlu0 %6182  ;;  %v5663_v6 = vpop.f32.mrf.mxu3 }
 0xd9d   : > { %v5785_v55 = vadd.f32 %v5753_v47, %v5663_v6  ;;  %8482 = vmatpush.xpose.msk.msra.mxu2 %vm729_vm1, %v14351_v34  ;;  %v8922_v34 = vpack.i.bf16 %v15871_v57, %v14163_v58 }
 0xd9e   : > { %v5390_v48 = vpop.f32.mrf.mxu2  ;;  %v6141_v23 = vpop.permute.xlu1 %6140 }
 0xd9f   : > { %5817 = vst.msk [vmem:[#allocation2 + $0x18] sm:$0xff] %vm291_vm0, %v5785_v55  ;;  %8530 = vmatpush.xpose.msk.msrb.mxu0 %vm729_vm1, %v14324_v42  ;;  %8918 = vrot.lane.b32.xlu1 %v8917_v32, %s9823_s13  ;;  %v5504_v19 = vadd.f32 %v5503_v46, %v5390_v48 }
 0xda1   : > { %8483 = vmatpush.xpose.msk.msra.mxu2 %vm729_vm1, %v14331_v3  ;;  %8398 = vmatmul.msk.f32.gmra.mxu3 %vm729_vm1, %v5504_v19  ;;  %v5506_v33 = vpop.f32.mrf.mxu0 }
 0xda4   : > { %v6185_v14 = vpop.permute.xlu0 %6184  ;;  %v5666_v8 = vpop.f32.mrf.mxu3 }
 0xda5   : > { %v5786_v10 = vadd.f32 %v5754_v56, %v5666_v8  ;;  %8484 = vmatpush.xpose.msk.msra.mxu2 %vm729_vm1, %v14322_v0  ;;  %8531 = vmatpush.xpose.msk.msrb.mxu0 %vm729_vm1, %v6185_v14 }
 0xda6   : > { %v5393_v42 = vpop.f32.mrf.mxu2  ;;  %v6175_v32 = vpop.permute.xlu1 %6174 }
 0xda7   : > { %5818 = vst.msk [vmem:[#allocation2 + $0x20] sm:$0xff] %vm291_vm0, %v5786_v10  ;;  %8923 = vrot.lane.b32.xlu1 %v8922_v34, %s9823_s13  ;;  %v5507_v3 = vadd.f32 %v5506_v33, %v5393_v42  ;;  %v5758_v42 = vld [vmem:[#allocation2 + $0x40] sm:$0xff] }
 0xda9   : > { %8485 = vmatpush.xpose.msk.msra.mxu2 %vm729_vm1, %v14306_v4  ;;  %8532 = vmatpush.xpose.msk.msrb.mxu0 %vm729_vm1, %v6183_v7  ;;  %v5509_v0 = vpop.f32.mrf.mxu0  ;;  %v5756_v7 = vld [vmem:[#allocation2 + $0x30] sm:$0xff] }
 0xdaa   : > { %8399 = vmatmul.msk.f32.gmra.mxu3 %vm729_vm1, %v5507_v3 }
 0xdac   : > { %v6177_v28 = vpop.permute.xlu0 %6176  ;;  %v5669_v27 = vpop.f32.mrf.mxu3 }
 0xdad   : > { %8486 = vmatpush.xpose.msk.msra.mxu2 %vm729_vm1, %v14313_v50  ;;  %8533 = vmatpush.xpose.msk.msrb.mxu0 %vm729_vm1, %v14315_v26  ;;  %v5787_v40 = vadd.f32 %v5755_v45, %v5669_v27 }
 0xdae   : > { %v5396_v4 = vpop.f32.mrf.mxu2 }
 0xdaf   : > { %8928 = vrot.lane.b32.xlu1 %v8927_v30, %s9823_s13  ;;  %5819 = vst.msk [vmem:[#allocation2 + $0x28] sm:$0xff] %vm291_vm0, %v5787_v40  ;;  %v5510_v39 = vadd.f32 %v5509_v0, %v5396_v4  ;;  %v5759_v0 = vld [vmem:[#allocation2 + $0x48] sm:$0xff] }
 0xdb1   : > { %8487 = vmatpush.xpose.msk.msra.mxu2 %vm729_vm1, %v14298_v63  ;;  %8534 = vmatpush.xpose.msk.msrb.mxu0 %vm729_vm1, %v14380_v36  ;;  %v5512_v6 = vpop.f32.mrf.mxu0 }
 0xdb2   : > { %8400 = vmatmul.msk.f32.gmra.mxu3 %vm729_vm1, %v5510_v39 }
 0xdb4   : > { %v6139_v50 = vpop.permute.xlu0 %6138  ;;  %v5672_v46 = vpop.f32.mrf.mxu3 }
 0xdb5   : > { %8488 = vmatpush.xpose.msk.msra.mxu2 %vm729_vm1, %v14288_v21  ;;  %8535 = vmatpush.xpose.msk.msrb.mxu0 %vm729_vm1, %v6177_v28  ;;  %v5788_v26 = vadd.f32 %v5756_v7, %v5672_v46  ;;  %v5757_v21 = vld [vmem:[#allocation2 + $0x38] sm:$0xff] }
 0xdb6   : > { %v5399_v47 = vpop.f32.mrf.mxu2 }
 0xdb7   : > { %5820 = vst.msk [vmem:[#allocation2 + $0x30] sm:$0xff] %vm291_vm0, %v5788_v26  ;;  %v5513_v63 = vadd.f32 %v5512_v6, %v5399_v47  ;;  %v5761_v6 = vld [vmem:[#allocation2 + $0x58] sm:$0xff]  ;;  %v14458_v47 = vld [vmem:[%s15549_s2 + $0x3] ss:$0 sm:$0xff] }
 0xdb9   : > { %8489 = vmatpush.xpose.msk.msra.mxu2 %vm729_vm1, %v6141_v23  ;;  %8536 = vmatpush.xpose.msk.msrb.mxu0 %vm729_vm1, %v6175_v32  ;;  %v5760_v23 = vld [vmem:[#allocation2 + $0x50] sm:$0xff] }
 0xdba   : > { %8401 = vmatmul.msk.f32.gmra.mxu3 %vm729_vm1, %v5513_v63  ;;  %v5117_v36 = vpop.xlane.xlu2 %5116 }
 0xdbb   : > { %9534 = vrcp.f32 %v5117_v36 }
 0xdbc   : > { %v6173_v55 = vpop.permute.xlu0 %6172  ;;  %v5675_v48 = vpop.f32.mrf.mxu3 }
 0xdbd   : > { %8490 = vmatpush.xpose.msk.msra.mxu2 %vm729_vm1, %v6139_v50  ;;  %8537 = vmatpush.xpose.msk.msrb.mxu0 %vm729_vm1, %v6173_v55  ;;  %v5789_v19 = vadd.f32 %v5757_v21, %v5675_v48  ;;  %v5762_v55 = vld [vmem:[#allocation2 + $0x60] sm:$0xff] }
 0xdbf   : > { %5821 = vst.msk [vmem:[#allocation2 + $0x38] sm:$0xff] %vm291_vm0, %v5789_v19  ;;  %v5970_v19 = vadd.f32 %v14458_v47, %v15874_v49 }
 0xdc1   : > { %v9535_v33 = vpop.eup %9534 }
 0xdc2   : > { %v6171_v14 = vpop.permute.xlu2 %6170  ;;  %v5213_v8 = vmul.f32 %v9535_v33, %v14277_v59  ;;  %v5214_v56 = vmul.f32 %v9535_v33, %v14279_v37 }
 0xdc3   : > { %8538 = vmatpush.xpose.msk.msrb.mxu0 %vm729_vm1, %v6171_v14 }
 0xdc4   : > { %v6137_v34 = vpop.permute.xlu0 %6136  ;;  %5419 = vmatmul.f32.gmra.mxu2 %v5213_v8  ;;  %5532 = vmatmul.f32.gmra.mxu0 %v5214_v56  ;;  %v5678_v10 = vpop.f32.mrf.mxu3 }
 0xdc5   : > { %8491 = vmatpush.xpose.msk.msra.mxu2 %vm729_vm1, %v6137_v34  ;;  %v5790_v3 = vadd.f32 %v5758_v42, %v5678_v10  ;;  %v5763_v34 = vld [vmem:[#allocation2 + $0x68] sm:$0xff] }
 0xdc7   : > { %5822 = vst.msk [vmem:[#allocation2 + $0x40] sm:$0xff] %vm291_vm0, %v5790_v3 }
 0xdca   : > { %v6131_v46 = vpop.permute.xlu2 %6130 }
 0xdcc   : > { %v6135_v28 = vpop.permute.xlu0 %6134  ;;  %v5681_v30 = vpop.f32.mrf.mxu3 }
 0xdcd   : > { %8492 = vmatpush.xpose.msk.msra.mxu2 %vm729_vm1, %v6135_v28  ;;  %v5791_v59 = vadd.f32 %v5759_v0, %v5681_v30  ;;  %v5971_v0 = vadd.f32 %v14458_v47, %v15872_v5 }
 0xdcf   : > { %5823 = vst.msk [vmem:[#allocation2 + $0x48] sm:$0xff] %vm291_vm0, %v5791_v59 }
 0xdd1   : > { %v5120_v37 = vpop.xlane.xlu1 %5119 }
 0xdd2   : > { %9536 = vrcp.f32 %v5120_v37 }
 0xdd4   : > { %v6169_v27 = vpop.permute.xlu0 %6168  ;;  %v5684_v45 = vpop.f32.mrf.mxu3 }
 0xdd5   : > { %8539 = vmatpush.xpose.msk.msrb.mxu0 %vm729_vm1, %v6169_v27  ;;  %v5792_v40 = vadd.f32 %v5760_v23, %v5684_v45 }
 0xdd7   : > { %5824 = vst.msk [vmem:[#allocation2 + $0x50] sm:$0xff] %vm291_vm0, %v5792_v40  ;;  %v5764_v40 = vld [vmem:[#allocation2 + $0x70] sm:$0xff] }
 0xdd8   : > { %v9537_v4 = vpop.eup %9536 }
 0xdd9   : > { %v5215_v39 = vmul.f32 %v9537_v4, %v14302_v16  ;;  %v5216_v50 = vmul.f32 %v9537_v4, %v14304_v60  ;;  %v5969_v16 = vadd.f32 %v14458_v47, %v15873_v1  ;;  %v6163_v60 = vpop.permute.xlu2 %6162 }
 0xddb   : > { %5422 = vmatmul.f32.gmra.mxu2 %v5215_v39  ;;  %5535 = vmatmul.f32.gmra.mxu0 %v5216_v50  ;;  %v5972_v50 = vadd.f32 %v14458_v47, %v15871_v57 }
 0xddc   : > { %v6133_v7 = vpop.permute.xlu0 %6132  ;;  %v5687_v26 = vpop.f32.mrf.mxu3 }
 0xddd   : > { %8493 = vmatpush.xpose.msk.msra.mxu2 %vm729_vm1, %v6133_v7  ;;  %v5793_v32 = vadd.f32 %v5761_v6, %v5687_v26 }
 0xddf   : > { %5825 = vst.msk [vmem:[#allocation2 + $0x58] sm:$0xff] %vm291_vm0, %v5793_v32  ;;  %v5765_v32 = vld [vmem:[#allocation2 + $0x78] sm:$0xff] }
 0xde1   : > { %8494 = vmatpush.xpose.msk.msra.mxu2 %vm729_vm1, %v6131_v46  ;;  %v8884_v10 = vpop.permute.xlu2 %8883 }
 0xde2   : > { %v8885_v28 = vunpack.i.l.bf16 %v8884_v10  ;;  %v8886_v59 = vunpack.i.h.bf16 %v8884_v10 }
 0xde4   : > { %8495 = vmatmul.msk.f32.vlgmr.msra.gmra.mxu2 %vm729_vm1, %v5969_v16  ;;  %v6165_v63 = vpop.permute.xlu0 %6164  ;;  %v5690_v36 = vpop.f32.mrf.mxu3 }
 0xde5   : > { %v5794_v48 = vadd.f32 %v5762_v55, %v5690_v36 }
 0xde7   : > { %5826 = vst.msk [vmem:[#allocation2 + $0x60] sm:$0xff] %vm291_vm0, %v5794_v48  ;;  %v5766_v48 = vld [vmem:[#allocation2 + $0x80] sm:$0xff] }
 0xde9   : > { %v6167_v21 = vpop.permute.xlu1 %6166 }
 0xdea   : > { %8540 = vmatpush.xpose.msk.msrb.mxu0 %vm729_vm1, %v6167_v21 }
 0xdec   : > { %8496 = vmatmul.msk.f32.gmra.mxu2 %vm729_vm1, %v5970_v19  ;;  %v8879_v33 = vpop.permute.xlu0 %8878  ;;  %v5693_v56 = vpop.f32.mrf.mxu3 }
 0xded   : > { %v8880_v14 = vunpack.i.l.bf16 %v8879_v33  ;;  %v5515_v8 = vpop.f32.mrf.mxu0  ;;  %v5795_v42 = vadd.f32 %v5763_v34, %v5693_v56  ;;  %v8881_v3 = vunpack.i.h.bf16 %v8879_v33  ;;  %v5767_v34 = vld [vmem:[#allocation2 + $0x88] sm:$0xff] }
 0xdee   : > { %8541 = vmatpush.xpose.msk.msrb.mxu0 %vm729_vm1, %v6165_v63  ;;  %v5973_v63 = vadd.f32 %v14458_v47, %v15869_v20 }
 0xdef   : > { %7156 = vmatpush.msrb.mxu3 %v8880_v14  ;;  %5827 = vst.msk [vmem:[#allocation2 + $0x68] sm:$0xff] %vm291_vm0, %v5795_v42  ;;  %v5974_v14 = vadd.f32 %v14458_v47, %v15866_v43 }
 0xdf1   : > { %v14472_v30 = vpop.permute.xlu1 %8893  ;;  %7157 = vmatpush.msrb.mxu3 %v8881_v3 }
 0xdf2   : > { %8542 = vmatpush.xpose.msk.msrb.mxu0 %vm729_vm1, %v6163_v60 }
 0xdf3   : > { %v5402_v37 = vpop.f32.mrf.mxu2  ;;  %7158 = vmatpush.msrb.mxu3 %v8885_v28  ;;  %v5975_v28 = vadd.f32 %v14458_v47, %v13927_v12 }
 0xdf4   : > { %v5516_v27 = vadd.f32 %v5515_v8, %v5402_v37  ;;  %8497 = vmatmul.msk.f32.gmra.mxu2 %vm729_vm1, %v5971_v0  ;;  %v5696_v23 = vpop.f32.mrf.mxu3  ;;  %v5768_v37 = vld [vmem:[#allocation2 + $0x90] sm:$0xff] }
 0xdf5   : > { %v5518_v45 = vpop.f32.mrf.mxu0  ;;  %8543 = vmatmul.msk.f32.vlgmr.msrb.gmra.mxu0 %vm729_vm1, %v5969_v16  ;;  %7159 = vmatpush.msrb.mxu3 %v8886_v59  ;;  %v5796_v4 = vadd.f32 %v5764_v40, %v5696_v23  ;;  %v5976_v23 = vadd.f32 %v14458_v47, %v13949_v31  ;;  %v8889_v40 = vpop.permute.xlu2 %8888 }
 0xdf6   : > { %8402 = vmatmul.msk.f32.gmra.mxu3 %vm729_vm1, %v5516_v27 }
 0xdf7   : > { %5828 = vst.msk [vmem:[#allocation2 + $0x70] sm:$0xff] %vm291_vm0, %v5796_v4 }
 0xdf9   : > { %v14481_v39 = vpop.permute.xlu1 %8903 }
 0xdfb   : > { %v5405_v46 = vpop.f32.mrf.mxu2 }
 0xdfc   : > { %v5519_v7 = vadd.f32 %v5518_v45, %v5405_v46  ;;  %8498 = vmatmul.msk.f32.gmra.mxu2 %vm729_vm1, %v5972_v50  ;;  %v5699_v6 = vpop.f32.mrf.mxu3 }
 0xdfd   : > { %v5521_v26 = vpop.f32.mrf.mxu0  ;;  %8544 = vmatmul.msk.f32.gmra.mxu0 %vm729_vm1, %v5970_v19  ;;  %v5797_v16 = vadd.f32 %v5765_v32, %v5699_v6  ;;  %v5977_v32 = vadd.f32 %v14458_v47, %v13971_v25 }
 0xdfe   : > { %8403 = vmatmul.msk.f32.gmra.mxu3 %vm729_vm1, %v5519_v7  ;;  %v5769_v7 = vld [vmem:[#allocation2 + $0x98] sm:$0xff] }
 0xdff   : > { %5829 = vst.msk [vmem:[#allocation2 + $0x78] sm:$0xff] %vm291_vm0, %v5797_v16 }
 0xe01   : > { %v14489_v60 = vpop.permute.xlu1 %8908 }
 0xe03   : > { %v5408_v57 = vpop.f32.mrf.mxu2 }
 0xe04   : > { %v5522_v36 = vadd.f32 %v5521_v26, %v5408_v57  ;;  %8499 = vmatmul.msk.f32.gmra.mxu2 %vm729_vm1, %v5973_v63  ;;  %v5702_v55 = vpop.f32.mrf.mxu3  ;;  %v8890_v57 = vunpack.i.l.bf16 %v8889_v40 }
 0xe05   : > { %8545 = vmatmul.msk.f32.gmra.mxu0 %vm729_vm1, %v5971_v0  ;;  %v5798_v21 = vadd.f32 %v5766_v48, %v5702_v55  ;;  %v5524_v19 = vpop.f32.mrf.mxu0  ;;  %v5770_v48 = vld [vmem:[#allocation2 + $0xa0] sm:$0xff] }
 0xe06   : > { %8404 = vmatmul.msk.f32.gmra.mxu3 %vm729_vm1, %v5522_v36  ;;  %v8899_v36 = vpop.permute.xlu2 %8898 }
 0xe07   : > { %5830 = vst.msk [vmem:[#allocation2 + $0x80] sm:$0xff] %vm291_vm0, %v5798_v21  ;;  %v8896_v21 = vunpack.i.h.bf16 %v14472_v30  ;;  %v8901_v25 = vunpack.i.h.bf16 %v8899_v36 }
 0xe09   : > { %v14497_v33 = vpop.permute.xlu1 %8913 }
 0xe0b   : > { %v5411_v20 = vpop.f32.mrf.mxu2 }
 0xe0c   : > { %v5525_v8 = vadd.f32 %v5524_v19, %v5411_v20  ;;  %8500 = vmatmul.msk.f32.gmra.mxu2 %vm729_vm1, %v5974_v14  ;;  %v5705_v56 = vpop.f32.mrf.mxu3  ;;  %v8900_v20 = vunpack.i.l.bf16 %v8899_v36  ;;  %v5987_v36 = vadd.f32 %v14458_v47, %v14102_v13 }
 0xe0d   : > { %8546 = vmatmul.msk.f32.gmra.mxu0 %vm729_vm1, %v5972_v50  ;;  %v5799_v10 = vadd.f32 %v5767_v34, %v5705_v56  ;;  %v5527_v42 = vpop.f32.mrf.mxu0  ;;  %v8906_v56 = vunpack.i.h.bf16 %v14481_v39  ;;  %v8905_v34 = vunpack.i.l.bf16 %v14481_v39 }
 0xe0e   : > { %8405 = vmatmul.msk.f32.gmra.mxu3 %vm729_vm1, %v5525_v8  ;;  %v5978_v8 = vadd.f32 %v14458_v47, %v13990_v61  ;;  %v8916_v61 = vunpack.i.h.bf16 %v14497_v33 }
 0xe0f   : > { %5831 = vst.msk [vmem:[#allocation2 + $0x88] sm:$0xff] %vm291_vm0, %v5799_v10  ;;  %v8911_v10 = vunpack.i.h.bf16 %v14489_v60 }
 0xe11   : > { %v14505_v3 = vpop.permute.xlu1 %8918 }
 0xe12   : > { %v8921_v39 = vunpack.i.h.bf16 %v14505_v3 }
 0xe13   : > { %v5414_v43 = vpop.f32.mrf.mxu2 }
 0xe14   : > { %v5528_v0 = vadd.f32 %v5527_v42, %v5414_v43  ;;  %8501 = vmatmul.msk.f32.gmra.mxu2 %vm729_vm1, %v5975_v28  ;;  %v5708_v59 = vpop.f32.mrf.mxu3 }
 0xe15   : > { %8547 = vmatmul.msk.f32.gmra.mxu0 %vm729_vm1, %v5973_v63  ;;  %v5800_v27 = vadd.f32 %v5768_v37, %v5708_v59  ;;  %v5530_v12 = vpop.f32.mrf.mxu0  ;;  %v8891_v63 = vunpack.i.h.bf16 %v8889_v40  ;;  %v8920_v59 = vunpack.i.l.bf16 %v14505_v3 }
 0xe16   : > { %8406 = vmatmul.msk.f32.gmra.mxu3 %vm729_vm1, %v5528_v0  ;;  %v8915_v0 = vunpack.i.l.bf16 %v14497_v33 }
 0xe17   : > { %5832 = vst.msk [vmem:[#allocation2 + $0x90] sm:$0xff] %vm291_vm0, %v5800_v27 }
 0xe19   : > { %v14513_v45 = vpop.permute.xlu1 %8923 }
 0xe1a   : > { %v8926_v37 = vunpack.i.h.bf16 %v14513_v45  ;;  %v8925_v27 = vunpack.i.l.bf16 %v14513_v45 }
 0xe1b   : > { %v5417_v4 = vpop.f32.mrf.mxu2 }
 0xe1c   : > { %v5531_v50 = vadd.f32 %v5530_v12, %v5417_v4  ;;  %8502 = vmatmul.msk.f32.gmra.mxu2 %vm729_vm1, %v5976_v23  ;;  %v5711_v46 = vpop.f32.mrf.mxu3  ;;  %v5773_v12 = vld [vmem:[#allocation2 + $0xb8] sm:$0xff]  ;;  %v5981_v4 = vadd.f32 %v14458_v47, %v14028_v24  ;;  %v5984_v24 = vadd.f32 %v14458_v47, %v14070_v52  ;;  %v8447_v52 = vld [vmem:[%s15552_s5 + $0x300] sm:$0xff] }
 0xe1d   : > { %8548 = vmatmul.msk.f32.gmra.mxu0 %vm729_vm1, %v5974_v14  ;;  %v5801_v26 = vadd.f32 %v5769_v7, %v5711_v46  ;;  %v8895_v14 = vunpack.i.l.bf16 %v14472_v30  ;;  %v8910_v30 = vunpack.i.l.bf16 %v14489_v60  ;;  %v5979_v60 = vadd.f32 %v14458_v47, %v14004_v41 }
 0xe1e   : > { %8407 = vmatmul.msk.f32.gmra.mxu3 %vm729_vm1, %v5531_v50  ;;  %v5980_v41 = vadd.f32 %v14458_v47, %v15877_v18  ;;  %v5982_v18 = vadd.f32 %v14458_v47, %v14044_v15 }
 0xe1f   : > { %5833 = vst.msk [vmem:[#allocation2 + $0x98] sm:$0xff] %vm291_vm0, %v5801_v26  ;;  %v5983_v26 = vadd.f32 %v14458_v47, %v14058_v29  ;;  %v5986_v29 = vadd.f32 %v14458_v47, %v14094_v11 }
 0xe21   : > { %v8929_v6 = vpop.permute.xlu1 %8928 }
 0xe22   : > { %v8931_v31 = vunpack.i.h.bf16 %v8929_v6  ;;  %v8930_v16 = vunpack.i.l.bf16 %v8929_v6 }
 0xe24   : > { %8503 = vmatmul.msk.f32.gmra.mxu2 %vm729_vm1, %v5977_v32  ;;  %7160 = vmatpush.msrb.mxu3 %v8931_v31  ;;  %v5714_v55 = vpop.f32.mrf.mxu3  ;;  %v5985_v31 = vadd.f32 %v14458_v47, %v14086_v53 }
 0xe25   : > { %7269 = vmatpush.msrb.mxu1 %v8930_v16  ;;  %8549 = vmatmul.msk.f32.gmra.mxu0 %vm729_vm1, %v5975_v28  ;;  %v5802_v19 = vadd.f32 %v5770_v48, %v5714_v55  ;;  %v5771_v28 = vld [vmem:[#allocation2 + $0xa8] sm:$0xff] }
 0xe26   : > { %7161 = vmatpush.msrb.mxu3 %v8891_v63  ;;  %v6034_v63 = vunpack.c.l.bf16 %v8447_v52 }
 0xe27   : > { %7270 = vmatpush.msrb.mxu1 %v8890_v57  ;;  %5834 = vst.msk [vmem:[#allocation2 + $0xa0] sm:$0xff] %vm291_vm0, %v5802_v19  ;;  %v6035_v57 = vunpack.c.h.bf16 %v8447_v52  ;;  %v8448_v19 = vld [vmem:[%s15552_s5 + $0x308] sm:$0xff]  ;;  %v5992_v52 = vadd.f32 %v14458_v47, %v14163_v58 }
 0xe28   : > { %7162 = vmatpush.msrb.mxu3 %v8896_v21 }
 0xe29   : > { %7271 = vmatpush.msrb.mxu1 %v8895_v14 }
 0xe2a   : > { %7163 = vmatpush.msrb.mxu3 %v8901_v25 }
 0xe2b   : > { %7272 = vmatpush.msrb.mxu1 %v8900_v20  ;;  %v6036_v20 = vunpack.c.l.bf16 %v8448_v19 }
 0xe2c   : > { %8504 = vmatmul.msk.f32.gmra.mxu2 %vm729_vm1, %v5978_v8  ;;  %7164 = vmatpush.msrb.mxu3 %v8906_v56 }
 0xe2d   : > { %7273 = vmatpush.msrb.mxu1 %v8905_v34  ;;  %v5717_v42 = vpop.f32.mrf.mxu3  ;;  %8550 = vmatmul.msk.f32.gmra.mxu0 %vm729_vm1, %v5976_v23  ;;  %v5772_v23 = vld [vmem:[#allocation2 + $0xb0] sm:$0xff]  ;;  %v5774_v34 = vld [vmem:[#allocation2 + $0xc0] sm:$0xff] }
 0xe2e   : > { %v5803_v43 = vadd.f32 %v5771_v28, %v5717_v42  ;;  %7165 = vmatpush.msrb.mxu3 %v8911_v10  ;;  %v5988_v10 = vadd.f32 %v14458_v47, %v14116_v44 }
 0xe2f   : > { %7274 = vmatpush.msrb.mxu1 %v8910_v30 }
 0xe30   : > { %5835 = vst.msk [vmem:[#allocation2 + $0xa8] sm:$0xff] %vm291_vm0, %v5803_v43  ;;  %7166 = vmatpush.msrb.mxu3 %v8916_v61  ;;  %v8449_v43 = vld [vmem:[%s15552_s5 + $0x310] sm:$0xff] }
 0xe31   : > { %7275 = vmatpush.msrb.mxu1 %v8915_v0 }
 0xe32   : > { %7167 = vmatpush.msrb.mxu3 %v8921_v39  ;;  %v6038_v39 = vunpack.c.l.bf16 %v8449_v43 }
 0xe33   : > { %7276 = vmatpush.msrb.mxu1 %v8920_v59  ;;  %v6039_v59 = vunpack.c.h.bf16 %v8449_v43 }
 0xe34   : > { %8505 = vmatmul.msk.f32.gmra.mxu2 %vm729_vm1, %v5979_v60  ;;  %7168 = vmatpush.msrb.mxu3 %v8926_v37 }
 0xe35   : > { %7277 = vmatpush.msrb.mxu1 %v8925_v27  ;;  %v5720_v33 = vpop.f32.mrf.mxu3  ;;  %8551 = vmatmul.msk.f32.gmra.mxu0 %vm729_vm1, %v5977_v32  ;;  %v5775_v27 = vld [vmem:[#allocation2 + $0xc8] sm:$0xff] }
 0xe36   : > { %v5804_v40 = vadd.f32 %v5772_v23, %v5720_v33  ;;  %v5989_v33 = vadd.f32 %v14458_v47, %v14130_v9 }
 0xe38   : > { %5836 = vst.msk [vmem:[#allocation2 + $0xb0] sm:$0xff] %vm291_vm0, %v5804_v40 }
 0xe3c   : > { %8506 = vmatmul.msk.f32.gmra.mxu2 %vm729_vm1, %v5980_v41 }
 0xe3d   : > { %v5723_v3 = vpop.f32.mrf.mxu3  ;;  %8552 = vmatmul.msk.f32.gmra.mxu0 %vm729_vm1, %v5978_v8  ;;  %v6037_v8 = vunpack.c.h.bf16 %v8448_v19 }
 0xe3e   : > { %v5805_v45 = vadd.f32 %v5773_v12, %v5723_v3 }
 0xe40   : > { %5837 = vst.msk [vmem:[#allocation2 + $0xb8] sm:$0xff] %vm291_vm0, %v5805_v45  ;;  %v8937_v45 = vpack.i.bf16 %v15874_v49, %v14142_v35 }
 0xe41   : > { %v5533_v50 = vpop.f32.mrf.mxu0 }
 0xe44   : > { %8507 = vmatmul.msk.f32.gmra.mxu2 %vm729_vm1, %v5981_v4 }
 0xe45   : > { %8553 = vmatmul.msk.f32.gmra.mxu0 %vm729_vm1, %v5979_v60 }
 0xe47   : > { %v5420_v46 = vpop.f32.mrf.mxu2 }
 0xe48   : > { %v5534_v7 = vadd.f32 %v5533_v50, %v5420_v46  ;;  %v5776_v50 = vld [vmem:[#allocation2 + $0xd0] sm:$0xff]  ;;  %v5990_v46 = vadd.f32 %v14458_v47, %v14142_v35  ;;  %v8942_v35 = vpack.i.bf16 %v15873_v1, %v14130_v9 }
 0xe4a   : > { %8408 = vmatmul.msk.f32.gmra.mxu3 %vm729_vm1, %v5534_v7 }
 0xe4c   : > { %8508 = vmatmul.msk.f32.gmra.mxu2 %vm729_vm1, %v5982_v18 }
 0xe4d   : > { %8554 = vmatmul.msk.f32.gmra.mxu0 %vm729_vm1, %v5980_v41 }
 0xe54   : > { %8509 = vmatmul.msk.f32.gmra.mxu2 %vm729_vm1, %v5983_v26 }
 0xe55   : > { %8555 = vmatmul.msk.f32.gmra.mxu0 %vm729_vm1, %v5981_v4 }
 0xe58   : > { %v5536_v15 = vpop.f32.mrf.mxu0 }
 0xe5c   : > { %8510 = vmatmul.msk.f32.gmra.mxu2 %vm729_vm1, %v5984_v24 }
 0xe5d   : > { %8556 = vmatmul.msk.f32.gmra.mxu0 %vm729_vm1, %v5982_v18 }
 0xe5e   : > { %v5423_v6 = vpop.f32.mrf.mxu2 }
 0xe5f   : > { %v5537_v32 = vadd.f32 %v5536_v15, %v5423_v6 }
 0xe61   : > { %8409 = vmatmul.msk.f32.gmra.mxu3 %vm729_vm1, %v5537_v32 }
 0xe64   : > { %8511 = vmatmul.msk.f32.gmra.mxu2 %vm729_vm1, %v5985_v31 }
 0xe65   : > { %8557 = vmatmul.msk.f32.gmra.mxu0 %vm729_vm1, %v5983_v26  ;;  %v5777_v26 = vld [vmem:[#allocation2 + $0xd8] sm:$0xff] }
 0xe67   : > { %v6371_v16 = vpop.f32.mrf.mxu2 }
 0xe68   : > { %v14584_v48 = vadd.f32 %v6371_v16, %v6034_v63 }
 0xe6c   : > { %8512 = vmatmul.msk.f32.gmra.mxu2 %vm729_vm1, %v5986_v29 }
 0xe6d   : > { %8558 = vmatmul.msk.f32.gmra.mxu0 %vm729_vm1, %v5984_v24  ;;  %v15878_v24 = vld [vmem:[#allocation34_spill] sm:$0xff] }
 0xe6e   : > { %v5991_v15 = vadd.f32 %v14458_v47, %v15878_v24  ;;  %v8932_v9 = vpack.i.bf16 %v15872_v5, %v15878_v24  ;;  %v5994_v5 = vadd.f32 %v14458_v47, %v15876_v51  ;;  %v8452_v51 = vld [vmem:[%s15552_s5 + $0x328] sm:$0xff] }
 0xe6f   : > { %v6374_v25 = vpop.f32.mrf.mxu2 }
 0xe70   : > { %v14597_v28 = vadd.f32 %v6374_v25, %v6036_v20 }
 0xe72   : > { %v6484_v55 = vpop.f32.mrf.mxu0 }
 0xe73   : > { %v14586_v21 = vadd.f32 %v6484_v55, %v6035_v57  ;;  %v5993_v55 = vadd.f32 %v14458_v47, %v14175_v54 }
 0xe74   : > { %8513 = vmatmul.msk.f32.gmra.mxu2 %vm729_vm1, %v5987_v36 }
 0xe75   : > { %v6580_v14 = vmax.f32 %v14584_v48, %v14586_v21  ;;  %8559 = vmatmul.msk.f32.gmra.mxu0 %vm729_vm1, %v5985_v31 }
 0xe77   : > { %6581 = vmax.xlane.f32.xlu0 %v6580_v14  ;;  %v6377_v60 = vpop.f32.mrf.mxu2  ;;  %v8450_v14 = vld [vmem:[%s15552_s5 + $0x318] sm:$0xff] }
 0xe78   : > { %v14611_v41 = vadd.f32 %v6377_v60, %v6038_v39  ;;  %v6041_v20 = vunpack.c.h.bf16 %v8450_v14  ;;  %v6040_v54 = vunpack.c.l.bf16 %v8450_v14  ;;  %v6044_v39 = vunpack.c.l.bf16 %v8452_v51 }
 0xe79   : > { %v5726_v56 = vpop.f32.mrf.mxu3 }
 0xe7a   : > { %v5806_v30 = vadd.f32 %v5774_v34, %v5726_v56  ;;  %v6487_v42 = vpop.f32.mrf.mxu0  ;;  %v5995_v34 = vadd.f32 %v14458_v47, %v14199_v62 }
 0xe7b   : > { %v14599_v61 = vadd.f32 %v6487_v42, %v6037_v8  ;;  %v6045_v42 = vunpack.c.h.bf16 %v8452_v51 }
 0xe7c   : > { %5838 = vst.msk [vmem:[#allocation2 + $0xc0] sm:$0xff] %vm291_vm0, %v5806_v30  ;;  %8514 = vmatmul.msk.f32.gmra.mxu2 %vm729_vm1, %v5988_v10 }
 0xe7d   : > { %v6583_v0 = vmax.f32 %v14597_v28, %v14599_v61  ;;  %8560 = vmatmul.msk.f32.gmra.mxu0 %vm729_vm1, %v5986_v29  ;;  %v5778_v29 = vld [vmem:[#allocation2 + $0xe0] sm:$0xff] }
 0xe7f   : > { %6584 = vmax.xlane.f32.xlu2 %v6583_v0  ;;  %v6380_v32 = vpop.f32.mrf.mxu2  ;;  %v8451_v0 = vld [vmem:[%s15552_s5 + $0x320] sm:$0xff] }
 0xe80   : > { %v14658_v56 = vadd.f32 %v6380_v32, %v6040_v54  ;;  %v6043_v62 = vunpack.c.h.bf16 %v8451_v0  ;;  %v6042_v60 = vunpack.c.l.bf16 %v8451_v0 }
 0xe81   : > { %v5729_v37 = vpop.f32.mrf.mxu3 }
 0xe82   : > { %v5807_v23 = vadd.f32 %v5775_v27, %v5729_v37  ;;  %v6490_v40 = vpop.f32.mrf.mxu0  ;;  %v5996_v27 = vadd.f32 %v14458_v47, %v14212_v22 }
 0xe83   : > { %v14613_v3 = vadd.f32 %v6490_v40, %v6039_v59 }
 0xe84   : > { %5839 = vst.msk [vmem:[#allocation2 + $0xc8] sm:$0xff] %vm291_vm0, %v5807_v23  ;;  %8515 = vmatmul.msk.f32.gmra.mxu2 %vm729_vm1, %v5989_v33  ;;  %v8454_v23 = vld [vmem:[%s15552_s5 + $0x338] sm:$0xff] }
 0xe85   : > { %v6586_v12 = vmax.f32 %v14611_v41, %v14613_v3  ;;  %8561 = vmatmul.msk.f32.gmra.mxu0 %vm729_vm1, %v5987_v36  ;;  %v5779_v36 = vld [vmem:[#allocation2 + $0xe8] sm:$0xff]  ;;  %v6048_v22 = vunpack.c.l.bf16 %v8454_v23 }
 0xe87   : > { %6587 = vmax.xlane.f32.xlu1 %v6586_v12  ;;  %v6383_v63 = vpop.f32.mrf.mxu2  ;;  %v6049_v12 = vunpack.c.h.bf16 %v8454_v23  ;;  %v8456_v23 = vld [vmem:[%s15552_s5 + $0x348] sm:$0xff] }
 0xe89   : > { %v5732_v4 = vpop.f32.mrf.mxu3 }
 0xe8a   : > { %v5808_v7 = vadd.f32 %v5776_v50, %v5732_v4  ;;  %v6493_v6 = vpop.f32.mrf.mxu0  ;;  %v8453_v50 = vld [vmem:[%s15552_s5 + $0x330] sm:$0xff] }
 0xe8b   : > { %8938 = vrot.lane.b32.xlu0 %v8937_v45, %s9823_s13  ;;  %v14656_v8 = vadd.f32 %v6493_v6, %v6041_v20  ;;  %v14685_v45 = vadd.f32 %v6383_v63, %v6042_v60  ;;  %v6046_v24 = vunpack.c.l.bf16 %v8453_v50  ;;  %v6000_v63 = vadd.f32 %v14458_v47, %v14245_v38 }
 0xe8c   : > { %5840 = vst.msk [vmem:[#allocation2 + $0xd0] sm:$0xff] %vm291_vm0, %v5808_v7  ;;  %8516 = vmatmul.msk.f32.gmra.mxu2 %vm729_vm1, %v5990_v46 }
 0xe8d   : > { %8562 = vmatmul.msk.f32.gmra.mxu0 %vm729_vm1, %v5988_v10  ;;  %v6589_v30 = vmax.f32 %v14658_v56, %v14656_v8 }
 0xe8f   : > { %v6386_v25 = vpop.f32.mrf.mxu2 }
 0xe90   : > { %v14674_v37 = vadd.f32 %v6386_v25, %v6044_v39 }
 0xe91   : > { %v5735_v18 = vpop.f32.mrf.mxu3 }
 0xe92   : > { %v5809_v49 = vadd.f32 %v5777_v26, %v5735_v18  ;;  %v6496_v1 = vpop.f32.mrf.mxu0  ;;  %v6047_v18 = vunpack.c.h.bf16 %v8453_v50 }
 0xe94   : > { %5841 = vst.msk [vmem:[#allocation2 + $0xd8] sm:$0xff] %vm291_vm0, %v5809_v49  ;;  %8517 = vmatmul.msk.f32.gmra.mxu2 %vm729_vm1, %v5991_v15  ;;  %v5997_v49 = vadd.f32 %v14458_v47, %v14217_v2 }
 0xe95   : > { %8563 = vmatmul.msk.f32.gmra.mxu0 %vm729_vm1, %v5989_v33  ;;  %v14678_v33 = vadd.f32 %v6496_v1, %v6043_v62  ;;  %v5999_v1 = vadd.f32 %v14458_v47, %v14238_v17 }
 0xe97   : > { %8943 = vrot.lane.b32.xlu2 %v8942_v35, %s9823_s13  ;;  %v6389_v43 = vpop.f32.mrf.mxu2 }
 0xe98   : > { %v14704_v32 = vadd.f32 %v6389_v43, %v6046_v24 }
 0xe99   : > { %v5738_v31 = vpop.f32.mrf.mxu3 }
 0xe9a   : > { %v5810_v16 = vadd.f32 %v5778_v29, %v5738_v31  ;;  %v6499_v19 = vpop.f32.mrf.mxu0  ;;  %v15879_v29 = vld [vmem:[#allocation36_spill] sm:$0xff] }
 0xe9b   : > { %v14672_v59 = vadd.f32 %v6499_v19, %v6045_v42 }
 0xe9c   : > { %5842 = vst.msk [vmem:[#allocation2 + $0xe0] sm:$0xff] %vm291_vm0, %v5810_v16  ;;  %8518 = vmatmul.msk.f32.gmra.mxu2 %vm729_vm1, %v5992_v52  ;;  %v5780_v16 = vld [vmem:[#allocation2 + $0xf0] sm:$0xff] }
 0xe9d   : > { %8564 = vmatmul.msk.f32.gmra.mxu0 %vm729_vm1, %v5990_v46  ;;  %v6595_v40 = vmax.f32 %v14674_v37, %v14672_v59  ;;  %v6592_v46 = vmax.f32 %v14685_v45, %v14678_v33 }
 0xe9f   : > { %v6392_v7 = vpop.f32.mrf.mxu2 }
 0xea0   : > { %8933 = vrot.lane.b32.xlu1 %v8932_v9, %s9823_s13 }
 0xea1   : > { %v5741_v57 = vpop.f32.mrf.mxu3 }
 0xea2   : > { %v5811_v58 = vadd.f32 %v5779_v36, %v5741_v57  ;;  %v6502_v10 = vpop.f32.mrf.mxu0  ;;  %v8952_v57 = vpack.i.bf16 %v14086_v53, %v14094_v11 }
 0xea3   : > { %v14700_v6 = vadd.f32 %v6502_v10, %v6047_v18  ;;  %v8459_v18 = vld [vmem:[%s15552_s5 + $0x360] sm:$0xff] }
 0xea4   : > { %5843 = vst.msk [vmem:[#allocation2 + $0xe8] sm:$0xff] %vm291_vm0, %v5811_v58  ;;  %8519 = vmatmul.msk.f32.gmra.mxu2 %vm729_vm1, %v5993_v55  ;;  %v5781_v58 = vld [vmem:[#allocation2 + $0xf8] sm:$0xff] }
 0xea5   : > { %8565 = vmatmul.msk.f32.gmra.mxu0 %vm729_vm1, %v5991_v15  ;;  %v14696_v15 = vadd.f32 %v6392_v7, %v6048_v22  ;;  %v6598_v31 = vmax.f32 %v14704_v32, %v14700_v6 }
 0xeaa   : > { %v6505_v4 = vpop.f32.mrf.mxu0 }
 0xeab   : > { %v14694_v26 = vadd.f32 %v6505_v4, %v6049_v12  ;;  %v6053_v12 = vunpack.c.h.bf16 %v8456_v23 }
 0xeac   : > { %8520 = vmatmul.msk.f32.gmra.mxu2 %vm729_vm1, %v5994_v5 }
 0xead   : > { %8566 = vmatmul.msk.f32.gmra.mxu0 %vm729_vm1, %v5992_v52  ;;  %v6601_v35 = vmax.f32 %v14696_v15, %v14694_v26  ;;  %v5998_v52 = vadd.f32 %v14458_v47, %v15879_v29  ;;  %v6058_v29 = vunpack.c.l.bf16 %v8459_v18 }
 0xeb2   : > { %v14725_v36 = vpop.f32.mrf.mxu0 }
 0xeb4   : > { %8521 = vmatmul.msk.f32.gmra.mxu2 %vm729_vm1, %v5995_v34 }
 0xeb5   : > { %8567 = vmatmul.msk.f32.gmra.mxu0 %vm729_vm1, %v5993_v55  ;;  %6590 = vmax.xlane.f32.xlu0 %v6589_v30  ;;  %v14728_v55 = vpop.f32.mrf.mxu2 }
 0xeba   : > { %v6511_v38 = vpop.f32.mrf.mxu0 }
 0xebb   : > { %v14762_v50 = vadd.f32 %v6511_v38, %v6053_v12 }
 0xebc   : > { %8522 = vmatmul.msk.f32.gmra.mxu2 %vm729_vm1, %v5996_v27 }
 0xebd   : > { %8568 = vmatmul.msk.f32.gmra.mxu0 %vm729_vm1, %v5994_v5  ;;  %6596 = vmax.xlane.f32.xlu0 %v6595_v40  ;;  %v6398_v53 = vpop.f32.mrf.mxu2 }
 0xec0   : > { %6593 = vmax.xlane.f32.xlu2 %v6592_v46 }
 0xec2   : > { %v14737_v51 = vpop.f32.mrf.mxu0 }
 0xec4   : > { %8523 = vmatmul.msk.f32.gmra.mxu2 %vm729_vm1, %v5997_v49 }
 0xec5   : > { %8569 = vmatmul.msk.f32.gmra.mxu0 %vm729_vm1, %v5995_v34  ;;  %6602 = vmax.xlane.f32.xlu0 %v6601_v35 }
 0xec8   : > { %6599 = vmax.xlane.f32.xlu2 %v6598_v31 }
 0xeca   : > { %v14756_v40 = vpop.f32.mrf.mxu0 }
 0xecc   : > { %8524 = vmatmul.msk.f32.gmra.mxu2 %vm729_vm1, %v5998_v52 }
 0xecd   : > { %8570 = vmatmul.msk.f32.gmra.mxu0 %vm729_vm1, %v5996_v27  ;;  %v5744_v2 = vpop.f32.mrf.mxu3 }
 0xece   : > { %v5812_v9 = vadd.f32 %v5780_v16, %v5744_v2  ;;  %v8947_v2 = vpack.i.bf16 %v14102_v13, %v14116_v44 }
 0xed0   : > { %5844 = vst.msk [vmem:[#allocation2 + $0xf0] sm:$0xff] %vm291_vm0, %v5812_v9 }
 0xed2   : > { %v6520_v31 = vpop.f32.mrf.mxu0 }
 0xed4   : > { %8525 = vmatmul.msk.f32.gmra.mxu2 %vm729_vm1, %v5999_v1 }
 0xed5   : > { %8571 = vmatmul.msk.f32.gmra.mxu0 %vm729_vm1, %v5997_v49  ;;  %v6059_v49 = vunpack.c.h.bf16 %v8459_v18 }
 0xed7   : > { %v14779_v16 = vadd.f32 %v6520_v31, %v6059_v49 }
 0xedc   : > { %8526 = vmatmul.msk.f32.gmra.mxu2 %vm729_vm1, %v6000_v63 }
 0xedd   : > { %8572 = vmatmul.msk.f32.gmra.mxu0 %vm729_vm1, %v5998_v52 }
 0xee0   : > { %8953 = vrot.lane.b32.xlu2 %v8952_v57, %s9823_s13 }
 0xee4   : > { %v5747_v17 = vpop.f32.mrf.mxu3 }
 0xee5   : > { %v5813_v19 = vadd.f32 %v5781_v58, %v5747_v17  ;;  %8573 = vmatmul.msk.f32.gmra.mxu0 %vm729_vm1, %v5999_v1 }
 0xee7   : > { %5845 = vst.msk [vmem:[#allocation2 + $0xf8] sm:$0xff] %vm291_vm0, %v5813_v19 }
 0xeea   : > { %v6582_v47 = vpop.xlane.xlu0 %6581 }
 0xeeb   : > { %v6676_v5 = vsub.f32 %v14584_v48, %v6582_v47  ;;  %v6677_v14 = vsub.f32 %v14586_v21, %v6582_v47  ;;  %v14743_v21 = vpop.f32.mrf.mxu2 }
 0xeed   : > { %v6740_v11 = vmul.f32 1.442695, %v6676_v5  ;;  %v6742_v25 = vmul.f32 1.442695, %v6677_v14  ;;  %8574 = vmatmul.msk.f32.gmra.mxu0 %vm729_vm1, %v6000_v63 }
 0xeef   : > { %9538 = vpow2.f32 %v6740_v11 }
 0xef0   : > { %9540 = vpow2.f32 %v6742_v25 }
 0xef2   : > { %v6585_v20 = vpop.xlane.xlu2 %6584 }
 0xef3   : > { %v6678_v54 = vsub.f32 %v14597_v28, %v6585_v20  ;;  %v6679_v34 = vsub.f32 %v14599_v61, %v6585_v20  ;;  %v8455_v20 = vld [vmem:[%s15552_s5 + $0x340] sm:$0xff] }
 0xef5   : > { %v14739_v10 = vpop.eup %9538  ;;  %v6744_v30 = vmul.f32 1.442695, %v6678_v54  ;;  %v6746_v48 = vmul.f32 1.442695, %v6679_v34  ;;  %v6051_v54 = vunpack.c.h.bf16 %v8455_v20  ;;  %v6050_v34 = vunpack.c.l.bf16 %v8455_v20 }
 0xef6   : > { %v14741_v42 = vpop.eup %9540 }
 0xef7   : > { %9542 = vpow2.f32 %v6744_v30  ;;  %v6868_v43 = vadd.f32 %v14741_v42, %v14739_v10 }
 0xef8   : > { %9544 = vpow2.f32 %v6746_v48  ;;  %v14792_v48 = vadd.f32 %v14725_v36, %v6051_v54 }
 0xef9   : > { %6869 = vadd.xlane.f32.xlu0 %v6868_v43  ;;  %v14794_v43 = vpop.f32.mrf.mxu0 }
 0xefa   : > { %v6588_v0 = vpop.xlane.xlu1 %6587  ;;  %v8944_v19 = vpop.permute.xlu2 %8943 }
 0xefb   : > { %v6680_v28 = vsub.f32 %v14611_v41, %v6588_v0  ;;  %v6681_v61 = vsub.f32 %v14613_v3, %v6588_v0  ;;  %v14760_v41 = vpop.f32.mrf.mxu2  ;;  %v6052_v3 = vunpack.c.l.bf16 %v8456_v23  ;;  %v8946_v13 = vunpack.i.h.bf16 %v8944_v19 }
 0xefc   : > { %v8945_v44 = vunpack.i.l.bf16 %v8944_v19 }
 0xefd   : > { %v14749_v39 = vpop.eup %9542  ;;  %v6748_v62 = vmul.f32 1.442695, %v6680_v28  ;;  %v6750_v60 = vmul.f32 1.442695, %v6681_v61  ;;  %v14766_v46 = vadd.f32 %v6398_v53, %v6052_v3  ;;  %v8939_v63 = vpop.permute.xlu0 %8938  ;;  %v8457_v61 = vld [vmem:[%s15552_s5 + $0x350] sm:$0xff] }
 0xefe   : > { %v14751_v27 = vpop.eup %9544  ;;  %v8941_v38 = vunpack.i.h.bf16 %v8939_v63  ;;  %v8940_v47 = vunpack.i.l.bf16 %v8939_v63  ;;  %v8458_v63 = vld [vmem:[%s15552_s5 + $0x358] sm:$0xff] }
 0xeff   : > { %9546 = vpow2.f32 %v6748_v62  ;;  %v6871_v4 = vadd.f32 %v14751_v27, %v14749_v39  ;;  %v6607_v24 = vmax.f32 %v14766_v46, %v14762_v50 }
 0xf00   : > { %9548 = vpow2.f32 %v6750_v60 }
 0xf01   : > { %6872 = vadd.xlane.f32.xlu1 %v6871_v4 }
 0xf03   : > { %v6407_v52 = vpop.f32.mrf.mxu2 }
 0xf04   : > { %v14781_v9 = vadd.f32 %v6407_v52, %v6058_v29 }
 0xf05   : > { %v14764_v22 = vpop.eup %9546 }
 0xf06   : > { %v14768_v7 = vpop.eup %9548  ;;  %v6616_v1 = vmax.f32 %v14781_v9, %v14779_v16 }
 0xf07   : > { %v6874_v35 = vadd.f32 %v14768_v7, %v14764_v22 }
 0xf09   : > { %6608 = vmax.xlane.f32.xlu1 %v6607_v24  ;;  %6875 = vadd.xlane.f32.xlu2 %v6874_v35  ;;  %v6054_v24 = vunpack.c.l.bf16 %v8457_v61 }
 0xf0b   : > { %v14806_v62 = vpop.f32.mrf.mxu2  ;;  %v14822_v29 = vadd.f32 %v14743_v21, %v6054_v24 }
 0xf0d   : > { %8948 = vrot.lane.b32.xlu0 %v8947_v2, %s9823_s13 }
 0xf11   : > { %6617 = vmax.xlane.f32.xlu2 %v6616_v1 }
 0xf12   : > { %v8934_v57 = vpop.permute.xlu1 %8933 }
 0xf13   : > { %v8936_v17 = vunpack.i.h.bf16 %v8934_v57  ;;  %v8935_v58 = vunpack.i.l.bf16 %v8934_v57  ;;  %v6526_v57 = vpop.f32.mrf.mxu0 }
 0xf15   : > { %7169 = vmatpush.msrb.mxu3 %v8936_v17  ;;  %7278 = vmatpush.msrb.mxu1 %v8935_v58  ;;  %v6413_v58 = vpop.f32.mrf.mxu2 }
 0xf17   : > { %7170 = vmatpush.msrb.mxu3 %v8941_v38  ;;  %7279 = vmatpush.msrb.mxu1 %v8940_v47  ;;  %v6056_v38 = vunpack.c.l.bf16 %v8458_v63 }
 0xf19   : > { %7171 = vmatpush.msrb.mxu3 %v8946_v13  ;;  %7280 = vmatpush.msrb.mxu1 %v8945_v44 }
 0xf28   : > { %v6591_v5 = vpop.xlane.xlu0 %6590 }
 0xf29   : > { %v6682_v14 = vsub.f32 %v14658_v56, %v6591_v5  ;;  %v6683_v53 = vsub.f32 %v14656_v8, %v6591_v5  ;;  %v14799_v8 = vadd.f32 %v14728_v55, %v6050_v34  ;;  %v6055_v55 = vunpack.c.h.bf16 %v8457_v61  ;;  %v6529_v34 = vpop.f32.mrf.mxu0  ;;  %v6416_v61 = vpop.f32.mrf.mxu2 }
 0xf2b   : > { %v6752_v11 = vmul.f32 1.442695, %v6682_v14  ;;  %v6754_v25 = vmul.f32 1.442695, %v6683_v53  ;;  %v6604_v12 = vmax.f32 %v14799_v8, %v14792_v48  ;;  %v14845_v14 = vadd.f32 %v14760_v41, %v6056_v38  ;;  %v8460_v41 = vld [vmem:[%s15552_s5 + $0x368] sm:$0xff] }
 0xf2d   : > { %9550 = vpow2.f32 %v6752_v11  ;;  %v8462_v11 = vld [vmem:[%s15552_s5 + $0x378] sm:$0xff] }
 0xf2e   : > { %9552 = vpow2.f32 %v6754_v25  ;;  %v6065_v20 = vunpack.c.h.bf16 %v8462_v11 }
 0xf30   : > { %v6597_v30 = vpop.xlane.xlu0 %6596 }
 0xf31   : > { %v6686_v60 = vsub.f32 %v14674_v37, %v6597_v30  ;;  %v6687_v49 = vsub.f32 %v14672_v59, %v6597_v30  ;;  %v6064_v30 = vunpack.c.l.bf16 %v8462_v11 }
 0xf33   : > { %v14796_v0 = vpop.eup %9550  ;;  %v6594_v56 = vpop.xlane.xlu2 %6593  ;;  %v6760_v35 = vmul.f32 1.442695, %v6686_v60  ;;  %v6762_v52 = vmul.f32 1.442695, %v6687_v49 }
 0xf34   : > { %v14801_v28 = vpop.eup %9552  ;;  %v6684_v36 = vsub.f32 %v14685_v45, %v6594_v56  ;;  %v6685_v23 = vsub.f32 %v14678_v33, %v6594_v56  ;;  %v14817_v45 = vadd.f32 %v14737_v51, %v6055_v55  ;;  %v6061_v56 = vunpack.c.h.bf16 %v8460_v41 }
 0xf35   : > { %v6877_v4 = vadd.f32 %v14801_v28, %v14796_v0  ;;  %v6060_v55 = vunpack.c.l.bf16 %v8460_v41 }
 0xf36   : > { %v6756_v3 = vmul.f32 1.442695, %v6684_v36  ;;  %v6758_v18 = vmul.f32 1.442695, %v6685_v23  ;;  %v14865_v23 = vadd.f32 %v6529_v34, %v6065_v20 }
 0xf37   : > { %6605 = vmax.xlane.f32.xlu0 %v6604_v12  ;;  %6878 = vadd.xlane.f32.xlu1 %v6877_v4  ;;  %v14869_v4 = vadd.f32 %v6416_v61, %v6064_v30 }
 0xf38   : > { %9554 = vpow2.f32 %v6756_v3  ;;  %v6603_v37 = vpop.xlane.xlu0 %6602  ;;  %v8461_v3 = vld [vmem:[%s15552_s5 + $0x370] sm:$0xff] }
 0xf39   : > { %9556 = vpow2.f32 %v6758_v18  ;;  %v6690_v33 = vsub.f32 %v14696_v15, %v6603_v37  ;;  %v6691_v31 = vsub.f32 %v14694_v26, %v6603_v37  ;;  %v6610_v26 = vmax.f32 %v14822_v29, %v14817_v45 }
 0xf3a   : > { %9558 = vpow2.f32 %v6760_v35  ;;  %v6057_v15 = vunpack.c.h.bf16 %v8458_v63  ;;  %v14875_v18 = vadd.f32 %v14794_v43, %v6061_v56  ;;  %v6063_v24 = vunpack.c.h.bf16 %v8461_v3  ;;  %v14894_v63 = vpop.f32.mrf.mxu2 }
 0xf3b   : > { %v6768_v2 = vmul.f32 1.442695, %v6690_v33  ;;  %v6770_v1 = vmul.f32 1.442695, %v6691_v31  ;;  %v6600_v59 = vpop.xlane.xlu2 %6599  ;;  %v6625_v49 = vmax.f32 %v14869_v4, %v14865_v23  ;;  %v14882_v37 = vadd.f32 %v14806_v62, %v6060_v55 }
 0xf3c   : > { %v6688_v51 = vsub.f32 %v14704_v32, %v6600_v59  ;;  %v6689_v17 = vsub.f32 %v14700_v6, %v6600_v59  ;;  %v14838_v6 = vadd.f32 %v14756_v40, %v6057_v15  ;;  %v6062_v33 = vunpack.c.l.bf16 %v8461_v3  ;;  %v14892_v59 = vpop.f32.mrf.mxu0 }
 0xf3d   : > { %9560 = vpow2.f32 %v6768_v2  ;;  %v6619_v31 = vmax.f32 %v14882_v37, %v14875_v18 }
 0xf3e   : > { %v14831_v21 = vpop.eup %9554  ;;  %9562 = vpow2.f32 %v6770_v1  ;;  %v6764_v47 = vmul.f32 1.442695, %v6688_v51  ;;  %v6766_v13 = vmul.f32 1.442695, %v6689_v17  ;;  %v6613_v40 = vmax.f32 %v14845_v14, %v14838_v6 }
 0xf3f   : > { %v14833_v19 = vpop.eup %9556  ;;  %9564 = vpow2.f32 %v6762_v52  ;;  %6611 = vmax.xlane.f32.xlu1 %v6610_v26  ;;  %v14886_v52 = vadd.f32 %v6526_v57, %v6063_v24  ;;  %v14888_v43 = vadd.f32 %v6413_v58, %v6062_v33  ;;  %v8464_v24 = vld [vmem:[%s15552_s5 + $0x388] sm:$0xff] }
 0xf40   : > { %v6880_v32 = vadd.f32 %v14833_v19, %v14831_v21  ;;  %v14840_v44 = vpop.eup %9558  ;;  %9566 = vpow2.f32 %v6764_v47 }
 0xf41   : > { %9568 = vpow2.f32 %v6766_v13  ;;  %v6622_v2 = vmax.f32 %v14888_v43, %v14886_v52 }
 0xf42   : > { %6881 = vadd.xlane.f32.xlu0 %v6880_v32  ;;  %v6422_v11 = vpop.f32.mrf.mxu2 }
 0xf43   : > { %v14842_v5 = vpop.eup %9560  ;;  %v8954_v51 = vpop.permute.xlu2 %8953 }
 0xf44   : > { %v14847_v53 = vpop.eup %9562  ;;  %v6535_v15 = vpop.f32.mrf.mxu0  ;;  %v8955_v30 = vunpack.i.l.bf16 %v8954_v51 }
 0xf45   : > { %v14852_v25 = vpop.eup %9564  ;;  %v6889_v54 = vadd.f32 %v14847_v53, %v14842_v5 }
 0xf46   : > { %v6883_v60 = vadd.f32 %v14852_v25, %v14840_v44  ;;  %v14863_v36 = vpop.eup %9566 }
 0xf47   : > { %6614 = vmax.xlane.f32.xlu1 %v6613_v40  ;;  %6890 = vadd.xlane.f32.xlu2 %v6889_v54  ;;  %v14867_v12 = vpop.eup %9568 }
 0xf48   : > { %v6886_v35 = vadd.f32 %v14867_v12, %v14863_v36 }
 0xf4a   : > { %6884 = vadd.xlane.f32.xlu0 %v6883_v60 }
 0xf4f   : > { %6887 = vadd.xlane.f32.xlu1 %v6886_v35  ;;  %6626 = vmax.xlane.f32.xlu2 %v6625_v49  ;;  %v14912_v49 = vpop.f32.mrf.mxu2  ;;  %v6069_v35 = vunpack.c.h.bf16 %v8464_v24 }
 0xf52   : > { %6620 = vmax.xlane.f32.xlu0 %v6619_v31  ;;  %v6068_v31 = vunpack.c.l.bf16 %v8464_v24 }
 0xf57   : > { %6623 = vmax.xlane.f32.xlu1 %v6622_v2  ;;  %v14917_v2 = vadd.f32 %v6535_v15, %v6069_v35 }
 0xf6c   : > { %v6870_v1 = vpop.xlane.xlu0 %6869 }
 0xf6d   : > { %9570 = vrcp.f32 %v6870_v1  ;;  %v14919_v1 = vadd.f32 %v6422_v11, %v6068_v31 }
 0xf73   : > { %v9571_v62 = vpop.eup %9570 }
 0xf74   : > { %v6996_v17 = vmul.f32 %v9571_v62, %v14739_v10  ;;  %v6873_v26 = vpop.xlane.xlu1 %6872  ;;  %v6997_v60 = vmul.f32 %v9571_v62, %v14741_v42 }
 0xf75   : > { %9572 = vrcp.f32 %v6873_v26 }
 0xf76   : > { %7172 = vmatmul.f32.vlgmr.msrb.gmra.mxu3 %v6996_v17  ;;  %v14926_v17 = vpop.f32.mrf.mxu2 }
 0xf7b   : > { %v9573_v57 = vpop.eup %9572 }
 0xf7c   : > { %v6609_v58 = vpop.xlane.xlu1 %6608  ;;  %v6876_v38 = vpop.xlane.xlu2 %6875  ;;  %v6998_v47 = vmul.f32 %v9573_v57, %v14749_v39  ;;  %v6999_v62 = vmul.f32 %v9573_v57, %v14751_v27  ;;  %v8467_v27 = vld [vmem:[%s15552_s5 + $0x3a0] sm:$0xff] }
 0xf7d   : > { %v6694_v13 = vsub.f32 %v14766_v46, %v6609_v58  ;;  %v6695_v32 = vsub.f32 %v14762_v50, %v6609_v58  ;;  %9574 = vrcp.f32 %v6876_v38  ;;  %v14901_v46 = vpop.f32.mrf.mxu0  ;;  %v8956_v50 = vunpack.i.h.bf16 %v8954_v51 }
 0xf7e   : > { %7175 = vmatmul.f32.gmra.mxu3 %v6998_v47  ;;  %v6075_v57 = vunpack.c.h.bf16 %v8467_v27 }
 0xf7f   : > { %v6776_v40 = vmul.f32 1.442695, %v6694_v13  ;;  %v6778_v20 = vmul.f32 1.442695, %v6695_v32  ;;  %v8949_v54 = vpop.permute.xlu0 %8948  ;;  %v6074_v13 = vunpack.c.l.bf16 %v8467_v27  ;;  %v6431_v32 = vpop.f32.mrf.mxu2 }
 0xf80   : > { %v8950_v10 = vunpack.i.l.bf16 %v8949_v54  ;;  %v8951_v34 = vunpack.i.h.bf16 %v8949_v54 }
 0xf81   : > { %9576 = vpow2.f32 %v6776_v40  ;;  %v14940_v40 = vadd.f32 %v6431_v32, %v6074_v13 }
 0xf82   : > { %9578 = vpow2.f32 %v6778_v20  ;;  %7281 = vmatpush.msrb.mxu1 %v8950_v10 }
 0xf83   : > { %v9575_v41 = vpop.eup %9574 }
 0xf84   : > { %7282 = vmatpush.msrb.mxu1 %v8951_v34  ;;  %v6618_v56 = vpop.xlane.xlu2 %6617  ;;  %v7000_v39 = vmul.f32 %v9575_v41, %v14764_v22  ;;  %v7001_v15 = vmul.f32 %v9575_v41, %v14768_v7 }
 0xf85   : > { %v6700_v55 = vsub.f32 %v14781_v9, %v6618_v56  ;;  %v6701_v22 = vsub.f32 %v14779_v16, %v6618_v56  ;;  %v14922_v51 = vpop.f32.mrf.mxu0  ;;  %v6631_v16 = vmax.f32 %v14919_v1, %v14917_v2 }
 0xf86   : > { %7283 = vmatpush.msrb.mxu1 %v8955_v30  ;;  %7178 = vmatmul.f32.gmra.mxu3 %v7000_v39 }
 0xf87   : > { %v14903_v61 = vpop.eup %9576  ;;  %v6788_v42 = vmul.f32 1.442695, %v6700_v55  ;;  %v6790_v9 = vmul.f32 1.442695, %v6701_v22 }
 0xf88   : > { %v14907_v3 = vpop.eup %9578  ;;  %7284 = vmatpush.msrb.mxu1 %v8956_v50 }
 0xf89   : > { %7285 = vmatmul.f32.vlgmr.msrb.gmra.mxu1 %v6997_v60  ;;  %v6895_v33 = vadd.f32 %v14907_v3, %v14903_v61  ;;  %9580 = vpow2.f32 %v6788_v42 }
 0xf8a   : > { %9582 = vpow2.f32 %v6790_v9 }
 0xf8b   : > { %6896 = vadd.xlane.f32.xlu1 %v6895_v33 }
 0xf8d   : > { %v6544_v47 = vpop.f32.mrf.mxu0 }
 0xf8e   : > { %v14938_v11 = vadd.f32 %v6544_v47, %v6075_v57  ;;  %v8465_v47 = vld [vmem:[%s15552_s5 + $0x390] sm:$0xff] }
 0xf8f   : > { %v14928_v26 = vpop.eup %9580 }
 0xf90   : > { %v14930_v58 = vpop.eup %9582  ;;  %v6640_v7 = vmax.f32 %v14940_v40, %v14938_v11 }
 0xf91   : > { %7288 = vmatmul.f32.gmra.mxu1 %v6999_v62  ;;  %v6904_v38 = vadd.f32 %v14930_v58, %v14928_v26 }
 0xf93   : > { %6632 = vmax.xlane.f32.xlu1 %v6631_v16 }
 0xf95   : > { %v14969_v57 = vpop.f32.mrf.mxu0 }
 0xf99   : > { %7291 = vmatmul.f32.gmra.mxu1 %v7001_v15 }
 0xf9b   : > { %6905 = vadd.xlane.f32.xlu1 %v6904_v38 }
 0xfa3   : > { %6641 = vmax.xlane.f32.xlu1 %v6640_v7 }
 0xfaa   : > { %v6879_v20 = vpop.xlane.xlu1 %6878  ;;  %v6606_v54 = vpop.xlane.xlu0 %6605 }
 0xfab   : > { %9584 = vrcp.f32 %v6879_v20  ;;  %v6692_v10 = vsub.f32 %v14799_v8, %v6606_v54  ;;  %v6693_v34 = vsub.f32 %v14792_v48, %v6606_v54  ;;  %v8463_v48 = vld [vmem:[%s15552_s5 + $0x380] sm:$0xff]  ;;  %v14980_v20 = vpop.f32.mrf.mxu2  ;;  %v6071_v54 = vunpack.c.h.bf16 %v8465_v47 }
 0xfad   : > { %v6772_v41 = vmul.f32 1.442695, %v6692_v10  ;;  %v6774_v30 = vmul.f32 1.442695, %v6693_v34  ;;  %v6070_v34 = vunpack.c.l.bf16 %v8465_v47 }
 0xfaf   : > { %9586 = vpow2.f32 %v6772_v41  ;;  %v14987_v41 = vadd.f32 %v14901_v46, %v6071_v54 }
 0xfb0   : > { %9588 = vpow2.f32 %v6774_v30 }
 0xfb1   : > { %v9585_v56 = vpop.eup %9584 }
 0xfb2   : > { %v6612_v39 = vpop.xlane.xlu1 %6611  ;;  %v7002_v50 = vmul.f32 %v9585_v56, %v14796_v0  ;;  %v7003_v60 = vmul.f32 %v9585_v56, %v14801_v28  ;;  %v6067_v0 = vunpack.c.h.bf16 %v8463_v48 }
 0xfb3   : > { %v6696_v55 = vsub.f32 %v14822_v29, %v6612_v39  ;;  %v6697_v24 = vsub.f32 %v14817_v45, %v6612_v39  ;;  %v6066_v45 = vunpack.c.l.bf16 %v8463_v48 }
 0xfb4   : > { %7181 = vmatmul.f32.gmra.mxu3 %v7002_v50  ;;  %7294 = vmatmul.f32.gmra.mxu1 %v7003_v60  ;;  %v14962_v9 = vadd.f32 %v14892_v59, %v6067_v0  ;;  %v14992_v50 = vadd.f32 %v14912_v49, %v6070_v34 }
 0xfb5   : > { %v14950_v22 = vpop.eup %9586  ;;  %v6780_v8 = vmul.f32 1.442695, %v6696_v55  ;;  %v6782_v35 = vmul.f32 1.442695, %v6697_v24  ;;  %v6882_v33 = vpop.xlane.xlu0 %6881  ;;  %v14967_v27 = vadd.f32 %v14894_v63, %v6066_v45  ;;  %v8466_v55 = vld [vmem:[%s15552_s5 + $0x398] sm:$0xff] }
 0xfb6   : > { %v14955_v31 = vpop.eup %9588  ;;  %9590 = vrcp.f32 %v6882_v33  ;;  %v6634_v0 = vmax.f32 %v14992_v50, %v14987_v41  ;;  %v6072_v45 = vunpack.c.l.bf16 %v8466_v55 }
 0xfb7   : > { %9592 = vpow2.f32 %v6780_v8  ;;  %v6892_v28 = vadd.f32 %v14955_v31, %v14950_v22  ;;  %v6628_v63 = vmax.f32 %v14967_v27, %v14962_v9 }
 0xfb8   : > { %9594 = vpow2.f32 %v6782_v35 }
 0xfb9   : > { %6893 = vadd.xlane.f32.xlu0 %v6892_v28  ;;  %v6073_v28 = vunpack.c.h.bf16 %v8466_v55 }
 0xfba   : > { %v6615_v29 = vpop.xlane.xlu1 %6614  ;;  %v14959_v42 = vpop.xlane.xlu2 %6890 }
 0xfbb   : > { %v6698_v62 = vsub.f32 %v14845_v14, %v6615_v29  ;;  %v6699_v16 = vsub.f32 %v14838_v6, %v6615_v29 }
 0xfbc   : > { %v9591_v15 = vpop.eup %9590 }
 0xfbd   : > { %v14971_v38 = vpop.eup %9592  ;;  %v6784_v13 = vmul.f32 1.442695, %v6698_v62  ;;  %v6786_v32 = vmul.f32 1.442695, %v6699_v16  ;;  %v6885_v59 = vpop.xlane.xlu0 %6884  ;;  %v7004_v7 = vmul.f32 %v9591_v15, %v14831_v21  ;;  %v7005_v14 = vmul.f32 %v9591_v15, %v14833_v19 }
 0xfbe   : > { %v14978_v6 = vpop.eup %9594  ;;  %9596 = vrcp.f32 %v6885_v59  ;;  %v15012_v16 = vadd.f32 %v14922_v51, %v6073_v28 }
 0xfbf   : > { %9598 = vpow2.f32 %v6784_v13  ;;  %7184 = vmatmul.f32.gmra.mxu3 %v7004_v7  ;;  %7297 = vmatmul.f32.gmra.mxu1 %v7005_v14  ;;  %v6898_v10 = vadd.f32 %v14978_v6, %v14971_v38  ;;  %v15017_v13 = vadd.f32 %v14926_v17, %v6072_v45 }
 0xfc0   : > { %9600 = vpow2.f32 %v6786_v32 }
 0xfc1   : > { %6899 = vadd.xlane.f32.xlu2 %v6898_v10  ;;  %6629 = vmax.xlane.f32.xlu0 %v6628_v63  ;;  %v8468_v10 = vld [vmem:[%s15552_s5 + $0x3a8] sm:$0xff] }
 0xfc2   : > { %v6888_v21 = vpop.xlane.xlu1 %6887  ;;  %v6627_v19 = vpop.xlane.xlu2 %6626  ;;  %v6076_v55 = vunpack.c.l.bf16 %v8468_v10 }
 0xfc3   : > { %v6706_v30 = vsub.f32 %v14869_v4, %v6627_v19  ;;  %v6707_v56 = vsub.f32 %v14865_v23, %v6627_v19  ;;  %9602 = vrcp.f32 %v6888_v21  ;;  %v15003_v23 = vpop.f32.mrf.mxu0  ;;  %v6077_v19 = vunpack.c.h.bf16 %v8468_v10 }
 0xfc4   : > { %v9597_v39 = vpop.eup %9596 }
 0xfc5   : > { %v14994_v60 = vpop.eup %9598  ;;  %v6800_v24 = vmul.f32 1.442695, %v6706_v30  ;;  %v6802_v48 = vmul.f32 1.442695, %v6707_v56  ;;  %v6621_v8 = vpop.xlane.xlu0 %6620  ;;  %v7006_v46 = vmul.f32 %v9597_v39, %v14840_v44  ;;  %v7007_v4 = vmul.f32 %v9597_v39, %v14852_v25 }
 0xfc6   : > { %v15001_v35 = vpop.eup %9600  ;;  %v6702_v49 = vsub.f32 %v14882_v37, %v6621_v8  ;;  %v6703_v33 = vsub.f32 %v14875_v18, %v6621_v8  ;;  %v6437_v25 = vpop.f32.mrf.mxu2 }
 0xfc7   : > { %9604 = vpow2.f32 %v6800_v24  ;;  %7187 = vmatmul.f32.gmra.mxu3 %v7006_v46  ;;  %7300 = vmatmul.f32.gmra.mxu1 %v7007_v4  ;;  %v6901_v44 = vadd.f32 %v15001_v35, %v14994_v60 }
 0xfc8   : > { %9606 = vpow2.f32 %v6802_v48  ;;  %v6792_v29 = vmul.f32 1.442695, %v6702_v49  ;;  %v6794_v62 = vmul.f32 1.442695, %v6703_v33  ;;  %v8469_v49 = vld [vmem:[%s15552_s5 + $0x3b0] sm:$0xff]  ;;  %v15056_v33 = vadd.f32 %v14969_v57, %v6077_v19 }
 0xfc9   : > { %6635 = vmax.xlane.f32.xlu2 %v6634_v0  ;;  %6902 = vadd.xlane.f32.xlu0 %v6901_v44  ;;  %v9603_v37 = vpop.eup %9602  ;;  %v6079_v0 = vunpack.c.h.bf16 %v8469_v49  ;;  %v6078_v44 = vunpack.c.l.bf16 %v8469_v49 }
 0xfca   : > { %9608 = vpow2.f32 %v6792_v29  ;;  %v6624_v18 = vpop.xlane.xlu1 %6623  ;;  %v7008_v14 = vmul.f32 %v9603_v37, %v14863_v36  ;;  %v7009_v63 = vmul.f32 %v9603_v37, %v14867_v12 }
 0xfcb   : > { %9610 = vpow2.f32 %v6794_v62  ;;  %v6704_v15 = vsub.f32 %v14888_v43, %v6624_v18  ;;  %v6705_v47 = vsub.f32 %v14886_v52, %v6624_v18  ;;  %v8470_v43 = vld [vmem:[%s15552_s5 + $0x3b8] sm:$0xff]  ;;  %v6637_v52 = vmax.f32 %v15017_v13, %v15012_v16  ;;  %v6553_v36 = vpop.f32.mrf.mxu0 }
 0xfcc   : > { %9612 = vrcp.f32 %v14959_v42  ;;  %v6081_v17 = vunpack.c.h.bf16 %v8470_v43  ;;  %v6080_v34 = vunpack.c.l.bf16 %v8470_v43  ;;  %v15068_v57 = vadd.f32 %v15003_v23, %v6079_v0 }
 0xfcd   : > { %v15020_v32 = vpop.eup %9604  ;;  %v6796_v59 = vmul.f32 1.442695, %v6704_v15  ;;  %v6798_v7 = vmul.f32 1.442695, %v6705_v47  ;;  %v15070_v29 = vadd.f32 %v6437_v25, %v6078_v44 }
 0xfce   : > { %v15024_v51 = vpop.eup %9606  ;;  %v6440_v30 = vpop.f32.mrf.mxu2  ;;  %v15042_v39 = vadd.f32 %v6553_v36, %v6081_v17 }
 0xfcf   : > { %9614 = vpow2.f32 %v6796_v59  ;;  %7190 = vmatmul.f32.gmra.mxu3 %v7008_v14  ;;  %7303 = vmatmul.f32.gmra.mxu1 %v7009_v63  ;;  %v6913_v42 = vadd.f32 %v15024_v51, %v15020_v32  ;;  %v15046_v48 = vadd.f32 %v6440_v30, %v6080_v34  ;;  %v6646_v62 = vmax.f32 %v15070_v29, %v15068_v57 }
 0xfd0   : > { %v15033_v54 = vpop.eup %9608  ;;  %9616 = vpow2.f32 %v6798_v7 }
 0xfd1   : > { %v15035_v12 = vpop.eup %9610  ;;  %6914 = vadd.xlane.f32.xlu1 %v6913_v42  ;;  %6638 = vmax.xlane.f32.xlu0 %v6637_v52  ;;  %v6649_v28 = vmax.f32 %v15046_v48, %v15042_v39 }
 0xfd2   : > { %v9613_v21 = vpop.eup %9612  ;;  %v6907_v56 = vadd.f32 %v15035_v12, %v15033_v54 }
 0xfd3   : > { %v7010_v8 = vmul.f32 %v9613_v21, %v14842_v5  ;;  %v7011_v46 = vmul.f32 %v9613_v21, %v14847_v53  ;;  %v15063_v53 = vadd.f32 %v14980_v20, %v6076_v55  ;;  %v8575_v20 = vld [vmem:[%s15550_s3 + $0x18] sm:$0xff]  ;;  %v15077_v37 = vpop.f32.mrf.mxu0 }
 0xfd4   : > { %6908 = vadd.xlane.f32.xlu2 %v6907_v56  ;;  %7495 = vmatpush.msrb.mxu2 %v8575_v20 }
 0xfd5   : > { %v15044_v24 = vpop.eup %9614  ;;  %v6643_v45 = vmax.f32 %v15063_v53, %v15056_v33 }
 0xfd6   : > { %v15050_v4 = vpop.eup %9616  ;;  %v15079_v18 = vpop.f32.mrf.mxu2 }
 0xfd7   : > { %7193 = vmatmul.f32.gmra.mxu3 %v7010_v8  ;;  %7306 = vmatmul.f32.gmra.mxu1 %v7011_v46  ;;  %v6910_v5 = vadd.f32 %v15050_v4, %v15044_v24 }
 0xfd9   : > { %6650 = vmax.xlane.f32.xlu1 %v6649_v28  ;;  %6911 = vadd.xlane.f32.xlu0 %v6910_v5 }
 0xfdb   : > { %v6559_v23 = vpop.f32.mrf.mxu0 }
 0xfdc   : > { %6644 = vmax.xlane.f32.xlu2 %v6643_v45 }
 0xfde   : > { %v6446_v43 = vpop.f32.mrf.mxu2 }
 0xfe1   : > { %6647 = vmax.xlane.f32.xlu0 %v6646_v62 }
 0xfe3   : > { %v15086_v21 = vpop.f32.mrf.mxu0 }
 0xfe6   : > { %v15096_v30 = vpop.f32.mrf.mxu2 }
 0xff9   : > { %v7173_v47 = vpop.f32.mrf.mxu3 }
 0xffe   : > { %v6897_v15 = vpop.xlane.xlu1 %6896 }
0x1001   : > { %v7176_v42 = vpop.f32.mrf.mxu3 }
0x1006   : > { %v6633_v59 = vpop.xlane.xlu1 %6632  ;;  %v7286_v7 = vpop.f32.mrf.mxu1 }
0x1007   : > { %v6710_v25 = vsub.f32 %v14919_v1, %v6633_v59  ;;  %v6711_v14 = vsub.f32 %v14917_v2, %v6633_v59  ;;  %v7287_v63 = vadd.f32 %v7286_v7, %v7173_v47  ;;  %v8472_v1 = vld [vmem:[%s15552_s5 + $0x3c8] sm:$0xff]  ;;  %v15107_v59 = vpop.f32.mrf.mxu0 }
0x1008   : > { %v6085_v56 = vunpack.c.h.bf16 %v8472_v1  ;;  %v6084_v8 = vunpack.c.l.bf16 %v8472_v1 }
0x1009   : > { %v6808_v52 = vmul.f32 1.442695, %v6710_v25  ;;  %v6810_v17 = vmul.f32 1.442695, %v6711_v14  ;;  %8576 = vmatmul.msk.f32.vlgmr.msrb.gmra.mxu2 %vm729_vm1, %v7287_v63  ;;  %v7179_v46 = vpop.f32.mrf.mxu3  ;;  %v15111_v25 = vpop.f32.mrf.mxu2 }
0x100a   : > { %v15100_v28 = vadd.f32 %v6559_v23, %v6085_v56  ;;  %v15104_v62 = vadd.f32 %v6446_v43, %v6084_v8  ;;  %v8475_v23 = vld [vmem:[%s15552_s5 + $0x3e0] sm:$0xff] }
0x100b   : > { %9618 = vpow2.f32 %v6808_v52  ;;  %v6091_v14 = vunpack.c.h.bf16 %v8475_v23  ;;  %v6090_v52 = vunpack.c.l.bf16 %v8475_v23 }
0x100c   : > { %9620 = vpow2.f32 %v6810_v17  ;;  %v6655_v7 = vmax.f32 %v15104_v62, %v15100_v28 }
0x100e   : > { %v15084_v36 = vpop.xlane.xlu1 %6905  ;;  %v7289_v10 = vpop.f32.mrf.mxu1 }
0x100f   : > { %v7290_v34 = vadd.f32 %v7289_v10, %v7176_v42  ;;  %v6568_v43 = vpop.f32.mrf.mxu0 }
0x1010   : > { %v15122_v42 = vadd.f32 %v6568_v43, %v6091_v14 }
0x1011   : > { %v15088_v19 = vpop.eup %9618  ;;  %8577 = vmatmul.msk.f32.gmra.mxu2 %vm729_vm1, %v7290_v34  ;;  %v6455_v17 = vpop.f32.mrf.mxu2 }
0x1012   : > { %v15091_v2 = vpop.eup %9620  ;;  %v15124_v10 = vadd.f32 %v6455_v17, %v6090_v52 }
0x1013   : > { %v6919_v55 = vadd.f32 %v15091_v2, %v15088_v19 }
0x1014   : > { %v6664_v34 = vmax.f32 %v15124_v10, %v15122_v42 }
0x1015   : > { %6920 = vadd.xlane.f32.xlu0 %v6919_v55 }
0x1016   : > { %v6642_v49 = vpop.xlane.xlu1 %6641  ;;  %v7292_v0 = vpop.f32.mrf.mxu1 }
0x1017   : > { %v6716_v5 = vsub.f32 %v14940_v40, %v6642_v49  ;;  %v6717_v44 = vsub.f32 %v14938_v11, %v6642_v49  ;;  %v7293_v45 = vadd.f32 %v7292_v0, %v7179_v46 }
0x1019   : > { %v6820_v20 = vmul.f32 1.442695, %v6716_v5  ;;  %v6822_v47 = vmul.f32 1.442695, %v6717_v44  ;;  %8578 = vmatmul.msk.f32.gmra.mxu2 %vm729_vm1, %v7293_v45 }
0x101b   : > { %9622 = vpow2.f32 %v6820_v20 }
0x101c   : > { %9624 = vpow2.f32 %v6822_v47 }
0x101d   : > { %6656 = vmax.xlane.f32.xlu0 %v6655_v7 }
0x1021   : > { %v15113_v40 = vpop.eup %9622 }
0x1022   : > { %v15115_v11 = vpop.eup %9624 }
0x1023   : > { %v6928_v63 = vadd.f32 %v15115_v11, %v15113_v40 }
0x1025   : > { %6929 = vadd.xlane.f32.xlu0 %v6928_v63 }
0x102c   : > { %v6894_v1 = vpop.xlane.xlu0 %6893 }
0x102d   : > { %6665 = vmax.xlane.f32.xlu0 %v6664_v34  ;;  %9626 = vrcp.f32 %v6894_v1  ;;  %v8471_v1 = vld [vmem:[%s15552_s5 + $0x3c0] sm:$0xff] }
0x102e   : > { %9628 = vrcp.f32 %v6897_v15 }
0x1031   : > { %v7295_v0 = vpop.f32.mrf.mxu1 }
0x1033   : > { %v9627_v56 = vpop.eup %9626 }
0x1034   : > { %v6900_v55 = vpop.xlane.xlu2 %6899  ;;  %v6630_v8 = vpop.xlane.xlu0 %6629  ;;  %v7012_v46 = vmul.f32 %v9627_v56, %v14950_v22  ;;  %v7013_v49 = vmul.f32 %v9627_v56, %v14955_v31  ;;  %v6083_v56 = vunpack.c.h.bf16 %v8471_v1 }
0x1035   : > { %v6708_v5 = vsub.f32 %v14967_v27, %v6630_v8  ;;  %v6709_v44 = vsub.f32 %v14962_v9, %v6630_v8  ;;  %v9629_v23 = vpop.eup %9628 }
0x1036   : > { %7196 = vmatmul.f32.gmra.mxu3 %v7012_v46  ;;  %7309 = vmatmul.f32.gmra.mxu1 %v7013_v49  ;;  %v7014_v31 = vmul.f32 %v9629_v23, %v14903_v61  ;;  %v7015_v27 = vmul.f32 %v9629_v23, %v14907_v3 }
0x1037   : > { %v6804_v45 = vmul.f32 1.442695, %v6708_v5  ;;  %v6806_v20 = vmul.f32 1.442695, %v6709_v44  ;;  %v7182_v47 = vpop.f32.mrf.mxu3  ;;  %v15151_v5 = vadd.f32 %v15077_v37, %v6083_v56  ;;  %v15153_v44 = vpop.f32.mrf.mxu0 }
0x1038   : > { %v7296_v7 = vadd.f32 %v7295_v0, %v7182_v47 }
0x1039   : > { %9630 = vpow2.f32 %v6804_v45 }
0x103a   : > { %9632 = vpow2.f32 %v6806_v20  ;;  %8579 = vmatmul.msk.f32.gmra.mxu2 %vm729_vm1, %v7296_v7 }
0x103b   : > { %9634 = vrcp.f32 %v6900_v55 }
0x103c   : > { %v6636_v22 = vpop.xlane.xlu2 %6635  ;;  %v6903_v15 = vpop.xlane.xlu0 %6902 }
0x103d   : > { %v6712_v9 = vsub.f32 %v14992_v50, %v6636_v22  ;;  %v6713_v14 = vsub.f32 %v14987_v41, %v6636_v22  ;;  %v7298_v63 = vpop.f32.mrf.mxu1  ;;  %v6082_v50 = vunpack.c.l.bf16 %v8471_v1 }
0x103e   : > { %7199 = vmatmul.f32.gmra.mxu3 %v7014_v31  ;;  %7312 = vmatmul.f32.gmra.mxu1 %v7015_v27 }
0x103f   : > { %v15137_v43 = vpop.eup %9630  ;;  %v6812_v52 = vmul.f32 1.442695, %v6712_v9  ;;  %v6814_v17 = vmul.f32 1.442695, %v6713_v14 }
0x1040   : > { %v15139_v34 = vpop.eup %9632 }
0x1041   : > { %v9635_v61 = vpop.eup %9634  ;;  %9636 = vpow2.f32 %v6812_v52  ;;  %v6916_v3 = vadd.f32 %v15139_v34, %v15137_v43 }
0x1042   : > { %9638 = vpow2.f32 %v6814_v17  ;;  %v7185_v41 = vpop.f32.mrf.mxu3  ;;  %v7016_v49 = vmul.f32 %v9635_v61, %v14971_v38  ;;  %v7017_v0 = vmul.f32 %v9635_v61, %v14978_v6  ;;  %v15161_v38 = vadd.f32 %v15079_v18, %v6082_v50 }
0x1043   : > { %9640 = vrcp.f32 %v6903_v15  ;;  %6917 = vadd.xlane.f32.xlu2 %v6916_v3  ;;  %v7299_v55 = vadd.f32 %v7298_v63, %v7185_v41 }
0x1044   : > { %v15146_v8 = vpop.xlane.xlu1 %6914  ;;  %v6639_v46 = vpop.xlane.xlu0 %6638  ;;  %v6652_v31 = vmax.f32 %v15161_v38, %v15151_v5 }
0x1045   : > { %v6714_v45 = vsub.f32 %v15017_v13, %v6639_v46  ;;  %v6715_v20 = vsub.f32 %v15012_v16, %v6639_v46  ;;  %8580 = vmatmul.msk.f32.gmra.mxu2 %vm729_vm1, %v7299_v55  ;;  %v7301_v47 = vpop.f32.mrf.mxu1  ;;  %v8473_v13 = vld [vmem:[%s15552_s5 + $0x3d0] sm:$0xff]  ;;  %v15168_v16 = vpop.f32.mrf.mxu2 }
0x1046   : > { %7202 = vmatmul.f32.gmra.mxu3 %v7016_v49  ;;  %7315 = vmatmul.f32.gmra.mxu1 %v7017_v0  ;;  %v6087_v27 = vunpack.c.h.bf16 %v8473_v13  ;;  %v6086_v14 = vunpack.c.l.bf16 %v8473_v13  ;;  %v15190_v55 = vpop.f32.mrf.mxu0 }
0x1047   : > { %v15158_v7 = vpop.eup %9636  ;;  %v6816_v6 = vmul.f32 1.442695, %v6714_v45  ;;  %v6818_v23 = vmul.f32 1.442695, %v6715_v20  ;;  %v6909_v37 = vpop.xlane.xlu2 %6908 }
0x1048   : > { %v15163_v22 = vpop.eup %9638  ;;  %v15180_v56 = vadd.f32 %v15086_v21, %v6087_v27  ;;  %v15188_v50 = vadd.f32 %v15096_v30, %v6086_v14 }
0x1049   : > { %v9641_v15 = vpop.eup %9640  ;;  %9642 = vpow2.f32 %v6816_v6  ;;  %v6922_v18 = vadd.f32 %v15163_v22, %v15158_v7 }
0x104a   : > { %9644 = vpow2.f32 %v6818_v23  ;;  %v7188_v9 = vpop.f32.mrf.mxu3  ;;  %v7018_v1 = vmul.f32 %v9641_v15, %v14994_v60  ;;  %v7019_v61 = vmul.f32 %v9641_v15, %v15001_v35  ;;  %v6658_v30 = vmax.f32 %v15188_v50, %v15180_v56 }
0x104b   : > { %9646 = vrcp.f32 %v15084_v36  ;;  %6923 = vadd.xlane.f32.xlu1 %v6922_v18  ;;  %6653 = vmax.xlane.f32.xlu2 %v6652_v31  ;;  %v7302_v63 = vadd.f32 %v7301_v47, %v7188_v9 }
0x104c   : > { %v6651_v52 = vpop.xlane.xlu1 %6650  ;;  %v15175_v17 = vpop.xlane.xlu0 %6911 }
0x104d   : > { %v6722_v3 = vsub.f32 %v15046_v48, %v6651_v52  ;;  %v6723_v41 = vsub.f32 %v15042_v39, %v6651_v52  ;;  %8581 = vmatmul.msk.f32.gmra.mxu2 %vm729_vm1, %v7302_v63  ;;  %v8474_v39 = vld [vmem:[%s15552_s5 + $0x3d8] sm:$0xff]  ;;  %v7304_v48 = vpop.f32.mrf.mxu1  ;;  %v15203_v6 = vpop.f32.mrf.mxu2 }
0x104e   : > { %7205 = vmatmul.f32.gmra.mxu3 %v7018_v1  ;;  %7318 = vmatmul.f32.gmra.mxu1 %v7019_v61  ;;  %v6089_v20 = vunpack.c.h.bf16 %v8474_v39  ;;  %v6088_v31 = vunpack.c.l.bf16 %v8474_v39  ;;  %v8476_v39 = vld [vmem:[%s15552_s5 + $0x3e8] sm:$0xff] }
0x104f   : > { %v15185_v36 = vpop.eup %9642  ;;  %v6832_v60 = vmul.f32 1.442695, %v6722_v3  ;;  %v6834_v35 = vmul.f32 1.442695, %v6723_v41  ;;  %v6645_v46 = vpop.xlane.xlu2 %6644 }
0x1050   : > { %v15192_v21 = vpop.eup %9644  ;;  %v6718_v49 = vsub.f32 %v15063_v53, %v6645_v46  ;;  %v6719_v0 = vsub.f32 %v15056_v33, %v6645_v46  ;;  %v15208_v9 = vadd.f32 %v15107_v59, %v6089_v20  ;;  %v15216_v52 = vadd.f32 %v15111_v25, %v6088_v31  ;;  %v8478_v59 = vld [vmem:[%s15552_s5 + $0x3f8] sm:$0xff]  ;;  %v6577_v3 = vpop.f32.mrf.mxu0 }
0x1051   : > { %v9647_v45 = vpop.eup %9646  ;;  %9648 = vpow2.f32 %v6832_v60  ;;  %v6925_v47 = vadd.f32 %v15192_v21, %v15185_v36  ;;  %v6097_v61 = vunpack.c.h.bf16 %v8478_v59 }
0x1052   : > { %9650 = vpow2.f32 %v6834_v35  ;;  %v6824_v23 = vmul.f32 1.442695, %v6718_v49  ;;  %v6826_v13 = vmul.f32 1.442695, %v6719_v0  ;;  %v7191_v15 = vpop.f32.mrf.mxu3  ;;  %v7020_v27 = vmul.f32 %v9647_v45, %v14928_v26 }
0x1053   : > { %9652 = vrcp.f32 %v6909_v37  ;;  %6659 = vmax.xlane.f32.xlu1 %v6658_v30  ;;  %6926 = vadd.xlane.f32.xlu2 %v6925_v47  ;;  %v7305_v33 = vadd.f32 %v7304_v48, %v7191_v15  ;;  %v7021_v18 = vmul.f32 %v9647_v45, %v14930_v58  ;;  %v6096_v48 = vunpack.c.l.bf16 %v8478_v59 }
0x1054   : > { %9654 = vpow2.f32 %v6824_v23  ;;  %v6648_v53 = vpop.xlane.xlu0 %6647  ;;  %v6093_v0 = vunpack.c.h.bf16 %v8476_v39  ;;  %v15238_v47 = vadd.f32 %v6577_v3, %v6097_v61  ;;  %v7593_v61 = vld [vmem:[#allocation2] sm:$0xff] }
0x1055   : > { %9656 = vpow2.f32 %v6826_v13  ;;  %v6720_v14 = vsub.f32 %v15070_v29, %v6648_v53  ;;  %v6721_v63 = vsub.f32 %v15068_v57, %v6648_v53  ;;  %8582 = vmatmul.msk.f32.gmra.mxu2 %vm729_vm1, %v7305_v33  ;;  %v6661_v57 = vmax.f32 %v15216_v52, %v15208_v9  ;;  %v7307_v60 = vpop.f32.mrf.mxu1  ;;  %v6464_v45 = vpop.f32.mrf.mxu2 }
0x1056   : > { %7208 = vmatmul.f32.gmra.mxu3 %v7020_v27  ;;  %7321 = vmatmul.f32.gmra.mxu1 %v7021_v18  ;;  %v6092_v13 = vunpack.c.l.bf16 %v8476_v39  ;;  %v15244_v15 = vadd.f32 %v6464_v45, %v6096_v48  ;;  %v15252_v33 = vadd.f32 %v15153_v44, %v6093_v0  ;;  %v7594_v48 = vld [vmem:[#allocation2 + $0x8] sm:$0xff] }
0x1057   : > { %v15213_v37 = vpop.eup %9648  ;;  %v6828_v26 = vmul.f32 1.442695, %v6720_v14  ;;  %v6830_v1 = vmul.f32 1.442695, %v6721_v63 }
0x1058   : > { %v15218_v58 = vpop.eup %9650  ;;  %v6673_v27 = vmax.f32 %v15244_v15, %v15238_v47  ;;  %v15259_v14 = vadd.f32 %v15168_v16, %v6092_v13 }
0x1059   : > { %v9653_v29 = vpop.eup %9652  ;;  %9658 = vpow2.f32 %v6828_v26  ;;  %v6937_v41 = vadd.f32 %v15218_v58, %v15213_v37 }
0x105a   : > { %v15227_v25 = vpop.eup %9654  ;;  %9660 = vpow2.f32 %v6830_v1  ;;  %v7194_v35 = vpop.f32.mrf.mxu3  ;;  %v7022_v20 = vmul.f32 %v9653_v29, %v15033_v54  ;;  %v7023_v23 = vmul.f32 %v9653_v29, %v15035_v12  ;;  %v8477_v54 = vld [vmem:[%s15552_s5 + $0x3f0] sm:$0xff]  ;;  %v6667_v44 = vmax.f32 %v15259_v14, %v15252_v33 }
0x105b   : > { %v15229_v46 = vpop.eup %9656  ;;  %9662 = vrcp.f32 %v15175_v17  ;;  %6938 = vadd.xlane.f32.xlu0 %v6937_v41  ;;  %6662 = vmax.xlane.f32.xlu2 %v6661_v57  ;;  %v7308_v49 = vadd.f32 %v7307_v60, %v7194_v35  ;;  %v6095_v53 = vunpack.c.h.bf16 %v8477_v54  ;;  %v6094_v63 = vunpack.c.l.bf16 %v8477_v54 }
0x105c   : > { %v6931_v30 = vadd.f32 %v15229_v46, %v15227_v25  ;;  %9664 = vrcp.f32 %v15146_v8 }
0x105d   : > { %8583 = vmatmul.msk.f32.gmra.mxu2 %vm729_vm1, %v7308_v49  ;;  %v15266_v1 = vadd.f32 %v15190_v55, %v6095_v53  ;;  %v15270_v16 = vadd.f32 %v15203_v6, %v6094_v63 }
0x105e   : > { %6932 = vadd.xlane.f32.xlu1 %v6931_v30  ;;  %7211 = vmatmul.f32.gmra.mxu3 %v7022_v20 }
0x105f   : > { %v15242_v17 = vpop.eup %9658  ;;  %7324 = vmatmul.f32.gmra.mxu1 %v7023_v23  ;;  %v6670_v8 = vmax.f32 %v15270_v16, %v15266_v1  ;;  %v7595_v23 = vld [vmem:[#allocation2 + $0x10] sm:$0xff] }
0x1060   : > { %v15246_v31 = vpop.eup %9660 }
0x1061   : > { %v9663_v12 = vpop.eup %9662  ;;  %v6934_v18 = vadd.f32 %v15246_v31, %v15242_v17 }
0x1062   : > { %v7024_v26 = vmul.f32 %v9663_v12, %v15044_v24  ;;  %v7025_v59 = vmul.f32 %v9663_v12, %v15050_v4  ;;  %v9665_v29 = vpop.eup %9664 }
0x1063   : > { %6674 = vmax.xlane.f32.xlu0 %v6673_v27  ;;  %6935 = vadd.xlane.f32.xlu2 %v6934_v18  ;;  %v7026_v57 = vmul.f32 %v9665_v29, %v15020_v32  ;;  %v7027_v24 = vmul.f32 %v9665_v29, %v15024_v51  ;;  %v15282_v32 = vld [vmem:[%s15551_s4] ss:$0 sm:$0xff] }
0x1066   : > { %6668 = vmax.xlane.f32.xlu1 %v6667_v44  ;;  %7214 = vmatmul.f32.gmra.mxu3 %v7024_v26 }
0x1067   : > { %7327 = vmatmul.f32.gmra.mxu1 %v7025_v59 }
0x106b   : > { %6671 = vmax.xlane.f32.xlu2 %v6670_v8 }
0x106e   : > { %7217 = vmatmul.f32.gmra.mxu3 %v7026_v57 }
0x106f   : > { %7330 = vmatmul.f32.gmra.mxu1 %v7027_v24 }
0x1088   : > { %v6921_v55 = vpop.xlane.xlu0 %6920 }
0x108c   : > { %v7497_v4 = vpop.f32.mrf.mxu2 }
0x108d   : > { %v7625_v3 = vadd.f32 %v7593_v61, %v7497_v4 }
0x108f   : > { %7657 = vst.msk [vmem:[#allocation2] sm:$0xff] %vm291_vm0, %v7625_v3 }
0x1090   : > { %v6657_v6 = vpop.xlane.xlu0 %6656 }
0x1091   : > { %v6726_v41 = vsub.f32 %v15104_v62, %v6657_v6  ;;  %v6727_v60 = vsub.f32 %v15100_v28, %v6657_v6 }
0x1093   : > { %v6840_v51 = vmul.f32 1.442695, %v6726_v41  ;;  %v6842_v35 = vmul.f32 1.442695, %v6727_v60  ;;  %v7596_v60 = vld [vmem:[#allocation2 + $0x18] sm:$0xff] }
0x1094   : > { %v7500_v39 = vpop.f32.mrf.mxu2 }
0x1095   : > { %9666 = vpow2.f32 %v6840_v51  ;;  %v7626_v49 = vadd.f32 %v7594_v48, %v7500_v39 }
0x1096   : > { %v7689_v62 = vld [vmem:[#allocation2] sm:$0xff]  ;;  %9668 = vpow2.f32 %v6842_v35 }
0x1097   : > { %v7725_v28 = vadd.f32 %v15282_v32, %v7689_v62  ;;  %7658 = vst.msk [vmem:[#allocation2 + $0x8] sm:$0xff] %vm291_vm0, %v7626_v49 }
0x1098   : > { %v15293_v0 = vpop.xlane.xlu0 %6929 }
0x1099   : > { %7757 = vst.msk [vmem:[%s15289_s15] sm:$0xff] %vm291_vm0, %v7725_v28 }
0x109b   : > { %v15297_v45 = vpop.eup %9666 }
0x109c   : > { %v15299_v30 = vpop.eup %9668  ;;  %v7503_v20 = vpop.f32.mrf.mxu2 }
0x109d   : > { %v6943_v13 = vadd.f32 %v15299_v30, %v15297_v45  ;;  %v7627_v54 = vadd.f32 %v7595_v23, %v7503_v20 }
0x109e   : > { %v7690_v12 = vld [vmem:[#allocation2 + $0x8] sm:$0xff] }
0x109f   : > { %v7726_v53 = vadd.f32 %v15282_v32, %v7690_v12  ;;  %6944 = vadd.xlane.f32.xlu2 %v6943_v13  ;;  %7659 = vst.msk [vmem:[#allocation2 + $0x10] sm:$0xff] %vm291_vm0, %v7627_v54 }
0x10a0   : > { %v6666_v27 = vpop.xlane.xlu0 %6665 }
0x10a1   : > { %7758 = vst.msk [vmem:[%s15289_s15 + $0x8] sm:$0xff] %vm291_vm0, %v7726_v53  ;;  %v6732_v18 = vsub.f32 %v15124_v10, %v6666_v27  ;;  %v6733_v63 = vsub.f32 %v15122_v42, %v6666_v27 }
0x10a3   : > { %v6852_v44 = vmul.f32 1.442695, %v6732_v18  ;;  %v6854_v26 = vmul.f32 1.442695, %v6733_v63 }
0x10a5   : > { %9670 = vpow2.f32 %v6852_v44 }
0x10a6   : > { %v7691_v59 = vld [vmem:[#allocation2 + $0x10] sm:$0xff]  ;;  %9672 = vpow2.f32 %v6854_v26  ;;  %v7597_v26 = vld [vmem:[#allocation2 + $0x20] sm:$0xff] }
0x10a7   : > { %v7727_v29 = vadd.f32 %v15282_v32, %v7691_v59 }
0x10a9   : > { %7759 = vst.msk [vmem:[%s15289_s15 + $0x10] sm:$0xff] %vm291_vm0, %v7727_v29 }
0x10ab   : > { %v15312_v8 = vpop.eup %9670 }
0x10ac   : > { %v15314_v57 = vpop.eup %9672 }
0x10ad   : > { %v6952_v24 = vadd.f32 %v15314_v57, %v15312_v8 }
0x10af   : > { %6953 = vadd.xlane.f32.xlu2 %v6952_v24 }
0x10b3   : > { %v7310_v10 = vpop.f32.mrf.mxu1 }
0x10b6   : > { %v6918_v4 = vpop.xlane.xlu2 %6917 }
0x10b7   : > { %9674 = vrcp.f32 %v6918_v4 }
0x10b8   : > { %9676 = vrcp.f32 %v6921_v55 }
0x10b9   : > { %v7197_v42 = vpop.f32.mrf.mxu3 }
0x10ba   : > { %v7311_v61 = vadd.f32 %v7310_v10, %v7197_v42 }
0x10bb   : > { %v7313_v3 = vpop.f32.mrf.mxu1 }
0x10bc   : > { %8584 = vmatmul.msk.f32.gmra.mxu2 %vm729_vm1, %v7311_v61 }
0x10bd   : > { %v9675_v6 = vpop.eup %9674  ;;  %v7506_v41 = vpop.f32.mrf.mxu2 }
0x10be   : > { %v6924_v51 = vpop.xlane.xlu1 %6923  ;;  %v6654_v35 = vpop.xlane.xlu2 %6653  ;;  %v7628_v39 = vadd.f32 %v7596_v60, %v7506_v41  ;;  %v7028_v48 = vmul.f32 %v9675_v6, %v15137_v43  ;;  %v7029_v49 = vmul.f32 %v9675_v6, %v15139_v34 }
0x10bf   : > { %v6724_v62 = vsub.f32 %v15161_v38, %v6654_v35  ;;  %v6725_v28 = vsub.f32 %v15151_v5, %v6654_v35  ;;  %v9677_v54 = vpop.eup %9676 }
0x10c0   : > { %7660 = vst.msk [vmem:[#allocation2 + $0x18] sm:$0xff] %vm291_vm0, %v7628_v39  ;;  %7220 = vmatmul.f32.gmra.mxu3 %v7028_v48  ;;  %7333 = vmatmul.f32.gmra.mxu1 %v7029_v49  ;;  %v7030_v38 = vmul.f32 %v9677_v54, %v15088_v19  ;;  %v7031_v5 = vmul.f32 %v9677_v54, %v15091_v2  ;;  %v7598_v39 = vld [vmem:[#allocation2 + $0x28] sm:$0xff] }
0x10c1   : > { %v6836_v20 = vmul.f32 1.442695, %v6724_v62  ;;  %v6838_v23 = vmul.f32 1.442695, %v6725_v28  ;;  %v7200_v55 = vpop.f32.mrf.mxu3 }
0x10c2   : > { %v7314_v13 = vadd.f32 %v7313_v3, %v7200_v55 }
0x10c3   : > { %9678 = vpow2.f32 %v6836_v20  ;;  %v7316_v12 = vpop.f32.mrf.mxu1 }
0x10c4   : > { %9680 = vpow2.f32 %v6838_v23  ;;  %8585 = vmatmul.msk.f32.gmra.mxu2 %vm729_vm1, %v7314_v13 }
0x10c5   : > { %9682 = vrcp.f32 %v6924_v51 }
0x10c6   : > { %v6660_v43 = vpop.xlane.xlu1 %6659  ;;  %v6927_v34 = vpop.xlane.xlu2 %6926 }
0x10c7   : > { %v7692_v53 = vld [vmem:[#allocation2 + $0x18] sm:$0xff]  ;;  %v6728_v27 = vsub.f32 %v15188_v50, %v6660_v43  ;;  %v6729_v18 = vsub.f32 %v15180_v56, %v6660_v43 }
0x10c8   : > { %v7728_v63 = vadd.f32 %v15282_v32, %v7692_v53  ;;  %7223 = vmatmul.f32.gmra.mxu3 %v7030_v38  ;;  %7336 = vmatmul.f32.gmra.mxu1 %v7031_v5  ;;  %v7509_v44 = vpop.f32.mrf.mxu2 }
0x10c9   : > { %v15330_v59 = vpop.eup %9678  ;;  %v6844_v29 = vmul.f32 1.442695, %v6728_v27  ;;  %v6846_v24 = vmul.f32 1.442695, %v6729_v18  ;;  %v7203_v10 = vpop.f32.mrf.mxu3  ;;  %v7629_v19 = vadd.f32 %v7597_v26, %v7509_v44  ;;  %v7599_v18 = vld [vmem:[#allocation2 + $0x30] sm:$0xff] }
0x10ca   : > { %v15332_v4 = vpop.eup %9680  ;;  %7760 = vst.msk [vmem:[%s15289_s15 + $0x18] sm:$0xff] %vm291_vm0, %v7728_v63  ;;  %v7317_v2 = vadd.f32 %v7316_v12, %v7203_v10 }
0x10cb   : > { %v9683_v50 = vpop.eup %9682  ;;  %9684 = vpow2.f32 %v6844_v29  ;;  %7661 = vst.msk [vmem:[#allocation2 + $0x20] sm:$0xff] %vm291_vm0, %v7629_v19  ;;  %v6940_v56 = vadd.f32 %v15332_v4, %v15330_v59  ;;  %v7319_v42 = vpop.f32.mrf.mxu1 }
0x10cc   : > { %9686 = vpow2.f32 %v6846_v24  ;;  %8586 = vmatmul.msk.f32.gmra.mxu2 %vm729_vm1, %v7317_v2  ;;  %v7032_v6 = vmul.f32 %v9683_v50, %v15158_v7  ;;  %v7033_v41 = vmul.f32 %v9683_v50, %v15163_v22 }
0x10cd   : > { %9688 = vrcp.f32 %v6927_v34  ;;  %6941 = vadd.xlane.f32.xlu1 %v6940_v56 }
0x10ce   : > { %v6663_v61 = vpop.xlane.xlu2 %6662  ;;  %v15340_v3 = vpop.xlane.xlu0 %6938 }
0x10cf   : > { %v6730_v60 = vsub.f32 %v15216_v52, %v6663_v61  ;;  %v6731_v51 = vsub.f32 %v15208_v9, %v6663_v61 }
0x10d0   : > { %7226 = vmatmul.f32.gmra.mxu3 %v7032_v6  ;;  %7339 = vmatmul.f32.gmra.mxu1 %v7033_v41  ;;  %v7512_v35 = vpop.f32.mrf.mxu2 }
0x10d1   : > { %v15346_v48 = vpop.eup %9684  ;;  %v6848_v49 = vmul.f32 1.442695, %v6730_v60  ;;  %v6850_v62 = vmul.f32 1.442695, %v6731_v51  ;;  %v6933_v28 = vpop.xlane.xlu1 %6932  ;;  %v7630_v23 = vadd.f32 %v7598_v39, %v7512_v35  ;;  %v7600_v35 = vld [vmem:[#allocation2 + $0x38] sm:$0xff] }
0x10d2   : > { %v7206_v20 = vpop.f32.mrf.mxu3  ;;  %v15348_v55 = vpop.eup %9686  ;;  %v7693_v7 = vld [vmem:[#allocation2 + $0x20] sm:$0xff] }
0x10d3   : > { %v7320_v22 = vadd.f32 %v7319_v42, %v7206_v20  ;;  %v9689_v13 = vpop.eup %9688  ;;  %v7729_v52 = vadd.f32 %v15282_v32, %v7693_v7  ;;  %9690 = vpow2.f32 %v6848_v49  ;;  %7662 = vst.msk [vmem:[#allocation2 + $0x28] sm:$0xff] %vm291_vm0, %v7630_v23  ;;  %v6946_v9 = vadd.f32 %v15348_v55, %v15346_v48  ;;  %v7322_v54 = vpop.f32.mrf.mxu1 }
0x10d4   : > { %9692 = vpow2.f32 %v6850_v62  ;;  %v7034_v34 = vmul.f32 %v9689_v13, %v15185_v36  ;;  %v7035_v38 = vmul.f32 %v9689_v13, %v15192_v21 }
0x10d5   : > { %8587 = vmatmul.msk.f32.gmra.mxu2 %vm729_vm1, %v7320_v22  ;;  %9694 = vrcp.f32 %v15293_v0  ;;  %7761 = vst.msk [vmem:[%s15289_s15 + $0x20] sm:$0xff] %vm291_vm0, %v7729_v52  ;;  %6947 = vadd.xlane.f32.xlu1 %v6946_v9 }
0x10d6   : > { %v6936_v12 = vpop.xlane.xlu2 %6935  ;;  %v6675_v43 = vpop.xlane.xlu0 %6674 }
0x10d7   : > { %v6738_v5 = vsub.f32 %v15244_v15, %v6675_v43  ;;  %v6739_v53 = vsub.f32 %v15238_v47, %v6675_v43 }
0x10d8   : > { %7229 = vmatmul.f32.gmra.mxu3 %v7034_v34  ;;  %7342 = vmatmul.f32.gmra.mxu1 %v7035_v38  ;;  %v7515_v27 = vpop.f32.mrf.mxu2 }
0x10d9   : > { %v15362_v63 = vpop.eup %9690  ;;  %v6864_v0 = vmul.f32 1.442695, %v6738_v5  ;;  %v6866_v44 = vmul.f32 1.442695, %v6739_v53  ;;  %v6669_v26 = vpop.xlane.xlu1 %6668  ;;  %v7631_v24 = vadd.f32 %v7599_v18, %v7515_v27 }
0x10da   : > { %v7209_v29 = vpop.f32.mrf.mxu3  ;;  %v15364_v10 = vpop.eup %9692  ;;  %v7694_v36 = vld [vmem:[#allocation2 + $0x28] sm:$0xff]  ;;  %v6734_v21 = vsub.f32 %v15259_v14, %v6669_v26  ;;  %v6735_v15 = vsub.f32 %v15252_v33, %v6669_v26 }
0x10db   : > { %v7323_v47 = vadd.f32 %v7322_v54, %v7209_v29  ;;  %v9695_v19 = vpop.eup %9694  ;;  %v7730_v2 = vadd.f32 %v15282_v32, %v7694_v36  ;;  %9696 = vpow2.f32 %v6864_v0  ;;  %7663 = vst.msk [vmem:[#allocation2 + $0x30] sm:$0xff] %vm291_vm0, %v7631_v24  ;;  %v6949_v50 = vadd.f32 %v15364_v10, %v15362_v63 }
0x10dc   : > { %9698 = vpow2.f32 %v6866_v44  ;;  %v6856_v56 = vmul.f32 1.442695, %v6734_v21  ;;  %v6858_v42 = vmul.f32 1.442695, %v6735_v15  ;;  %v7325_v33 = vpop.f32.mrf.mxu1  ;;  %v7036_v61 = vmul.f32 %v9695_v19, %v15113_v40 }
0x10dd   : > { %8588 = vmatmul.msk.f32.gmra.mxu2 %vm729_vm1, %v7323_v47  ;;  %9700 = vrcp.f32 %v6933_v28  ;;  %7762 = vst.msk [vmem:[%s15289_s15 + $0x28] sm:$0xff] %vm291_vm0, %v7730_v2  ;;  %6950 = vadd.xlane.f32.xlu0 %v6949_v50  ;;  %v7037_v6 = vmul.f32 %v9695_v19, %v15115_v11  ;;  %v7601_v47 = vld [vmem:[#allocation2 + $0x40] sm:$0xff] }
0x10de   : > { %9702 = vpow2.f32 %v6856_v56  ;;  %v6672_v14 = vpop.xlane.xlu2 %6671 }
0x10df   : > { %9704 = vpow2.f32 %v6858_v42  ;;  %v6736_v41 = vsub.f32 %v15270_v16, %v6672_v14  ;;  %v6737_v60 = vsub.f32 %v15266_v1, %v6672_v14  ;;  %v7602_v42 = vld [vmem:[#allocation2 + $0x48] sm:$0xff] }
0x10e0   : > { %7232 = vmatmul.f32.gmra.mxu3 %v7036_v61  ;;  %7345 = vmatmul.f32.gmra.mxu1 %v7037_v6  ;;  %v7518_v51 = vpop.f32.mrf.mxu2 }
0x10e1   : > { %v15379_v39 = vpop.eup %9696  ;;  %v6860_v49 = vmul.f32 1.442695, %v6736_v41  ;;  %v6862_v62 = vmul.f32 1.442695, %v6737_v60  ;;  %v7632_v20 = vadd.f32 %v7600_v35, %v7518_v51 }
0x10e2   : > { %v7212_v28 = vpop.f32.mrf.mxu3  ;;  %v15381_v23 = vpop.eup %9698  ;;  %v7695_v40 = vld [vmem:[#allocation2 + $0x30] sm:$0xff] }
0x10e3   : > { %v7326_v11 = vadd.f32 %v7325_v33, %v7212_v28  ;;  %v9701_v7 = vpop.eup %9700  ;;  %v7731_v16 = vadd.f32 %v15282_v32, %v7695_v40  ;;  %9706 = vpow2.f32 %v6860_v49  ;;  %7664 = vst.msk [vmem:[#allocation2 + $0x38] sm:$0xff] %vm291_vm0, %v7632_v20  ;;  %v6961_v1 = vadd.f32 %v15381_v23, %v15379_v39 }
0x10e4   : > { %v15387_v22 = vpop.eup %9702  ;;  %9708 = vpow2.f32 %v6862_v62  ;;  %v7038_v9 = vmul.f32 %v9701_v7, %v15227_v25  ;;  %v7328_v54 = vpop.f32.mrf.mxu1  ;;  %v7039_v43 = vmul.f32 %v9701_v7, %v15229_v46 }
0x10e5   : > { %8589 = vmatmul.msk.f32.gmra.mxu2 %vm729_vm1, %v7326_v11  ;;  %v15390_v13 = vpop.eup %9704  ;;  %9710 = vrcp.f32 %v6936_v12  ;;  %7763 = vst.msk [vmem:[%s15289_s15 + $0x30] sm:$0xff] %vm291_vm0, %v7731_v16  ;;  %6962 = vadd.xlane.f32.xlu2 %v6961_v1 }
0x10e6   : > { %v6955_v52 = vadd.f32 %v15390_v13, %v15387_v22  ;;  %9712 = vrcp.f32 %v15340_v3 }
0x10e8   : > { %6956 = vadd.xlane.f32.xlu1 %v6955_v52  ;;  %7235 = vmatmul.f32.gmra.mxu3 %v7038_v9 }
0x10e9   : > { %v15398_v34 = vpop.eup %9706  ;;  %7348 = vmatmul.f32.gmra.mxu1 %v7039_v43 }
0x10ea   : > { %v7215_v38 = vpop.f32.mrf.mxu3  ;;  %v15400_v5 = vpop.eup %9708  ;;  %v7696_v12 = vld [vmem:[#allocation2 + $0x38] sm:$0xff] }
0x10eb   : > { %v7329_v53 = vadd.f32 %v7328_v54, %v7215_v38  ;;  %v9711_v27 = vpop.eup %9710  ;;  %v7732_v18 = vadd.f32 %v15282_v32, %v7696_v12  ;;  %v6958_v25 = vadd.f32 %v15400_v5, %v15398_v34 }
0x10ec   : > { %v7040_v46 = vmul.f32 %v9711_v27, %v15242_v17  ;;  %v7041_v0 = vmul.f32 %v9711_v27, %v15246_v31  ;;  %v7331_v44 = vpop.f32.mrf.mxu1  ;;  %v9713_v24 = vpop.eup %9712 }
0x10ed   : > { %8590 = vmatmul.msk.f32.gmra.mxu2 %vm729_vm1, %v7329_v53  ;;  %7764 = vst.msk [vmem:[%s15289_s15 + $0x38] sm:$0xff] %vm291_vm0, %v7732_v18  ;;  %6959 = vadd.xlane.f32.xlu0 %v6958_v25  ;;  %v7042_v36 = vmul.f32 %v9713_v24, %v15213_v37  ;;  %v7043_v21 = vmul.f32 %v9713_v24, %v15218_v58 }
0x10f0   : > { %7238 = vmatmul.f32.gmra.mxu3 %v7040_v46 }
0x10f1   : > { %7351 = vmatmul.f32.gmra.mxu1 %v7041_v0 }
0x10f2   : > { %v7218_v26 = vpop.f32.mrf.mxu3 }
0x10f3   : > { %v7332_v29 = vadd.f32 %v7331_v44, %v7218_v26 }
0x10f5   : > { %8591 = vmatmul.msk.f32.gmra.mxu2 %vm729_vm1, %v7332_v29 }
0x10f8   : > { %7241 = vmatmul.f32.gmra.mxu3 %v7042_v36 }
0x10f9   : > { %7354 = vmatmul.f32.gmra.mxu1 %v7043_v21 }
0x1112   : > { %v6945_v2 = vpop.xlane.xlu2 %6944 }
0x1122   : > { %v6954_v25 = vpop.xlane.xlu2 %6953 }
0x113d   : > { %v7334_v3 = vpop.f32.mrf.mxu1 }
0x113f   : > { %v7521_v15 = vpop.f32.mrf.mxu2 }
0x1140   : > { %v6942_v17 = vpop.xlane.xlu1 %6941  ;;  %v7633_v19 = vadd.f32 %v7601_v47, %v7521_v15 }
0x1141   : > { %9714 = vrcp.f32 %v6942_v17 }
0x1142   : > { %7665 = vst.msk [vmem:[#allocation2 + $0x40] sm:$0xff] %vm291_vm0, %v7633_v19  ;;  %9716 = vrcp.f32 %v6945_v2 }
0x1143   : > { %v7221_v31 = vpop.f32.mrf.mxu3 }
0x1144   : > { %v7335_v50 = vadd.f32 %v7334_v3, %v7221_v31 }
0x1145   : > { %v7337_v56 = vpop.f32.mrf.mxu1 }
0x1146   : > { %8592 = vmatmul.msk.f32.gmra.mxu2 %vm729_vm1, %v7335_v50 }
0x1147   : > { %v9715_v37 = vpop.eup %9714  ;;  %v7524_v58 = vpop.f32.mrf.mxu2 }
0x1148   : > { %v7634_v33 = vadd.f32 %v7602_v42, %v7524_v58  ;;  %v7044_v14 = vmul.f32 %v9715_v37, %v15330_v59  ;;  %v7045_v61 = vmul.f32 %v9715_v37, %v15332_v4  ;;  %v6948_v51 = vpop.xlane.xlu1 %6947  ;;  %v9717_v49 = vpop.eup %9716  ;;  %v7603_v4 = vld [vmem:[#allocation2 + $0x50] sm:$0xff] }
0x1149   : > { %v7697_v6 = vld [vmem:[#allocation2 + $0x40] sm:$0xff]  ;;  %9718 = vrcp.f32 %v6948_v51  ;;  %v7046_v20 = vmul.f32 %v9717_v49, %v15297_v45  ;;  %v7047_v40 = vmul.f32 %v9717_v49, %v15299_v30  ;;  %v7604_v30 = vld [vmem:[#allocation2 + $0x58] sm:$0xff] }
0x114a   : > { %v7733_v41 = vadd.f32 %v15282_v32, %v7697_v6  ;;  %7666 = vst.msk [vmem:[#allocation2 + $0x48] sm:$0xff] %vm291_vm0, %v7634_v33  ;;  %7244 = vmatmul.f32.gmra.mxu3 %v7044_v14  ;;  %7357 = vmatmul.f32.gmra.mxu1 %v7045_v61  ;;  %v7607_v61 = vld [vmem:[#allocation2 + $0x70] sm:$0xff] }
0x114b   : > { %v7224_v60 = vpop.f32.mrf.mxu3 }
0x114c   : > { %7765 = vst.msk [vmem:[%s15289_s15 + $0x40] sm:$0xff] %vm291_vm0, %v7733_v41  ;;  %v7338_v35 = vadd.f32 %v7337_v56, %v7224_v60 }
0x114d   : > { %v7340_v62 = vpop.f32.mrf.mxu1 }
0x114e   : > { %8593 = vmatmul.msk.f32.gmra.mxu2 %vm729_vm1, %v7338_v35 }
0x114f   : > { %v7527_v59 = vpop.f32.mrf.mxu2  ;;  %v9719_v9 = vpop.eup %9718 }
0x1150   : > { %v7635_v28 = vadd.f32 %v7603_v4, %v7527_v59  ;;  %v6951_v1 = vpop.xlane.xlu0 %6950  ;;  %v7048_v38 = vmul.f32 %v9719_v9, %v15346_v48  ;;  %v7049_v12 = vmul.f32 %v9719_v9, %v15348_v55  ;;  %v7605_v55 = vld [vmem:[#allocation2 + $0x60] sm:$0xff] }
0x1151   : > { %v7698_v11 = vld [vmem:[#allocation2 + $0x48] sm:$0xff]  ;;  %9720 = vrcp.f32 %v6951_v1 }
0x1152   : > { %v7734_v7 = vadd.f32 %v15282_v32, %v7698_v11  ;;  %7667 = vst.msk [vmem:[#allocation2 + $0x50] sm:$0xff] %vm291_vm0, %v7635_v28  ;;  %7247 = vmatmul.f32.gmra.mxu3 %v7046_v20  ;;  %7360 = vmatmul.f32.gmra.mxu1 %v7047_v40  ;;  %9722 = vrcp.f32 %v6954_v25 }
0x1153   : > { %v7227_v16 = vpop.f32.mrf.mxu3 }
0x1154   : > { %7766 = vst.msk [vmem:[%s15289_s15 + $0x48] sm:$0xff] %vm291_vm0, %v7734_v7  ;;  %v7341_v52 = vadd.f32 %v7340_v62, %v7227_v16 }
0x1155   : > { %v7343_v54 = vpop.f32.mrf.mxu1 }
0x1156   : > { %8594 = vmatmul.msk.f32.gmra.mxu2 %vm729_vm1, %v7341_v52 }
0x1157   : > { %v9721_v0 = vpop.eup %9720 }
0x1158   : > { %v7530_v45 = vpop.f32.mrf.mxu2  ;;  %v7050_v29 = vmul.f32 %v9721_v0, %v15362_v63  ;;  %v7051_v24 = vmul.f32 %v9721_v0, %v15364_v10  ;;  %v9723_v17 = vpop.eup %9722  ;;  %v7606_v10 = vld [vmem:[#allocation2 + $0x68] sm:$0xff] }
0x1159   : > { %v7636_v43 = vadd.f32 %v7604_v30, %v7530_v45  ;;  %v7699_v53 = vld [vmem:[#allocation2 + $0x50] sm:$0xff]  ;;  %v7052_v2 = vmul.f32 %v9723_v17, %v15312_v8  ;;  %v7053_v50 = vmul.f32 %v9723_v17, %v15314_v57  ;;  %v6963_v62 = vpop.xlane.xlu2 %6962 }
0x115a   : > { %v7735_v27 = vadd.f32 %v15282_v32, %v7699_v53  ;;  %7250 = vmatmul.f32.gmra.mxu3 %v7048_v38  ;;  %7363 = vmatmul.f32.gmra.mxu1 %v7049_v12  ;;  %v7609_v38 = vld [vmem:[#allocation2 + $0x80] sm:$0xff] }
0x115b   : > { %7668 = vst.msk [vmem:[#allocation2 + $0x58] sm:$0xff] %vm291_vm0, %v7636_v43  ;;  %v7230_v18 = vpop.f32.mrf.mxu3  ;;  %v6957_v15 = vpop.xlane.xlu1 %6956 }
0x115c   : > { %7767 = vst.msk [vmem:[%s15289_s15 + $0x50] sm:$0xff] %vm291_vm0, %v7735_v27  ;;  %v7344_v46 = vadd.f32 %v7343_v54, %v7230_v18  ;;  %9724 = vrcp.f32 %v6957_v15 }
0x115d   : > { %v7346_v44 = vpop.f32.mrf.mxu1 }
0x115e   : > { %8595 = vmatmul.msk.f32.gmra.mxu2 %vm729_vm1, %v7344_v46 }
0x1160   : > { %v7533_v48 = vpop.f32.mrf.mxu2  ;;  %v6960_v42 = vpop.xlane.xlu0 %6959 }
0x1161   : > { %v7637_v26 = vadd.f32 %v7605_v55, %v7533_v48  ;;  %9726 = vrcp.f32 %v6960_v42 }
0x1162   : > { %v7700_v36 = vld [vmem:[#allocation2 + $0x58] sm:$0xff]  ;;  %7253 = vmatmul.f32.gmra.mxu3 %v7050_v29  ;;  %7366 = vmatmul.f32.gmra.mxu1 %v7051_v24  ;;  %v9725_v14 = vpop.eup %9724  ;;  %9728 = vrcp.f32 %v6963_v62  ;;  %v7611_v29 = vld [vmem:[#allocation2 + $0x90] sm:$0xff] }
0x1163   : > { %v7736_v21 = vadd.f32 %v15282_v32, %v7700_v36  ;;  %7669 = vst.msk [vmem:[#allocation2 + $0x60] sm:$0xff] %vm291_vm0, %v7637_v26  ;;  %v7233_v3 = vpop.f32.mrf.mxu3  ;;  %v7054_v6 = vmul.f32 %v9725_v14, %v15387_v22  ;;  %v7055_v41 = vmul.f32 %v9725_v14, %v15390_v13  ;;  %v7608_v13 = vld [vmem:[#allocation2 + $0x78] sm:$0xff] }
0x1164   : > { %v7347_v47 = vadd.f32 %v7346_v44, %v7233_v3 }
0x1165   : > { %7768 = vst.msk [vmem:[%s15289_s15 + $0x58] sm:$0xff] %vm291_vm0, %v7736_v21 }
0x1166   : > { %8596 = vmatmul.msk.f32.gmra.mxu2 %vm729_vm1, %v7347_v47  ;;  %v7349_v63 = vpop.f32.mrf.mxu1 }
0x1167   : > { %v9727_v4 = vpop.eup %9726 }
0x1168   : > { %v7536_v19 = vpop.f32.mrf.mxu2  ;;  %v7056_v20 = vmul.f32 %v9727_v4, %v15398_v34  ;;  %v7057_v40 = vmul.f32 %v9727_v4, %v15400_v5  ;;  %v9729_v9 = vpop.eup %9728  ;;  %v7615_v4 = vld [vmem:[#allocation2 + $0xb0] sm:$0xff] }
0x1169   : > { %v7638_v31 = vadd.f32 %v7606_v10, %v7536_v19  ;;  %v7058_v34 = vmul.f32 %v9729_v9, %v15379_v39  ;;  %v7059_v5 = vmul.f32 %v9729_v9, %v15381_v23  ;;  %v7610_v23 = vld [vmem:[#allocation2 + $0x88] sm:$0xff] }
0x116a   : > { %v7701_v56 = vld [vmem:[#allocation2 + $0x60] sm:$0xff]  ;;  %7256 = vmatmul.f32.gmra.mxu3 %v7052_v2  ;;  %7369 = vmatmul.f32.gmra.mxu1 %v7053_v50 }
0x116b   : > { %v7737_v37 = vadd.f32 %v15282_v32, %v7701_v56  ;;  %7670 = vst.msk [vmem:[#allocation2 + $0x68] sm:$0xff] %vm291_vm0, %v7638_v31  ;;  %v7236_v58 = vpop.f32.mrf.mxu3 }
0x116c   : > { %v7350_v33 = vadd.f32 %v7349_v63, %v7236_v58  ;;  %v7612_v63 = vld [vmem:[#allocation2 + $0x98] sm:$0xff]  ;;  %v7613_v58 = vld [vmem:[#allocation2 + $0xa0] sm:$0xff] }
0x116d   : > { %7769 = vst.msk [vmem:[%s15289_s15 + $0x60] sm:$0xff] %vm291_vm0, %v7737_v37 }
0x116e   : > { %8597 = vmatmul.msk.f32.gmra.mxu2 %vm729_vm1, %v7350_v33  ;;  %v7352_v51 = vpop.f32.mrf.mxu1 }
0x1170   : > { %v7539_v8 = vpop.f32.mrf.mxu2 }
0x1171   : > { %v7639_v57 = vadd.f32 %v7607_v61, %v7539_v8 }
0x1172   : > { %v7702_v60 = vld [vmem:[#allocation2 + $0x68] sm:$0xff]  ;;  %7259 = vmatmul.f32.gmra.mxu3 %v7054_v6  ;;  %7372 = vmatmul.f32.gmra.mxu1 %v7055_v41 }
0x1173   : > { %v7738_v35 = vadd.f32 %v15282_v32, %v7702_v60  ;;  %7671 = vst.msk [vmem:[#allocation2 + $0x70] sm:$0xff] %vm291_vm0, %v7639_v57  ;;  %v7239_v49 = vpop.f32.mrf.mxu3  ;;  %v7614_v41 = vld [vmem:[#allocation2 + $0xa8] sm:$0xff] }
0x1174   : > { %v7353_v59 = vadd.f32 %v7352_v51, %v7239_v49 }
0x1175   : > { %7770 = vst.msk [vmem:[%s15289_s15 + $0x68] sm:$0xff] %vm291_vm0, %v7738_v35 }
0x1176   : > { %8598 = vmatmul.msk.f32.gmra.mxu2 %vm729_vm1, %v7353_v59  ;;  %v7355_v16 = vpop.f32.mrf.mxu1 }
0x1178   : > { %v7542_v22 = vpop.f32.mrf.mxu2 }
0x1179   : > { %v7640_v28 = vadd.f32 %v7608_v13, %v7542_v22 }
0x117a   : > { %v7703_v11 = vld [vmem:[#allocation2 + $0x70] sm:$0xff]  ;;  %7262 = vmatmul.f32.gmra.mxu3 %v7056_v20  ;;  %7375 = vmatmul.f32.gmra.mxu1 %v7057_v40 }
0x117b   : > { %v7739_v7 = vadd.f32 %v15282_v32, %v7703_v11  ;;  %7672 = vst.msk [vmem:[#allocation2 + $0x78] sm:$0xff] %vm291_vm0, %v7640_v28  ;;  %v7242_v1 = vpop.f32.mrf.mxu3 }
0x117c   : > { %v7356_v52 = vadd.f32 %v7355_v16, %v7242_v1  ;;  %v7616_v16 = vld [vmem:[#allocation2 + $0xb8] sm:$0xff] }
0x117d   : > { %7771 = vst.msk [vmem:[%s15289_s15 + $0x70] sm:$0xff] %vm291_vm0, %v7739_v7 }
0x117e   : > { %8599 = vmatmul.msk.f32.gmra.mxu2 %vm729_vm1, %v7356_v52 }
0x1182   : > { %v7704_v54 = vld [vmem:[#allocation2 + $0x78] sm:$0xff]  ;;  %7265 = vmatmul.f32.gmra.mxu3 %v7058_v34  ;;  %7378 = vmatmul.f32.gmra.mxu1 %v7059_v5 }
0x1183   : > { %v7740_v45 = vadd.f32 %v15282_v32, %v7704_v54 }
0x1185   : > { %7772 = vst.msk [vmem:[%s15289_s15 + $0x78] sm:$0xff] %vm291_vm0, %v7740_v45 }
0x11c7   : > { %v7358_v30 = vpop.f32.mrf.mxu1 }
0x11c9   : > { %v7545_v43 = vpop.f32.mrf.mxu2 }
0x11ca   : > { %v7641_v12 = vadd.f32 %v7609_v38, %v7545_v43  ;;  %v7617_v38 = vld [vmem:[#allocation2 + $0xc0] sm:$0xff] }
0x11cc   : > { %7673 = vst.msk [vmem:[#allocation2 + $0x80] sm:$0xff] %vm291_vm0, %v7641_v12 }
0x11cd   : > { %v7245_v53 = vpop.f32.mrf.mxu3 }
0x11ce   : > { %v7359_v27 = vadd.f32 %v7358_v30, %v7245_v53 }
0x11cf   : > { %v7361_v18 = vpop.f32.mrf.mxu1 }
0x11d0   : > { %8600 = vmatmul.msk.f32.gmra.mxu2 %vm729_vm1, %v7359_v27  ;;  %v7618_v27 = vld [vmem:[#allocation2 + $0xc8] sm:$0xff] }
0x11d1   : > { %v7548_v39 = vpop.f32.mrf.mxu2 }
0x11d2   : > { %v7642_v25 = vadd.f32 %v7610_v23, %v7548_v39 }
0x11d3   : > { %v7705_v46 = vld [vmem:[#allocation2 + $0x80] sm:$0xff] }
0x11d4   : > { %v7741_v0 = vadd.f32 %v15282_v32, %v7705_v46  ;;  %7674 = vst.msk [vmem:[#allocation2 + $0x88] sm:$0xff] %vm291_vm0, %v7642_v25  ;;  %v7619_v46 = vld [vmem:[#allocation2 + $0xd0] sm:$0xff] }
0x11d5   : > { %v7248_v44 = vpop.f32.mrf.mxu3 }
0x11d6   : > { %7773 = vst.msk [vmem:[%s15289_s15 + $0x80] sm:$0xff] %vm291_vm0, %v7741_v0  ;;  %v7362_v48 = vadd.f32 %v7361_v18, %v7248_v44 }
0x11d7   : > { %v7364_v55 = vpop.f32.mrf.mxu1 }
0x11d8   : > { %8601 = vmatmul.msk.f32.gmra.mxu2 %vm729_vm1, %v7362_v48 }
0x11d9   : > { %v7551_v26 = vpop.f32.mrf.mxu2 }
0x11da   : > { %v7643_v24 = vadd.f32 %v7611_v29, %v7551_v26  ;;  %v7620_v26 = vld [vmem:[#allocation2 + $0xd8] sm:$0xff] }
0x11db   : > { %v7706_v36 = vld [vmem:[#allocation2 + $0x88] sm:$0xff] }
0x11dc   : > { %v7742_v21 = vadd.f32 %v15282_v32, %v7706_v36  ;;  %7675 = vst.msk [vmem:[#allocation2 + $0x90] sm:$0xff] %vm291_vm0, %v7643_v24 }
0x11dd   : > { %v7251_v3 = vpop.f32.mrf.mxu3 }
0x11de   : > { %7774 = vst.msk [vmem:[%s15289_s15 + $0x88] sm:$0xff] %vm291_vm0, %v7742_v21  ;;  %v7365_v15 = vadd.f32 %v7364_v55, %v7251_v3  ;;  %v7621_v3 = vld [vmem:[#allocation2 + $0xe0] sm:$0xff] }
0x11df   : > { %v7367_v47 = vpop.f32.mrf.mxu1 }
0x11e0   : > { %8602 = vmatmul.msk.f32.gmra.mxu2 %vm729_vm1, %v7365_v15 }
0x11e1   : > { %v7554_v17 = vpop.f32.mrf.mxu2 }
0x11e2   : > { %v7644_v19 = vadd.f32 %v7612_v63, %v7554_v17 }
0x11e3   : > { %v7707_v10 = vld [vmem:[#allocation2 + $0x90] sm:$0xff] }
0x11e4   : > { %v7743_v31 = vadd.f32 %v15282_v32, %v7707_v10  ;;  %7676 = vst.msk [vmem:[#allocation2 + $0x98] sm:$0xff] %vm291_vm0, %v7644_v19  ;;  %v7622_v19 = vld [vmem:[#allocation2 + $0xe8] sm:$0xff] }
0x11e5   : > { %v7254_v2 = vpop.f32.mrf.mxu3 }
0x11e6   : > { %7775 = vst.msk [vmem:[%s15289_s15 + $0x90] sm:$0xff] %vm291_vm0, %v7743_v31  ;;  %v7368_v50 = vadd.f32 %v7367_v47, %v7254_v2 }
0x11e7   : > { %v7370_v56 = vpop.f32.mrf.mxu1 }
0x11e8   : > { %8603 = vmatmul.msk.f32.gmra.mxu2 %vm729_vm1, %v7368_v50 }
0x11e9   : > { %v7557_v37 = vpop.f32.mrf.mxu2 }
0x11ea   : > { %v7645_v42 = vadd.f32 %v7613_v58, %v7557_v37 }
0x11eb   : > { %v7708_v33 = vld [vmem:[#allocation2 + $0x98] sm:$0xff] }
0x11ec   : > { %v7744_v14 = vadd.f32 %v15282_v32, %v7708_v33  ;;  %7677 = vst.msk [vmem:[#allocation2 + $0xa0] sm:$0xff] %vm291_vm0, %v7645_v42 }
0x11ed   : > { %v7257_v8 = vpop.f32.mrf.mxu3 }
0x11ee   : > { %7776 = vst.msk [vmem:[%s15289_s15 + $0x98] sm:$0xff] %vm291_vm0, %v7744_v14  ;;  %v7371_v61 = vadd.f32 %v7370_v56, %v7257_v8  ;;  %v7623_v56 = vld [vmem:[#allocation2 + $0xf0] sm:$0xff]  ;;  %v7624_v14 = vld [vmem:[#allocation2 + $0xf8] sm:$0xff] }
0x11ef   : > { %v7373_v57 = vpop.f32.mrf.mxu1 }
0x11f0   : > { %8604 = vmatmul.msk.f32.gmra.mxu2 %vm729_vm1, %v7371_v61 }
0x11f1   : > { %v7560_v6 = vpop.f32.mrf.mxu2 }
0x11f2   : > { %v7646_v60 = vadd.f32 %v7614_v41, %v7560_v6  ;;  %v9813_v41 = vld [vmem:[%s15551_s4] ss:$0 sm:$0xff] }
0x11f3   : > { %v7709_v51 = vld [vmem:[#allocation2 + $0xa0] sm:$0xff] }
0x11f4   : > { %v7745_v35 = vadd.f32 %v15282_v32, %v7709_v51  ;;  %7678 = vst.msk [vmem:[#allocation2 + $0xa8] sm:$0xff] %vm291_vm0, %v7646_v60 }
0x11f5   : > { %v7260_v49 = vpop.f32.mrf.mxu3 }
0x11f6   : > { %7777 = vst.msk [vmem:[%s15289_s15 + $0xa0] sm:$0xff] %vm291_vm0, %v7745_v35  ;;  %v7374_v62 = vadd.f32 %v7373_v57, %v7260_v49 }
0x11f7   : > { %v7376_v28 = vpop.f32.mrf.mxu1 }
0x11f8   : > { %8605 = vmatmul.msk.f32.gmra.mxu2 %vm729_vm1, %v7374_v62 }
0x11f9   : > { %v7563_v59 = vpop.f32.mrf.mxu2 }
0x11fa   : > { %v7647_v22 = vadd.f32 %v7615_v4, %v7563_v59 }
0x11fb   : > { %v7710_v13 = vld [vmem:[#allocation2 + $0xa8] sm:$0xff] }
0x11fc   : > { %v7746_v20 = vadd.f32 %v15282_v32, %v7710_v13  ;;  %7679 = vst.msk [vmem:[#allocation2 + $0xb0] sm:$0xff] %vm291_vm0, %v7647_v22 }
0x11fd   : > { %v7263_v40 = vpop.f32.mrf.mxu3 }
0x11fe   : > { %7778 = vst.msk [vmem:[%s15289_s15 + $0xa8] sm:$0xff] %vm291_vm0, %v7746_v20  ;;  %v7377_v11 = vadd.f32 %v7376_v28, %v7263_v40 }
0x11ff   : > { %v7379_v34 = vpop.f32.mrf.mxu1 }
0x1200   : > { %8606 = vmatmul.msk.f32.gmra.mxu2 %vm729_vm1, %v7377_v11 }
0x1201   : > { %v7566_v7 = vpop.f32.mrf.mxu2 }
0x1202   : > { %v7648_v1 = vadd.f32 %v7616_v16, %v7566_v7 }
0x1203   : > { %v7711_v52 = vld [vmem:[#allocation2 + $0xb0] sm:$0xff] }
0x1204   : > { %v7747_v9 = vadd.f32 %v15282_v32, %v7711_v52  ;;  %7680 = vst.msk [vmem:[#allocation2 + $0xb8] sm:$0xff] %vm291_vm0, %v7648_v1 }
0x1205   : > { %v7266_v5 = vpop.f32.mrf.mxu3 }
0x1206   : > { %7779 = vst.msk [vmem:[%s15289_s15 + $0xb0] sm:$0xff] %vm291_vm0, %v7747_v9  ;;  %v7380_v54 = vadd.f32 %v7379_v34, %v7266_v5 }
0x1208   : > { %8607 = vmatmul.msk.f32.gmra.mxu2 %vm729_vm1, %v7380_v54 }
0x120b   : > { %v7712_v45 = vld [vmem:[#allocation2 + $0xb8] sm:$0xff] }
0x120c   : > { %v7748_v30 = vadd.f32 %v15282_v32, %v7712_v45 }
0x120e   : > { %7780 = vst.msk [vmem:[%s15289_s15 + $0xb8] sm:$0xff] %vm291_vm0, %v7748_v30 }
0x1253   : > { %v7569_v43 = vpop.f32.mrf.mxu2 }
0x1254   : > { %v7649_v12 = vadd.f32 %v7617_v38, %v7569_v43 }
0x1256   : > { %7681 = vst.msk [vmem:[#allocation2 + $0xc0] sm:$0xff] %vm291_vm0, %v7649_v12 }
0x125b   : > { %v7572_v53 = vpop.f32.mrf.mxu2 }
0x125c   : > { %v7650_v18 = vadd.f32 %v7618_v27, %v7572_v53 }
0x125d   : > { %v7713_v39 = vld [vmem:[#allocation2 + $0xc0] sm:$0xff] }
0x125e   : > { %v7749_v23 = vadd.f32 %v15282_v32, %v7713_v39  ;;  %7682 = vst.msk [vmem:[#allocation2 + $0xc8] sm:$0xff] %vm291_vm0, %v7650_v18 }
0x1260   : > { %7781 = vst.msk [vmem:[%s15289_s15 + $0xc0] sm:$0xff] %vm291_vm0, %v7749_v23 }
0x1263   : > { %v7575_v25 = vpop.f32.mrf.mxu2 }
0x1264   : > { %v7651_v0 = vadd.f32 %v7619_v46, %v7575_v25 }
0x1265   : > { %v7714_v44 = vld [vmem:[#allocation2 + $0xc8] sm:$0xff] }
0x1266   : > { %v7750_v48 = vadd.f32 %v15282_v32, %v7714_v44  ;;  %7683 = vst.msk [vmem:[#allocation2 + $0xd0] sm:$0xff] %vm291_vm0, %v7651_v0 }
0x1268   : > { %7782 = vst.msk [vmem:[%s15289_s15 + $0xc8] sm:$0xff] %vm291_vm0, %v7750_v48 }
0x126b   : > { %v7578_v55 = vpop.f32.mrf.mxu2 }
0x126c   : > { %v7652_v29 = vadd.f32 %v7620_v26, %v7578_v55 }
0x126d   : > { %v7715_v24 = vld [vmem:[#allocation2 + $0xd0] sm:$0xff] }
0x126e   : > { %v7751_v36 = vadd.f32 %v15282_v32, %v7715_v24  ;;  %7684 = vst.msk [vmem:[#allocation2 + $0xd8] sm:$0xff] %vm291_vm0, %v7652_v29 }
0x1270   : > { %7783 = vst.msk [vmem:[%s15289_s15 + $0xd0] sm:$0xff] %vm291_vm0, %v7751_v36 }
0x1273   : > { %v7581_v21 = vpop.f32.mrf.mxu2 }
0x1274   : > { %v7653_v15 = vadd.f32 %v7621_v3, %v7581_v21 }
0x1275   : > { %v7716_v47 = vld [vmem:[#allocation2 + $0xd8] sm:$0xff] }
0x1276   : > { %v7752_v17 = vadd.f32 %v15282_v32, %v7716_v47  ;;  %7685 = vst.msk [vmem:[#allocation2 + $0xe0] sm:$0xff] %vm291_vm0, %v7653_v15 }
0x1278   : > { %7784 = vst.msk [vmem:[%s15289_s15 + $0xd8] sm:$0xff] %vm291_vm0, %v7752_v17 }
0x127b   : > { %v7584_v63 = vpop.f32.mrf.mxu2 }
0x127c   : > { %v7654_v10 = vadd.f32 %v7622_v19, %v7584_v63 }
0x127d   : > { %v7717_v31 = vld [vmem:[#allocation2 + $0xe0] sm:$0xff] }
0x127e   : > { %v7753_v2 = vadd.f32 %v15282_v32, %v7717_v31  ;;  %7686 = vst.msk [vmem:[#allocation2 + $0xe8] sm:$0xff] %vm291_vm0, %v7654_v10 }
0x1280   : > { %7785 = vst.msk [vmem:[%s15289_s15 + $0xe0] sm:$0xff] %vm291_vm0, %v7753_v2 }
0x1283   : > { %v7587_v50 = vpop.f32.mrf.mxu2 }
0x1284   : > { %v7655_v37 = vadd.f32 %v7623_v56, %v7587_v50 }
0x1285   : > { %v7718_v58 = vld [vmem:[#allocation2 + $0xe8] sm:$0xff] }
0x1286   : > { %v7754_v42 = vadd.f32 %v15282_v32, %v7718_v58  ;;  %7687 = vst.msk [vmem:[#allocation2 + $0xf0] sm:$0xff] %vm291_vm0, %v7655_v37 }
0x1288   : > { %7786 = vst.msk [vmem:[%s15289_s15 + $0xe8] sm:$0xff] %vm291_vm0, %v7754_v42 }
0x128b   : > { %v7590_v33 = vpop.f32.mrf.mxu2 }
0x128c   : > { %v7656_v8 = vadd.f32 %v7624_v14, %v7590_v33 }
0x128d   : > { %v7719_v61 = vld [vmem:[#allocation2 + $0xf0] sm:$0xff] }
0x128e   : > { %v7755_v57 = vadd.f32 %v15282_v32, %v7719_v61  ;;  %7688 = vst.msk [vmem:[#allocation2 + $0xf8] sm:$0xff] %vm291_vm0, %v7656_v8 }
0x1290   : > { %7787 = vst.msk [vmem:[%s15289_s15 + $0xf0] sm:$0xff] %vm291_vm0, %v7755_v57 }
0x1295   : > { %v7720_v6 = vld [vmem:[#allocation2 + $0xf8] sm:$0xff] }
0x1296   : > { %v7756_v60 = vadd.f32 %v9813_v41, %v7720_v6 }
0x1298   : > { %7788 = vst.msk [vmem:[%s15289_s15 + $0xf8] sm:$0xff] %vm291_vm0, %v7756_v60 }
0x1299 PF: > { %s16_s21 = sadd.s32 1, %s9820_s21  }
0x129a   : > { %p13_p4 = scmp.ge.s32.totalorder %s16_s21, 6  }
0x129c   :  { %15 = sbr.rel (!%p13_p4) target bundleno = 1 (0x1), region = 86 }

</bundles_post_ra>
